<compile_context>
chip_gen: v5e
topology: v5e:2x2
jax: 0.10.0
libtpu: 0.0.40
codegen_flags: <defaults>
</compile_context>

<pallas_src>
import jax
import jax.numpy as jnp
from jax.experimental import pallas as pl
from jax.experimental.pallas import tpu as pltpu

LRELU_SLOPE = 0.2
IN_EPS = 1e-5


# ----------------------------- Pallas kernels ------------------------------

def _leaky_relu(y):
    return jnp.where(y > 0, y, LRELU_SLOPE * y)


def _accumulate_conv_taps(x_ref, w_ref):
    """4-tap accumulation of a k=4, s=2, p=1 conv on a space-to-depth input.

    x_ref: (1, Ho+1, Wo+1, 4*Cin)  space-to-depth of the zero-padded input
    w_ref: (4, 4*Cin, Cout)        tap index t = 2*bi + bj
    returns an f32 accumulator of shape (Ho*Wo, Cout)
    """
    _, hq, wq, cin4 = x_ref.shape
    cout = w_ref.shape[2]
    ho, wo = hq - 1, wq - 1
    # One full-plane load; cast to f32 so the window slices and the
    # (Ho, Wo, C) -> (Ho*Wo, C) collapse stay on the (8,128)-friendly layout.
    x = x_ref[0].astype(jnp.float32)
    acc = jnp.zeros((ho * wo, cout), jnp.float32)
    for bi in range(2):
        for bj in range(2):
            tap = x[bi:bi + ho, bj:bj + wo, :]                    # (Ho, Wo, 4Cin)
            tap2d = tap.reshape(ho * wo, cin4).astype(jnp.bfloat16)
            acc = acc + jnp.dot(tap2d, w_ref[2 * bi + bj],
                                preferred_element_type=jnp.float32)
    return acc


def _conv_bias_lrelu_kernel(x_ref, w_ref, b_ref, o_ref):
    # Conv(k4 s2 p1) + bias + LeakyReLU(0.2)
    acc = _accumulate_conv_taps(x_ref, w_ref)
    o_ref[0] = _leaky_relu(acc + b_ref[...]).astype(o_ref.dtype)


def _conv_in_lrelu_kernel(x_ref, w_ref, g_ref, b_ref, o_ref):
    # Conv(k4 s2 p1, no bias) + InstanceNorm2d(affine) + LeakyReLU(0.2)
    acc = _accumulate_conv_taps(x_ref, w_ref)                      # (P, C) f32
    mean = jnp.mean(acc, axis=0, keepdims=True)                    # per-channel
    var = jnp.mean(jnp.square(acc - mean), axis=0, keepdims=True)  # biased var
    scale = g_ref[...] * jax.lax.rsqrt(var + IN_EPS)               # gamma folded
    shift = b_ref[...] - mean * scale
    o_ref[0] = _leaky_relu(acc * scale + shift).astype(o_ref.dtype)


def _final_block_kernel(p_ref, w3_ref, g3_ref, b3_ref, w4_ref, b4_ref, o_ref):
    # Layer 3: Conv(k4 s2 p1, no bias) + InstanceNorm + LeakyReLU
    # (single (16, 512) @ (512, 8d) matmul; patches prepared by the wrapper)
    acc = jnp.dot(p_ref[0], w3_ref[...],
                  preferred_element_type=jnp.float32)              # (16, C3) f32
    mean = jnp.mean(acc, axis=0, keepdims=True)
    var = jnp.mean(jnp.square(acc - mean), axis=0, keepdims=True)
    scale = g3_ref[...] * jax.lax.rsqrt(var + IN_EPS)
    shift = b3_ref[...] - mean * scale
    a3 = _leaky_relu(acc * scale + shift)                          # (16, C3)
    # Layer 4: Conv(C3 -> 1, k4 s2 p0) over the whole 4x4 map == weighted sum,
    # done on the VPU (multiply + reduce) instead of a 1xKx1 MXU matmul.
    s = jnp.sum(a3 * w4_ref[...], axis=0, keepdims=True)           # (1, C3)
    s = jnp.sum(s, axis=1, keepdims=True)                          # (1, 1)
    o_ref[0] = s + b4_ref[...]


# ------------------------------- glue (JAX) --------------------------------

def _pad_s2d(x_nhwc):
    """pad=1 then 2x2 space-to-depth: (N,H,W,C) -> (N,(H+2)//2,(W+2)//2,4C)."""
    n, h, w, c = x_nhwc.shape
    xp = jnp.pad(x_nhwc, ((0, 0), (1, 1), (1, 1), (0, 0)))
    hq, wq = (h + 2) // 2, (w + 2) // 2
    xb = xp.reshape(n, hq, 2, wq, 2, c)
    xb = jnp.transpose(xb, (0, 1, 3, 2, 4, 5))      # (n, hq, wq, pi, pj, c)
    return xb.reshape(n, hq, wq, 4 * c)


def _w_to_taps(w_oihw):
    """(Cout, Cin, 4, 4) -> (4, 4*Cin, Cout); tap t=2*bi+bj, chans (pi,pj,c)."""
    cout, cin, kh, kw = w_oihw.shape
    wt = jnp.transpose(w_oihw, (2, 3, 1, 0))        # (kh, kw, cin, cout)
    wt = wt.reshape(2, 2, 2, 2, cin, cout)          # (bi, pi, bj, pj, cin, cout)
    wt = jnp.transpose(wt, (0, 2, 1, 3, 4, 5))      # (bi, bj, pi, pj, cin, cout)
    return wt.reshape(4, 4 * cin, cout)


def _w_to_mat(w_oihw):
    # (C_out, C_in, kH, kW) -> (kH*kW*C_in, C_out), matching im2col ordering
    c_out, c_in, kh, kw = w_oihw.shape
    return jnp.transpose(w_oihw, (2, 3, 1, 0)).reshape(kh * kw * c_in, c_out)


def _im2col_k4s2p1(x_nhwc):
    """im2col for the tiny layer-3 input only (8x8 -> 16 patches)."""
    n, h, w, c = x_nhwc.shape
    xp = jnp.pad(x_nhwc, ((0, 0), (1, 1), (1, 1), (0, 0)))
    ho, wo = h // 2, w // 2
    cols = []
    for i in range(4):
        for j in range(4):
            cols.append(xp[:, i:i + 2 * ho:2, j:j + 2 * wo:2, :])
    patches = jnp.stack(cols, axis=3)               # (n, ho, wo, 16, c)
    return patches.reshape(n, ho * wo, 16 * c)


def _conv_s2d_layer(kernel_fn, x_nhwc, w_taps, extras):
    xs = _pad_s2d(x_nhwc)                           # (n, hq, wq, 4*cin) bf16
    n, hq, wq, cin4 = xs.shape
    ho, wo = hq - 1, wq - 1
    cout = w_taps.shape[-1]
    out = pl.pallas_call(
        kernel_fn,
        out_shape=jax.ShapeDtypeStruct((n, ho * wo, cout), jnp.bfloat16),
        grid=(n,),
        in_specs=[
            pl.BlockSpec((1, hq, wq, cin4), lambda i: (i, 0, 0, 0)),
            pl.BlockSpec((4, cin4, cout), lambda i: (0, 0, 0)),
        ] + [pl.BlockSpec((1, cout), lambda i: (0, 0)) for _ in extras],
        out_specs=pl.BlockSpec((1, ho * wo, cout), lambda i: (i, 0, 0)),
        compiler_params=pltpu.CompilerParams(
            dimension_semantics=("parallel",)),
    )(xs, w_taps, *extras)
    return out.reshape(n, ho, wo, cout)


def _final_block(x_nhwc, w3_mat, g3, b3, w4_mat, b4):
    patches = _im2col_k4s2p1(x_nhwc)                # (n, 16, 16*C2) bf16
    n, p, k = patches.shape
    c3 = w3_mat.shape[1]
    out = pl.pallas_call(
        _final_block_kernel,
        out_shape=jax.ShapeDtypeStruct((n, 1, 1), jnp.float32),
        grid=(n,),
        in_specs=[
            pl.BlockSpec((1, p, k), lambda i: (i, 0, 0)),
            pl.BlockSpec((k, c3), lambda i: (0, 0)),
            pl.BlockSpec((1, c3), lambda i: (0, 0)),
            pl.BlockSpec((1, c3), lambda i: (0, 0)),
            pl.BlockSpec((p, c3), lambda i: (0, 0)),
            pl.BlockSpec((1, 1), lambda i: (0, 0)),
        ],
        out_specs=pl.BlockSpec((1, 1, 1), lambda i: (i, 0, 0)),
        compiler_params=pltpu.CompilerParams(
            dimension_semantics=("parallel",)),
    )(patches, w3_mat, g3, b3, w4_mat, b4)
    return out.reshape(n, 1, 1, 1)


def critic_forward(x_nchw, params):
    """Forward pass of the WGAN Critic. Input NCHW, output (N, 1, 1, 1) f32."""
    x = jnp.transpose(x_nchw, (0, 2, 3, 1)).astype(jnp.bfloat16)   # NHWC bf16

    # Layer 0: Conv(ch_img -> d, k4 s2 p1) + bias + LeakyReLU
    x = _conv_s2d_layer(
        _conv_bias_lrelu_kernel, x,
        _w_to_taps(params["w0"]).astype(jnp.bfloat16),
        [params["b0"].astype(jnp.float32).reshape(1, -1)])

    # Layers 1-2: Conv(no bias) + InstanceNorm2d(affine) + LeakyReLU
    for i in (1, 2):
        x = _conv_s2d_layer(
            _conv_in_lrelu_kernel, x,
            _w_to_taps(params[f"w{i}"]).astype(jnp.bfloat16),
            [params[f"g{i}"].astype(jnp.float32).reshape(1, -1),
             params[f"be{i}"].astype(jnp.float32).reshape(1, -1)])

    # Layer 3 (Conv + IN + LeakyReLU) fused with layer 4 (Conv(8d -> 1, k4 s2 p0))
    c3 = params["w3"].shape[0]
    w3_mat = _w_to_mat(params["w3"]).astype(jnp.bfloat16)          # (512, 8d)
    w4_mat = jnp.transpose(params["w4"][0], (1, 2, 0)).reshape(16, c3)
    return _final_block(
        x, w3_mat,
        params["g3"].astype(jnp.float32).reshape(1, -1),
        params["be3"].astype(jnp.float32).reshape(1, -1),
        w4_mat.astype(jnp.float32),
        params["b4"].astype(jnp.float32).reshape(1, 1))


def init_params(key, channel_img, features_d):
    d = features_d
    shapes = [
        (d, channel_img), (2 * d, d), (4 * d, 2 * d), (8 * d, 4 * d), (1, 8 * d)
    ]
    keys = jax.random.split(key, 5 * len(shapes))
    params = {}
    ki = 0
    for i, (co, ci) in enumerate(shapes):
        params[f"w{i}"] = 0.02 * jax.random.normal(
            keys[ki], (co, ci, 4, 4), jnp.float32); ki += 1
        if i in (0, 4):  # biased convs
            params[f"b{i}"] = 0.01 * jax.random.normal(
                keys[ki], (co,), jnp.float32); ki += 1
        else:            # InstanceNorm affine params
            params[f"g{i}"] = 1.0 + 0.1 * jax.random.normal(
                keys[ki], (co,), jnp.float32); ki += 1
            params[f"be{i}"] = 0.01 * jax.random.normal(
                keys[ki], (co,), jnp.float32); ki += 1
    return params


if __name__ == "__main__":
    key = jax.random.PRNGKey(0)
    k_x, k_p = jax.random.split(key)

    batch, channel_img, features_d = 2, 3, 8
    # spatial must be 64 so the final Conv(k=4, s=2, p=0) sees a 4x4 map
    x = jax.random.normal(k_x, (batch, channel_img, 64, 64), jnp.float32)
    params = init_params(k_p, channel_img, features_d)

    out = jax.jit(critic_forward)(x, params)
    out = jax.block_until_ready(out)
    assert out.shape == (batch, 1, 1, 1), out.shape
    assert jnp.all(jnp.isfinite(out))
    print("KERNEL_OK")
</pallas_src>

<mosaic_0001>
module attributes {stable_mosaic.version = 11 : i64} {
  func.func @_conv_bias_lrelu_kernel(%arg0: i32, %arg1: memref<1x33x33x12xbf16, #tpu.memory_space<vmem>>, %arg2: memref<4x12x8xbf16, #tpu.memory_space<vmem>>, %arg3: memref<1x8xf32, #tpu.memory_space<vmem>>, %arg4: memref<1x1024x8xbf16, #tpu.memory_space<vmem>>) attributes {dimension_semantics = [#tpu.dimension_semantics<parallel>], iteration_bounds = array<i64: 2>, scalar_prefetch = 0 : i64, scratch_operands = 0 : i64, tpu.core_type = #tpu.core_type<tc>, window_params = [{transform_indices = @transform_0, window_bounds = array<i64: 1, 33, 33, 12>}, {pipeline_mode = #tpu.pipeline_mode<synchronous>, transform_indices = @transform_1, window_bounds = array<i64: 4, 12, 8>}, {pipeline_mode = #tpu.pipeline_mode<synchronous>, transform_indices = @transform_2, window_bounds = array<i64: 1, 8>}, {transform_indices = @transform_3, window_bounds = array<i64: 1, 1024, 8>}]} {
    %c0 = arith.constant 0 : index
    %c0_0 = arith.constant 0 : index
    %c0_1 = arith.constant 0 : index
    %c0_2 = arith.constant 0 : index
    %0 = vector.load %arg1[%c0, %c0_0, %c0_1, %c0_2] : memref<1x33x33x12xbf16, #tpu.memory_space<vmem>>, vector<1x33x33x12xbf16>
    %1 = vector.shape_cast %0 : vector<1x33x33x12xbf16> to vector<33x33x12xbf16>
    %2 = arith.extf %1 : vector<33x33x12xbf16> to vector<33x33x12xf32>
    %cst = arith.constant 0.000000e+00 : f32
    %3 = vector.broadcast %cst : f32 to vector<1024x8xf32>
    %4 = vector.extract_strided_slice %2 {offsets = [0, 0, 0], sizes = [32, 32, 12], strides = [1, 1, 1]} : vector<33x33x12xf32> to vector<32x32x12xf32>
    %5 = vector.shape_cast %4 : vector<32x32x12xf32> to vector<1024x12xf32>
    %6 = arith.truncf %5 : vector<1024x12xf32> to vector<1024x12xbf16>
    %c0_3 = arith.constant 0 : index
    %c0_4 = arith.constant 0 : index
    %c0_5 = arith.constant 0 : index
    %7 = vector.load %arg2[%c0_3, %c0_4, %c0_5] : memref<4x12x8xbf16, #tpu.memory_space<vmem>>, vector<1x12x8xbf16>
    %8 = vector.shape_cast %7 : vector<1x12x8xbf16> to vector<12x8xbf16>
    %cst_6 = arith.constant dense<0.000000e+00> : vector<1024x8xf32>
    %9 = tpu.matmul %6, %8, %cst_6 {dimension_numbers = #tpu.dot_dimension_numbers<[1], [0], [0], [1], [0, 0, 1, 1], [], []>} : vector<1024x12xbf16>, vector<12x8xbf16>, vector<1024x8xf32> -> vector<1024x8xf32>
    %10 = arith.addf %3, %9 : vector<1024x8xf32>
    %11 = vector.extract_strided_slice %2 {offsets = [0, 1, 0], sizes = [32, 32, 12], strides = [1, 1, 1]} : vector<33x33x12xf32> to vector<32x32x12xf32>
    %12 = vector.shape_cast %11 : vector<32x32x12xf32> to vector<1024x12xf32>
    %13 = arith.truncf %12 : vector<1024x12xf32> to vector<1024x12xbf16>
    %c1 = arith.constant 1 : index
    %c0_7 = arith.constant 0 : index
    %c0_8 = arith.constant 0 : index
    %14 = vector.load %arg2[%c1, %c0_7, %c0_8] : memref<4x12x8xbf16, #tpu.memory_space<vmem>>, vector<1x12x8xbf16>
    %15 = vector.shape_cast %14 : vector<1x12x8xbf16> to vector<12x8xbf16>
    %cst_9 = arith.constant dense<0.000000e+00> : vector<1024x8xf32>
    %16 = tpu.matmul %13, %15, %cst_9 {dimension_numbers = #tpu.dot_dimension_numbers<[1], [0], [0], [1], [0, 0, 1, 1], [], []>} : vector<1024x12xbf16>, vector<12x8xbf16>, vector<1024x8xf32> -> vector<1024x8xf32>
    %17 = arith.addf %10, %16 : vector<1024x8xf32>
    %18 = vector.extract_strided_slice %2 {offsets = [1, 0, 0], sizes = [32, 32, 12], strides = [1, 1, 1]} : vector<33x33x12xf32> to vector<32x32x12xf32>
    %19 = vector.shape_cast %18 : vector<32x32x12xf32> to vector<1024x12xf32>
    %20 = arith.truncf %19 : vector<1024x12xf32> to vector<1024x12xbf16>
    %c2 = arith.constant 2 : index
    %c0_10 = arith.constant 0 : index
    %c0_11 = arith.constant 0 : index
    %21 = vector.load %arg2[%c2, %c0_10, %c0_11] : memref<4x12x8xbf16, #tpu.memory_space<vmem>>, vector<1x12x8xbf16>
    %22 = vector.shape_cast %21 : vector<1x12x8xbf16> to vector<12x8xbf16>
    %cst_12 = arith.constant dense<0.000000e+00> : vector<1024x8xf32>
    %23 = tpu.matmul %20, %22, %cst_12 {dimension_numbers = #tpu.dot_dimension_numbers<[1], [0], [0], [1], [0, 0, 1, 1], [], []>} : vector<1024x12xbf16>, vector<12x8xbf16>, vector<1024x8xf32> -> vector<1024x8xf32>
    %24 = arith.addf %17, %23 : vector<1024x8xf32>
    %25 = vector.extract_strided_slice %2 {offsets = [1, 1, 0], sizes = [32, 32, 12], strides = [1, 1, 1]} : vector<33x33x12xf32> to vector<32x32x12xf32>
    %26 = vector.shape_cast %25 : vector<32x32x12xf32> to vector<1024x12xf32>
    %27 = arith.truncf %26 : vector<1024x12xf32> to vector<1024x12xbf16>
    %c3 = arith.constant 3 : index
    %c0_13 = arith.constant 0 : index
    %c0_14 = arith.constant 0 : index
    %28 = vector.load %arg2[%c3, %c0_13, %c0_14] : memref<4x12x8xbf16, #tpu.memory_space<vmem>>, vector<1x12x8xbf16>
    %29 = vector.shape_cast %28 : vector<1x12x8xbf16> to vector<12x8xbf16>
    %cst_15 = arith.constant dense<0.000000e+00> : vector<1024x8xf32>
    %30 = tpu.matmul %27, %29, %cst_15 {dimension_numbers = #tpu.dot_dimension_numbers<[1], [0], [0], [1], [0, 0, 1, 1], [], []>} : vector<1024x12xbf16>, vector<12x8xbf16>, vector<1024x8xf32> -> vector<1024x8xf32>
    %31 = arith.addf %24, %30 : vector<1024x8xf32>
    %c0_16 = arith.constant 0 : index
    %c0_17 = arith.constant 0 : index
    %32 = vector.load %arg3[%c0_16, %c0_17] : memref<1x8xf32, #tpu.memory_space<vmem>>, vector<1x8xf32>
    %33 = vector.broadcast %32 : vector<1x8xf32> to vector<1024x8xf32>
    %34 = arith.addf %31, %33 : vector<1024x8xf32>
    %cst_18 = arith.constant 0.000000e+00 : f32
    %35 = vector.broadcast %cst_18 : f32 to vector<1024x8xf32>
    %36 = arith.cmpf ogt, %34, %35 : vector<1024x8xf32>
    %cst_19 = arith.constant 2.000000e-01 : f32
    %37 = vector.broadcast %cst_19 : f32 to vector<1024x8xf32>
    %38 = arith.mulf %37, %34 : vector<1024x8xf32>
    %39 = arith.select %36, %34, %38 : vector<1024x8xi1>, vector<1024x8xf32>
    %40 = arith.truncf %39 : vector<1024x8xf32> to vector<1024x8xbf16>
    %c0_20 = arith.constant 0 : index
    %c0_21 = arith.constant 0 : index
    %c0_22 = arith.constant 0 : index
    %41 = vector.load %arg4[%c0_20, %c0_21, %c0_22] : memref<1x1024x8xbf16, #tpu.memory_space<vmem>>, vector<1x1024x8xbf16>
    %42 = vector.shape_cast %41 : vector<1x1024x8xbf16> to vector<1024x8xbf16>
    %43 = vector.shape_cast %40 : vector<1024x8xbf16> to vector<1x1024x8xbf16>
    tpu.vector_store %arg4[%c0_20, %c0_21, %c0_22], %43 {strides = array<i32>} : memref<1x1024x8xbf16, #tpu.memory_space<vmem>>, vector<1x1024x8xbf16>,
    return
  }
  func.func @transform_0(%arg0: i32) -> (i32, i32, i32, i32) {
    %c0_i32 = arith.constant 0 : i32
    %c0_i32_0 = arith.constant 0 : i32
    %c0_i32_1 = arith.constant 0 : i32
    %c0_i32_2 = arith.constant 0 : i32
    return %arg0, %c0_i32, %c0_i32_0, %c0_i32_1 : i32, i32, i32, i32
  }
  func.func @transform_1(%arg0: i32) -> (i32, i32, i32) {
    %c0_i32 = arith.constant 0 : i32
    %c0_i32_0 = arith.constant 0 : i32
    %c0_i32_1 = arith.constant 0 : i32
    %c0_i32_2 = arith.constant 0 : i32
    return %c0_i32, %c0_i32_0, %c0_i32_1 : i32, i32, i32
  }
  func.func @transform_2(%arg0: i32) -> (i32, i32) {
    %c0_i32 = arith.constant 0 : i32
    %c0_i32_0 = arith.constant 0 : i32
    %c0_i32_1 = arith.constant 0 : i32
    return %c0_i32, %c0_i32_0 : i32, i32
  }
  func.func @transform_3(%arg0: i32) -> (i32, i32, i32) {
    %c0_i32 = arith.constant 0 : i32
    %c0_i32_0 = arith.constant 0 : i32
    %c0_i32_1 = arith.constant 0 : i32
    return %arg0, %c0_i32, %c0_i32_0 : i32, i32, i32
  }
}

module attributes {stable_mosaic.version = 11 : i64} {
  func.func @_conv_in_lrelu_kernel(%arg0: i32, %arg1: memref<1x17x17x32xbf16, #tpu.memory_space<vmem>>, %arg2: memref<4x32x16xbf16, #tpu.memory_space<vmem>>, %arg3: memref<1x16xf32, #tpu.memory_space<vmem>>, %arg4: memref<1x16xf32, #tpu.memory_space<vmem>>, %arg5: memref<1x256x16xbf16, #tpu.memory_space<vmem>>) attributes {dimension_semantics = [#tpu.dimension_semantics<parallel>], iteration_bounds = array<i64: 2>, scalar_prefetch = 0 : i64, scratch_operands = 0 : i64, tpu.core_type = #tpu.core_type<tc>, window_params = [{transform_indices = @transform_0, window_bounds = array<i64: 1, 17, 17, 32>}, {pipeline_mode = #tpu.pipeline_mode<synchronous>, transform_indices = @transform_1, window_bounds = array<i64: 4, 32, 16>}, {pipeline_mode = #tpu.pipeline_mode<synchronous>, transform_indices = @transform_2, window_bounds = array<i64: 1, 16>}, {pipeline_mode = #tpu.pipeline_mode<synchronous>, transform_indices = @transform_3, window_bounds = array<i64: 1, 16>}, {transform_indices = @transform_4, window_bounds = array<i64: 1, 256, 16>}]} {
    %c0 = arith.constant 0 : index
    %c0_0 = arith.constant 0 : index
    %c0_1 = arith.constant 0 : index
    %c0_2 = arith.constant 0 : index
    %0 = vector.load %arg1[%c0, %c0_0, %c0_1, %c0_2] : memref<1x17x17x32xbf16, #tpu.memory_space<vmem>>, vector<1x17x17x32xbf16>
    %1 = vector.shape_cast %0 : vector<1x17x17x32xbf16> to vector<17x17x32xbf16>
    %2 = arith.extf %1 : vector<17x17x32xbf16> to vector<17x17x32xf32>
    %cst = arith.constant 0.000000e+00 : f32
    %3 = vector.broadcast %cst : f32 to vector<256x16xf32>
    %4 = vector.extract_strided_slice %2 {offsets = [0, 0, 0], sizes = [16, 16, 32], strides = [1, 1, 1]} : vector<17x17x32xf32> to vector<16x16x32xf32>
    %5 = vector.shape_cast %4 : vector<16x16x32xf32> to vector<256x32xf32>
    %6 = arith.truncf %5 : vector<256x32xf32> to vector<256x32xbf16>
    %c0_3 = arith.constant 0 : index
    %c0_4 = arith.constant 0 : index
    %c0_5 = arith.constant 0 : index
    %7 = vector.load %arg2[%c0_3, %c0_4, %c0_5] : memref<4x32x16xbf16, #tpu.memory_space<vmem>>, vector<1x32x16xbf16>
    %8 = vector.shape_cast %7 : vector<1x32x16xbf16> to vector<32x16xbf16>
    %cst_6 = arith.constant dense<0.000000e+00> : vector<256x16xf32>
    %9 = tpu.matmul %6, %8, %cst_6 {dimension_numbers = #tpu.dot_dimension_numbers<[1], [0], [0], [1], [0, 0, 1, 1], [], []>} : vector<256x32xbf16>, vector<32x16xbf16>, vector<256x16xf32> -> vector<256x16xf32>
    %10 = arith.addf %3, %9 : vector<256x16xf32>
    %11 = vector.extract_strided_slice %2 {offsets = [0, 1, 0], sizes = [16, 16, 32], strides = [1, 1, 1]} : vector<17x17x32xf32> to vector<16x16x32xf32>
    %12 = vector.shape_cast %11 : vector<16x16x32xf32> to vector<256x32xf32>
    %13 = arith.truncf %12 : vector<256x32xf32> to vector<256x32xbf16>
    %c1 = arith.constant 1 : index
    %c0_7 = arith.constant 0 : index
    %c0_8 = arith.constant 0 : index
    %14 = vector.load %arg2[%c1, %c0_7, %c0_8] : memref<4x32x16xbf16, #tpu.memory_space<vmem>>, vector<1x32x16xbf16>
    %15 = vector.shape_cast %14 : vector<1x32x16xbf16> to vector<32x16xbf16>
    %cst_9 = arith.constant dense<0.000000e+00> : vector<256x16xf32>
    %16 = tpu.matmul %13, %15, %cst_9 {dimension_numbers = #tpu.dot_dimension_numbers<[1], [0], [0], [1], [0, 0, 1, 1], [], []>} : vector<256x32xbf16>, vector<32x16xbf16>, vector<256x16xf32> -> vector<256x16xf32>
    %17 = arith.addf %10, %16 : vector<256x16xf32>
    %18 = vector.extract_strided_slice %2 {offsets = [1, 0, 0], sizes = [16, 16, 32], strides = [1, 1, 1]} : vector<17x17x32xf32> to vector<16x16x32xf32>
    %19 = vector.shape_cast %18 : vector<16x16x32xf32> to vector<256x32xf32>
    %20 = arith.truncf %19 : vector<256x32xf32> to vector<256x32xbf16>
    %c2 = arith.constant 2 : index
    %c0_10 = arith.constant 0 : index
    %c0_11 = arith.constant 0 : index
    %21 = vector.load %arg2[%c2, %c0_10, %c0_11] : memref<4x32x16xbf16, #tpu.memory_space<vmem>>, vector<1x32x16xbf16>
    %22 = vector.shape_cast %21 : vector<1x32x16xbf16> to vector<32x16xbf16>
    %cst_12 = arith.constant dense<0.000000e+00> : vector<256x16xf32>
    %23 = tpu.matmul %20, %22, %cst_12 {dimension_numbers = #tpu.dot_dimension_numbers<[1], [0], [0], [1], [0, 0, 1, 1], [], []>} : vector<256x32xbf16>, vector<32x16xbf16>, vector<256x16xf32> -> vector<256x16xf32>
    %24 = arith.addf %17, %23 : vector<256x16xf32>
    %25 = vector.extract_strided_slice %2 {offsets = [1, 1, 0], sizes = [16, 16, 32], strides = [1, 1, 1]} : vector<17x17x32xf32> to vector<16x16x32xf32>
    %26 = vector.shape_cast %25 : vector<16x16x32xf32> to vector<256x32xf32>
    %27 = arith.truncf %26 : vector<256x32xf32> to vector<256x32xbf16>
    %c3 = arith.constant 3 : index
    %c0_13 = arith.constant 0 : index
    %c0_14 = arith.constant 0 : index
    %28 = vector.load %arg2[%c3, %c0_13, %c0_14] : memref<4x32x16xbf16, #tpu.memory_space<vmem>>, vector<1x32x16xbf16>
    %29 = vector.shape_cast %28 : vector<1x32x16xbf16> to vector<32x16xbf16>
    %cst_15 = arith.constant dense<0.000000e+00> : vector<256x16xf32>
    %30 = tpu.matmul %27, %29, %cst_15 {dimension_numbers = #tpu.dot_dimension_numbers<[1], [0], [0], [1], [0, 0, 1, 1], [], []>} : vector<256x32xbf16>, vector<32x16xbf16>, vector<256x16xf32> -> vector<256x16xf32>
    %31 = arith.addf %24, %30 : vector<256x16xf32>
    %cst_16 = arith.constant dense<0.000000e+00> : vector<16xf32>
    %32 = vector.multi_reduction <add>, %31, %cst_16 [0] : vector<256x16xf32> to vector<16xf32>
    %33 = vector.shape_cast %32 : vector<16xf32> to vector<1x16xf32>
    %cst_17 = arith.constant 2.560000e+02 : f32
    %34 = vector.broadcast %cst_17 : f32 to vector<1x16xf32>
    %35 = arith.divf %33, %34 : vector<1x16xf32>
    %36 = vector.broadcast %35 : vector<1x16xf32> to vector<256x16xf32>
    %37 = arith.subf %31, %36 : vector<256x16xf32>
    %38 = arith.mulf %37, %37 : vector<256x16xf32>
    %cst_18 = arith.constant dense<0.000000e+00> : vector<16xf32>
    %39 = vector.multi_reduction <add>, %38, %cst_18 [0] : vector<256x16xf32> to vector<16xf32>
    %40 = vector.shape_cast %39 : vector<16xf32> to vector<1x16xf32>
    %cst_19 = arith.constant 2.560000e+02 : f32
    %41 = vector.broadcast %cst_19 : f32 to vector<1x16xf32>
    %42 = arith.divf %40, %41 : vector<1x16xf32>
    %c0_20 = arith.constant 0 : index
    %c0_21 = arith.constant 0 : index
    %43 = vector.load %arg3[%c0_20, %c0_21] : memref<1x16xf32, #tpu.memory_space<vmem>>, vector<1x16xf32>
    %cst_22 = arith.constant 9.99999974E-6 : f32
    %44 = vector.broadcast %cst_22 : f32 to vector<1x16xf32>
    %45 = arith.addf %42, %44 : vector<1x16xf32>
    %46 = math.rsqrt %45 : vector<1x16xf32>
    %47 = arith.mulf %43, %46 : vector<1x16xf32>
    %c0_23 = arith.constant 0 : index
    %c0_24 = arith.constant 0 : index
    %48 = vector.load %arg4[%c0_23, %c0_24] : memref<1x16xf32, #tpu.memory_space<vmem>>, vector<1x16xf32>
    %49 = arith.mulf %35, %47 : vector<1x16xf32>
    %50 = arith.subf %48, %49 : vector<1x16xf32>
    %51 = vector.broadcast %47 : vector<1x16xf32> to vector<256x16xf32>
    %52 = arith.mulf %31, %51 : vector<256x16xf32>
    %53 = vector.broadcast %50 : vector<1x16xf32> to vector<256x16xf32>
    %54 = arith.addf %52, %53 : vector<256x16xf32>
    %cst_25 = arith.constant 0.000000e+00 : f32
    %55 = vector.broadcast %cst_25 : f32 to vector<256x16xf32>
    %56 = arith.cmpf ogt, %54, %55 : vector<256x16xf32>
    %cst_26 = arith.constant 2.000000e-01 : f32
    %57 = vector.broadcast %cst_26 : f32 to vector<256x16xf32>
    %58 = arith.mulf %57, %54 : vector<256x16xf32>
    %59 = arith.select %56, %54, %58 : vector<256x16xi1>, vector<256x16xf32>
    %60 = arith.truncf %59 : vector<256x16xf32> to vector<256x16xbf16>
    %c0_27 = arith.constant 0 : index
    %c0_28 = arith.constant 0 : index
    %c0_29 = arith.constant 0 : index
    %61 = vector.load %arg5[%c0_27, %c0_28, %c0_29] : memref<1x256x16xbf16, #tpu.memory_space<vmem>>, vector<1x256x16xbf16>
    %62 = vector.shape_cast %61 : vector<1x256x16xbf16> to vector<256x16xbf16>
    %63 = vector.shape_cast %60 : vector<256x16xbf16> to vector<1x256x16xbf16>
    tpu.vector_store %arg5[%c0_27, %c0_28, %c0_29], %63 {strides = array<i32>} : memref<1x256x16xbf16, #tpu.memory_space<vmem>>, vector<1x256x16xbf16>,
    return
  }
  func.func @transform_0(%arg0: i32) -> (i32, i32, i32, i32) {
    %c0_i32 = arith.constant 0 : i32
    %c0_i32_0 = arith.constant 0 : i32
    %c0_i32_1 = arith.constant 0 : i32
    %c0_i32_2 = arith.constant 0 : i32
    return %arg0, %c0_i32, %c0_i32_0, %c0_i32_1 : i32, i32, i32, i32
  }
  func.func @transform_1(%arg0: i32) -> (i32, i32, i32) {
    %c0_i32 = arith.constant 0 : i32
    %c0_i32_0 = arith.constant 0 : i32
    %c0_i32_1 = arith.constant 0 : i32
    %c0_i32_2 = arith.constant 0 : i32
    return %c0_i32, %c0_i32_0, %c0_i32_1 : i32, i32, i32
  }
  func.func @transform_2(%arg0: i32) -> (i32, i32) {
    %c0_i32 = arith.constant 0 : i32
    %c0_i32_0 = arith.constant 0 : i32
    %c0_i32_1 = arith.constant 0 : i32
    return %c0_i32, %c0_i32_0 : i32, i32
  }
  func.func @transform_3(%arg0: i32) -> (i32, i32) {
    %c0_i32 = arith.constant 0 : i32
    %c0_i32_0 = arith.constant 0 : i32
    %c0_i32_1 = arith.constant 0 : i32
    return %c0_i32, %c0_i32_0 : i32, i32
  }
  func.func @transform_4(%arg0: i32) -> (i32, i32, i32) {
    %c0_i32 = arith.constant 0 : i32
    %c0_i32_0 = arith.constant 0 : i32
    %c0_i32_1 = arith.constant 0 : i32
    return %arg0, %c0_i32, %c0_i32_0 : i32, i32, i32
  }
}

module attributes {stable_mosaic.version = 11 : i64} {
  func.func @_conv_in_lrelu_kernel(%arg0: i32, %arg1: memref<1x9x9x64xbf16, #tpu.memory_space<vmem>>, %arg2: memref<4x64x32xbf16, #tpu.memory_space<vmem>>, %arg3: memref<1x32xf32, #tpu.memory_space<vmem>>, %arg4: memref<1x32xf32, #tpu.memory_space<vmem>>, %arg5: memref<1x64x32xbf16, #tpu.memory_space<vmem>>) attributes {dimension_semantics = [#tpu.dimension_semantics<parallel>], iteration_bounds = array<i64: 2>, scalar_prefetch = 0 : i64, scratch_operands = 0 : i64, tpu.core_type = #tpu.core_type<tc>, window_params = [{transform_indices = @transform_0, window_bounds = array<i64: 1, 9, 9, 64>}, {pipeline_mode = #tpu.pipeline_mode<synchronous>, transform_indices = @transform_1, window_bounds = array<i64: 4, 64, 32>}, {pipeline_mode = #tpu.pipeline_mode<synchronous>, transform_indices = @transform_2, window_bounds = array<i64: 1, 32>}, {pipeline_mode = #tpu.pipeline_mode<synchronous>, transform_indices = @transform_3, window_bounds = array<i64: 1, 32>}, {transform_indices = @transform_4, window_bounds = array<i64: 1, 64, 32>}]} {
    %c0 = arith.constant 0 : index
    %c0_0 = arith.constant 0 : index
    %c0_1 = arith.constant 0 : index
    %c0_2 = arith.constant 0 : index
    %0 = vector.load %arg1[%c0, %c0_0, %c0_1, %c0_2] : memref<1x9x9x64xbf16, #tpu.memory_space<vmem>>, vector<1x9x9x64xbf16>
    %1 = vector.shape_cast %0 : vector<1x9x9x64xbf16> to vector<9x9x64xbf16>
    %2 = arith.extf %1 : vector<9x9x64xbf16> to vector<9x9x64xf32>
    %cst = arith.constant 0.000000e+00 : f32
    %3 = vector.broadcast %cst : f32 to vector<64x32xf32>
    %4 = vector.extract_strided_slice %2 {offsets = [0, 0, 0], sizes = [8, 8, 64], strides = [1, 1, 1]} : vector<9x9x64xf32> to vector<8x8x64xf32>
    %5 = vector.shape_cast %4 : vector<8x8x64xf32> to vector<64x64xf32>
    %6 = arith.truncf %5 : vector<64x64xf32> to vector<64x64xbf16>
    %c0_3 = arith.constant 0 : index
    %c0_4 = arith.constant 0 : index
    %c0_5 = arith.constant 0 : index
    %7 = vector.load %arg2[%c0_3, %c0_4, %c0_5] : memref<4x64x32xbf16, #tpu.memory_space<vmem>>, vector<1x64x32xbf16>
    %8 = vector.shape_cast %7 : vector<1x64x32xbf16> to vector<64x32xbf16>
    %cst_6 = arith.constant dense<0.000000e+00> : vector<64x32xf32>
    %9 = tpu.matmul %6, %8, %cst_6 {dimension_numbers = #tpu.dot_dimension_numbers<[1], [0], [0], [1], [0, 0, 1, 1], [], []>} : vector<64x64xbf16>, vector<64x32xbf16>, vector<64x32xf32> -> vector<64x32xf32>
    %10 = arith.addf %3, %9 : vector<64x32xf32>
    %11 = vector.extract_strided_slice %2 {offsets = [0, 1, 0], sizes = [8, 8, 64], strides = [1, 1, 1]} : vector<9x9x64xf32> to vector<8x8x64xf32>
    %12 = vector.shape_cast %11 : vector<8x8x64xf32> to vector<64x64xf32>
    %13 = arith.truncf %12 : vector<64x64xf32> to vector<64x64xbf16>
    %c1 = arith.constant 1 : index
    %c0_7 = arith.constant 0 : index
    %c0_8 = arith.constant 0 : index
    %14 = vector.load %arg2[%c1, %c0_7, %c0_8] : memref<4x64x32xbf16, #tpu.memory_space<vmem>>, vector<1x64x32xbf16>
    %15 = vector.shape_cast %14 : vector<1x64x32xbf16> to vector<64x32xbf16>
    %cst_9 = arith.constant dense<0.000000e+00> : vector<64x32xf32>
    %16 = tpu.matmul %13, %15, %cst_9 {dimension_numbers = #tpu.dot_dimension_numbers<[1], [0], [0], [1], [0, 0, 1, 1], [], []>} : vector<64x64xbf16>, vector<64x32xbf16>, vector<64x32xf32> -> vector<64x32xf32>
    %17 = arith.addf %10, %16 : vector<64x32xf32>
    %18 = vector.extract_strided_slice %2 {offsets = [1, 0, 0], sizes = [8, 8, 64], strides = [1, 1, 1]} : vector<9x9x64xf32> to vector<8x8x64xf32>
    %19 = vector.shape_cast %18 : vector<8x8x64xf32> to vector<64x64xf32>
    %20 = arith.truncf %19 : vector<64x64xf32> to vector<64x64xbf16>
    %c2 = arith.constant 2 : index
    %c0_10 = arith.constant 0 : index
    %c0_11 = arith.constant 0 : index
    %21 = vector.load %arg2[%c2, %c0_10, %c0_11] : memref<4x64x32xbf16, #tpu.memory_space<vmem>>, vector<1x64x32xbf16>
    %22 = vector.shape_cast %21 : vector<1x64x32xbf16> to vector<64x32xbf16>
    %cst_12 = arith.constant dense<0.000000e+00> : vector<64x32xf32>
    %23 = tpu.matmul %20, %22, %cst_12 {dimension_numbers = #tpu.dot_dimension_numbers<[1], [0], [0], [1], [0, 0, 1, 1], [], []>} : vector<64x64xbf16>, vector<64x32xbf16>, vector<64x32xf32> -> vector<64x32xf32>
    %24 = arith.addf %17, %23 : vector<64x32xf32>
    %25 = vector.extract_strided_slice %2 {offsets = [1, 1, 0], sizes = [8, 8, 64], strides = [1, 1, 1]} : vector<9x9x64xf32> to vector<8x8x64xf32>
    %26 = vector.shape_cast %25 : vector<8x8x64xf32> to vector<64x64xf32>
    %27 = arith.truncf %26 : vector<64x64xf32> to vector<64x64xbf16>
    %c3 = arith.constant 3 : index
    %c0_13 = arith.constant 0 : index
    %c0_14 = arith.constant 0 : index
    %28 = vector.load %arg2[%c3, %c0_13, %c0_14] : memref<4x64x32xbf16, #tpu.memory_space<vmem>>, vector<1x64x32xbf16>
    %29 = vector.shape_cast %28 : vector<1x64x32xbf16> to vector<64x32xbf16>
    %cst_15 = arith.constant dense<0.000000e+00> : vector<64x32xf32>
    %30 = tpu.matmul %27, %29, %cst_15 {dimension_numbers = #tpu.dot_dimension_numbers<[1], [0], [0], [1], [0, 0, 1, 1], [], []>} : vector<64x64xbf16>, vector<64x32xbf16>, vector<64x32xf32> -> vector<64x32xf32>
    %31 = arith.addf %24, %30 : vector<64x32xf32>
    %cst_16 = arith.constant dense<0.000000e+00> : vector<32xf32>
    %32 = vector.multi_reduction <add>, %31, %cst_16 [0] : vector<64x32xf32> to vector<32xf32>
    %33 = vector.shape_cast %32 : vector<32xf32> to vector<1x32xf32>
    %cst_17 = arith.constant 6.400000e+01 : f32
    %34 = vector.broadcast %cst_17 : f32 to vector<1x32xf32>
    %35 = arith.divf %33, %34 : vector<1x32xf32>
    %36 = vector.broadcast %35 : vector<1x32xf32> to vector<64x32xf32>
    %37 = arith.subf %31, %36 : vector<64x32xf32>
    %38 = arith.mulf %37, %37 : vector<64x32xf32>
    %cst_18 = arith.constant dense<0.000000e+00> : vector<32xf32>
    %39 = vector.multi_reduction <add>, %38, %cst_18 [0] : vector<64x32xf32> to vector<32xf32>
    %40 = vector.shape_cast %39 : vector<32xf32> to vector<1x32xf32>
    %cst_19 = arith.constant 6.400000e+01 : f32
    %41 = vector.broadcast %cst_19 : f32 to vector<1x32xf32>
    %42 = arith.divf %40, %41 : vector<1x32xf32>
    %c0_20 = arith.constant 0 : index
    %c0_21 = arith.constant 0 : index
    %43 = vector.load %arg3[%c0_20, %c0_21] : memref<1x32xf32, #tpu.memory_space<vmem>>, vector<1x32xf32>
    %cst_22 = arith.constant 9.99999974E-6 : f32
    %44 = vector.broadcast %cst_22 : f32 to vector<1x32xf32>
    %45 = arith.addf %42, %44 : vector<1x32xf32>
    %46 = math.rsqrt %45 : vector<1x32xf32>
    %47 = arith.mulf %43, %46 : vector<1x32xf32>
    %c0_23 = arith.constant 0 : index
    %c0_24 = arith.constant 0 : index
    %48 = vector.load %arg4[%c0_23, %c0_24] : memref<1x32xf32, #tpu.memory_space<vmem>>, vector<1x32xf32>
    %49 = arith.mulf %35, %47 : vector<1x32xf32>
    %50 = arith.subf %48, %49 : vector<1x32xf32>
    %51 = vector.broadcast %47 : vector<1x32xf32> to vector<64x32xf32>
    %52 = arith.mulf %31, %51 : vector<64x32xf32>
    %53 = vector.broadcast %50 : vector<1x32xf32> to vector<64x32xf32>
    %54 = arith.addf %52, %53 : vector<64x32xf32>
    %cst_25 = arith.constant 0.000000e+00 : f32
    %55 = vector.broadcast %cst_25 : f32 to vector<64x32xf32>
    %56 = arith.cmpf ogt, %54, %55 : vector<64x32xf32>
    %cst_26 = arith.constant 2.000000e-01 : f32
    %57 = vector.broadcast %cst_26 : f32 to vector<64x32xf32>
    %58 = arith.mulf %57, %54 : vector<64x32xf32>
    %59 = arith.select %56, %54, %58 : vector<64x32xi1>, vector<64x32xf32>
    %60 = arith.truncf %59 : vector<64x32xf32> to vector<64x32xbf16>
    %c0_27 = arith.constant 0 : index
    %c0_28 = arith.constant 0 : index
    %c0_29 = arith.constant 0 : index
    %61 = vector.load %arg5[%c0_27, %c0_28, %c0_29] : memref<1x64x32xbf16, #tpu.memory_space<vmem>>, vector<1x64x32xbf16>
    %62 = vector.shape_cast %61 : vector<1x64x32xbf16> to vector<64x32xbf16>
    %63 = vector.shape_cast %60 : vector<64x32xbf16> to vector<1x64x32xbf16>
    tpu.vector_store %arg5[%c0_27, %c0_28, %c0_29], %63 {strides = array<i32>} : memref<1x64x32xbf16, #tpu.memory_space<vmem>>, vector<1x64x32xbf16>,
    return
  }
  func.func @transform_0(%arg0: i32) -> (i32, i32, i32, i32) {
    %c0_i32 = arith.constant 0 : i32
    %c0_i32_0 = arith.constant 0 : i32
    %c0_i32_1 = arith.constant 0 : i32
    %c0_i32_2 = arith.constant 0 : i32
    return %arg0, %c0_i32, %c0_i32_0, %c0_i32_1 : i32, i32, i32, i32
  }
  func.func @transform_1(%arg0: i32) -> (i32, i32, i32) {
    %c0_i32 = arith.constant 0 : i32
    %c0_i32_0 = arith.constant 0 : i32
    %c0_i32_1 = arith.constant 0 : i32
    %c0_i32_2 = arith.constant 0 : i32
    return %c0_i32, %c0_i32_0, %c0_i32_1 : i32, i32, i32
  }
  func.func @transform_2(%arg0: i32) -> (i32, i32) {
    %c0_i32 = arith.constant 0 : i32
    %c0_i32_0 = arith.constant 0 : i32
    %c0_i32_1 = arith.constant 0 : i32
    return %c0_i32, %c0_i32_0 : i32, i32
  }
  func.func @transform_3(%arg0: i32) -> (i32, i32) {
    %c0_i32 = arith.constant 0 : i32
    %c0_i32_0 = arith.constant 0 : i32
    %c0_i32_1 = arith.constant 0 : i32
    return %c0_i32, %c0_i32_0 : i32, i32
  }
  func.func @transform_4(%arg0: i32) -> (i32, i32, i32) {
    %c0_i32 = arith.constant 0 : i32
    %c0_i32_0 = arith.constant 0 : i32
    %c0_i32_1 = arith.constant 0 : i32
    return %arg0, %c0_i32, %c0_i32_0 : i32, i32, i32
  }
}

module attributes {stable_mosaic.version = 11 : i64} {
  func.func @_final_block_kernel(%arg0: i32, %arg1: memref<1x16x512xbf16, #tpu.memory_space<vmem>>, %arg2: memref<512x64xbf16, #tpu.memory_space<vmem>>, %arg3: memref<1x64xf32, #tpu.memory_space<vmem>>, %arg4: memref<1x64xf32, #tpu.memory_space<vmem>>, %arg5: memref<16x64xf32, #tpu.memory_space<vmem>>, %arg6: memref<1x1xf32, #tpu.memory_space<vmem>>, %arg7: memref<1x1x1xf32, #tpu.memory_space<vmem>>) attributes {dimension_semantics = [#tpu.dimension_semantics<parallel>], iteration_bounds = array<i64: 2>, scalar_prefetch = 0 : i64, scratch_operands = 0 : i64, tpu.core_type = #tpu.core_type<tc>, window_params = [{transform_indices = @transform_0, window_bounds = array<i64: 1, 16, 512>}, {pipeline_mode = #tpu.pipeline_mode<synchronous>, transform_indices = @transform_1, window_bounds = array<i64: 512, 64>}, {pipeline_mode = #tpu.pipeline_mode<synchronous>, transform_indices = @transform_2, window_bounds = array<i64: 1, 64>}, {pipeline_mode = #tpu.pipeline_mode<synchronous>, transform_indices = @transform_3, window_bounds = array<i64: 1, 64>}, {pipeline_mode = #tpu.pipeline_mode<synchronous>, transform_indices = @transform_4, window_bounds = array<i64: 16, 64>}, {pipeline_mode = #tpu.pipeline_mode<synchronous>, transform_indices = @transform_5, window_bounds = array<i64: 1, 1>}, {transform_indices = @transform_6, window_bounds = array<i64: 1, 1, 1>}]} {
    %c0 = arith.constant 0 : index
    %c0_0 = arith.constant 0 : index
    %c0_1 = arith.constant 0 : index
    %0 = vector.load %arg1[%c0, %c0_0, %c0_1] : memref<1x16x512xbf16, #tpu.memory_space<vmem>>, vector<1x16x512xbf16>
    %1 = vector.shape_cast %0 : vector<1x16x512xbf16> to vector<16x512xbf16>
    %c0_2 = arith.constant 0 : index
    %c0_3 = arith.constant 0 : index
    %2 = vector.load %arg2[%c0_2, %c0_3] : memref<512x64xbf16, #tpu.memory_space<vmem>>, vector<512x64xbf16>
    %cst = arith.constant dense<0.000000e+00> : vector<16x64xf32>
    %3 = tpu.matmul %1, %2, %cst {dimension_numbers = #tpu.dot_dimension_numbers<[1], [0], [0], [1], [0, 0, 1, 1], [], []>} : vector<16x512xbf16>, vector<512x64xbf16>, vector<16x64xf32> -> vector<16x64xf32>
    %cst_4 = arith.constant dense<0.000000e+00> : vector<64xf32>
    %4 = vector.multi_reduction <add>, %3, %cst_4 [0] : vector<16x64xf32> to vector<64xf32>
    %5 = vector.shape_cast %4 : vector<64xf32> to vector<1x64xf32>
    %cst_5 = arith.constant 1.600000e+01 : f32
    %6 = vector.broadcast %cst_5 : f32 to vector<1x64xf32>
    %7 = arith.divf %5, %6 : vector<1x64xf32>
    %8 = vector.broadcast %7 : vector<1x64xf32> to vector<16x64xf32>
    %9 = arith.subf %3, %8 : vector<16x64xf32>
    %10 = arith.mulf %9, %9 : vector<16x64xf32>
    %cst_6 = arith.constant dense<0.000000e+00> : vector<64xf32>
    %11 = vector.multi_reduction <add>, %10, %cst_6 [0] : vector<16x64xf32> to vector<64xf32>
    %12 = vector.shape_cast %11 : vector<64xf32> to vector<1x64xf32>
    %cst_7 = arith.constant 1.600000e+01 : f32
    %13 = vector.broadcast %cst_7 : f32 to vector<1x64xf32>
    %14 = arith.divf %12, %13 : vector<1x64xf32>
    %c0_8 = arith.constant 0 : index
    %c0_9 = arith.constant 0 : index
    %15 = vector.load %arg3[%c0_8, %c0_9] : memref<1x64xf32, #tpu.memory_space<vmem>>, vector<1x64xf32>
    %cst_10 = arith.constant 9.99999974E-6 : f32
    %16 = vector.broadcast %cst_10 : f32 to vector<1x64xf32>
    %17 = arith.addf %14, %16 : vector<1x64xf32>
    %18 = math.rsqrt %17 : vector<1x64xf32>
    %19 = arith.mulf %15, %18 : vector<1x64xf32>
    %c0_11 = arith.constant 0 : index
    %c0_12 = arith.constant 0 : index
    %20 = vector.load %arg4[%c0_11, %c0_12] : memref<1x64xf32, #tpu.memory_space<vmem>>, vector<1x64xf32>
    %21 = arith.mulf %7, %19 : vector<1x64xf32>
    %22 = arith.subf %20, %21 : vector<1x64xf32>
    %23 = vector.broadcast %19 : vector<1x64xf32> to vector<16x64xf32>
    %24 = arith.mulf %3, %23 : vector<16x64xf32>
    %25 = vector.broadcast %22 : vector<1x64xf32> to vector<16x64xf32>
    %26 = arith.addf %24, %25 : vector<16x64xf32>
    %cst_13 = arith.constant 0.000000e+00 : f32
    %27 = vector.broadcast %cst_13 : f32 to vector<16x64xf32>
    %28 = arith.cmpf ogt, %26, %27 : vector<16x64xf32>
    %cst_14 = arith.constant 2.000000e-01 : f32
    %29 = vector.broadcast %cst_14 : f32 to vector<16x64xf32>
    %30 = arith.mulf %29, %26 : vector<16x64xf32>
    %31 = arith.select %28, %26, %30 : vector<16x64xi1>, vector<16x64xf32>
    %c0_15 = arith.constant 0 : index
    %c0_16 = arith.constant 0 : index
    %32 = vector.load %arg5[%c0_15, %c0_16] : memref<16x64xf32, #tpu.memory_space<vmem>>, vector<16x64xf32>
    %33 = arith.mulf %31, %32 : vector<16x64xf32>
    %cst_17 = arith.constant dense<0.000000e+00> : vector<64xf32>
    %34 = vector.multi_reduction <add>, %33, %cst_17 [0] : vector<16x64xf32> to vector<64xf32>
    %35 = vector.shape_cast %34 : vector<64xf32> to vector<1x64xf32>
    %cst_18 = arith.constant dense<0.000000e+00> : vector<1xf32>
    %36 = vector.multi_reduction <add>, %35, %cst_18 [1] : vector<1x64xf32> to vector<1xf32>
    %37 = vector.shape_cast %36 : vector<1xf32> to vector<1x1xf32>
    %c0_19 = arith.constant 0 : index
    %c0_20 = arith.constant 0 : index
    %38 = vector.load %arg6[%c0_19, %c0_20] : memref<1x1xf32, #tpu.memory_space<vmem>>, vector<1x1xf32>
    %39 = arith.addf %37, %38 : vector<1x1xf32>
    %c0_21 = arith.constant 0 : index
    %c0_22 = arith.constant 0 : index
    %c0_23 = arith.constant 0 : index
    %40 = vector.load %arg7[%c0_21, %c0_22, %c0_23] : memref<1x1x1xf32, #tpu.memory_space<vmem>>, vector<1x1x1xf32>
    %41 = vector.shape_cast %40 : vector<1x1x1xf32> to vector<1x1xf32>
    %42 = vector.shape_cast %39 : vector<1x1xf32> to vector<1x1x1xf32>
    tpu.vector_store %arg7[%c0_21, %c0_22, %c0_23], %42 {strides = array<i32>} : memref<1x1x1xf32, #tpu.memory_space<vmem>>, vector<1x1x1xf32>,
    return
  }
  func.func @transform_0(%arg0: i32) -> (i32, i32, i32) {
    %c0_i32 = arith.constant 0 : i32
    %c0_i32_0 = arith.constant 0 : i32
    %c0_i32_1 = arith.constant 0 : i32
    return %arg0, %c0_i32, %c0_i32_0 : i32, i32, i32
  }
  func.func @transform_1(%arg0: i32) -> (i32, i32) {
    %c0_i32 = arith.constant 0 : i32
    %c0_i32_0 = arith.constant 0 : i32
    %c0_i32_1 = arith.constant 0 : i32
    return %c0_i32, %c0_i32_0 : i32, i32
  }
  func.func @transform_2(%arg0: i32) -> (i32, i32) {
    %c0_i32 = arith.constant 0 : i32
    %c0_i32_0 = arith.constant 0 : i32
    %c0_i32_1 = arith.constant 0 : i32
    return %c0_i32, %c0_i32_0 : i32, i32
  }
  func.func @transform_3(%arg0: i32) -> (i32, i32) {
    %c0_i32 = arith.constant 0 : i32
    %c0_i32_0 = arith.constant 0 : i32
    %c0_i32_1 = arith.constant 0 : i32
    return %c0_i32, %c0_i32_0 : i32, i32
  }
  func.func @transform_4(%arg0: i32) -> (i32, i32) {
    %c0_i32 = arith.constant 0 : i32
    %c0_i32_0 = arith.constant 0 : i32
    %c0_i32_1 = arith.constant 0 : i32
    return %c0_i32, %c0_i32_0 : i32, i32
  }
  func.func @transform_5(%arg0: i32) -> (i32, i32) {
    %c0_i32 = arith.constant 0 : i32
    %c0_i32_0 = arith.constant 0 : i32
    %c0_i32_1 = arith.constant 0 : i32
    return %c0_i32, %c0_i32_0 : i32, i32
  }
  func.func @transform_6(%arg0: i32) -> (i32, i32, i32) {
    %c0_i32 = arith.constant 0 : i32
    %c0_i32_0 = arith.constant 0 : i32
    %c0_i32_1 = arith.constant 0 : i32
    return %arg0, %c0_i32, %c0_i32_0 : i32, i32, i32
  }
}

</mosaic_0001>

<bundles_post_ra>
// kernel: critic_forward.4
= control target key start
LH: loop header
LB: loop body
LE: loop exit
PB: predicated region body
PF: predicated region fallthrough
CT: control target
= control target key end

     0   :  { %s4654_s12 = smov 0   ;;  %s6170_s0 = inlined_call_operand.vmem [shape: bf16[2,33,33,12], index: 0, kind: input, shape index: {}]   ;;  %s6171_s1 = inlined_call_operand.vmem [shape: bf16[4,12,8], index: 1, kind: input, shape index: {}]   ;;  %s6172_s2 = inlined_call_operand.vmem [shape: f32[1,8], index: 2, kind: input, shape index: {}]   ;;  %s6173_s3 = inlined_call_operand.vmem [shape: bf16[2,1024,8], index: 3, kind: output, shape index: {}]  }
   0x1 LB: > { %s4070_s13 = sadd.s32 4294967295, %s4632_s12   ;;  %p4074_p0 = scmp.ge.s32.totalorder %s4632_s12, 1  ;;  %s4632_s12 = sphi %s4654_s12, %s13_s12  }
   0x2   : > { %p137_p1 = scmp.lt.s32.totalorder %s4632_s12, 3 }
   0x4   : > { %p138_p2 = pnand %p4074_p0, %p137_p1 }
   0x5   : > { %p161_p3 = scmp.lt.s32.totalorder (!%p138_p2), %s4070_s13, 1 }
   0x6   : > { %141 = sbr.rel (%p138_p2) target bundleno = 1184 (0x4a0), region = 32 }
   0xb   : > { %v4150_v0 = vld [vmem:[%s6171_s1] sm:$0xf]  ;;  %v4359_v1 = vld [vmem:[%s6171_s1] sm:$0x30]  ;;  %vm1410_vm0 = vcmask 1045504   ;;  %s6175_s13 = smov (!%p161_p3, %s4070_s13), 1 }
   0xc   : > { %v4151_v2 = vor.u32 %v4359_v1, %v4150_v0  ;;  %v4220_v3 = vld [vmem:[%s6171_s1 + $0x10] sm:$0xf]  ;;  %v4361_v4 = vld [vmem:[%s6171_s1 + $0x10] sm:$0x30]  ;;  %v4082_v6 = vld [vmem:[%s6171_s1 + $0x8] sm:$0xf] }
   0xd   : > { %v4221_v5 = vor.u32 %v4361_v4, %v4220_v3  ;;  %v4360_v7 = vld [vmem:[%s6171_s1 + $0x8] sm:$0x30]  ;;  %v4290_v10 = vld [vmem:[%s6171_s1 + $0x18] sm:$0xf]  ;;  %v4362_v11 = vld [vmem:[%s6171_s1 + $0x18] sm:$0x30] }
   0xe   : > { %v1941_v8 = vsel %vm1410_vm0, %v4151_v2, 0  ;;  %v4083_v9 = vor.u32 %v4360_v7, %v4082_v6  ;;  %s4612_s30 = smul.u32 660, %s6175_s13  ;;  %v4291_v13 = vor.u32 %v4362_v11, %v4290_v10  ;;  %vm1217_vm1 = vcmask 97280   ;;  %s4358_s9 = sshll.u32 %s6175_s13, 9 }
   0xf   : > { %1950 = vmatpush.bf16.msra.mxu1 %v1941_v8  ;;  %v2289_v12 = vsel %vm1410_vm0, %v4221_v5, 0  ;;  %vm728_vm2 = vcmask 1046528   ;;  %s4807_s14 = scalar_lea.vmem %s6173_s3, %s4358_s9  ;;  %vm3886_vm4 = vcmask 60416  }
  0x10   : > { %2298 = vmatpush.bf16.msra.mxu2 %v2289_v12  ;;  %v1412_v14 = vsel %vm1410_vm0, %v4083_v9, 0  ;;  %s4695_s6 = scalar_lea.vmem %s6170_s0, %s4612_s30  ;;  %v2783_v15 = vsel %vm1410_vm0, %v4291_v13, 0 }
  0x11   : > { %1421 = vmatpush.bf16.msra.mxu0 %v1412_v14  ;;  %v4364_v16 = vld [vmem:[%s4695_s6] sm:$0xff]   ;;  %v177_v17 = vld [vmem:[%s4695_s6 + $0x14] sm:$0xf]  ;;  %v4564_v18 = vld [vmem:[%s4695_s6 + $0x18] sm:$0xff]   ;;  %2792 = vmatpush.bf16.msra.mxu3 %v2783_v15 }
  0x12   : > { %v4365_v19 = vunpack.c.l.bf16 %v4364_v16  ;;  %v4366_v20 = vunpack.c.h.bf16 %v4364_v16  ;;  %4152 = vmatmul.msk.bf16.vlgmr.msra.gmra.mxu1 %vm1217_vm1, %v4364_v16  ;;  %v4373_v21 = vunpack.c.l.bf16 %v4564_v18  ;;  %v4374_v22 = vunpack.c.h.bf16 %v4564_v18  ;;  %v4563_v23 = vld [vmem:[%s4695_s6 + $0x8] sm:$0xff]   ;;  %v180_v39 = vld [vmem:[%s4695_s6 + $0x20] sm:$0xf]  ;;  %v176_v40 = vld [vmem:[%s4695_s6 + $0x10] sm:$0x1] }
  0x13   : > { %v342_v24 = vunpack.c.l.bf16 %v177_v17  ;;  %v4369_v25 = vunpack.c.l.bf16 %v4563_v23  ;;  %v181_v41 = vld [vmem:[%s4695_s6 + $0x24] sm:$0x1]  ;;  %v345_v42 = vunpack.c.l.bf16 %v180_v39  ;;  %v4370_v43 = vunpack.c.h.bf16 %v4563_v23  ;;  %v4565_v57 = vld [vmem:[%s4695_s6 + $0x28] sm:$0xff]   ;;  %v4566_v58 = vld [vmem:[%s4695_s6 + $0x30] sm:$0xff]  }
  0x14   : > { %v729_v26 = vrot.slane %v4365_v19, 1  ;;  %v730_v27 = vrot.slane %v4366_v20, 1  ;;  %v739_v28 = vrot.slane %v4373_v21, 1  ;;  %v741_v29 = vrot.slane %v4374_v22, 1  ;;  %v186_v4 = vld [vmem:[%s4695_s6 + $0x38] sm:$0x1] }
  0x15   : > { %v504_v30 = vpack.c.bf16 %v4373_v21, %v342_v24  ;;  %v738_v31 = vrot.slane %v342_v24, 1  ;;  %v732_v32 = vrot.slane %v4369_v25, 1  ;;  %v341_v44 = vunpack.c.l.bf16 %v176_v40  ;;  %v187_v12 = vld [vmem:[%s4695_s6 + $0x3c] sm:$0xf]  ;;  %v4567_v13 = vld [vmem:[%s4695_s6 + $0x40] sm:$0xff]  }
  0x16   : > { %v731_v33 = vsel %vm728_vm2, %v729_v26, %v730_v27  ;;  %v742_v34 = vsel %vm728_vm2, %v739_v28, %v741_v29  ;;  %v346_v45 = vunpack.c.l.bf16 %v181_v41  ;;  %v743_v46 = vrot.slane %v345_v42, 1  ;;  %v190_v24 = vld [vmem:[%s4695_s6 + $0x48] sm:$0xf]  ;;  %v191_v25 = vld [vmem:[%s4695_s6 + $0x4c] sm:$0x1] }
  0x17   : > { %4222 = vmatmul.msk.bf16.vlgmr.msra.gmra.mxu2 %vm1217_vm1, %v504_v30  ;;  %v733_v35 = vsel %vm728_vm2, %v730_v27, %v732_v32  ;;  %v740_v36 = vsel %vm728_vm2, %v738_v31, %v739_v28  ;;  %v734_v47 = vrot.slane %v4370_v43, 1  ;;  %v736_v48 = vrot.slane %v341_v44, 1 }
  0x18   : > { %v1145_v37 = vpack.c.bf16 %v733_v35, %v731_v33  ;;  %v1147_v38 = vpack.c.bf16 %v742_v34, %v740_v36  ;;  %v745_v49 = vrot.slane %v346_v45, 1  ;;  %v505_v50 = vpack.c.bf16 %v345_v42, %v4374_v22  ;;  %v4568_v34 = vld [vmem:[%s4695_s6 + $0x50] sm:$0xff]   ;;  %v4752_v35 = vld [vmem:[%s4695_s6 + $0x58] sm:$0xff]   ;;  %v196_v45 = vld [vmem:[%s4695_s6 + $0x60] sm:$0x1] }
  0x19   : > { %v735_v51 = vsel %vm728_vm2, %v732_v32, %v734_v47  ;;  %v737_v52 = vsel %vm728_vm2, %v734_v47, %v736_v48  ;;  %v744_v53 = vsel %vm728_vm2, %v741_v29, %v743_v46  ;;  %v4377_v59 = vunpack.c.l.bf16 %v4565_v57 }
  0x1a   : > { %4084 = vmatmul.msk.bf16.vlgmr.msra.gmra.mxu0 %vm1217_vm1, %v1145_v37  ;;  %4292 = vmatmul.msk.bf16.vlgmr.msra.gmra.mxu3 %vm1217_vm1, %v1147_v38  ;;  %v746_v54 = vsel %vm728_vm2, %v743_v46, %v745_v49  ;;  %v1146_v55 = vpack.c.bf16 %v737_v52, %v735_v51  ;;  %v4378_v60 = vunpack.c.h.bf16 %v4565_v57  ;;  %v4381_v61 = vunpack.c.l.bf16 %v4566_v58 }
  0x1b   : > { %v1148_v56 = vpack.c.bf16 %v746_v54, %v744_v53  ;;  %v747_v62 = vrot.slane %v4377_v59, 1  ;;  %v4382_v5 = vunpack.c.h.bf16 %v4566_v58  ;;  %v351_v6 = vunpack.c.l.bf16 %v186_v4  ;;  %v197_v53 = vld [vmem:[%s4695_s6 + $0x64] sm:$0xf]  ;;  %v4570_v54 = vld [vmem:[%s4695_s6 + $0x68] sm:$0xff]  }
  0x1c   : > { %v748_v63 = vrot.slane %v4378_v60, 1  ;;  %v750_v0 = vrot.slane %v4381_v61, 1  ;;  %v4385_v14 = vunpack.c.l.bf16 %v4567_v13  ;;  %v4386_v15 = vunpack.c.h.bf16 %v4567_v13 }
  0x1d   : > { %v752_v7 = vrot.slane %v4382_v5, 1  ;;  %v754_v8 = vrot.slane %v351_v6, 1  ;;  %v352_v16 = vunpack.c.l.bf16 %v187_v12  ;;  %v355_v26 = vunpack.c.l.bf16 %v190_v24  ;;  %v200_v5 = vld [vmem:[%s4695_s6 + $0x70] sm:$0xf]  ;;  %v201_v6 = vld [vmem:[%s4695_s6 + $0x74] sm:$0x1] }
  0x1e   : > { %v749_v1 = vsel %vm728_vm2, %v747_v62, %v748_v63  ;;  %v751_v2 = vsel %vm728_vm2, %v748_v63, %v750_v0  ;;  %v757_v18 = vrot.slane %v4385_v14, 1  ;;  %v759_v19 = vrot.slane %v4386_v15, 1 }
  0x1f   : > { %v1149_v3 = vpack.c.bf16 %v751_v2, %v749_v1  ;;  %v753_v9 = vsel %vm728_vm2, %v750_v0, %v752_v7  ;;  %v755_v10 = vsel %vm728_vm2, %v752_v7, %v754_v8  ;;  %v756_v17 = vrot.slane %v352_v16, 1 }
  0x20   : > { %v1150_v11 = vpack.c.bf16 %v755_v10, %v753_v9  ;;  %v508_v20 = vpack.c.bf16 %v4385_v14, %v352_v16  ;;  %v760_v22 = vsel %vm728_vm2, %v757_v18, %v759_v19  ;;  %v356_v27 = vunpack.c.l.bf16 %v191_v25 }
  0x21   : > { %v758_v21 = vsel %vm728_vm2, %v756_v17, %v757_v18  ;;  %v761_v28 = vrot.slane %v355_v26, 1  ;;  %v4389_v36 = vunpack.c.l.bf16 %v4568_v34  ;;  %v4390_v37 = vunpack.c.h.bf16 %v4568_v34 }
  0x22   : > { %4153 = vmatmul.msk.bf16.gmra.mxu1 %vm1217_vm1, %v4563_v23  ;;  %v1151_v23 = vpack.c.bf16 %v760_v22, %v758_v21  ;;  %v763_v29 = vrot.slane %v356_v27, 1  ;;  %v4394_v46 = vunpack.c.h.bf16 %v4752_v35  ;;  %v361_v47 = vunpack.c.l.bf16 %v196_v45 }
  0x23   : > { %v762_v31 = vsel %vm728_vm2, %v759_v19, %v761_v28  ;;  %v765_v39 = vrot.slane %v4389_v36, 1  ;;  %v766_v40 = vrot.slane %v4390_v37, 1  ;;  %v365_v9 = vunpack.c.l.bf16 %v200_v5  ;;  %v4820_v36 = vld [vmem:[%s4695_s6 + $0x80] sm:$0xff]   ;;  %v206_v5 = vld [vmem:[%s4695_s6 + $0x88] sm:$0x1] }
  0x24   : > { %v764_v32 = vsel %vm728_vm2, %v761_v28, %v763_v29  ;;  %v770_v48 = vrot.slane %v4394_v46, 1  ;;  %v772_v49 = vrot.slane %v361_v47, 1  ;;  %v366_v10 = vunpack.c.l.bf16 %v201_v6 }
  0x25   : > { %v1152_v33 = vpack.c.bf16 %v764_v32, %v762_v31  ;;  %v767_v42 = vsel %vm728_vm2, %v765_v39, %v766_v40  ;;  %v779_v16 = vrot.slane %v365_v9, 1 }
  0x26   : > { %v773_v51 = vsel %vm728_vm2, %v770_v48, %v772_v49  ;;  %v781_v17 = vrot.slane %v366_v10, 1  ;;  %v371_v10 = vunpack.c.l.bf16 %v206_v5 }
  0x27   : > { %4223 = vmatmul.msk.bf16.gmra.mxu2 %vm1217_vm1, %v505_v50 }
  0x28   : > { %v782_v25 = vsel %vm728_vm2, %v779_v16, %v781_v17 }
  0x2a   : > { %4085 = vmatmul.msk.bf16.gmra.mxu0 %vm1217_vm1, %v1146_v55  ;;  %4293 = vmatmul.msk.bf16.gmra.mxu3 %vm1217_vm1, %v1148_v56  ;;  %v4397_v55 = vunpack.c.l.bf16 %v4570_v54 }
  0x2c   : > { %v775_v60 = vrot.slane %v4397_v55, 1 }
  0x32   : > { %4154 = vmatmul.msk.bf16.gmra.mxu1 %vm1217_vm1, %v504_v30  ;;  %v509_v30 = vpack.c.bf16 %v355_v26, %v4386_v15 }
  0x37   : > { %4224 = vmatmul.msk.bf16.gmra.mxu2 %vm1217_vm1, %v4565_v57 }
  0x3a   : > { %4086 = vmatmul.msk.bf16.gmra.mxu0 %vm1217_vm1, %v1147_v38  ;;  %4294 = vmatmul.msk.bf16.gmra.mxu3 %vm1217_vm1, %v1149_v3  ;;  %v4393_v38 = vunpack.c.l.bf16 %v4752_v35 }
  0x3c   : > { %v768_v41 = vrot.slane %v4393_v38, 1 }
  0x3e   : > { %v769_v43 = vsel %vm728_vm2, %v766_v40, %v768_v41 }
  0x3f   : > { %v1153_v44 = vpack.c.bf16 %v769_v43, %v767_v42  ;;  %v4405_v42 = vunpack.c.l.bf16 %v4820_v36 }
  0x42   : > { %4155 = vmatmul.msk.bf16.gmra.mxu1 %vm1217_vm1, %v505_v50  ;;  %v771_v50 = vsel %vm728_vm2, %v768_v41, %v770_v48 }
  0x43   : > { %v4768_v52 = vpack.c.bf16 %v773_v51, %v771_v50  ;;  %v786_v51 = vrot.slane %v4405_v42, 1 }
  0x47   : > { %4225 = vmatmul.msk.bf16.gmra.mxu2 %vm1217_vm1, %v4566_v58 }
  0x4a   : > { %4087 = vmatmul.msk.bf16.gmra.mxu0 %vm1217_vm1, %v1148_v56  ;;  %4295 = vmatmul.msk.bf16.gmra.mxu3 %vm1217_vm1, %v1150_v11  ;;  %v4398_v56 = vunpack.c.h.bf16 %v4570_v54 }
  0x4c   : > { %v777_v61 = vrot.slane %v4398_v56, 1 }
  0x4e   : > { %v778_v0 = vsel %vm728_vm2, %v775_v60, %v777_v61  ;;  %v780_v24 = vsel %vm728_vm2, %v777_v61, %v779_v16 }
  0x52   : > { %4156 = vmatmul.msk.bf16.gmra.mxu1 %vm1217_vm1, %v4565_v57  ;;  %v362_v57 = vunpack.c.l.bf16 %v197_v53 }
  0x54   : > { %v774_v59 = vrot.slane %v362_v57, 1  ;;  %v4778_v62 = vpack.c.bf16 %v4397_v55, %v362_v57 }
  0x56   : > { %v776_v63 = vsel %vm728_vm2, %v774_v59, %v775_v60 }
  0x57   : > { %4226 = vmatmul.msk.bf16.gmra.mxu2 %vm1217_vm1, %v508_v20  ;;  %v4782_v1 = vpack.c.bf16 %v778_v0, %v776_v63 }
  0x5a   : > { %4088 = vmatmul.msk.bf16.gmra.mxu0 %vm1217_vm1, %v1149_v3  ;;  %4296 = vmatmul.msk.bf16.gmra.mxu3 %vm1217_vm1, %v1151_v23 }
  0x62   : > { %4157 = vmatmul.msk.bf16.gmra.mxu1 %vm1217_vm1, %v4566_v58 }
  0x67   : > { %4227 = vmatmul.msk.bf16.gmra.mxu2 %vm1217_vm1, %v509_v30 }
  0x6a   : > { %4089 = vmatmul.msk.bf16.gmra.mxu0 %vm1217_vm1, %v1150_v11  ;;  %4297 = vmatmul.msk.bf16.gmra.mxu3 %vm1217_vm1, %v1152_v33  ;;  %v4794_v11 = vld [vmem:[%s6172_s2] ss:$0 sm:$0xff] }
  0x72   : > { %4158 = vmatmul.msk.bf16.gmra.mxu1 %vm1217_vm1, %v508_v20 }
  0x77   : > { %4228 = vmatmul.msk.bf16.gmra.mxu2 %vm1217_vm1, %v4568_v34 }
  0x7a   : > { %4090 = vmatmul.msk.bf16.gmra.mxu0 %vm1217_vm1, %v1151_v23  ;;  %4298 = vmatmul.msk.bf16.gmra.mxu3 %vm1217_vm1, %v1153_v44  ;;  %v4800_v23 = vpack.c.bf16 %v365_v9, %v4398_v56  ;;  %v4406_v9 = vunpack.c.h.bf16 %v4820_v36 }
  0x82   : > { %4159 = vmatmul.msk.bf16.gmra.mxu1 %vm1217_vm1, %v509_v30  ;;  %v4809_v30 = vpack.c.bf16 %v782_v25, %v780_v24 }
  0x87   : > { %4229 = vmatmul.msk.bf16.gmra.mxu2 %vm1217_vm1, %v4752_v35 }
  0x8a   : > { %4091 = vmatmul.msk.bf16.gmra.mxu0 %vm1217_vm1, %v1152_v33  ;;  %4299 = vmatmul.msk.bf16.gmra.mxu3 %vm1217_vm1, %v4768_v52 }
  0x8f   : > { %v1952_v58 = vpop.f32.mrf.mxu1 }
  0x92   : > { %4160 = vmatmul.msk.bf16.gmra.mxu1 %vm1217_vm1, %v4568_v34 }
  0x97   : > { %v1423_v2 = vpop.f32.mrf.mxu0  ;;  %4230 = vmatmul.msk.bf16.gmra.mxu2 %vm1217_vm1, %v4778_v62  ;;  %v1954_v3 = vpop.f32.mrf.mxu1 }
  0x98   : > { %v1953_v4 = vadd.f32 %v1952_v58, %v1423_v2 }
  0x9a   : > { %4092 = vmatmul.msk.bf16.gmra.mxu0 %vm1217_vm1, %v1153_v44  ;;  %v2300_v7 = vpop.f32.mrf.mxu2  ;;  %4300 = vmatmul.msk.bf16.gmra.mxu3 %vm1217_vm1, %v4782_v1 }
  0x9b   : > { %v2620_v8 = vadd.f32 %v2300_v7, %v1953_v4 }
  0x9d   : > { %v2794_v12 = vpop.f32.mrf.mxu3 }
  0x9e   : > { %v3114_v13 = vadd.f32 %v2794_v12, %v2620_v8 }
  0x9f   : > { %v1425_v14 = vpop.f32.mrf.mxu0  ;;  %v1957_v15 = vpop.f32.mrf.mxu1 }
  0xa0   : > { %v3246_v18 = vadd.f32 %v4794_v11, %v3114_v13  ;;  %v1955_v19 = vadd.f32 %v1954_v3, %v1425_v14 }
  0xa2   : > { %vm3374_vm3 = vcmp.gt.f32.partialorder %v3246_v18, 0.0  ;;  %v3502_v20 = vmul.f32 0.2, %v3246_v18  ;;  %v2302_v21 = vpop.f32.mrf.mxu2  ;;  %4161 = vmatmul.msk.bf16.gmra.mxu1 %vm1217_vm1, %v4752_v35  ;;  %v4817_v35 = vld [vmem:[%s4695_s6 + $0x78] sm:$0xff]  }
  0xa3   : > { %v2621_v22 = vadd.f32 %v2302_v21, %v1955_v19  ;;  %v4401_v40 = vunpack.c.l.bf16 %v4817_v35  ;;  %v4402_v41 = vunpack.c.h.bf16 %v4817_v35  ;;  %v790_v19 = vrot.slane %v371_v10, 1 }
  0xa4   : > { %v3630_v26 = vsel %vm3374_vm3, %v3246_v18, %v3502_v20  ;;  %v788_v18 = vrot.slane %v4406_v9, 1  ;;  %v211_v9 = vld [vmem:[%s4695_s6 + $0x9c] sm:$0x1] }
  0xa5   : > { %v3758_v27 = vpack.c.bf16 %v3630_v26, %v3630_v26  ;;  %v2796_v28 = vpop.f32.mrf.mxu3  ;;  %v783_v49 = vrot.slane %v4401_v40, 1  ;;  %v784_v50 = vrot.slane %v4402_v41, 1 }
  0xa6   : > { %v3115_v29 = vadd.f32 %v2796_v28, %v2621_v22  ;;  %v789_v25 = vsel %vm728_vm2, %v786_v51, %v788_v18  ;;  %v791_v26 = vsel %vm728_vm2, %v788_v18, %v790_v19 }
  0xa7   : > { %3887 = vst.msk [vmem:[%s4807_s14] sm:$0xf] %vm3886_vm4, %v3758_v27  ;;  %v1428_v31 = vpop.f32.mrf.mxu0  ;;  %4231 = vmatmul.msk.bf16.gmra.mxu2 %vm1217_vm1, %v4800_v23  ;;  %v1959_v32 = vpop.f32.mrf.mxu1  ;;  %v785_v57 = vsel %vm728_vm2, %v783_v49, %v784_v50  ;;  %v787_v58 = vsel %vm728_vm2, %v784_v50, %v786_v51 }
  0xa8   : > { %v3247_v33 = vadd.f32 %v4794_v11, %v3115_v29  ;;  %v1958_v34 = vadd.f32 %v1957_v15, %v1428_v31  ;;  %v4836_v0 = vpack.c.bf16 %v787_v58, %v785_v57 }
  0xaa   : > { %vm3375_vm5 = vcmp.gt.f32.partialorder %v3247_v33, 0.0  ;;  %v3503_v37 = vmul.f32 0.2, %v3247_v33  ;;  %4093 = vmatmul.msk.bf16.gmra.mxu0 %vm1217_vm1, %v4768_v52  ;;  %v2305_v38 = vpop.f32.mrf.mxu2  ;;  %4301 = vmatmul.msk.bf16.gmra.mxu3 %vm1217_vm1, %v4809_v30 }
  0xab   : > { %v2622_v39 = vadd.f32 %v2305_v38, %v1958_v34  ;;  %v207_v38 = vld [vmem:[%s4695_s6 + $0x8c] sm:$0xf] }
  0xac   : > { %v3631_v43 = vsel %vm3375_vm5, %v3247_v33, %v3503_v37 }
  0xad   : > { %v3759_v44 = vpack.c.bf16 %v3631_v43, %v3631_v43  ;;  %v2799_v45 = vpop.f32.mrf.mxu3 }
  0xae   : > { %v3116_v46 = vadd.f32 %v2799_v45, %v2622_v39  ;;  %v4865_v39 = vld [vmem:[%s4695_s6 + $0x90] sm:$0xff]   ;;  %v372_v45 = vunpack.c.l.bf16 %v207_v38 }
  0xaf   : > { %3888 = vst.msk [vmem:[%s4807_s14 + $0x4] sm:$0xf] %vm3886_vm4, %v3759_v44  ;;  %v1430_v47 = vpop.f32.mrf.mxu0  ;;  %v1962_v48 = vpop.f32.mrf.mxu1  ;;  %v4409_v43 = vunpack.c.l.bf16 %v4865_v39  ;;  %v4410_v44 = vunpack.c.h.bf16 %v4865_v39 }
  0xb0   : > { %v3248_v52 = vadd.f32 %v4794_v11, %v3116_v46  ;;  %v1960_v53 = vadd.f32 %v1959_v32, %v1430_v47  ;;  %v4856_v32 = vpack.c.bf16 %v791_v26, %v789_v25 }
  0xb2   : > { %vm3376_vm6 = vcmp.gt.f32.partialorder %v3248_v52, 0.0  ;;  %v3504_v54 = vmul.f32 0.2, %v3248_v52  ;;  %v2307_v55 = vpop.f32.mrf.mxu2  ;;  %4162 = vmatmul.msk.bf16.gmra.mxu1 %vm1217_vm1, %v4778_v62 }
  0xb3   : > { %v2623_v56 = vadd.f32 %v2307_v55, %v1960_v53  ;;  %v795_v53 = vrot.slane %v4410_v44, 1 }
  0xb4   : > { %v3632_v59 = vsel %vm3376_vm6, %v3248_v52, %v3504_v54  ;;  %v792_v52 = vrot.slane %v372_v45, 1 }
  0xb5   : > { %v3760_v60 = vpack.c.bf16 %v3632_v59, %v3632_v59  ;;  %v2801_v61 = vpop.f32.mrf.mxu3  ;;  %v4878_v59 = vpack.c.bf16 %v4409_v43, %v372_v45 }
  0xb6   : > { %v3117_v63 = vadd.f32 %v2801_v61, %v2623_v56 }
  0xb7   : > { %3889 = vst.msk [vmem:[%s4807_s14 + $0x8] sm:$0xf] %vm3886_vm4, %v3760_v60  ;;  %v1433_v2 = vpop.f32.mrf.mxu0  ;;  %4232 = vmatmul.msk.bf16.gmra.mxu2 %vm1217_vm1, %v4817_v35  ;;  %v1964_v3 = vpop.f32.mrf.mxu1 }
  0xb8   : > { %v3249_v62 = vadd.f32 %v4794_v11, %v3117_v63  ;;  %v1963_v4 = vadd.f32 %v1962_v48, %v1433_v2 }
  0xba   : > { %vm3377_vm7 = vcmp.gt.f32.partialorder %v3249_v62, 0.0  ;;  %v3505_v6 = vmul.f32 0.2, %v3249_v62  ;;  %4094 = vmatmul.msk.bf16.gmra.mxu0 %vm1217_vm1, %v4782_v1  ;;  %v2310_v7 = vpop.f32.mrf.mxu2  ;;  %4302 = vmatmul.msk.bf16.gmra.mxu3 %vm1217_vm1, %v4836_v0 }
  0xbb   : > { %v2624_v8 = vadd.f32 %v2310_v7, %v1963_v4 }
  0xbc   : > { %v3633_v12 = vsel %vm3377_vm7, %v3249_v62, %v3505_v6 }
  0xbd   : > { %v3761_v13 = vpack.c.bf16 %v3633_v12, %v3633_v12  ;;  %v2804_v14 = vpop.f32.mrf.mxu3 }
  0xbe   : > { %v3118_v15 = vadd.f32 %v2804_v14, %v2624_v8  ;;  %v210_v8 = vld [vmem:[%s4695_s6 + $0x98] sm:$0xf] }
  0xbf   : > { %3890 = vst.msk [vmem:[%s4807_s14 + $0xc] sm:$0xf] %vm3886_vm4, %v3761_v13  ;;  %v1435_v16 = vpop.f32.mrf.mxu0  ;;  %v1967_v17 = vpop.f32.mrf.mxu1  ;;  %v375_v14 = vunpack.c.l.bf16 %v210_v8 }
  0xc0   : > { %v3250_v1 = vadd.f32 %v4794_v11, %v3118_v15  ;;  %v1965_v20 = vadd.f32 %v1964_v3, %v1435_v16  ;;  %v376_v15 = vunpack.c.l.bf16 %v211_v9 }
  0xc2   : > { %vm3378_vm8 = vcmp.gt.f32.partialorder %v3250_v1, 0.0  ;;  %v3506_v21 = vmul.f32 0.2, %v3250_v1  ;;  %v2312_v22 = vpop.f32.mrf.mxu2  ;;  %4163 = vmatmul.msk.bf16.gmra.mxu1 %vm1217_vm1, %v4800_v23 }
  0xc3   : > { %v2625_v24 = vadd.f32 %v2312_v22, %v1965_v20  ;;  %v799_v22 = vrot.slane %v376_v15, 1 }
  0xc4   : > { %v3634_v27 = vsel %vm3378_vm8, %v3250_v1, %v3506_v21  ;;  %v797_v21 = vrot.slane %v375_v14, 1 }
  0xc5   : > { %v3762_v28 = vpack.c.bf16 %v3634_v27, %v3634_v27  ;;  %v2806_v29 = vpop.f32.mrf.mxu3 }
  0xc6   : > { %v3119_v31 = vadd.f32 %v2806_v29, %v2625_v24  ;;  %v798_v29 = vsel %vm728_vm2, %v795_v53, %v797_v21 }
  0xc7   : > { %3891 = vst.msk [vmem:[%s4807_s14 + $0x10] sm:$0xf] %vm3886_vm4, %v3762_v28  ;;  %v1438_v33 = vpop.f32.mrf.mxu0  ;;  %4233 = vmatmul.msk.bf16.gmra.mxu2 %vm1217_vm1, %v4820_v36  ;;  %v1969_v34 = vpop.f32.mrf.mxu1  ;;  %v4900_v28 = vpack.c.bf16 %v375_v14, %v4410_v44 }
  0xc8   : > { %v3251_v23 = vadd.f32 %v4794_v11, %v3119_v31  ;;  %v1968_v37 = vadd.f32 %v1967_v17, %v1438_v33  ;;  %v800_v31 = vsel %vm728_vm2, %v797_v21, %v799_v22 }
  0xc9   : > { %v4904_v38 = vpack.c.bf16 %v800_v31, %v798_v29 }
  0xca   : > { %vm3379_vm9 = vcmp.gt.f32.partialorder %v3251_v23, 0.0  ;;  %v3507_v40 = vmul.f32 0.2, %v3251_v23  ;;  %4095 = vmatmul.msk.bf16.gmra.mxu0 %vm1217_vm1, %v4809_v30  ;;  %v2315_v41 = vpop.f32.mrf.mxu2  ;;  %4303 = vmatmul.msk.bf16.gmra.mxu3 %vm1217_vm1, %v4856_v32  ;;  %v793_v30 = vrot.slane %v4409_v43, 1  ;;  %v4915_v43 = vld [vmem:[%s4695_s6 + $0xa8] sm:$0xff]  }
  0xcb   : > { %v2626_v42 = vadd.f32 %v2315_v41, %v1968_v37 }
  0xcc   : > { %v3635_v46 = vsel %vm3379_vm9, %v3251_v23, %v3507_v40  ;;  %v794_v60 = vsel %vm728_vm2, %v792_v52, %v793_v30  ;;  %v796_v61 = vsel %vm728_vm2, %v793_v30, %v795_v53 }
  0xcd   : > { %v3763_v47 = vpack.c.bf16 %v3635_v46, %v3635_v46  ;;  %v2809_v48 = vpop.f32.mrf.mxu3  ;;  %v4882_v4 = vpack.c.bf16 %v796_v61, %v794_v60 }
  0xce   : > { %v3120_v49 = vadd.f32 %v2809_v48, %v2626_v42  ;;  %v4912_v42 = vld [vmem:[%s4695_s6 + $0xa0] sm:$0xff]  }
  0xcf   : > { %3892 = vst.msk [vmem:[%s4807_s14 + $0x14] sm:$0xf] %vm3886_vm4, %v3763_v47  ;;  %v1440_v50 = vpop.f32.mrf.mxu0  ;;  %v1972_v51 = vpop.f32.mrf.mxu1  ;;  %v4413_v47 = vunpack.c.l.bf16 %v4912_v42  ;;  %v4414_v48 = vunpack.c.h.bf16 %v4912_v42 }
  0xd0   : > { %v3252_v54 = vadd.f32 %v4794_v11, %v3120_v49  ;;  %v1970_v55 = vadd.f32 %v1969_v34, %v1440_v50  ;;  %v4417_v49 = vunpack.c.l.bf16 %v4915_v43 }
  0xd2   : > { %vm3380_vm10 = vcmp.gt.f32.partialorder %v3252_v54, 0.0  ;;  %v3508_v56 = vmul.f32 0.2, %v3252_v54  ;;  %v2317_v57 = vpop.f32.mrf.mxu2  ;;  %4164 = vmatmul.msk.bf16.gmra.mxu1 %vm1217_vm1, %v4817_v35 }
  0xd3   : > { %v2627_v58 = vadd.f32 %v2317_v57, %v1970_v55  ;;  %v802_v55 = vrot.slane %v4414_v48, 1 }
  0xd4   : > { %v3636_v63 = vsel %vm3380_vm10, %v3252_v54, %v3508_v56  ;;  %v804_v56 = vrot.slane %v4417_v49, 1 }
  0xd5   : > { %v3764_v2 = vpack.c.bf16 %v3636_v63, %v3636_v63  ;;  %v2811_v3 = vpop.f32.mrf.mxu3 }
  0xd6   : > { %v3121_v62 = vadd.f32 %v2811_v3, %v2627_v58  ;;  %v805_v3 = vsel %vm728_vm2, %v802_v55, %v804_v56 }
  0xd7   : > { %3893 = vst.msk [vmem:[%s4807_s14 + $0x18] sm:$0xf] %vm3886_vm4, %v3764_v2  ;;  %v1443_v5 = vpop.f32.mrf.mxu0  ;;  %4234 = vmatmul.msk.bf16.gmra.mxu2 %vm1217_vm1, %v4878_v59  ;;  %v1974_v35 = vpop.f32.mrf.mxu1 }
  0xd8   : > { %v3253_v6 = vadd.f32 %v4794_v11, %v3121_v62  ;;  %v1973_v7 = vadd.f32 %v1972_v51, %v1443_v5 }
  0xda   : > { %vm3381_vm11 = vcmp.gt.f32.partialorder %v3253_v6, 0.0  ;;  %v3509_v10 = vmul.f32 0.2, %v3253_v6  ;;  %4096 = vmatmul.msk.bf16.gmra.mxu0 %vm1217_vm1, %v4836_v0  ;;  %v2320_v12 = vpop.f32.mrf.mxu2  ;;  %4304 = vmatmul.msk.bf16.gmra.mxu3 %vm1217_vm1, %v4882_v4 }
  0xdb   : > { %v2628_v13 = vadd.f32 %v2320_v12, %v1973_v7  ;;  %v216_v12 = vld [vmem:[%s4695_s6 + $0xb0] sm:$0x1] }
  0xdc   : > { %v3637_v16 = vsel %vm3381_vm11, %v3253_v6, %v3509_v10 }
  0xdd   : > { %v3765_v17 = vpack.c.bf16 %v3637_v16, %v3637_v16  ;;  %v2814_v18 = vpop.f32.mrf.mxu3  ;;  %v4418_v16 = vunpack.c.h.bf16 %v4915_v43 }
  0xde   : > { %v3122_v19 = vadd.f32 %v2814_v18, %v2628_v13 }
  0xdf   : > { %3894 = vst.msk [vmem:[%s4807_s14 + $0x1c] sm:$0xf] %vm3886_vm4, %v3765_v17  ;;  %v1445_v1 = vpop.f32.mrf.mxu0  ;;  %v1977_v20 = vpop.f32.mrf.mxu1  ;;  %v381_v17 = vunpack.c.l.bf16 %v216_v12 }
  0xe0   : > { %v3254_v0 = vadd.f32 %v4794_v11, %v3122_v19  ;;  %v1975_v24 = vadd.f32 %v1974_v35, %v1445_v1 }
  0xe2   : > { %vm3382_vm12 = vcmp.gt.f32.partialorder %v3254_v0, 0.0  ;;  %v3510_v25 = vmul.f32 0.2, %v3254_v0  ;;  %v2322_v26 = vpop.f32.mrf.mxu2  ;;  %4165 = vmatmul.msk.bf16.gmra.mxu1 %vm1217_vm1, %v4820_v36 }
  0xe3   : > { %v2629_v27 = vadd.f32 %v2322_v26, %v1975_v24  ;;  %v808_v24 = vrot.slane %v381_v17, 1 }
  0xe4   : > { %v3638_v33 = vsel %vm3382_vm12, %v3254_v0, %v3510_v25  ;;  %v806_v0 = vrot.slane %v4418_v16, 1  ;;  %v221_v16 = vld [vmem:[%s4695_s6 + $0xc4] sm:$0x1] }
  0xe5   : > { %v3766_v34 = vpack.c.bf16 %v3638_v33, %v3638_v33  ;;  %v2816_v23 = vpop.f32.mrf.mxu3 }
  0xe6   : > { %v3123_v37 = vadd.f32 %v2816_v23, %v2629_v27  ;;  %v807_v31 = vsel %vm728_vm2, %v804_v56, %v806_v0  ;;  %v809_v33 = vsel %vm728_vm2, %v806_v0, %v808_v24 }
  0xe7   : > { %3895 = vst.msk [vmem:[%s4807_s14 + $0x20] sm:$0xf] %vm3886_vm4, %v3766_v34  ;;  %v1448_v39 = vpop.f32.mrf.mxu0  ;;  %4235 = vmatmul.msk.bf16.gmra.mxu2 %vm1217_vm1, %v4900_v28  ;;  %v1979_v36 = vpop.f32.mrf.mxu1 }
  0xe8   : > { %v3255_v40 = vadd.f32 %v4794_v11, %v3123_v37  ;;  %v1978_v41 = vadd.f32 %v1977_v20, %v1448_v39 }
  0xea   : > { %vm3383_vm13 = vcmp.gt.f32.partialorder %v3255_v40, 0.0  ;;  %v3511_v44 = vmul.f32 0.2, %v3255_v40  ;;  %4097 = vmatmul.msk.bf16.gmra.mxu0 %vm1217_vm1, %v4856_v32  ;;  %v2325_v45 = vpop.f32.mrf.mxu2  ;;  %4305 = vmatmul.msk.bf16.gmra.mxu3 %vm1217_vm1, %v4904_v38  ;;  %v801_v32 = vrot.slane %v4413_v47, 1 }
  0xeb   : > { %v2630_v46 = vadd.f32 %v2325_v45, %v1978_v41  ;;  %v217_v45 = vld [vmem:[%s4695_s6 + $0xb4] sm:$0xf] }
  0xec   : > { %v3639_v50 = vsel %vm3383_vm13, %v3255_v40, %v3511_v44  ;;  %v803_v2 = vsel %vm728_vm2, %v801_v32, %v802_v55 }
  0xed   : > { %v3767_v51 = vpack.c.bf16 %v3639_v50, %v3639_v50  ;;  %v2819_v52 = vpop.f32.mrf.mxu3  ;;  %v4931_v7 = vpack.c.bf16 %v805_v3, %v803_v2 }
  0xee   : > { %v3124_v30 = vadd.f32 %v2819_v52, %v2630_v46  ;;  %v4960_v46 = vld [vmem:[%s4695_s6 + $0xb8] sm:$0xff]   ;;  %v382_v52 = vunpack.c.l.bf16 %v217_v45 }
  0xef   : > { %3896 = vst.msk [vmem:[%s4807_s14 + $0x24] sm:$0xf] %vm3886_vm4, %v3767_v51  ;;  %v1450_v53 = vpop.f32.mrf.mxu0  ;;  %v1982_v54 = vpop.f32.mrf.mxu1  ;;  %v4421_v50 = vunpack.c.l.bf16 %v4960_v46  ;;  %v4422_v51 = vunpack.c.h.bf16 %v4960_v46 }
  0xf0   : > { %v3256_v57 = vadd.f32 %v4794_v11, %v3124_v30  ;;  %v1980_v58 = vadd.f32 %v1979_v36, %v1450_v53  ;;  %v4951_v36 = vpack.c.bf16 %v809_v33, %v807_v31 }
  0xf2   : > { %vm3384_vm14 = vcmp.gt.f32.partialorder %v3256_v57, 0.0  ;;  %v3512_v60 = vmul.f32 0.2, %v3256_v57  ;;  %v2327_v61 = vpop.f32.mrf.mxu2  ;;  %4166 = vmatmul.msk.bf16.gmra.mxu1 %vm1217_vm1, %v4878_v59 }
  0xf3   : > { %v2631_v63 = vadd.f32 %v2327_v61, %v1980_v58  ;;  %v813_v58 = vrot.slane %v4422_v51, 1 }
  0xf4   : > { %v3640_v62 = vsel %vm3384_vm14, %v3256_v57, %v3512_v60  ;;  %v810_v57 = vrot.slane %v382_v52, 1 }
  0xf5   : > { %v3768_v5 = vpack.c.bf16 %v3640_v62, %v3640_v62  ;;  %v2821_v35 = vpop.f32.mrf.mxu3  ;;  %v4973_v62 = vpack.c.bf16 %v4421_v50, %v382_v52 }
  0xf6   : > { %v3125_v6 = vadd.f32 %v2821_v35, %v2631_v63 }
  0xf7   : > { %3897 = vst.msk [vmem:[%s4807_s14 + $0x28] sm:$0xf] %vm3886_vm4, %v3768_v5  ;;  %v1453_v8 = vpop.f32.mrf.mxu0  ;;  %4236 = vmatmul.msk.bf16.gmra.mxu2 %vm1217_vm1, %v4912_v42  ;;  %v1984_v9 = vpop.f32.mrf.mxu1 }
  0xf8   : > { %v3257_v59 = vadd.f32 %v4794_v11, %v3125_v6  ;;  %v1983_v10 = vadd.f32 %v1982_v54, %v1453_v8 }
  0xfa   : > { %vm3385_vm15 = vcmp.gt.f32.partialorder %v3257_v59, 0.0  ;;  %v3513_v13 = vmul.f32 0.2, %v3257_v59  ;;  %4098 = vmatmul.msk.bf16.gmra.mxu0 %vm1217_vm1, %v4882_v4  ;;  %v2330_v14 = vpop.f32.mrf.mxu2  ;;  %4306 = vmatmul.msk.bf16.gmra.mxu3 %vm1217_vm1, %v4931_v7 }
  0xfb   : > { %v2632_v15 = vadd.f32 %v2330_v14, %v1983_v10 }
  0xfc   : > { %v3641_v18 = vsel %vm3385_vm15, %v3257_v59, %v3513_v13 }
  0xfd   : > { %v3769_v19 = vpack.c.bf16 %v3641_v18, %v3641_v18  ;;  %v2824_v1 = vpop.f32.mrf.mxu3 }
  0xfe   : > { %v3126_v20 = vadd.f32 %v2824_v1, %v2632_v15  ;;  %v220_v15 = vld [vmem:[%s4695_s6 + $0xc0] sm:$0xf] }
  0xff   : > { %3898 = vst.msk [vmem:[%s4807_s14 + $0x2c] sm:$0xf] %vm3886_vm4, %v3769_v19  ;;  %v1455_v21 = vpop.f32.mrf.mxu0  ;;  %v1987_v22 = vpop.f32.mrf.mxu1  ;;  %v385_v1 = vunpack.c.l.bf16 %v220_v15 }
 0x100   : > { %v3258_v4 = vadd.f32 %v4794_v11, %v3126_v20  ;;  %v1985_v25 = vadd.f32 %v1984_v9, %v1455_v21  ;;  %v386_v20 = vunpack.c.l.bf16 %v221_v16 }
 0x102   : > { %vm3386_vm0 = vcmp.gt.f32.partialorder %v3258_v4, 0.0  ;;  %v3514_v26 = vmul.f32 0.2, %v3258_v4  ;;  %v2332_v27 = vpop.f32.mrf.mxu2  ;;  %4167 = vmatmul.msk.bf16.gmra.mxu1 %vm1217_vm1, %v4900_v28 }
 0x103   : > { %v2633_v29 = vadd.f32 %v2332_v27, %v1985_v25  ;;  %v817_v27 = vrot.slane %v386_v20, 1 }
 0x104   : > { %v3642_v34 = vsel %vm3386_vm0, %v3258_v4, %v3514_v26  ;;  %v815_v26 = vrot.slane %v385_v1, 1 }
 0x105   : > { %v3770_v23 = vpack.c.bf16 %v3642_v34, %v3642_v34  ;;  %v2826_v37 = vpop.f32.mrf.mxu3 }
 0x106   : > { %v3127_v39 = vadd.f32 %v2826_v37, %v2633_v29  ;;  %v816_v37 = vsel %vm728_vm2, %v813_v58, %v815_v26 }
 0x107   : > { %3899 = vst.msk [vmem:[%s4807_s14 + $0x30] sm:$0xf] %vm3886_vm4, %v3770_v23  ;;  %v1458_v40 = vpop.f32.mrf.mxu0  ;;  %4237 = vmatmul.msk.bf16.gmra.mxu2 %vm1217_vm1, %v4915_v43  ;;  %v1989_v41 = vpop.f32.mrf.mxu1  ;;  %v4995_v23 = vpack.c.bf16 %v385_v1, %v4422_v51 }
 0x108   : > { %v3259_v28 = vadd.f32 %v4794_v11, %v3127_v39  ;;  %v1988_v44 = vadd.f32 %v1987_v22, %v1458_v40  ;;  %v818_v39 = vsel %vm728_vm2, %v815_v26, %v817_v27 }
 0x109   : > { %v4999_v45 = vpack.c.bf16 %v818_v39, %v816_v37 }
 0x10a   : > { %vm3387_vm3 = vcmp.gt.f32.partialorder %v3259_v28, 0.0  ;;  %v3515_v47 = vmul.f32 0.2, %v3259_v28  ;;  %4099 = vmatmul.msk.bf16.gmra.mxu0 %vm1217_vm1, %v4904_v38  ;;  %v2335_v48 = vpop.f32.mrf.mxu2  ;;  %4307 = vmatmul.msk.bf16.gmra.mxu3 %vm1217_vm1, %v4951_v36  ;;  %v811_v38 = vrot.slane %v4421_v50, 1  ;;  %v5010_v50 = vld [vmem:[%s4695_s6 + $0xd0] sm:$0xff]  }
 0x10b   : > { %v2634_v49 = vadd.f32 %v2335_v48, %v1988_v44 }
 0x10c   : > { %v3643_v30 = vsel %vm3387_vm3, %v3259_v28, %v3515_v47  ;;  %v812_v5 = vsel %vm728_vm2, %v810_v57, %v811_v38  ;;  %v814_v35 = vsel %vm728_vm2, %v811_v38, %v813_v58 }
 0x10d   : > { %v3771_v53 = vpack.c.bf16 %v3643_v30, %v3643_v30  ;;  %v2829_v54 = vpop.f32.mrf.mxu3  ;;  %v4977_v10 = vpack.c.bf16 %v814_v35, %v812_v5 }
 0x10e   : > { %v3128_v32 = vadd.f32 %v2829_v54, %v2634_v49  ;;  %v5007_v49 = vld [vmem:[%s4695_s6 + $0xc8] sm:$0xff]  }
 0x10f   : > { %3900 = vst.msk [vmem:[%s4807_s14 + $0x34] sm:$0xf] %vm3886_vm4, %v3771_v53  ;;  %v1460_v55 = vpop.f32.mrf.mxu0  ;;  %v1992_v56 = vpop.f32.mrf.mxu1  ;;  %v4425_v53 = vunpack.c.l.bf16 %v5007_v49  ;;  %v4426_v54 = vunpack.c.h.bf16 %v5007_v49 }
 0x110   : > { %v3260_v60 = vadd.f32 %v4794_v11, %v3128_v32  ;;  %v1990_v61 = vadd.f32 %v1989_v41, %v1460_v55  ;;  %v4429_v32 = vunpack.c.l.bf16 %v5010_v50 }
 0x112   : > { %vm3388_vm5 = vcmp.gt.f32.partialorder %v3260_v60, 0.0  ;;  %v3516_v63 = vmul.f32 0.2, %v3260_v60  ;;  %v2337_v2 = vpop.f32.mrf.mxu2  ;;  %4168 = vmatmul.msk.bf16.gmra.mxu1 %vm1217_vm1, %v4912_v42 }
 0x113   : > { %v2635_v3 = vadd.f32 %v2337_v2, %v1990_v61  ;;  %v820_v61 = vrot.slane %v4426_v54, 1 }
 0x114   : > { %v3644_v6 = vsel %vm3388_vm5, %v3260_v60, %v3516_v63  ;;  %v822_v63 = vrot.slane %v4429_v32, 1 }
 0x115   : > { %v3772_v8 = vpack.c.bf16 %v3644_v6, %v3644_v6  ;;  %v2831_v9 = vpop.f32.mrf.mxu3 }
 0x116   : > { %v3129_v59 = vadd.f32 %v2831_v9, %v2635_v3  ;;  %v823_v9 = vsel %vm728_vm2, %v820_v61, %v822_v63 }
 0x117   : > { %3901 = vst.msk [vmem:[%s4807_s14 + $0x38] sm:$0xf] %vm3886_vm4, %v3772_v8  ;;  %v1463_v12 = vpop.f32.mrf.mxu0  ;;  %4238 = vmatmul.msk.bf16.gmra.mxu2 %vm1217_vm1, %v4973_v62  ;;  %v1994_v42 = vpop.f32.mrf.mxu1 }
 0x118   : > { %v3261_v13 = vadd.f32 %v4794_v11, %v3129_v59  ;;  %v1993_v14 = vadd.f32 %v1992_v56, %v1463_v12 }
 0x11a   : > { %vm3389_vm6 = vcmp.gt.f32.partialorder %v3261_v13, 0.0  ;;  %v3517_v17 = vmul.f32 0.2, %v3261_v13  ;;  %4100 = vmatmul.msk.bf16.gmra.mxu0 %vm1217_vm1, %v4931_v7  ;;  %v2340_v18 = vpop.f32.mrf.mxu2  ;;  %4308 = vmatmul.msk.bf16.gmra.mxu3 %vm1217_vm1, %v4977_v10 }
 0x11b   : > { %v2636_v19 = vadd.f32 %v2340_v18, %v1993_v14  ;;  %v226_v18 = vld [vmem:[%s4695_s6 + $0xd8] sm:$0x1] }
 0x11c   : > { %v3645_v21 = vsel %vm3389_vm6, %v3261_v13, %v3517_v17 }
 0x11d   : > { %v3773_v22 = vpack.c.bf16 %v3645_v21, %v3645_v21  ;;  %v2834_v0 = vpop.f32.mrf.mxu3  ;;  %v4430_v21 = vunpack.c.h.bf16 %v5010_v50 }
 0x11e   : > { %v3130_v24 = vadd.f32 %v2834_v0, %v2636_v19 }
 0x11f   : > { %3902 = vst.msk [vmem:[%s4807_s14 + $0x3c] sm:$0xf] %vm3886_vm4, %v3773_v22  ;;  %v1465_v4 = vpop.f32.mrf.mxu0  ;;  %v1997_v25 = vpop.f32.mrf.mxu1  ;;  %v391_v22 = vunpack.c.l.bf16 %v226_v18 }
 0x120   : > { %v3262_v7 = vadd.f32 %v4794_v11, %v3130_v24  ;;  %v1995_v29 = vadd.f32 %v1994_v42, %v1465_v4 }
 0x122   : > { %vm3390_vm7 = vcmp.gt.f32.partialorder %v3262_v7, 0.0  ;;  %v3518_v31 = vmul.f32 0.2, %v3262_v7  ;;  %v2342_v33 = vpop.f32.mrf.mxu2  ;;  %4169 = vmatmul.msk.bf16.gmra.mxu1 %vm1217_vm1, %v4915_v43 }
 0x123   : > { %v2637_v34 = vadd.f32 %v2342_v33, %v1995_v29  ;;  %v826_v29 = vrot.slane %v391_v22, 1 }
 0x124   : > { %v3646_v40 = vsel %vm3390_vm7, %v3262_v7, %v3518_v31  ;;  %v824_v7 = vrot.slane %v4430_v21, 1  ;;  %v231_v21 = vld [vmem:[%s4695_s6 + $0xec] sm:$0x1] }
 0x125   : > { %v3774_v41 = vpack.c.bf16 %v3646_v40, %v3646_v40  ;;  %v2836_v28 = vpop.f32.mrf.mxu3 }
 0x126   : > { %v3131_v44 = vadd.f32 %v2836_v28, %v2637_v34  ;;  %v825_v39 = vsel %vm728_vm2, %v822_v63, %v824_v7  ;;  %v827_v40 = vsel %vm728_vm2, %v824_v7, %v826_v29 }
 0x127   : > { %3903 = vst.msk [vmem:[%s4807_s14 + $0x40] sm:$0xf] %vm3886_vm4, %v3774_v41  ;;  %v1468_v46 = vpop.f32.mrf.mxu0  ;;  %4239 = vmatmul.msk.bf16.gmra.mxu2 %vm1217_vm1, %v4995_v23  ;;  %v1999_v43 = vpop.f32.mrf.mxu1 }
 0x128   : > { %v3263_v47 = vadd.f32 %v4794_v11, %v3131_v44  ;;  %v1998_v48 = vadd.f32 %v1997_v25, %v1468_v46 }
 0x12a   : > { %vm3391_vm8 = vcmp.gt.f32.partialorder %v3263_v47, 0.0  ;;  %v3519_v51 = vmul.f32 0.2, %v3263_v47  ;;  %4101 = vmatmul.msk.bf16.gmra.mxu0 %vm1217_vm1, %v4951_v36  ;;  %v2345_v52 = vpop.f32.mrf.mxu2  ;;  %4309 = vmatmul.msk.bf16.gmra.mxu3 %vm1217_vm1, %v4999_v45  ;;  %v819_v36 = vrot.slane %v4425_v53, 1 }
 0x12b   : > { %v2638_v30 = vadd.f32 %v2345_v52, %v1998_v48  ;;  %v227_v52 = vld [vmem:[%s4695_s6 + $0xdc] sm:$0xf] }
 0x12c   : > { %v3647_v55 = vsel %vm3391_vm8, %v3263_v47, %v3519_v51  ;;  %v821_v8 = vsel %vm728_vm2, %v819_v36, %v820_v61 }
 0x12d   : > { %v3775_v56 = vpack.c.bf16 %v3647_v55, %v3647_v55  ;;  %v2839_v57 = vpop.f32.mrf.mxu3  ;;  %v5026_v14 = vpack.c.bf16 %v823_v9, %v821_v8 }
 0x12e   : > { %v3132_v38 = vadd.f32 %v2839_v57, %v2638_v30  ;;  %v5055_v30 = vld [vmem:[%s4695_s6 + $0xe0] sm:$0xff]   ;;  %v392_v57 = vunpack.c.l.bf16 %v227_v52 }
 0x12f   : > { %3904 = vst.msk [vmem:[%s4807_s14 + $0x44] sm:$0xf] %vm3886_vm4, %v3775_v56  ;;  %v1470_v58 = vpop.f32.mrf.mxu0  ;;  %v2002_v60 = vpop.f32.mrf.mxu1  ;;  %v4433_v55 = vunpack.c.l.bf16 %v5055_v30  ;;  %v4434_v56 = vunpack.c.h.bf16 %v5055_v30  ;;  %v5103_v30 = vld [vmem:[%s6172_s2] ss:$0 sm:$0xff] }
 0x130   : > { %v3264_v2 = vadd.f32 %v4794_v11, %v3132_v38  ;;  %v2000_v3 = vadd.f32 %v1999_v43, %v1470_v58  ;;  %v5046_v43 = vpack.c.bf16 %v827_v40, %v825_v39 }
 0x132   : > { %vm3392_vm9 = vcmp.gt.f32.partialorder %v3264_v2, 0.0  ;;  %v3520_v5 = vmul.f32 0.2, %v3264_v2  ;;  %v2347_v35 = vpop.f32.mrf.mxu2  ;;  %4170 = vmatmul.msk.bf16.gmra.mxu1 %vm1217_vm1, %v4973_v62 }
 0x133   : > { %v2639_v6 = vadd.f32 %v2347_v35, %v2000_v3  ;;  %v831_v3 = vrot.slane %v4434_v56, 1 }
 0x134   : > { %v3648_v59 = vsel %vm3392_vm9, %v3264_v2, %v3520_v5  ;;  %v828_v2 = vrot.slane %v392_v57, 1 }
 0x135   : > { %v3776_v12 = vpack.c.bf16 %v3648_v59, %v3648_v59  ;;  %v2841_v42 = vpop.f32.mrf.mxu3  ;;  %v5068_v59 = vpack.c.bf16 %v4433_v55, %v392_v57 }
 0x136   : > { %v3133_v13 = vadd.f32 %v2841_v42, %v2639_v6 }
 0x137   : > { %3905 = vst.msk [vmem:[%s4807_s14 + $0x48] sm:$0xf] %vm3886_vm4, %v3776_v12  ;;  %v1473_v15 = vpop.f32.mrf.mxu0  ;;  %4240 = vmatmul.msk.bf16.gmra.mxu2 %vm1217_vm1, %v5007_v49  ;;  %v2004_v16 = vpop.f32.mrf.mxu1 }
 0x138   : > { %v3265_v62 = vadd.f32 %v4794_v11, %v3133_v13  ;;  %v2003_v17 = vadd.f32 %v2002_v60, %v1473_v15 }
 0x13a   : > { %vm3393_vm10 = vcmp.gt.f32.partialorder %v3265_v62, 0.0  ;;  %v3521_v19 = vmul.f32 0.2, %v3265_v62  ;;  %4102 = vmatmul.msk.bf16.gmra.mxu0 %vm1217_vm1, %v4977_v10  ;;  %v2350_v1 = vpop.f32.mrf.mxu2  ;;  %4310 = vmatmul.msk.bf16.gmra.mxu3 %vm1217_vm1, %v5026_v14 }
 0x13b   : > { %v2640_v20 = vadd.f32 %v2350_v1, %v2003_v17 }
 0x13c   : > { %v3649_v0 = vsel %vm3393_vm10, %v3265_v62, %v3521_v19 }
 0x13d   : > { %v3777_v24 = vpack.c.bf16 %v3649_v0, %v3649_v0  ;;  %v2844_v4 = vpop.f32.mrf.mxu3 }
 0x13e   : > { %v3134_v25 = vadd.f32 %v2844_v4, %v2640_v20  ;;  %v230_v20 = vld [vmem:[%s4695_s6 + $0xe8] sm:$0xf] }
 0x13f   : > { %3906 = vst.msk [vmem:[%s4807_s14 + $0x4c] sm:$0xf] %vm3886_vm4, %v3777_v24  ;;  %v1475_v26 = vpop.f32.mrf.mxu0  ;;  %v2007_v27 = vpop.f32.mrf.mxu1  ;;  %v395_v4 = vunpack.c.l.bf16 %v230_v20 }
 0x140   : > { %v3266_v10 = vadd.f32 %v4794_v11, %v3134_v25  ;;  %v2005_v31 = vadd.f32 %v2004_v16, %v1475_v26  ;;  %v396_v25 = vunpack.c.l.bf16 %v231_v21 }
 0x142   : > { %vm3394_vm11 = vcmp.gt.f32.partialorder %v3266_v10, 0.0  ;;  %v3522_v33 = vmul.f32 0.2, %v3266_v10  ;;  %v2352_v34 = vpop.f32.mrf.mxu2  ;;  %4171 = vmatmul.msk.bf16.gmra.mxu1 %vm1217_vm1, %v4995_v23 }
 0x143   : > { %v2641_v37 = vadd.f32 %v2352_v34, %v2005_v31  ;;  %v835_v34 = vrot.slane %v396_v25, 1 }
 0x144   : > { %v3650_v41 = vsel %vm3394_vm11, %v3266_v10, %v3522_v33  ;;  %v833_v33 = vrot.slane %v395_v4, 1 }
 0x145   : > { %v3778_v28 = vpack.c.bf16 %v3650_v41, %v3650_v41  ;;  %v2846_v44 = vpop.f32.mrf.mxu3 }
 0x146   : > { %v3135_v46 = vadd.f32 %v2846_v44, %v2641_v37  ;;  %v834_v44 = vsel %vm728_vm2, %v831_v3, %v833_v33 }
 0x147   : > { %3907 = vst.msk [vmem:[%s4807_s14 + $0x50] sm:$0xf] %vm3886_vm4, %v3778_v28  ;;  %v1478_v47 = vpop.f32.mrf.mxu0  ;;  %4241 = vmatmul.msk.bf16.gmra.mxu2 %vm1217_vm1, %v5010_v50  ;;  %v2009_v48 = vpop.f32.mrf.mxu1  ;;  %v5090_v28 = vpack.c.bf16 %v395_v4, %v4434_v56 }
 0x148   : > { %v3267_v23 = vadd.f32 %v4794_v11, %v3135_v46  ;;  %v2008_v51 = vadd.f32 %v2007_v27, %v1478_v47  ;;  %v836_v46 = vsel %vm728_vm2, %v833_v33, %v835_v34 }
 0x14a   : > { %vm3395_vm12 = vcmp.gt.f32.partialorder %v3267_v23, 0.0  ;;  %v3523_v53 = vmul.f32 0.2, %v3267_v23  ;;  %4103 = vmatmul.msk.bf16.gmra.mxu0 %vm1217_vm1, %v4999_v45  ;;  %v2355_v54 = vpop.f32.mrf.mxu2  ;;  %4311 = vmatmul.msk.bf16.gmra.mxu3 %vm1217_vm1, %v5046_v43  ;;  %v829_v45 = vrot.slane %v4433_v55, 1  ;;  %v5110_v55 = vld [vmem:[%s4695_s6 + $0xf8] sm:$0xff]  }
 0x14b   : > { %v2642_v32 = vadd.f32 %v2355_v54, %v2008_v51  ;;  %v5094_v51 = vpack.c.bf16 %v836_v46, %v834_v44 }
 0x14c   : > { %v3651_v38 = vsel %vm3395_vm12, %v3267_v23, %v3523_v53  ;;  %v830_v12 = vsel %vm728_vm2, %v828_v2, %v829_v45  ;;  %v832_v42 = vsel %vm728_vm2, %v829_v45, %v831_v3 }
 0x14d   : > { %v3779_v58 = vpack.c.bf16 %v3651_v38, %v3651_v38  ;;  %v2849_v60 = vpop.f32.mrf.mxu3  ;;  %v5072_v17 = vpack.c.bf16 %v832_v42, %v830_v12 }
 0x14e   : > { %v3136_v36 = vadd.f32 %v2849_v60, %v2642_v32  ;;  %v5107_v32 = vld [vmem:[%s4695_s6 + $0xf0] sm:$0xff]  }
 0x14f   : > { %3908 = vst.msk [vmem:[%s4807_s14 + $0x54] sm:$0xf] %vm3886_vm4, %v3779_v58  ;;  %v1480_v61 = vpop.f32.mrf.mxu0  ;;  %v2012_v63 = vpop.f32.mrf.mxu1  ;;  %v4437_v58 = vunpack.c.l.bf16 %v5107_v32  ;;  %v4438_v60 = vunpack.c.h.bf16 %v5107_v32 }
 0x150   : > { %v3268_v5 = vadd.f32 %v4794_v11, %v3136_v36  ;;  %v2010_v35 = vadd.f32 %v2009_v48, %v1480_v61  ;;  %v4441_v36 = vunpack.c.l.bf16 %v5110_v55 }
 0x152   : > { %vm3396_vm13 = vcmp.gt.f32.partialorder %v3268_v5, 0.0  ;;  %v3524_v6 = vmul.f32 0.2, %v3268_v5  ;;  %v2357_v8 = vpop.f32.mrf.mxu2  ;;  %4172 = vmatmul.msk.bf16.gmra.mxu1 %vm1217_vm1, %v5007_v49 }
 0x153   : > { %v2643_v9 = vadd.f32 %v2357_v8, %v2010_v35  ;;  %v838_v35 = vrot.slane %v4438_v60, 1 }
 0x154   : > { %v3652_v13 = vsel %vm3396_vm13, %v3268_v5, %v3524_v6  ;;  %v840_v6 = vrot.slane %v4441_v36, 1 }
 0x155   : > { %v3780_v15 = vpack.c.bf16 %v3652_v13, %v3652_v13  ;;  %v2851_v16 = vpop.f32.mrf.mxu3 }
 0x156   : > { %v3137_v62 = vadd.f32 %v2851_v16, %v2643_v9  ;;  %v841_v16 = vsel %vm728_vm2, %v838_v35, %v840_v6 }
 0x157   : > { %3909 = vst.msk [vmem:[%s4807_s14 + $0x58] sm:$0xf] %vm3886_vm4, %v3780_v15  ;;  %v1483_v18 = vpop.f32.mrf.mxu0  ;;  %4242 = vmatmul.msk.bf16.gmra.mxu2 %vm1217_vm1, %v5068_v59  ;;  %v2014_v49 = vpop.f32.mrf.mxu1 }
 0x158   : > { %v3269_v19 = vadd.f32 %v4794_v11, %v3137_v62  ;;  %v2013_v1 = vadd.f32 %v2012_v63, %v1483_v18 }
 0x15a   : > { %vm3397_vm14 = vcmp.gt.f32.partialorder %v3269_v19, 0.0  ;;  %v3525_v22 = vmul.f32 0.2, %v3269_v19  ;;  %4104 = vmatmul.msk.bf16.gmra.mxu0 %vm1217_vm1, %v5026_v14  ;;  %v2360_v0 = vpop.f32.mrf.mxu2  ;;  %4312 = vmatmul.msk.bf16.gmra.mxu3 %vm1217_vm1, %v5072_v17 }
 0x15b   : > { %v2644_v24 = vadd.f32 %v2360_v0, %v2013_v1  ;;  %v236_v0 = vld [vmem:[%s4695_s6 + $0x100] sm:$0x1] }
 0x15c   : > { %v3653_v26 = vsel %vm3397_vm14, %v3269_v19, %v3525_v22 }
 0x15d   : > { %v3781_v27 = vpack.c.bf16 %v3653_v26, %v3653_v26  ;;  %v2854_v7 = vpop.f32.mrf.mxu3  ;;  %v4442_v26 = vunpack.c.h.bf16 %v5110_v55 }
 0x15e   : > { %v3138_v29 = vadd.f32 %v2854_v7, %v2644_v24 }
 0x15f   : > { %3910 = vst.msk [vmem:[%s4807_s14 + $0x5c] sm:$0xf] %vm3886_vm4, %v3781_v27  ;;  %v1485_v10 = vpop.f32.mrf.mxu0  ;;  %v2017_v31 = vpop.f32.mrf.mxu1  ;;  %v401_v27 = vunpack.c.l.bf16 %v236_v0 }
 0x160   : > { %v3270_v14 = vadd.f32 %v4794_v11, %v3138_v29  ;;  %v2015_v37 = vadd.f32 %v2014_v49, %v1485_v10 }
 0x162   : > { %vm3398_vm15 = vcmp.gt.f32.partialorder %v3270_v14, 0.0  ;;  %v3526_v39 = vmul.f32 0.2, %v3270_v14  ;;  %v2362_v40 = vpop.f32.mrf.mxu2  ;;  %4173 = vmatmul.msk.bf16.gmra.mxu1 %vm1217_vm1, %v5010_v50 }
 0x163   : > { %v2645_v41 = vadd.f32 %v2362_v40, %v2015_v37  ;;  %v844_v37 = vrot.slane %v401_v27, 1 }
 0x164   : > { %v3654_v47 = vsel %vm3398_vm15, %v3270_v14, %v3526_v39  ;;  %v842_v14 = vrot.slane %v4442_v26, 1  ;;  %v241_v26 = vld [vmem:[%s4695_s6 + $0x114] sm:$0x1] }
 0x165   : > { %v3782_v48 = vpack.c.bf16 %v3654_v47, %v3654_v47  ;;  %v2856_v23 = vpop.f32.mrf.mxu3 }
 0x166   : > { %v3139_v11 = vadd.f32 %v2856_v23, %v2645_v41  ;;  %v843_v46 = vsel %vm728_vm2, %v840_v6, %v842_v14  ;;  %v845_v47 = vsel %vm728_vm2, %v842_v14, %v844_v37 }
 0x167   : > { %3911 = vst.msk [vmem:[%s4807_s14 + $0x60] sm:$0xf] %vm3886_vm4, %v3782_v48  ;;  %v1488_v52 = vpop.f32.mrf.mxu0  ;;  %4243 = vmatmul.msk.bf16.gmra.mxu2 %vm1217_vm1, %v5090_v28  ;;  %v2019_v50 = vpop.f32.mrf.mxu1 }
 0x168   : > { %v3271_v53 = vadd.f32 %v5103_v30, %v3139_v11  ;;  %v2018_v54 = vadd.f32 %v2017_v31, %v1488_v52 }
 0x16a   : > { %vm3399_vm0 = vcmp.gt.f32.partialorder %v3271_v53, 0.0  ;;  %v3527_v56 = vmul.f32 0.2, %v3271_v53  ;;  %4105 = vmatmul.msk.bf16.gmra.mxu0 %vm1217_vm1, %v5046_v43  ;;  %v2365_v57 = vpop.f32.mrf.mxu2  ;;  %4313 = vmatmul.msk.bf16.gmra.mxu3 %vm1217_vm1, %v5094_v51  ;;  %v837_v43 = vrot.slane %v4437_v58, 1 }
 0x16b   : > { %v2646_v38 = vadd.f32 %v2365_v57, %v2018_v54  ;;  %v237_v57 = vld [vmem:[%s4695_s6 + $0x104] sm:$0xf] }
 0x16c   : > { %v3655_v61 = vsel %vm3399_vm0, %v3271_v53, %v3527_v56  ;;  %v839_v15 = vsel %vm728_vm2, %v837_v43, %v838_v35 }
 0x16d   : > { %v3783_v63 = vpack.c.bf16 %v3655_v61, %v3655_v61  ;;  %v2859_v2 = vpop.f32.mrf.mxu3  ;;  %v5126_v1 = vpack.c.bf16 %v841_v16, %v839_v15 }
 0x16e   : > { %v3140_v45 = vadd.f32 %v2859_v2, %v2646_v38  ;;  %v5155_v38 = vld [vmem:[%s4695_s6 + $0x108] sm:$0xff]   ;;  %v402_v2 = vunpack.c.l.bf16 %v237_v57 }
 0x16f   : > { %3912 = vst.msk [vmem:[%s4807_s14 + $0x64] sm:$0xf] %vm3886_vm4, %v3783_v63  ;;  %v1490_v3 = vpop.f32.mrf.mxu0  ;;  %v2022_v5 = vpop.f32.mrf.mxu1  ;;  %v4445_v61 = vunpack.c.l.bf16 %v5155_v38  ;;  %v4446_v63 = vunpack.c.h.bf16 %v5155_v38 }
 0x170   : > { %v3272_v8 = vadd.f32 %v5103_v30, %v3140_v45  ;;  %v2020_v9 = vadd.f32 %v2019_v50, %v1490_v3  ;;  %v5146_v50 = vpack.c.bf16 %v845_v47, %v843_v46 }
 0x172   : > { %vm3400_vm3 = vcmp.gt.f32.partialorder %v3272_v8, 0.0  ;;  %v3528_v12 = vmul.f32 0.2, %v3272_v8  ;;  %v2367_v42 = vpop.f32.mrf.mxu2  ;;  %4174 = vmatmul.msk.bf16.gmra.mxu1 %vm1217_vm1, %v5068_v59 }
 0x173   : > { %v2647_v13 = vadd.f32 %v2367_v42, %v2020_v9  ;;  %v849_v9 = vrot.slane %v4446_v63, 1 }
 0x174   : > { %v3656_v62 = vsel %vm3400_vm3, %v3272_v8, %v3528_v12  ;;  %v846_v8 = vrot.slane %v402_v2, 1 }
 0x175   : > { %v3784_v18 = vpack.c.bf16 %v3656_v62, %v3656_v62  ;;  %v2861_v49 = vpop.f32.mrf.mxu3  ;;  %v5168_v62 = vpack.c.bf16 %v4445_v61, %v402_v2 }
 0x176   : > { %v3141_v19 = vadd.f32 %v2861_v49, %v2647_v13 }
 0x177   : > { %3913 = vst.msk [vmem:[%s4807_s14 + $0x68] sm:$0xf] %vm3886_vm4, %v3784_v18  ;;  %v1493_v20 = vpop.f32.mrf.mxu0  ;;  %4244 = vmatmul.msk.bf16.gmra.mxu2 %vm1217_vm1, %v5107_v32  ;;  %v2024_v21 = vpop.f32.mrf.mxu1 }
 0x178   : > { %v3273_v59 = vadd.f32 %v5103_v30, %v3141_v19  ;;  %v2023_v22 = vadd.f32 %v2022_v5, %v1493_v20 }
 0x17a   : > { %vm3401_vm5 = vcmp.gt.f32.partialorder %v3273_v59, 0.0  ;;  %v3529_v24 = vmul.f32 0.2, %v3273_v59  ;;  %4106 = vmatmul.msk.bf16.gmra.mxu0 %vm1217_vm1, %v5072_v17  ;;  %v2370_v4 = vpop.f32.mrf.mxu2  ;;  %4314 = vmatmul.msk.bf16.gmra.mxu3 %vm1217_vm1, %v5126_v1 }
 0x17b   : > { %v2648_v25 = vadd.f32 %v2370_v4, %v2023_v22 }
 0x17c   : > { %v3657_v7 = vsel %vm3401_vm5, %v3273_v59, %v3529_v24 }
 0x17d   : > { %v3785_v29 = vpack.c.bf16 %v3657_v7, %v3657_v7  ;;  %v2864_v10 = vpop.f32.mrf.mxu3 }
 0x17e   : > { %v3142_v31 = vadd.f32 %v2864_v10, %v2648_v25  ;;  %v240_v25 = vld [vmem:[%s4695_s6 + $0x110] sm:$0xf] }
 0x17f   : > { %3914 = vst.msk [vmem:[%s4807_s14 + $0x6c] sm:$0xf] %vm3886_vm4, %v3785_v29  ;;  %v1495_v33 = vpop.f32.mrf.mxu0  ;;  %v2027_v34 = vpop.f32.mrf.mxu1  ;;  %v405_v10 = vunpack.c.l.bf16 %v240_v25 }
 0x180   : > { %v3274_v17 = vadd.f32 %v5103_v30, %v3142_v31  ;;  %v2025_v39 = vadd.f32 %v2024_v21, %v1495_v33  ;;  %v406_v31 = vunpack.c.l.bf16 %v241_v26 }
 0x182   : > { %vm3402_vm6 = vcmp.gt.f32.partialorder %v3274_v17, 0.0  ;;  %v3530_v40 = vmul.f32 0.2, %v3274_v17  ;;  %v2372_v41 = vpop.f32.mrf.mxu2  ;;  %4175 = vmatmul.msk.bf16.gmra.mxu1 %vm1217_vm1, %v5090_v28 }
 0x183   : > { %v2649_v44 = vadd.f32 %v2372_v41, %v2025_v39  ;;  %v853_v41 = vrot.slane %v406_v31, 1 }
 0x184   : > { %v3658_v48 = vsel %vm3402_vm6, %v3274_v17, %v3530_v40  ;;  %v851_v40 = vrot.slane %v405_v10, 1 }
 0x185   : > { %v3786_v23 = vpack.c.bf16 %v3658_v48, %v3658_v48  ;;  %v2866_v11 = vpop.f32.mrf.mxu3 }
 0x186   : > { %v3143_v52 = vadd.f32 %v2866_v11, %v2649_v44  ;;  %v852_v11 = vsel %vm728_vm2, %v849_v9, %v851_v40 }
 0x187   : > { %3915 = vst.msk [vmem:[%s4807_s14 + $0x70] sm:$0xf] %vm3886_vm4, %v3786_v23  ;;  %v1498_v53 = vpop.f32.mrf.mxu0  ;;  %4245 = vmatmul.msk.bf16.gmra.mxu2 %vm1217_vm1, %v5110_v55  ;;  %v2029_v54 = vpop.f32.mrf.mxu1  ;;  %v5190_v23 = vpack.c.bf16 %v405_v10, %v4446_v63 }
 0x188   : > { %v3275_v28 = vadd.f32 %v5103_v30, %v3143_v52  ;;  %v2028_v56 = vadd.f32 %v2027_v34, %v1498_v53  ;;  %v854_v52 = vsel %vm728_vm2, %v851_v40, %v853_v41 }
 0x189   : > { %v5194_v57 = vpack.c.bf16 %v854_v52, %v852_v11 }
 0x18a   : > { %vm3403_vm7 = vcmp.gt.f32.partialorder %v3275_v28, 0.0  ;;  %v3531_v58 = vmul.f32 0.2, %v3275_v28  ;;  %4107 = vmatmul.msk.bf16.gmra.mxu0 %vm1217_vm1, %v5094_v51  ;;  %v2375_v60 = vpop.f32.mrf.mxu2  ;;  %4315 = vmatmul.msk.bf16.gmra.mxu3 %vm1217_vm1, %v5146_v50  ;;  %v847_v51 = vrot.slane %v4445_v61, 1  ;;  %v5205_v61 = vld [vmem:[%s4695_s6 + $0x120] sm:$0xff]  }
 0x18b   : > { %v2650_v36 = vadd.f32 %v2375_v60, %v2028_v56 }
 0x18c   : > { %v3659_v45 = vsel %vm3403_vm7, %v3275_v28, %v3531_v58  ;;  %v848_v18 = vsel %vm728_vm2, %v846_v8, %v847_v51  ;;  %v850_v49 = vsel %vm728_vm2, %v847_v51, %v849_v9 }
 0x18d   : > { %v3787_v3 = vpack.c.bf16 %v3659_v45, %v3659_v45  ;;  %v2869_v5 = vpop.f32.mrf.mxu3  ;;  %v5172_v22 = vpack.c.bf16 %v850_v49, %v848_v18 }
 0x18e   : > { %v3144_v43 = vadd.f32 %v2869_v5, %v2650_v36  ;;  %v5202_v36 = vld [vmem:[%s4695_s6 + $0x118] sm:$0xff]  }
 0x18f   : > { %3916 = vst.msk [vmem:[%s4807_s14 + $0x74] sm:$0xf] %vm3886_vm4, %v3787_v3  ;;  %v1500_v35 = vpop.f32.mrf.mxu0  ;;  %v2032_v6 = vpop.f32.mrf.mxu1  ;;  %v4449_v3 = vunpack.c.l.bf16 %v5202_v36  ;;  %v4450_v5 = vunpack.c.h.bf16 %v5202_v36 }
 0x190   : > { %v3276_v12 = vadd.f32 %v5103_v30, %v3144_v43  ;;  %v2030_v42 = vadd.f32 %v2029_v54, %v1500_v35  ;;  %v4453_v43 = vunpack.c.l.bf16 %v5205_v61 }
 0x192   : > { %vm3404_vm8 = vcmp.gt.f32.partialorder %v3276_v12, 0.0  ;;  %v3532_v13 = vmul.f32 0.2, %v3276_v12  ;;  %v2377_v15 = vpop.f32.mrf.mxu2  ;;  %4176 = vmatmul.msk.bf16.gmra.mxu1 %vm1217_vm1, %v5107_v32 }
 0x193   : > { %v2651_v16 = vadd.f32 %v2377_v15, %v2030_v42  ;;  %v856_v42 = vrot.slane %v4450_v5, 1 }
 0x194   : > { %v3660_v19 = vsel %vm3404_vm8, %v3276_v12, %v3532_v13  ;;  %v858_v13 = vrot.slane %v4453_v43, 1 }
 0x195   : > { %v3788_v20 = vpack.c.bf16 %v3660_v19, %v3660_v19  ;;  %v2871_v21 = vpop.f32.mrf.mxu3 }
 0x196   : > { %v3145_v59 = vadd.f32 %v2871_v21, %v2651_v16  ;;  %v859_v21 = vsel %vm728_vm2, %v856_v42, %v858_v13 }
 0x197   : > { %3917 = vst.msk [vmem:[%s4807_s14 + $0x78] sm:$0xf] %vm3886_vm4, %v3788_v20  ;;  %v1503_v0 = vpop.f32.mrf.mxu0  ;;  %4246 = vmatmul.msk.bf16.gmra.mxu2 %vm1217_vm1, %v5168_v62  ;;  %v2034_v32 = vpop.f32.mrf.mxu1 }
 0x198   : > { %v3277_v24 = vadd.f32 %v5103_v30, %v3145_v59  ;;  %v2033_v4 = vadd.f32 %v2032_v6, %v1503_v0 }
 0x19a   : > { %vm3405_vm9 = vcmp.gt.f32.partialorder %v3277_v24, 0.0  ;;  %v3533_v27 = vmul.f32 0.2, %v3277_v24  ;;  %4108 = vmatmul.msk.bf16.gmra.mxu0 %vm1217_vm1, %v5126_v1  ;;  %v2380_v7 = vpop.f32.mrf.mxu2  ;;  %4316 = vmatmul.msk.bf16.gmra.mxu3 %vm1217_vm1, %v5172_v22 }
 0x19b   : > { %v2652_v29 = vadd.f32 %v2380_v7, %v2033_v4  ;;  %v246_v7 = vld [vmem:[%s4695_s6 + $0x128] sm:$0x1] }
 0x19c   : > { %v3661_v33 = vsel %vm3405_vm9, %v3277_v24, %v3533_v27 }
 0x19d   : > { %v3789_v34 = vpack.c.bf16 %v3661_v33, %v3661_v33  ;;  %v2874_v14 = vpop.f32.mrf.mxu3  ;;  %v4454_v33 = vunpack.c.h.bf16 %v5205_v61 }
 0x19e   : > { %v3146_v37 = vadd.f32 %v2874_v14, %v2652_v29 }
 0x19f   : > { %3918 = vst.msk [vmem:[%s4807_s14 + $0x7c] sm:$0xf] %vm3886_vm4, %v3789_v34  ;;  %v1505_v17 = vpop.f32.mrf.mxu0  ;;  %v2037_v39 = vpop.f32.mrf.mxu1  ;;  %v411_v34 = vunpack.c.l.bf16 %v246_v7 }
 0x1a0   : > { %v3278_v1 = vadd.f32 %v5103_v30, %v3146_v37  ;;  %v2035_v44 = vadd.f32 %v2034_v32, %v1505_v17 }
 0x1a2   : > { %vm3406_vm10 = vcmp.gt.f32.partialorder %v3278_v1, 0.0  ;;  %v3534_v46 = vmul.f32 0.2, %v3278_v1  ;;  %v2382_v47 = vpop.f32.mrf.mxu2  ;;  %4177 = vmatmul.msk.bf16.gmra.mxu1 %vm1217_vm1, %v5110_v55 }
 0x1a3   : > { %v2653_v48 = vadd.f32 %v2382_v47, %v2035_v44  ;;  %v862_v44 = vrot.slane %v411_v34, 1 }
 0x1a4   : > { %v3662_v53 = vsel %vm3406_vm10, %v3278_v1, %v3534_v46  ;;  %v860_v1 = vrot.slane %v4454_v33, 1  ;;  %v251_v33 = vld [vmem:[%s4695_s6 + $0x13c] sm:$0x1] }
 0x1a5   : > { %v3790_v54 = vpack.c.bf16 %v3662_v53, %v3662_v53  ;;  %v2876_v28 = vpop.f32.mrf.mxu3 }
 0x1a6   : > { %v3147_v56 = vadd.f32 %v2876_v28, %v2653_v48  ;;  %v861_v52 = vsel %vm728_vm2, %v858_v13, %v860_v1  ;;  %v863_v53 = vsel %vm728_vm2, %v860_v1, %v862_v44 }
 0x1a7   : > { %3919 = vst.msk [vmem:[%s4807_s14 + $0x80] sm:$0xf] %vm3886_vm4, %v3790_v54  ;;  %v1508_v38 = vpop.f32.mrf.mxu0  ;;  %4247 = vmatmul.msk.bf16.gmra.mxu2 %vm1217_vm1, %v5190_v23  ;;  %v2039_v55 = vpop.f32.mrf.mxu1 }
 0x1a8   : > { %v3279_v58 = vadd.f32 %v5103_v30, %v3147_v56  ;;  %v2038_v60 = vadd.f32 %v2037_v39, %v1508_v38 }
 0x1aa   : > { %vm3407_vm11 = vcmp.gt.f32.partialorder %v3279_v58, 0.0  ;;  %v3535_v63 = vmul.f32 0.2, %v3279_v58  ;;  %4109 = vmatmul.msk.bf16.gmra.mxu0 %vm1217_vm1, %v5146_v50  ;;  %v2385_v2 = vpop.f32.mrf.mxu2  ;;  %4317 = vmatmul.msk.bf16.gmra.mxu3 %vm1217_vm1, %v5194_v57  ;;  %v855_v50 = vrot.slane %v4449_v3, 1 }
 0x1ab   : > { %v2654_v45 = vadd.f32 %v2385_v2, %v2038_v60  ;;  %v247_v2 = vld [vmem:[%s4695_s6 + $0x12c] sm:$0xf] }
 0x1ac   : > { %v3663_v35 = vsel %vm3407_vm11, %v3279_v58, %v3535_v63  ;;  %v857_v20 = vsel %vm728_vm2, %v855_v50, %v856_v42 }
 0x1ad   : > { %v3791_v6 = vpack.c.bf16 %v3663_v35, %v3663_v35  ;;  %v2879_v8 = vpop.f32.mrf.mxu3  ;;  %v5221_v4 = vpack.c.bf16 %v859_v21, %v857_v20 }
 0x1ae   : > { %v3148_v51 = vadd.f32 %v2879_v8, %v2654_v45  ;;  %v5250_v45 = vld [vmem:[%s4695_s6 + $0x130] sm:$0xff]   ;;  %v412_v8 = vunpack.c.l.bf16 %v247_v2 }
 0x1af   : > { %3920 = vst.msk [vmem:[%s4807_s14 + $0x84] sm:$0xf] %vm3886_vm4, %v3791_v6  ;;  %v1510_v9 = vpop.f32.mrf.mxu0  ;;  %v2042_v12 = vpop.f32.mrf.mxu1  ;;  %v4457_v35 = vunpack.c.l.bf16 %v5250_v45  ;;  %v4458_v6 = vunpack.c.h.bf16 %v5250_v45 }
 0x1b0   : > { %v3280_v15 = vadd.f32 %v5103_v30, %v3148_v51  ;;  %v2040_v16 = vadd.f32 %v2039_v55, %v1510_v9  ;;  %v5241_v55 = vpack.c.bf16 %v863_v53, %v861_v52 }
 0x1b2   : > { %vm3408_vm12 = vcmp.gt.f32.partialorder %v3280_v15, 0.0  ;;  %v3536_v18 = vmul.f32 0.2, %v3280_v15  ;;  %v2387_v49 = vpop.f32.mrf.mxu2  ;;  %4178 = vmatmul.msk.bf16.gmra.mxu1 %vm1217_vm1, %v5168_v62 }
 0x1b3   : > { %v2655_v19 = vadd.f32 %v2387_v49, %v2040_v16  ;;  %v867_v16 = vrot.slane %v4458_v6, 1 }
 0x1b4   : > { %v3664_v59 = vsel %vm3408_vm12, %v3280_v15, %v3536_v18  ;;  %v864_v15 = vrot.slane %v412_v8, 1 }
 0x1b5   : > { %v3792_v0 = vpack.c.bf16 %v3664_v59, %v3664_v59  ;;  %v2881_v32 = vpop.f32.mrf.mxu3  ;;  %v5263_v59 = vpack.c.bf16 %v4457_v35, %v412_v8 }
 0x1b6   : > { %v3149_v24 = vadd.f32 %v2881_v32, %v2655_v19 }
 0x1b7   : > { %3921 = vst.msk [vmem:[%s4807_s14 + $0x88] sm:$0xf] %vm3886_vm4, %v3792_v0  ;;  %v1513_v25 = vpop.f32.mrf.mxu0  ;;  %4248 = vmatmul.msk.bf16.gmra.mxu2 %vm1217_vm1, %v5202_v36  ;;  %v2044_v26 = vpop.f32.mrf.mxu1 }
 0x1b8   : > { %v3281_v62 = vadd.f32 %v5103_v30, %v3149_v24  ;;  %v2043_v27 = vadd.f32 %v2042_v12, %v1513_v25 }
 0x1ba   : > { %vm3409_vm13 = vcmp.gt.f32.partialorder %v3281_v62, 0.0  ;;  %v3537_v29 = vmul.f32 0.2, %v3281_v62  ;;  %4110 = vmatmul.msk.bf16.gmra.mxu0 %vm1217_vm1, %v5172_v22  ;;  %v2390_v10 = vpop.f32.mrf.mxu2  ;;  %4318 = vmatmul.msk.bf16.gmra.mxu3 %vm1217_vm1, %v5221_v4 }
 0x1bb   : > { %v2656_v31 = vadd.f32 %v2390_v10, %v2043_v27 }
 0x1bc   : > { %v3665_v14 = vsel %vm3409_vm13, %v3281_v62, %v3537_v29 }
 0x1bd   : > { %v3793_v37 = vpack.c.bf16 %v3665_v14, %v3665_v14  ;;  %v2884_v17 = vpop.f32.mrf.mxu3 }
 0x1be   : > { %v3150_v39 = vadd.f32 %v2884_v17, %v2656_v31  ;;  %v250_v31 = vld [vmem:[%s4695_s6 + $0x138] sm:$0xf] }
 0x1bf   : > { %3922 = vst.msk [vmem:[%s4807_s14 + $0x8c] sm:$0xf] %vm3886_vm4, %v3793_v37  ;;  %v1515_v40 = vpop.f32.mrf.mxu0  ;;  %v2047_v41 = vpop.f32.mrf.mxu1  ;;  %v415_v17 = vunpack.c.l.bf16 %v250_v31 }
 0x1c0   : > { %v3282_v22 = vadd.f32 %v5103_v30, %v3150_v39  ;;  %v2045_v46 = vadd.f32 %v2044_v26, %v1515_v40  ;;  %v416_v39 = vunpack.c.l.bf16 %v251_v33 }
 0x1c2   : > { %vm3410_vm14 = vcmp.gt.f32.partialorder %v3282_v22, 0.0  ;;  %v3538_v47 = vmul.f32 0.2, %v3282_v22  ;;  %v2392_v48 = vpop.f32.mrf.mxu2  ;;  %4179 = vmatmul.msk.bf16.gmra.mxu1 %vm1217_vm1, %v5190_v23 }
 0x1c3   : > { %v2657_v11 = vadd.f32 %v2392_v48, %v2045_v46  ;;  %v871_v48 = vrot.slane %v416_v39, 1 }
 0x1c4   : > { %v3666_v54 = vsel %vm3410_vm14, %v3282_v22, %v3538_v47  ;;  %v869_v47 = vrot.slane %v415_v17, 1 }
 0x1c5   : > { %v3794_v28 = vpack.c.bf16 %v3666_v54, %v3666_v54  ;;  %v2886_v56 = vpop.f32.mrf.mxu3 }
 0x1c6   : > { %v3151_v38 = vadd.f32 %v2886_v56, %v2657_v11  ;;  %v870_v56 = vsel %vm728_vm2, %v867_v16, %v869_v47 }
 0x1c7   : > { %3923 = vst.msk [vmem:[%s4807_s14 + $0x90] sm:$0xf] %vm3886_vm4, %v3794_v28  ;;  %v1518_v58 = vpop.f32.mrf.mxu0  ;;  %4249 = vmatmul.msk.bf16.gmra.mxu2 %vm1217_vm1, %v5205_v61  ;;  %v2049_v60 = vpop.f32.mrf.mxu1  ;;  %v5285_v28 = vpack.c.bf16 %v415_v17, %v4458_v6 }
 0x1c8   : > { %v3283_v23 = vadd.f32 %v5103_v30, %v3151_v38  ;;  %v2048_v63 = vadd.f32 %v2047_v41, %v1518_v58  ;;  %v872_v38 = vsel %vm728_vm2, %v869_v47, %v871_v48 }
 0x1c9   : > { %v5289_v2 = vpack.c.bf16 %v872_v38, %v870_v56 }
 0x1ca   : > { %vm3411_vm15 = vcmp.gt.f32.partialorder %v3283_v23, 0.0  ;;  %v3539_v3 = vmul.f32 0.2, %v3283_v23  ;;  %4111 = vmatmul.msk.bf16.gmra.mxu0 %vm1217_vm1, %v5194_v57  ;;  %v2395_v5 = vpop.f32.mrf.mxu2  ;;  %4319 = vmatmul.msk.bf16.gmra.mxu3 %vm1217_vm1, %v5241_v55  ;;  %v865_v57 = vrot.slane %v4457_v35, 1  ;;  %v5300_v35 = vld [vmem:[%s4695_s6 + $0x148] sm:$0xff]  }
 0x1cb   : > { %v2658_v43 = vadd.f32 %v2395_v5, %v2048_v63 }
 0x1cc   : > { %v3667_v51 = vsel %vm3411_vm15, %v3283_v23, %v3539_v3  ;;  %v866_v0 = vsel %vm728_vm2, %v864_v15, %v865_v57  ;;  %v868_v32 = vsel %vm728_vm2, %v865_v57, %v867_v16 }
 0x1cd   : > { %v3795_v9 = vpack.c.bf16 %v3667_v51, %v3667_v51  ;;  %v2889_v12 = vpop.f32.mrf.mxu3  ;;  %v5267_v27 = vpack.c.bf16 %v868_v32, %v866_v0 }
 0x1ce   : > { %v3152_v50 = vadd.f32 %v2889_v12, %v2658_v43  ;;  %v5297_v43 = vld [vmem:[%s4695_s6 + $0x140] sm:$0xff]  }
 0x1cf   : > { %3924 = vst.msk [vmem:[%s4807_s14 + $0x94] sm:$0xf] %vm3886_vm4, %v3795_v9  ;;  %v1520_v42 = vpop.f32.mrf.mxu0  ;;  %v2052_v13 = vpop.f32.mrf.mxu1  ;;  %v4461_v9 = vunpack.c.l.bf16 %v5297_v43  ;;  %v4462_v12 = vunpack.c.h.bf16 %v5297_v43 }
 0x1d0   : > { %v3284_v18 = vadd.f32 %v5103_v30, %v3152_v50  ;;  %v2050_v49 = vadd.f32 %v2049_v60, %v1520_v42  ;;  %v4465_v50 = vunpack.c.l.bf16 %v5300_v35 }
 0x1d2   : > { %vm3412_vm0 = vcmp.gt.f32.partialorder %v3284_v18, 0.0  ;;  %v3540_v19 = vmul.f32 0.2, %v3284_v18  ;;  %v2397_v20 = vpop.f32.mrf.mxu2  ;;  %4180 = vmatmul.msk.bf16.gmra.mxu1 %vm1217_vm1, %v5202_v36 }
 0x1d3   : > { %v2659_v21 = vadd.f32 %v2397_v20, %v2050_v49  ;;  %v874_v49 = vrot.slane %v4462_v12, 1 }
 0x1d4   : > { %v3668_v24 = vsel %vm3412_vm0, %v3284_v18, %v3540_v19  ;;  %v876_v19 = vrot.slane %v4465_v50, 1 }
 0x1d5   : > { %v3796_v25 = vpack.c.bf16 %v3668_v24, %v3668_v24  ;;  %v2891_v26 = vpop.f32.mrf.mxu3 }
 0x1d6   : > { %v3153_v62 = vadd.f32 %v2891_v26, %v2659_v21  ;;  %v877_v26 = vsel %vm728_vm2, %v874_v49, %v876_v19 }
 0x1d7   : > { %3925 = vst.msk [vmem:[%s4807_s14 + $0x98] sm:$0xf] %vm3886_vm4, %v3796_v25  ;;  %v1523_v7 = vpop.f32.mrf.mxu0  ;;  %4250 = vmatmul.msk.bf16.gmra.mxu2 %vm1217_vm1, %v5263_v59  ;;  %v2054_v36 = vpop.f32.mrf.mxu1 }
 0x1d8   : > { %v3285_v29 = vadd.f32 %v5103_v30, %v3153_v62  ;;  %v2053_v10 = vadd.f32 %v2052_v13, %v1523_v7 }
 0x1da   : > { %vm3413_vm3 = vcmp.gt.f32.partialorder %v3285_v29, 0.0  ;;  %v3541_v34 = vmul.f32 0.2, %v3285_v29  ;;  %4112 = vmatmul.msk.bf16.gmra.mxu0 %vm1217_vm1, %v5221_v4  ;;  %v2400_v14 = vpop.f32.mrf.mxu2  ;;  %4320 = vmatmul.msk.bf16.gmra.mxu3 %vm1217_vm1, %v5267_v27 }
 0x1db   : > { %v2660_v37 = vadd.f32 %v2400_v14, %v2053_v10  ;;  %v256_v14 = vld [vmem:[%s4695_s6 + $0x150] sm:$0x1] }
 0x1dc   : > { %v3669_v40 = vsel %vm3413_vm3, %v3285_v29, %v3541_v34 }
 0x1dd   : > { %v3797_v41 = vpack.c.bf16 %v3669_v40, %v3669_v40  ;;  %v2894_v1 = vpop.f32.mrf.mxu3  ;;  %v4466_v40 = vunpack.c.h.bf16 %v5300_v35 }
 0x1de   : > { %v3154_v44 = vadd.f32 %v2894_v1, %v2660_v37 }
 0x1df   : > { %3926 = vst.msk [vmem:[%s4807_s14 + $0x9c] sm:$0xf] %vm3886_vm4, %v3797_v41  ;;  %v1525_v22 = vpop.f32.mrf.mxu0  ;;  %v2057_v46 = vpop.f32.mrf.mxu1  ;;  %v421_v41 = vunpack.c.l.bf16 %v256_v14 }
 0x1e0   : > { %v3286_v4 = vadd.f32 %v5103_v30, %v3154_v44  ;;  %v2055_v11 = vadd.f32 %v2054_v36, %v1525_v22 }
 0x1e2   : > { %vm3414_vm5 = vcmp.gt.f32.partialorder %v3286_v4, 0.0  ;;  %v3542_v52 = vmul.f32 0.2, %v3286_v4  ;;  %v2402_v53 = vpop.f32.mrf.mxu2  ;;  %4181 = vmatmul.msk.bf16.gmra.mxu1 %vm1217_vm1, %v5205_v61 }
 0x1e3   : > { %v2661_v54 = vadd.f32 %v2402_v53, %v2055_v11  ;;  %v880_v11 = vrot.slane %v421_v41, 1 }
 0x1e4   : > { %v3670_v58 = vsel %vm3414_vm5, %v3286_v4, %v3542_v52  ;;  %v878_v4 = vrot.slane %v4466_v40, 1  ;;  %v261_v40 = vld [vmem:[%s4695_s6 + $0x164] sm:$0x1] }
 0x1e5   : > { %v3798_v60 = vpack.c.bf16 %v3670_v58, %v3670_v58  ;;  %v2896_v23 = vpop.f32.mrf.mxu3 }
 0x1e6   : > { %v3155_v63 = vadd.f32 %v2896_v23, %v2661_v54  ;;  %v879_v38 = vsel %vm728_vm2, %v876_v19, %v878_v4  ;;  %v881_v58 = vsel %vm728_vm2, %v878_v4, %v880_v11 }
 0x1e7   : > { %3927 = vst.msk [vmem:[%s4807_s14 + $0xa0] sm:$0xf] %vm3886_vm4, %v3798_v60  ;;  %v1528_v45 = vpop.f32.mrf.mxu0  ;;  %4251 = vmatmul.msk.bf16.gmra.mxu2 %vm1217_vm1, %v5285_v28  ;;  %v2059_v61 = vpop.f32.mrf.mxu1 }
 0x1e8   : > { %v3287_v3 = vadd.f32 %v5103_v30, %v3155_v63  ;;  %v2058_v5 = vadd.f32 %v2057_v46, %v1528_v45 }
 0x1ea   : > { %vm3415_vm6 = vcmp.gt.f32.partialorder %v3287_v3, 0.0  ;;  %v3543_v6 = vmul.f32 0.2, %v3287_v3  ;;  %4113 = vmatmul.msk.bf16.gmra.mxu0 %vm1217_vm1, %v5241_v55  ;;  %v2405_v8 = vpop.f32.mrf.mxu2  ;;  %4321 = vmatmul.msk.bf16.gmra.mxu3 %vm1217_vm1, %v5289_v2  ;;  %v873_v55 = vrot.slane %v4461_v9, 1 }
 0x1eb   : > { %v2662_v51 = vadd.f32 %v2405_v8, %v2058_v5  ;;  %v257_v8 = vld [vmem:[%s4695_s6 + $0x154] sm:$0xf] }
 0x1ec   : > { %v3671_v42 = vsel %vm3415_vm6, %v3287_v3, %v3543_v6  ;;  %v875_v25 = vsel %vm728_vm2, %v873_v55, %v874_v49 }
 0x1ed   : > { %v3799_v13 = vpack.c.bf16 %v3671_v42, %v3671_v42  ;;  %v2899_v15 = vpop.f32.mrf.mxu3  ;;  %v5316_v10 = vpack.c.bf16 %v877_v26, %v875_v25 }
 0x1ee   : > { %v3156_v57 = vadd.f32 %v2899_v15, %v2662_v51  ;;  %v5345_v51 = vld [vmem:[%s4695_s6 + $0x158] sm:$0xff]   ;;  %v422_v15 = vunpack.c.l.bf16 %v257_v8 }
 0x1ef   : > { %3928 = vst.msk [vmem:[%s4807_s14 + $0xa4] sm:$0xf] %vm3886_vm4, %v3799_v13  ;;  %v1530_v16 = vpop.f32.mrf.mxu0  ;;  %v2062_v18 = vpop.f32.mrf.mxu1  ;;  %v4469_v42 = vunpack.c.l.bf16 %v5345_v51  ;;  %v4470_v13 = vunpack.c.h.bf16 %v5345_v51 }
 0x1f0   : > { %v3288_v20 = vadd.f32 %v5103_v30, %v3156_v57  ;;  %v2060_v21 = vadd.f32 %v2059_v61, %v1530_v16  ;;  %v5336_v61 = vpack.c.bf16 %v881_v58, %v879_v38 }
 0x1f2   : > { %vm3416_vm7 = vcmp.gt.f32.partialorder %v3288_v20, 0.0  ;;  %v3544_v0 = vmul.f32 0.2, %v3288_v20  ;;  %v2407_v32 = vpop.f32.mrf.mxu2  ;;  %4182 = vmatmul.msk.bf16.gmra.mxu1 %vm1217_vm1, %v5263_v59 }
 0x1f3   : > { %v2663_v24 = vadd.f32 %v2407_v32, %v2060_v21  ;;  %v885_v21 = vrot.slane %v4470_v13, 1 }
 0x1f4   : > { %v3672_v62 = vsel %vm3416_vm7, %v3288_v20, %v3544_v0  ;;  %v882_v20 = vrot.slane %v422_v15, 1 }
 0x1f5   : > { %v3800_v7 = vpack.c.bf16 %v3672_v62, %v3672_v62  ;;  %v2901_v36 = vpop.f32.mrf.mxu3  ;;  %v5358_v62 = vpack.c.bf16 %v4469_v42, %v422_v15 }
 0x1f6   : > { %v3157_v29 = vadd.f32 %v2901_v36, %v2663_v24 }
 0x1f7   : > { %3929 = vst.msk [vmem:[%s4807_s14 + $0xa8] sm:$0xf] %vm3886_vm4, %v3800_v7  ;;  %v1533_v31 = vpop.f32.mrf.mxu0  ;;  %4252 = vmatmul.msk.bf16.gmra.mxu2 %vm1217_vm1, %v5297_v43  ;;  %v2064_v33 = vpop.f32.mrf.mxu1 }
 0x1f8   : > { %v3289_v59 = vadd.f32 %v5103_v30, %v3157_v29  ;;  %v2063_v34 = vadd.f32 %v2062_v18, %v1533_v31 }
 0x1fa   : > { %vm3417_vm8 = vcmp.gt.f32.partialorder %v3289_v59, 0.0  ;;  %v3545_v37 = vmul.f32 0.2, %v3289_v59  ;;  %4114 = vmatmul.msk.bf16.gmra.mxu0 %vm1217_vm1, %v5267_v27  ;;  %v2410_v17 = vpop.f32.mrf.mxu2  ;;  %4322 = vmatmul.msk.bf16.gmra.mxu3 %vm1217_vm1, %v5316_v10 }
 0x1fb   : > { %v2664_v39 = vadd.f32 %v2410_v17, %v2063_v34 }
 0x1fc   : > { %v3673_v1 = vsel %vm3417_vm8, %v3289_v59, %v3545_v37 }
 0x1fd   : > { %v3801_v44 = vpack.c.bf16 %v3673_v1, %v3673_v1  ;;  %v2904_v22 = vpop.f32.mrf.mxu3 }
 0x1fe   : > { %v3158_v46 = vadd.f32 %v2904_v22, %v2664_v39  ;;  %v260_v39 = vld [vmem:[%s4695_s6 + $0x160] sm:$0xf] }
 0x1ff   : > { %3930 = vst.msk [vmem:[%s4807_s14 + $0xac] sm:$0xf] %vm3886_vm4, %v3801_v44  ;;  %v1535_v47 = vpop.f32.mrf.mxu0  ;;  %v2067_v48 = vpop.f32.mrf.mxu1  ;;  %v425_v22 = vunpack.c.l.bf16 %v260_v39 }
 0x200   : > { %v3290_v27 = vadd.f32 %v5103_v30, %v3158_v46  ;;  %v2065_v52 = vadd.f32 %v2064_v33, %v1535_v47  ;;  %v426_v46 = vunpack.c.l.bf16 %v261_v40 }
 0x202   : > { %vm3418_vm9 = vcmp.gt.f32.partialorder %v3290_v27, 0.0  ;;  %v3546_v53 = vmul.f32 0.2, %v3290_v27  ;;  %v2412_v54 = vpop.f32.mrf.mxu2  ;;  %4183 = vmatmul.msk.bf16.gmra.mxu1 %vm1217_vm1, %v5285_v28 }
 0x203   : > { %v2665_v56 = vadd.f32 %v2412_v54, %v2065_v52  ;;  %v889_v54 = vrot.slane %v426_v46, 1 }
 0x204   : > { %v3674_v60 = vsel %vm3418_vm9, %v3290_v27, %v3546_v53  ;;  %v887_v53 = vrot.slane %v425_v22, 1 }
 0x205   : > { %v3802_v23 = vpack.c.bf16 %v3674_v60, %v3674_v60  ;;  %v2906_v63 = vpop.f32.mrf.mxu3 }
 0x206   : > { %v3159_v45 = vadd.f32 %v2906_v63, %v2665_v56  ;;  %v888_v63 = vsel %vm728_vm2, %v885_v21, %v887_v53 }
 0x207   : > { %3931 = vst.msk [vmem:[%s4807_s14 + $0xb0] sm:$0xf] %vm3886_vm4, %v3802_v23  ;;  %v1538_v3 = vpop.f32.mrf.mxu0  ;;  %4253 = vmatmul.msk.bf16.gmra.mxu2 %vm1217_vm1, %v5300_v35  ;;  %v2069_v5 = vpop.f32.mrf.mxu1  ;;  %v5380_v23 = vpack.c.bf16 %v425_v22, %v4470_v13 }
 0x208   : > { %v3291_v28 = vadd.f32 %v5103_v30, %v3159_v45  ;;  %v2068_v6 = vadd.f32 %v2067_v48, %v1538_v3  ;;  %v890_v45 = vsel %vm728_vm2, %v887_v53, %v889_v54 }
 0x209   : > { %v5384_v8 = vpack.c.bf16 %v890_v45, %v888_v63 }
 0x20a   : > { %vm3419_vm10 = vcmp.gt.f32.partialorder %v3291_v28, 0.0  ;;  %v3547_v9 = vmul.f32 0.2, %v3291_v28  ;;  %4115 = vmatmul.msk.bf16.gmra.mxu0 %vm1217_vm1, %v5289_v2  ;;  %v2415_v12 = vpop.f32.mrf.mxu2  ;;  %4323 = vmatmul.msk.bf16.gmra.mxu3 %vm1217_vm1, %v5336_v61  ;;  %v883_v2 = vrot.slane %v4469_v42, 1  ;;  %v5395_v42 = vld [vmem:[%s4695_s6 + $0x170] sm:$0xff]  }
 0x20b   : > { %v2666_v50 = vadd.f32 %v2415_v12, %v2068_v6 }
 0x20c   : > { %v3675_v57 = vsel %vm3419_vm10, %v3291_v28, %v3547_v9  ;;  %v884_v7 = vsel %vm728_vm2, %v882_v20, %v883_v2  ;;  %v886_v36 = vsel %vm728_vm2, %v883_v2, %v885_v21 }
 0x20d   : > { %v3803_v16 = vpack.c.bf16 %v3675_v57, %v3675_v57  ;;  %v2909_v18 = vpop.f32.mrf.mxu3  ;;  %v5362_v34 = vpack.c.bf16 %v886_v36, %v884_v7 }
 0x20e   : > { %v3160_v55 = vadd.f32 %v2909_v18, %v2666_v50  ;;  %v5392_v50 = vld [vmem:[%s4695_s6 + $0x168] sm:$0xff]  }
 0x20f   : > { %3932 = vst.msk [vmem:[%s4807_s14 + $0xb4] sm:$0xf] %vm3886_vm4, %v3803_v16  ;;  %v1540_v49 = vpop.f32.mrf.mxu0  ;;  %v2072_v19 = vpop.f32.mrf.mxu1  ;;  %v4473_v16 = vunpack.c.l.bf16 %v5392_v50  ;;  %v4474_v18 = vunpack.c.h.bf16 %v5392_v50 }
 0x210   : > { %v3292_v0 = vadd.f32 %v5103_v30, %v3160_v55  ;;  %v2070_v32 = vadd.f32 %v2069_v5, %v1540_v49  ;;  %v4477_v55 = vunpack.c.l.bf16 %v5395_v42 }
 0x212   : > { %vm3420_vm11 = vcmp.gt.f32.partialorder %v3292_v0, 0.0  ;;  %v3548_v24 = vmul.f32 0.2, %v3292_v0  ;;  %v2417_v25 = vpop.f32.mrf.mxu2  ;;  %4184 = vmatmul.msk.bf16.gmra.mxu1 %vm1217_vm1, %v5297_v43 }
 0x213   : > { %v2667_v26 = vadd.f32 %v2417_v25, %v2070_v32  ;;  %v892_v32 = vrot.slane %v4474_v18, 1 }
 0x214   : > { %v3676_v29 = vsel %vm3420_vm11, %v3292_v0, %v3548_v24  ;;  %v894_v24 = vrot.slane %v4477_v55, 1 }
 0x215   : > { %v3804_v31 = vpack.c.bf16 %v3676_v29, %v3676_v29  ;;  %v2911_v33 = vpop.f32.mrf.mxu3 }
 0x216   : > { %v3161_v59 = vadd.f32 %v2911_v33, %v2667_v26  ;;  %v895_v33 = vsel %vm728_vm2, %v892_v32, %v894_v24 }
 0x217   : > { %3933 = vst.msk [vmem:[%s4807_s14 + $0xb8] sm:$0xf] %vm3886_vm4, %v3804_v31  ;;  %v1543_v14 = vpop.f32.mrf.mxu0  ;;  %4254 = vmatmul.msk.bf16.gmra.mxu2 %vm1217_vm1, %v5358_v62  ;;  %v2074_v43 = vpop.f32.mrf.mxu1 }
 0x218   : > { %v3293_v37 = vadd.f32 %v5103_v30, %v3161_v59  ;;  %v2073_v17 = vadd.f32 %v2072_v19, %v1543_v14 }
 0x21a   : > { %vm3421_vm12 = vcmp.gt.f32.partialorder %v3293_v37, 0.0  ;;  %v3549_v41 = vmul.f32 0.2, %v3293_v37  ;;  %4116 = vmatmul.msk.bf16.gmra.mxu0 %vm1217_vm1, %v5316_v10  ;;  %v2420_v1 = vpop.f32.mrf.mxu2  ;;  %4324 = vmatmul.msk.bf16.gmra.mxu3 %vm1217_vm1, %v5362_v34 }
 0x21b   : > { %v2668_v44 = vadd.f32 %v2420_v1, %v2073_v17  ;;  %v266_v1 = vld [vmem:[%s4695_s6 + $0x178] sm:$0x1] }
 0x21c   : > { %v3677_v47 = vsel %vm3421_vm12, %v3293_v37, %v3549_v41 }
 0x21d   : > { %v3805_v48 = vpack.c.bf16 %v3677_v47, %v3677_v47  ;;  %v2914_v4 = vpop.f32.mrf.mxu3  ;;  %v4478_v47 = vunpack.c.h.bf16 %v5395_v42 }
 0x21e   : > { %v3162_v11 = vadd.f32 %v2914_v4, %v2668_v44 }
 0x21f   : > { %3934 = vst.msk [vmem:[%s4807_s14 + $0xbc] sm:$0xf] %vm3886_vm4, %v3805_v48  ;;  %v1545_v27 = vpop.f32.mrf.mxu0  ;;  %v2077_v52 = vpop.f32.mrf.mxu1  ;;  %v431_v48 = vunpack.c.l.bf16 %v266_v1 }
 0x220   : > { %v3294_v10 = vadd.f32 %v5103_v30, %v3162_v11  ;;  %v2075_v56 = vadd.f32 %v2074_v43, %v1545_v27 }
 0x222   : > { %vm3422_vm13 = vcmp.gt.f32.partialorder %v3294_v10, 0.0  ;;  %v3550_v38 = vmul.f32 0.2, %v3294_v10  ;;  %v2422_v58 = vpop.f32.mrf.mxu2  ;;  %4185 = vmatmul.msk.bf16.gmra.mxu1 %vm1217_vm1, %v5300_v35 }
 0x223   : > { %v2669_v60 = vadd.f32 %v2422_v58, %v2075_v56  ;;  %v898_v56 = vrot.slane %v431_v48, 1 }
 0x224   : > { %v3678_v3 = vsel %vm3422_vm13, %v3294_v10, %v3550_v38  ;;  %v896_v10 = vrot.slane %v4478_v47, 1  ;;  %v271_v47 = vld [vmem:[%s4695_s6 + $0x18c] sm:$0x1] }
 0x225   : > { %v3806_v5 = vpack.c.bf16 %v3678_v3, %v3678_v3  ;;  %v2916_v28 = vpop.f32.mrf.mxu3 }
 0x226   : > { %v3163_v6 = vadd.f32 %v2916_v28, %v2669_v60  ;;  %v897_v45 = vsel %vm728_vm2, %v894_v24, %v896_v10  ;;  %v899_v3 = vsel %vm728_vm2, %v896_v10, %v898_v56 }
 0x227   : > { %3935 = vst.msk [vmem:[%s4807_s14 + $0xc0] sm:$0xf] %vm3886_vm4, %v3806_v5  ;;  %v1548_v51 = vpop.f32.mrf.mxu0  ;;  %4255 = vmatmul.msk.bf16.gmra.mxu2 %vm1217_vm1, %v5380_v23  ;;  %v2079_v35 = vpop.f32.mrf.mxu1 }
 0x228   : > { %v3295_v9 = vadd.f32 %v5103_v30, %v3163_v6  ;;  %v2078_v12 = vadd.f32 %v2077_v52, %v1548_v51 }
 0x22a   : > { %vm3423_vm14 = vcmp.gt.f32.partialorder %v3295_v9, 0.0  ;;  %v3551_v13 = vmul.f32 0.2, %v3295_v9  ;;  %4117 = vmatmul.msk.bf16.gmra.mxu0 %vm1217_vm1, %v5336_v61  ;;  %v2425_v15 = vpop.f32.mrf.mxu2  ;;  %4325 = vmatmul.msk.bf16.gmra.mxu3 %vm1217_vm1, %v5384_v8  ;;  %v891_v61 = vrot.slane %v4473_v16, 1 }
 0x22b   : > { %v2670_v57 = vadd.f32 %v2425_v15, %v2078_v12  ;;  %v267_v15 = vld [vmem:[%s4695_s6 + $0x17c] sm:$0xf] }
 0x22c   : > { %v3679_v49 = vsel %vm3423_vm14, %v3295_v9, %v3551_v13  ;;  %v893_v31 = vsel %vm728_vm2, %v891_v61, %v892_v32 }
 0x22d   : > { %v3807_v19 = vpack.c.bf16 %v3679_v49, %v3679_v49  ;;  %v2919_v20 = vpop.f32.mrf.mxu3  ;;  %v5411_v17 = vpack.c.bf16 %v895_v33, %v893_v31 }
 0x22e   : > { %v3164_v2 = vadd.f32 %v2919_v20, %v2670_v57  ;;  %v5445_v57 = vld [vmem:[%s4695_s6 + $0x180] sm:$0xff]   ;;  %v432_v20 = vunpack.c.l.bf16 %v267_v15 }
 0x22f   : > { %3936 = vst.msk [vmem:[%s4807_s14 + $0xc4] sm:$0xf] %vm3886_vm4, %v3807_v19  ;;  %v1550_v21 = vpop.f32.mrf.mxu0  ;;  %v2082_v0 = vpop.f32.mrf.mxu1  ;;  %v4481_v49 = vunpack.c.l.bf16 %v5445_v57  ;;  %v4482_v19 = vunpack.c.h.bf16 %v5445_v57 }
 0x230   : > { %v3296_v25 = vadd.f32 %v5103_v30, %v3164_v2  ;;  %v2080_v26 = vadd.f32 %v2079_v35, %v1550_v21  ;;  %v5436_v35 = vpack.c.bf16 %v899_v3, %v897_v45 }
 0x232   : > { %vm3424_vm15 = vcmp.gt.f32.partialorder %v3296_v25, 0.0  ;;  %v3552_v7 = vmul.f32 0.2, %v3296_v25  ;;  %v2427_v36 = vpop.f32.mrf.mxu2  ;;  %4186 = vmatmul.msk.bf16.gmra.mxu1 %vm1217_vm1, %v5358_v62  ;;  %v5420_v62 = vld [vmem:[%s6172_s2] ss:$0 sm:$0xff] }
 0x233   : > { %v2671_v29 = vadd.f32 %v2427_v36, %v2080_v26  ;;  %v903_v26 = vrot.slane %v4482_v19, 1 }
 0x234   : > { %v3680_v59 = vsel %vm3424_vm15, %v3296_v25, %v3552_v7  ;;  %v900_v25 = vrot.slane %v432_v20, 1 }
 0x235   : > { %v3808_v14 = vpack.c.bf16 %v3680_v59, %v3680_v59  ;;  %v2921_v43 = vpop.f32.mrf.mxu3  ;;  %v5458_v59 = vpack.c.bf16 %v4481_v49, %v432_v20 }
 0x236   : > { %v3165_v37 = vadd.f32 %v2921_v43, %v2671_v29 }
 0x237   : > { %3937 = vst.msk [vmem:[%s4807_s14 + $0xc8] sm:$0xf] %vm3886_vm4, %v3808_v14  ;;  %v1553_v30 = vpop.f32.mrf.mxu0  ;;  %4256 = vmatmul.msk.bf16.gmra.mxu2 %vm1217_vm1, %v5392_v50  ;;  %v2084_v39 = vpop.f32.mrf.mxu1 }
 0x238   : > { %v3297_v40 = vadd.f32 %v5420_v62, %v3165_v37  ;;  %v2083_v41 = vadd.f32 %v2082_v0, %v1553_v30 }
 0x23a   : > { %vm3425_vm0 = vcmp.gt.f32.partialorder %v3297_v40, 0.0  ;;  %v3553_v44 = vmul.f32 0.2, %v3297_v40  ;;  %4118 = vmatmul.msk.bf16.gmra.mxu0 %vm1217_vm1, %v5362_v34  ;;  %v2430_v22 = vpop.f32.mrf.mxu2  ;;  %4326 = vmatmul.msk.bf16.gmra.mxu3 %vm1217_vm1, %v5411_v17 }
 0x23b   : > { %v2672_v46 = vadd.f32 %v2430_v22, %v2083_v41 }
 0x23c   : > { %v3681_v4 = vsel %vm3425_vm0, %v3297_v40, %v3553_v44 }
 0x23d   : > { %v3809_v11 = vpack.c.bf16 %v3681_v4, %v3681_v4  ;;  %v2924_v27 = vpop.f32.mrf.mxu3 }
 0x23e   : > { %v3166_v52 = vadd.f32 %v2924_v27, %v2672_v46  ;;  %v270_v46 = vld [vmem:[%s4695_s6 + $0x188] sm:$0xf] }
 0x23f   : > { %3938 = vst.msk [vmem:[%s4807_s14 + $0xcc] sm:$0xf] %vm3886_vm4, %v3809_v11  ;;  %v1555_v53 = vpop.f32.mrf.mxu0  ;;  %v2087_v54 = vpop.f32.mrf.mxu1  ;;  %v435_v27 = vunpack.c.l.bf16 %v270_v46 }
 0x240   : > { %v3298_v34 = vadd.f32 %v5420_v62, %v3166_v52  ;;  %v2085_v38 = vadd.f32 %v2084_v39, %v1555_v53  ;;  %v436_v52 = vunpack.c.l.bf16 %v271_v47 }
 0x242   : > { %vm3426_vm3 = vcmp.gt.f32.partialorder %v3298_v34, 0.0  ;;  %v3554_v58 = vmul.f32 0.2, %v3298_v34  ;;  %v2432_v60 = vpop.f32.mrf.mxu2  ;;  %4187 = vmatmul.msk.bf16.gmra.mxu1 %vm1217_vm1, %v5380_v23 }
 0x243   : > { %v2673_v63 = vadd.f32 %v2432_v60, %v2085_v38  ;;  %v907_v60 = vrot.slane %v436_v52, 1 }
 0x244   : > { %v3682_v5 = vsel %vm3426_vm3, %v3298_v34, %v3554_v58  ;;  %v905_v58 = vrot.slane %v435_v27, 1 }
 0x245   : > { %v3810_v28 = vpack.c.bf16 %v3682_v5, %v3682_v5  ;;  %v2926_v6 = vpop.f32.mrf.mxu3 }
 0x246   : > { %v3167_v51 = vadd.f32 %v2926_v6, %v2673_v63  ;;  %v906_v6 = vsel %vm728_vm2, %v903_v26, %v905_v58 }
 0x247   : > { %3939 = vst.msk [vmem:[%s4807_s14 + $0xd0] sm:$0xf] %vm3886_vm4, %v3810_v28  ;;  %v1558_v9 = vpop.f32.mrf.mxu0  ;;  %4257 = vmatmul.msk.bf16.gmra.mxu2 %vm1217_vm1, %v5395_v42  ;;  %v2089_v12 = vpop.f32.mrf.mxu1  ;;  %v5480_v28 = vpack.c.bf16 %v435_v27, %v4482_v19 }
 0x248   : > { %v3299_v23 = vadd.f32 %v5420_v62, %v3167_v51  ;;  %v2088_v13 = vadd.f32 %v2087_v54, %v1558_v9  ;;  %v908_v51 = vsel %vm728_vm2, %v905_v58, %v907_v60 }
 0x249   : > { %v5484_v15 = vpack.c.bf16 %v908_v51, %v906_v6 }
 0x24a   : > { %vm3427_vm5 = vcmp.gt.f32.partialorder %v3299_v23, 0.0  ;;  %v3555_v16 = vmul.f32 0.2, %v3299_v23  ;;  %4119 = vmatmul.msk.bf16.gmra.mxu0 %vm1217_vm1, %v5384_v8  ;;  %v2435_v18 = vpop.f32.mrf.mxu2  ;;  %4327 = vmatmul.msk.bf16.gmra.mxu3 %vm1217_vm1, %v5436_v35  ;;  %v901_v8 = vrot.slane %v4481_v49, 1  ;;  %v5495_v49 = vld [vmem:[%s4695_s6 + $0x198] sm:$0xff]  }
 0x24b   : > { %v2674_v55 = vadd.f32 %v2435_v18, %v2088_v13 }
 0x24c   : > { %v3683_v2 = vsel %vm3427_vm5, %v3299_v23, %v3555_v16  ;;  %v902_v14 = vsel %vm728_vm2, %v900_v25, %v901_v8  ;;  %v904_v43 = vsel %vm728_vm2, %v901_v8, %v903_v26 }
 0x24d   : > { %v3811_v21 = vpack.c.bf16 %v3683_v2, %v3683_v2  ;;  %v2929_v0 = vpop.f32.mrf.mxu3  ;;  %v5462_v41 = vpack.c.bf16 %v904_v43, %v902_v14 }
 0x24e   : > { %v3168_v61 = vadd.f32 %v2929_v0, %v2674_v55  ;;  %v5492_v55 = vld [vmem:[%s4695_s6 + $0x190] sm:$0xff]  }
 0x24f   : > { %3940 = vst.msk [vmem:[%s4807_s14 + $0xd4] sm:$0xf] %vm3886_vm4, %v3811_v21  ;;  %v1560_v32 = vpop.f32.mrf.mxu0  ;;  %v2092_v24 = vpop.f32.mrf.mxu1  ;;  %v4485_v21 = vunpack.c.l.bf16 %v5492_v55  ;;  %v4486_v0 = vunpack.c.h.bf16 %v5492_v55 }
 0x250   : > { %v3300_v7 = vadd.f32 %v5420_v62, %v3168_v61  ;;  %v2090_v36 = vadd.f32 %v2089_v12, %v1560_v32  ;;  %v4489_v61 = vunpack.c.l.bf16 %v5495_v49 }
 0x252   : > { %vm3428_vm6 = vcmp.gt.f32.partialorder %v3300_v7, 0.0  ;;  %v3556_v29 = vmul.f32 0.2, %v3300_v7  ;;  %v2437_v31 = vpop.f32.mrf.mxu2  ;;  %4188 = vmatmul.msk.bf16.gmra.mxu1 %vm1217_vm1, %v5392_v50 }
 0x253   : > { %v2675_v33 = vadd.f32 %v2437_v31, %v2090_v36  ;;  %v910_v36 = vrot.slane %v4486_v0, 1 }
 0x254   : > { %v3684_v37 = vsel %vm3428_vm6, %v3300_v7, %v3556_v29  ;;  %v912_v29 = vrot.slane %v4489_v61, 1 }
 0x255   : > { %v3812_v30 = vpack.c.bf16 %v3684_v37, %v3684_v37  ;;  %v2931_v39 = vpop.f32.mrf.mxu3 }
 0x256   : > { %v3169_v40 = vadd.f32 %v2931_v39, %v2675_v33  ;;  %v913_v39 = vsel %vm728_vm2, %v910_v36, %v912_v29 }
 0x257   : > { %3941 = vst.msk [vmem:[%s4807_s14 + $0xd8] sm:$0xf] %vm3886_vm4, %v3812_v30  ;;  %v1563_v1 = vpop.f32.mrf.mxu0  ;;  %4258 = vmatmul.msk.bf16.gmra.mxu2 %vm1217_vm1, %v5458_v59  ;;  %v2094_v50 = vpop.f32.mrf.mxu1 }
 0x258   : > { %v3301_v44 = vadd.f32 %v5420_v62, %v3169_v40  ;;  %v2093_v22 = vadd.f32 %v2092_v24, %v1563_v1 }
 0x25a   : > { %vm3429_vm7 = vcmp.gt.f32.partialorder %v3301_v44, 0.0  ;;  %v3557_v48 = vmul.f32 0.2, %v3301_v44  ;;  %4120 = vmatmul.msk.bf16.gmra.mxu0 %vm1217_vm1, %v5411_v17  ;;  %v2440_v4 = vpop.f32.mrf.mxu2  ;;  %4328 = vmatmul.msk.bf16.gmra.mxu3 %vm1217_vm1, %v5462_v41 }
 0x25b   : > { %v2676_v11 = vadd.f32 %v2440_v4, %v2093_v22  ;;  %v276_v4 = vld [vmem:[%s4695_s6 + $0x1a0] sm:$0x1] }
 0x25c   : > { %v3685_v53 = vsel %vm3429_vm7, %v3301_v44, %v3557_v48 }
 0x25d   : > { %v3813_v54 = vpack.c.bf16 %v3685_v53, %v3685_v53  ;;  %v2934_v10 = vpop.f32.mrf.mxu3  ;;  %v4490_v53 = vunpack.c.h.bf16 %v5495_v49 }
 0x25e   : > { %v3170_v56 = vadd.f32 %v2934_v10, %v2676_v11 }
 0x25f   : > { %3942 = vst.msk [vmem:[%s4807_s14 + $0xdc] sm:$0xf] %vm3886_vm4, %v3813_v54  ;;  %v1565_v34 = vpop.f32.mrf.mxu0  ;;  %v2097_v38 = vpop.f32.mrf.mxu1  ;;  %v441_v54 = vunpack.c.l.bf16 %v276_v4 }
 0x260   : > { %v3302_v17 = vadd.f32 %v5420_v62, %v3170_v56  ;;  %v2095_v63 = vadd.f32 %v2094_v50, %v1565_v34 }
 0x262   : > { %vm3430_vm8 = vcmp.gt.f32.partialorder %v3302_v17, 0.0  ;;  %v3558_v45 = vmul.f32 0.2, %v3302_v17  ;;  %v2442_v3 = vpop.f32.mrf.mxu2  ;;  %4189 = vmatmul.msk.bf16.gmra.mxu1 %vm1217_vm1, %v5395_v42 }
 0x263   : > { %v2677_v5 = vadd.f32 %v2442_v3, %v2095_v63  ;;  %v916_v63 = vrot.slane %v441_v54, 1 }
 0x264   : > { %v3686_v9 = vsel %vm3430_vm8, %v3302_v17, %v3558_v45  ;;  %v914_v17 = vrot.slane %v4490_v53, 1  ;;  %v281_v53 = vld [vmem:[%s4695_s6 + $0x1b4] sm:$0x1] }
 0x265   : > { %v3814_v12 = vpack.c.bf16 %v3686_v9, %v3686_v9  ;;  %v2936_v23 = vpop.f32.mrf.mxu3 }
 0x266   : > { %v3171_v13 = vadd.f32 %v2936_v23, %v2677_v5  ;;  %v915_v51 = vsel %vm728_vm2, %v912_v29, %v914_v17  ;;  %v917_v9 = vsel %vm728_vm2, %v914_v17, %v916_v63 }
 0x267   : > { %3943 = vst.msk [vmem:[%s4807_s14 + $0xe0] sm:$0xf] %vm3886_vm4, %v3814_v12  ;;  %v1568_v57 = vpop.f32.mrf.mxu0  ;;  %4259 = vmatmul.msk.bf16.gmra.mxu2 %vm1217_vm1, %v5480_v28  ;;  %v2099_v42 = vpop.f32.mrf.mxu1 }
 0x268   : > { %v3303_v16 = vadd.f32 %v5420_v62, %v3171_v13  ;;  %v2098_v18 = vadd.f32 %v2097_v38, %v1568_v57 }
 0x26a   : > { %vm3431_vm9 = vcmp.gt.f32.partialorder %v3303_v16, 0.0  ;;  %v3559_v19 = vmul.f32 0.2, %v3303_v16  ;;  %4121 = vmatmul.msk.bf16.gmra.mxu0 %vm1217_vm1, %v5436_v35  ;;  %v2445_v20 = vpop.f32.mrf.mxu2  ;;  %4329 = vmatmul.msk.bf16.gmra.mxu3 %vm1217_vm1, %v5484_v15  ;;  %v909_v35 = vrot.slane %v4485_v21, 1 }
 0x26b   : > { %v2678_v2 = vadd.f32 %v2445_v20, %v2098_v18  ;;  %v277_v20 = vld [vmem:[%s4695_s6 + $0x1a4] sm:$0xf] }
 0x26c   : > { %v3687_v32 = vsel %vm3431_vm9, %v3303_v16, %v3559_v19  ;;  %v911_v30 = vsel %vm728_vm2, %v909_v35, %v910_v36 }
 0x26d   : > { %v3815_v24 = vpack.c.bf16 %v3687_v32, %v3687_v32  ;;  %v2939_v25 = vpop.f32.mrf.mxu3  ;;  %v5511_v22 = vpack.c.bf16 %v913_v39, %v911_v30 }
 0x26e   : > { %v3172_v8 = vadd.f32 %v2939_v25, %v2678_v2  ;;  %v5540_v2 = vld [vmem:[%s4695_s6 + $0x1a8] sm:$0xff]   ;;  %v442_v25 = vunpack.c.l.bf16 %v277_v20 }
 0x26f   : > { %3944 = vst.msk [vmem:[%s4807_s14 + $0xe4] sm:$0xf] %vm3886_vm4, %v3815_v24  ;;  %v1570_v26 = vpop.f32.mrf.mxu0  ;;  %v2102_v7 = vpop.f32.mrf.mxu1  ;;  %v4493_v32 = vunpack.c.l.bf16 %v5540_v2  ;;  %v4494_v24 = vunpack.c.h.bf16 %v5540_v2 }
 0x270   : > { %v3304_v31 = vadd.f32 %v5420_v62, %v3172_v8  ;;  %v2100_v33 = vadd.f32 %v2099_v42, %v1570_v26  ;;  %v5531_v42 = vpack.c.bf16 %v917_v9, %v915_v51 }
 0x272   : > { %vm3432_vm10 = vcmp.gt.f32.partialorder %v3304_v31, 0.0  ;;  %v3560_v14 = vmul.f32 0.2, %v3304_v31  ;;  %v2447_v43 = vpop.f32.mrf.mxu2  ;;  %4190 = vmatmul.msk.bf16.gmra.mxu1 %vm1217_vm1, %v5458_v59 }
 0x273   : > { %v2679_v37 = vadd.f32 %v2447_v43, %v2100_v33  ;;  %v921_v33 = vrot.slane %v4494_v24, 1 }
 0x274   : > { %v3688_v40 = vsel %vm3432_vm10, %v3304_v31, %v3560_v14  ;;  %v918_v31 = vrot.slane %v442_v25, 1 }
 0x275   : > { %v3816_v1 = vpack.c.bf16 %v3688_v40, %v3688_v40  ;;  %v2941_v50 = vpop.f32.mrf.mxu3  ;;  %v5553_v40 = vpack.c.bf16 %v4493_v32, %v442_v25 }
 0x276   : > { %v3173_v44 = vadd.f32 %v2941_v50, %v2679_v37 }
 0x277   : > { %3945 = vst.msk [vmem:[%s4807_s14 + $0xe8] sm:$0xf] %vm3886_vm4, %v3816_v1  ;;  %v1573_v46 = vpop.f32.mrf.mxu0  ;;  %4260 = vmatmul.msk.bf16.gmra.mxu2 %vm1217_vm1, %v5492_v55  ;;  %v2104_v47 = vpop.f32.mrf.mxu1 }
 0x278   : > { %v3305_v59 = vadd.f32 %v5420_v62, %v3173_v44  ;;  %v2103_v48 = vadd.f32 %v2102_v7, %v1573_v46 }
 0x27a   : > { %vm3433_vm11 = vcmp.gt.f32.partialorder %v3305_v59, 0.0  ;;  %v3561_v11 = vmul.f32 0.2, %v3305_v59  ;;  %4122 = vmatmul.msk.bf16.gmra.mxu0 %vm1217_vm1, %v5462_v41  ;;  %v2450_v27 = vpop.f32.mrf.mxu2  ;;  %4330 = vmatmul.msk.bf16.gmra.mxu3 %vm1217_vm1, %v5511_v22 }
 0x27b   : > { %v2680_v52 = vadd.f32 %v2450_v27, %v2103_v48 }
 0x27c   : > { %v3689_v10 = vsel %vm3433_vm11, %v3305_v59, %v3561_v11 }
 0x27d   : > { %v3817_v56 = vpack.c.bf16 %v3689_v10, %v3689_v10  ;;  %v2944_v34 = vpop.f32.mrf.mxu3 }
 0x27e   : > { %v3174_v38 = vadd.f32 %v2944_v34, %v2680_v52  ;;  %v280_v52 = vld [vmem:[%s4695_s6 + $0x1b0] sm:$0xf] }
 0x27f   : > { %3946 = vst.msk [vmem:[%s4807_s14 + $0xec] sm:$0xf] %vm3886_vm4, %v3817_v56  ;;  %v1575_v58 = vpop.f32.mrf.mxu0  ;;  %v2107_v60 = vpop.f32.mrf.mxu1  ;;  %v445_v34 = vunpack.c.l.bf16 %v280_v52 }
 0x280   : > { %v3306_v41 = vadd.f32 %v5420_v62, %v3174_v38  ;;  %v2105_v45 = vadd.f32 %v2104_v47, %v1575_v58  ;;  %v446_v38 = vunpack.c.l.bf16 %v281_v53 }
 0x282   : > { %vm3434_vm12 = vcmp.gt.f32.partialorder %v3306_v41, 0.0  ;;  %v3562_v3 = vmul.f32 0.2, %v3306_v41  ;;  %v2452_v5 = vpop.f32.mrf.mxu2  ;;  %4191 = vmatmul.msk.bf16.gmra.mxu1 %vm1217_vm1, %v5480_v28 }
 0x283   : > { %v2681_v6 = vadd.f32 %v2452_v5, %v2105_v45  ;;  %v925_v5 = vrot.slane %v446_v38, 1 }
 0x284   : > { %v3690_v12 = vsel %vm3434_vm12, %v3306_v41, %v3562_v3  ;;  %v923_v3 = vrot.slane %v445_v34, 1 }
 0x285   : > { %v3818_v23 = vpack.c.bf16 %v3690_v12, %v3690_v12  ;;  %v2946_v13 = vpop.f32.mrf.mxu3 }
 0x286   : > { %v3175_v57 = vadd.f32 %v2946_v13, %v2681_v6  ;;  %v924_v13 = vsel %vm728_vm2, %v921_v33, %v923_v3 }
 0x287   : > { %3947 = vst.msk [vmem:[%s4807_s14 + $0xf0] sm:$0xf] %vm3886_vm4, %v3818_v23  ;;  %v1578_v16 = vpop.f32.mrf.mxu0  ;;  %4261 = vmatmul.msk.bf16.gmra.mxu2 %vm1217_vm1, %v5495_v49  ;;  %v2109_v18 = vpop.f32.mrf.mxu1  ;;  %v5575_v23 = vpack.c.bf16 %v445_v34, %v4494_v24 }
 0x288   : > { %v3307_v28 = vadd.f32 %v5420_v62, %v3175_v57  ;;  %v2108_v19 = vadd.f32 %v2107_v60, %v1578_v16  ;;  %v926_v57 = vsel %vm728_vm2, %v923_v3, %v925_v5 }
 0x289   : > { %v5579_v20 = vpack.c.bf16 %v926_v57, %v924_v13 }
 0x28a   : > { %vm3435_vm13 = vcmp.gt.f32.partialorder %v3307_v28, 0.0  ;;  %v3563_v21 = vmul.f32 0.2, %v3307_v28  ;;  %4123 = vmatmul.msk.bf16.gmra.mxu0 %vm1217_vm1, %v5484_v15  ;;  %v2455_v0 = vpop.f32.mrf.mxu2  ;;  %4331 = vmatmul.msk.bf16.gmra.mxu3 %vm1217_vm1, %v5531_v42  ;;  %v919_v15 = vrot.slane %v4493_v32, 1  ;;  %v5590_v32 = vld [vmem:[%s4695_s6 + $0x1c0] sm:$0xff]  }
 0x28b   : > { %v2682_v61 = vadd.f32 %v2455_v0, %v2108_v19 }
 0x28c   : > { %v3691_v8 = vsel %vm3435_vm13, %v3307_v28, %v3563_v21  ;;  %v920_v1 = vsel %vm728_vm2, %v918_v31, %v919_v15  ;;  %v922_v50 = vsel %vm728_vm2, %v919_v15, %v921_v33 }
 0x28d   : > { %v3819_v26 = vpack.c.bf16 %v3691_v8, %v3691_v8  ;;  %v2949_v7 = vpop.f32.mrf.mxu3  ;;  %v5557_v48 = vpack.c.bf16 %v922_v50, %v920_v1 }
 0x28e   : > { %v3176_v35 = vadd.f32 %v2949_v7, %v2682_v61  ;;  %v5587_v61 = vld [vmem:[%s4695_s6 + $0x1b8] sm:$0xff]  }
 0x28f   : > { %3948 = vst.msk [vmem:[%s4807_s14 + $0xf4] sm:$0xf] %vm3886_vm4, %v3819_v26  ;;  %v1580_v36 = vpop.f32.mrf.mxu0  ;;  %v2112_v29 = vpop.f32.mrf.mxu1  ;;  %v4497_v26 = vunpack.c.l.bf16 %v5587_v61  ;;  %v4498_v7 = vunpack.c.h.bf16 %v5587_v61 }
 0x290   : > { %v3308_v14 = vadd.f32 %v5420_v62, %v3176_v35  ;;  %v2110_v43 = vadd.f32 %v2109_v18, %v1580_v36  ;;  %v4501_v35 = vunpack.c.l.bf16 %v5590_v32 }
 0x292   : > { %vm3436_vm14 = vcmp.gt.f32.partialorder %v3308_v14, 0.0  ;;  %v3564_v37 = vmul.f32 0.2, %v3308_v14  ;;  %v2457_v30 = vpop.f32.mrf.mxu2  ;;  %4192 = vmatmul.msk.bf16.gmra.mxu1 %vm1217_vm1, %v5492_v55 }
 0x293   : > { %v2683_v39 = vadd.f32 %v2457_v30, %v2110_v43  ;;  %v928_v43 = vrot.slane %v4498_v7, 1 }
 0x294   : > { %v3692_v44 = vsel %vm3436_vm14, %v3308_v14, %v3564_v37  ;;  %v930_v37 = vrot.slane %v4501_v35, 1 }
 0x295   : > { %v3820_v46 = vpack.c.bf16 %v3692_v44, %v3692_v44  ;;  %v2951_v47 = vpop.f32.mrf.mxu3 }
 0x296   : > { %v3177_v59 = vadd.f32 %v2951_v47, %v2683_v39  ;;  %v931_v47 = vsel %vm728_vm2, %v928_v43, %v930_v37 }
 0x297   : > { %3949 = vst.msk [vmem:[%s4807_s14 + $0xf8] sm:$0xf] %vm3886_vm4, %v3820_v46  ;;  %v1583_v4 = vpop.f32.mrf.mxu0  ;;  %4262 = vmatmul.msk.bf16.gmra.mxu2 %vm1217_vm1, %v5553_v40  ;;  %v2114_v55 = vpop.f32.mrf.mxu1 }
 0x298   : > { %v3309_v11 = vadd.f32 %v5420_v62, %v3177_v59  ;;  %v2113_v27 = vadd.f32 %v2112_v29, %v1583_v4 }
 0x29a   : > { %vm3437_vm15 = vcmp.gt.f32.partialorder %v3309_v11, 0.0  ;;  %v3565_v54 = vmul.f32 0.2, %v3309_v11  ;;  %4124 = vmatmul.msk.bf16.gmra.mxu0 %vm1217_vm1, %v5511_v22  ;;  %v2460_v10 = vpop.f32.mrf.mxu2  ;;  %4332 = vmatmul.msk.bf16.gmra.mxu3 %vm1217_vm1, %v5557_v48 }
 0x29b   : > { %v2684_v56 = vadd.f32 %v2460_v10, %v2113_v27  ;;  %v286_v10 = vld [vmem:[%s4695_s6 + $0x1c8] sm:$0x1] }
 0x29c   : > { %v3693_v58 = vsel %vm3437_vm15, %v3309_v11, %v3565_v54 }
 0x29d   : > { %v3821_v60 = vpack.c.bf16 %v3693_v58, %v3693_v58  ;;  %v2954_v17 = vpop.f32.mrf.mxu3  ;;  %v4502_v58 = vunpack.c.h.bf16 %v5590_v32 }
 0x29e   : > { %v3178_v63 = vadd.f32 %v2954_v17, %v2684_v56 }
 0x29f   : > { %3950 = vst.msk [vmem:[%s4807_s14 + $0xfc] sm:$0xf] %vm3886_vm4, %v3821_v60  ;;  %v1585_v41 = vpop.f32.mrf.mxu0  ;;  %v2117_v45 = vpop.f32.mrf.mxu1  ;;  %v451_v60 = vunpack.c.l.bf16 %v286_v10 }
 0x2a0   : > { %v3310_v22 = vadd.f32 %v5420_v62, %v3178_v63  ;;  %v2115_v6 = vadd.f32 %v2114_v55, %v1585_v41 }
 0x2a2   : > { %vm3438_vm0 = vcmp.gt.f32.partialorder %v3310_v22, 0.0  ;;  %v3566_v51 = vmul.f32 0.2, %v3310_v22  ;;  %v2462_v9 = vpop.f32.mrf.mxu2  ;;  %4193 = vmatmul.msk.bf16.gmra.mxu1 %vm1217_vm1, %v5495_v49 }
 0x2a3   : > { %v2685_v12 = vadd.f32 %v2462_v9, %v2115_v6  ;;  %v934_v6 = vrot.slane %v451_v60, 1 }
 0x2a4   : > { %v3694_v16 = vsel %vm3438_vm0, %v3310_v22, %v3566_v51  ;;  %v932_v22 = vrot.slane %v4502_v58, 1  ;;  %v291_v58 = vld [vmem:[%s4695_s6 + $0x1dc] sm:$0x1] }
 0x2a5   : > { %v3822_v18 = vpack.c.bf16 %v3694_v16, %v3694_v16  ;;  %v2956_v28 = vpop.f32.mrf.mxu3 }
 0x2a6   : > { %v3179_v19 = vadd.f32 %v2956_v28, %v2685_v12  ;;  %v933_v57 = vsel %vm728_vm2, %v930_v37, %v932_v22  ;;  %v935_v16 = vsel %vm728_vm2, %v932_v22, %v934_v6 }
 0x2a7   : > { %3951 = vst.msk [vmem:[%s4807_s14 + $0x100] sm:$0xf] %vm3886_vm4, %v3822_v18  ;;  %v1588_v2 = vpop.f32.mrf.mxu0  ;;  %4263 = vmatmul.msk.bf16.gmra.mxu2 %vm1217_vm1, %v5575_v23  ;;  %v2119_v49 = vpop.f32.mrf.mxu1 }
 0x2a8   : > { %v3311_v21 = vadd.f32 %v5420_v62, %v3179_v19  ;;  %v2118_v0 = vadd.f32 %v2117_v45, %v1588_v2 }
 0x2aa   : > { %vm3439_vm3 = vcmp.gt.f32.partialorder %v3311_v21, 0.0  ;;  %v3567_v24 = vmul.f32 0.2, %v3311_v21  ;;  %4125 = vmatmul.msk.bf16.gmra.mxu0 %vm1217_vm1, %v5531_v42  ;;  %v2465_v25 = vpop.f32.mrf.mxu2  ;;  %4333 = vmatmul.msk.bf16.gmra.mxu3 %vm1217_vm1, %v5579_v20  ;;  %v927_v42 = vrot.slane %v4497_v26, 1 }
 0x2ab   : > { %v2686_v8 = vadd.f32 %v2465_v25, %v2118_v0  ;;  %v287_v25 = vld [vmem:[%s4695_s6 + $0x1cc] sm:$0xf] }
 0x2ac   : > { %v3695_v36 = vsel %vm3439_vm3, %v3311_v21, %v3567_v24  ;;  %v929_v46 = vsel %vm728_vm2, %v927_v42, %v928_v43 }
 0x2ad   : > { %v3823_v29 = vpack.c.bf16 %v3695_v36, %v3695_v36  ;;  %v2959_v31 = vpop.f32.mrf.mxu3  ;;  %v5606_v27 = vpack.c.bf16 %v931_v47, %v929_v46 }
 0x2ae   : > { %v3180_v15 = vadd.f32 %v2959_v31, %v2686_v8  ;;  %v5635_v8 = vld [vmem:[%s4695_s6 + $0x1d0] sm:$0xff]   ;;  %v452_v31 = vunpack.c.l.bf16 %v287_v25 }
 0x2af   : > { %3952 = vst.msk [vmem:[%s4807_s14 + $0x104] sm:$0xf] %vm3886_vm4, %v3823_v29  ;;  %v1590_v33 = vpop.f32.mrf.mxu0  ;;  %v2122_v14 = vpop.f32.mrf.mxu1  ;;  %v4505_v36 = vunpack.c.l.bf16 %v5635_v8  ;;  %v4506_v29 = vunpack.c.h.bf16 %v5635_v8 }
 0x2b0   : > { %v3312_v30 = vadd.f32 %v5420_v62, %v3180_v15  ;;  %v2120_v39 = vadd.f32 %v2119_v49, %v1590_v33  ;;  %v5626_v49 = vpack.c.bf16 %v935_v16, %v933_v57 }
 0x2b2   : > { %vm3440_vm5 = vcmp.gt.f32.partialorder %v3312_v30, 0.0  ;;  %v3568_v1 = vmul.f32 0.2, %v3312_v30  ;;  %v2467_v50 = vpop.f32.mrf.mxu2  ;;  %4194 = vmatmul.msk.bf16.gmra.mxu1 %vm1217_vm1, %v5553_v40 }
 0x2b3   : > { %v2687_v44 = vadd.f32 %v2467_v50, %v2120_v39  ;;  %v939_v39 = vrot.slane %v4506_v29, 1 }
 0x2b4   : > { %v3696_v59 = vsel %vm3440_vm5, %v3312_v30, %v3568_v1  ;;  %v936_v30 = vrot.slane %v452_v31, 1 }
 0x2b5   : > { %v3824_v4 = vpack.c.bf16 %v3696_v59, %v3696_v59  ;;  %v2961_v55 = vpop.f32.mrf.mxu3  ;;  %v5648_v59 = vpack.c.bf16 %v4505_v36, %v452_v31 }
 0x2b6   : > { %v3181_v11 = vadd.f32 %v2961_v55, %v2687_v44 }
 0x2b7   : > { %3953 = vst.msk [vmem:[%s4807_s14 + $0x108] sm:$0xf] %vm3886_vm4, %v3824_v4  ;;  %v1593_v52 = vpop.f32.mrf.mxu0  ;;  %4264 = vmatmul.msk.bf16.gmra.mxu2 %vm1217_vm1, %v5587_v61  ;;  %v2124_v53 = vpop.f32.mrf.mxu1 }
 0x2b8   : > { %v3313_v40 = vadd.f32 %v5420_v62, %v3181_v11  ;;  %v2123_v54 = vadd.f32 %v2122_v14, %v1593_v52 }
 0x2ba   : > { %vm3441_vm6 = vcmp.gt.f32.partialorder %v3313_v40, 0.0  ;;  %v3569_v56 = vmul.f32 0.2, %v3313_v40  ;;  %4126 = vmatmul.msk.bf16.gmra.mxu0 %vm1217_vm1, %v5557_v48  ;;  %v2470_v34 = vpop.f32.mrf.mxu2  ;;  %4334 = vmatmul.msk.bf16.gmra.mxu3 %vm1217_vm1, %v5606_v27 }
 0x2bb   : > { %v2688_v38 = vadd.f32 %v2470_v34, %v2123_v54 }
 0x2bc   : > { %v3697_v17 = vsel %vm3441_vm6, %v3313_v40, %v3569_v56 }
 0x2bd   : > { %v3825_v63 = vpack.c.bf16 %v3697_v17, %v3697_v17  ;;  %v2964_v41 = vpop.f32.mrf.mxu3 }
 0x2be   : > { %v3182_v45 = vadd.f32 %v2964_v41, %v2688_v38  ;;  %v290_v38 = vld [vmem:[%s4695_s6 + $0x1d8] sm:$0xf] }
 0x2bf   : > { %3954 = vst.msk [vmem:[%s4807_s14 + $0x10c] sm:$0xf] %vm3886_vm4, %v3825_v63  ;;  %v1595_v3 = vpop.f32.mrf.mxu0  ;;  %v2127_v5 = vpop.f32.mrf.mxu1  ;;  %v455_v41 = vunpack.c.l.bf16 %v290_v38 }
 0x2c0   : > { %v3314_v48 = vadd.f32 %v5420_v62, %v3182_v45  ;;  %v2125_v51 = vadd.f32 %v2124_v53, %v1595_v3  ;;  %v456_v45 = vunpack.c.l.bf16 %v291_v58 }
 0x2c2   : > { %vm3442_vm7 = vcmp.gt.f32.partialorder %v3314_v48, 0.0  ;;  %v3570_v9 = vmul.f32 0.2, %v3314_v48  ;;  %v2472_v12 = vpop.f32.mrf.mxu2  ;;  %4195 = vmatmul.msk.bf16.gmra.mxu1 %vm1217_vm1, %v5575_v23 }
 0x2c3   : > { %v2689_v13 = vadd.f32 %v2472_v12, %v2125_v51  ;;  %v943_v12 = vrot.slane %v456_v45, 1 }
 0x2c4   : > { %v3698_v18 = vsel %vm3442_vm7, %v3314_v48, %v3570_v9  ;;  %v941_v9 = vrot.slane %v455_v41, 1 }
 0x2c5   : > { %v3826_v28 = vpack.c.bf16 %v3698_v18, %v3698_v18  ;;  %v2966_v19 = vpop.f32.mrf.mxu3 }
 0x2c6   : > { %v3183_v2 = vadd.f32 %v2966_v19, %v2689_v13  ;;  %v942_v19 = vsel %vm728_vm2, %v939_v39, %v941_v9 }
 0x2c7   : > { %3955 = vst.msk [vmem:[%s4807_s14 + $0x110] sm:$0xf] %vm3886_vm4, %v3826_v28  ;;  %v1598_v21 = vpop.f32.mrf.mxu0  ;;  %4265 = vmatmul.msk.bf16.gmra.mxu2 %vm1217_vm1, %v5590_v32  ;;  %v2129_v0 = vpop.f32.mrf.mxu1  ;;  %v5670_v28 = vpack.c.bf16 %v455_v41, %v4506_v29 }
 0x2c8   : > { %v3315_v23 = vadd.f32 %v5420_v62, %v3183_v2  ;;  %v2128_v24 = vadd.f32 %v2127_v5, %v1598_v21  ;;  %v944_v2 = vsel %vm728_vm2, %v941_v9, %v943_v12 }
 0x2c9   : > { %v5674_v25 = vpack.c.bf16 %v944_v2, %v942_v19 }
 0x2ca   : > { %vm3443_vm8 = vcmp.gt.f32.partialorder %v3315_v23, 0.0  ;;  %v3571_v26 = vmul.f32 0.2, %v3315_v23  ;;  %4127 = vmatmul.msk.bf16.gmra.mxu0 %vm1217_vm1, %v5579_v20  ;;  %v2475_v7 = vpop.f32.mrf.mxu2  ;;  %4335 = vmatmul.msk.bf16.gmra.mxu3 %vm1217_vm1, %v5626_v49  ;;  %v937_v20 = vrot.slane %v4505_v36, 1  ;;  %v5685_v36 = vld [vmem:[%s4695_s6 + $0x1e8] sm:$0xff]  }
 0x2cb   : > { %v2690_v35 = vadd.f32 %v2475_v7, %v2128_v24 }
 0x2cc   : > { %v3699_v15 = vsel %vm3443_vm8, %v3315_v23, %v3571_v26  ;;  %v938_v4 = vsel %vm728_vm2, %v936_v30, %v937_v20  ;;  %v940_v55 = vsel %vm728_vm2, %v937_v20, %v939_v39 }
 0x2cd   : > { %v3827_v33 = vpack.c.bf16 %v3699_v15, %v3699_v15  ;;  %v2969_v14 = vpop.f32.mrf.mxu3  ;;  %v5652_v54 = vpack.c.bf16 %v940_v55, %v938_v4 }
 0x2ce   : > { %v3184_v42 = vadd.f32 %v2969_v14, %v2690_v35  ;;  %v5682_v35 = vld [vmem:[%s4695_s6 + $0x1e0] sm:$0xff]  }
 0x2cf   : > { %3956 = vst.msk [vmem:[%s4807_s14 + $0x114] sm:$0xf] %vm3886_vm4, %v3827_v33  ;;  %v1600_v43 = vpop.f32.mrf.mxu0  ;;  %v2132_v37 = vpop.f32.mrf.mxu1  ;;  %v4509_v33 = vunpack.c.l.bf16 %v5682_v35  ;;  %v4510_v14 = vunpack.c.h.bf16 %v5682_v35 }
 0x2d0   : > { %v3316_v1 = vadd.f32 %v5420_v62, %v3184_v42  ;;  %v2130_v50 = vadd.f32 %v2129_v0, %v1600_v43  ;;  %v4513_v42 = vunpack.c.l.bf16 %v5685_v36 }
 0x2d2   : > { %vm3444_vm9 = vcmp.gt.f32.partialorder %v3316_v1, 0.0  ;;  %v3572_v44 = vmul.f32 0.2, %v3316_v1  ;;  %v2477_v46 = vpop.f32.mrf.mxu2  ;;  %4196 = vmatmul.msk.bf16.gmra.mxu1 %vm1217_vm1, %v5587_v61 }
 0x2d3   : > { %v2691_v47 = vadd.f32 %v2477_v46, %v2130_v50  ;;  %v946_v50 = vrot.slane %v4510_v14, 1 }
 0x2d4   : > { %v3700_v11 = vsel %vm3444_vm9, %v3316_v1, %v3572_v44  ;;  %v948_v44 = vrot.slane %v4513_v42, 1 }
 0x2d5   : > { %v3828_v52 = vpack.c.bf16 %v3700_v11, %v3700_v11  ;;  %v2971_v53 = vpop.f32.mrf.mxu3 }
 0x2d6   : > { %v3185_v40 = vadd.f32 %v2971_v53, %v2691_v47  ;;  %v949_v53 = vsel %vm728_vm2, %v946_v50, %v948_v44 }
 0x2d7   : > { %3957 = vst.msk [vmem:[%s4807_s14 + $0x118] sm:$0xf] %vm3886_vm4, %v3828_v52  ;;  %v1603_v10 = vpop.f32.mrf.mxu0  ;;  %4266 = vmatmul.msk.bf16.gmra.mxu2 %vm1217_vm1, %v5648_v59  ;;  %v2134_v61 = vpop.f32.mrf.mxu1 }
 0x2d8   : > { %v3317_v56 = vadd.f32 %v5420_v62, %v3185_v40  ;;  %v2133_v34 = vadd.f32 %v2132_v37, %v1603_v10 }
 0x2da   : > { %vm3445_vm10 = vcmp.gt.f32.partialorder %v3317_v56, 0.0  ;;  %v3573_v60 = vmul.f32 0.2, %v3317_v56  ;;  %4128 = vmatmul.msk.bf16.gmra.mxu0 %vm1217_vm1, %v5606_v27  ;;  %v2480_v17 = vpop.f32.mrf.mxu2  ;;  %4336 = vmatmul.msk.bf16.gmra.mxu3 %vm1217_vm1, %v5652_v54 }
 0x2db   : > { %v2692_v63 = vadd.f32 %v2480_v17, %v2133_v34  ;;  %v296_v17 = vld [vmem:[%s4695_s6 + $0x1f0] sm:$0x1] }
 0x2dc   : > { %v3701_v3 = vsel %vm3445_vm10, %v3317_v56, %v3573_v60 }
 0x2dd   : > { %v3829_v5 = vpack.c.bf16 %v3701_v3, %v3701_v3  ;;  %v2974_v22 = vpop.f32.mrf.mxu3  ;;  %v4514_v3 = vunpack.c.h.bf16 %v5685_v36 }
 0x2de   : > { %v3186_v6 = vadd.f32 %v2974_v22, %v2692_v63 }
 0x2df   : > { %3958 = vst.msk [vmem:[%s4807_s14 + $0x11c] sm:$0xf] %vm3886_vm4, %v3829_v5  ;;  %v1605_v48 = vpop.f32.mrf.mxu0  ;;  %v2137_v51 = vpop.f32.mrf.mxu1  ;;  %v461_v5 = vunpack.c.l.bf16 %v296_v17 }
 0x2e0   : > { %v3318_v27 = vadd.f32 %v5420_v62, %v3186_v6  ;;  %v2135_v13 = vadd.f32 %v2134_v61, %v1605_v48 }
 0x2e2   : > { %vm3446_vm11 = vcmp.gt.f32.partialorder %v3318_v27, 0.0  ;;  %v3574_v57 = vmul.f32 0.2, %v3318_v27  ;;  %v2482_v16 = vpop.f32.mrf.mxu2  ;;  %4197 = vmatmul.msk.bf16.gmra.mxu1 %vm1217_vm1, %v5590_v32 }
 0x2e3   : > { %v2693_v18 = vadd.f32 %v2482_v16, %v2135_v13  ;;  %v952_v13 = vrot.slane %v461_v5, 1 }
 0x2e4   : > { %v3702_v21 = vsel %vm3446_vm11, %v3318_v27, %v3574_v57  ;;  %v950_v27 = vrot.slane %v4514_v3, 1  ;;  %v301_v3 = vld [vmem:[%s4695_s6 + $0x204] sm:$0x1] }
 0x2e5   : > { %v3830_v0 = vpack.c.bf16 %v3702_v21, %v3702_v21  ;;  %v2976_v23 = vpop.f32.mrf.mxu3 }
 0x2e6   : > { %v3187_v24 = vadd.f32 %v2976_v23, %v2693_v18  ;;  %v951_v2 = vsel %vm728_vm2, %v948_v44, %v950_v27  ;;  %v953_v21 = vsel %vm728_vm2, %v950_v27, %v952_v13 }
 0x2e7   : > { %3959 = vst.msk [vmem:[%s4807_s14 + $0x120] sm:$0xf] %vm3886_vm4, %v3830_v0  ;;  %v1608_v8 = vpop.f32.mrf.mxu0  ;;  %4267 = vmatmul.msk.bf16.gmra.mxu2 %vm1217_vm1, %v5670_v28  ;;  %v2139_v32 = vpop.f32.mrf.mxu1 }
 0x2e8   : > { %v3319_v26 = vadd.f32 %v5420_v62, %v3187_v24  ;;  %v2138_v7 = vadd.f32 %v2137_v51, %v1608_v8 }
 0x2ea   : > { %vm3447_vm12 = vcmp.gt.f32.partialorder %v3319_v26, 0.0  ;;  %v3575_v29 = vmul.f32 0.2, %v3319_v26  ;;  %4129 = vmatmul.msk.bf16.gmra.mxu0 %vm1217_vm1, %v5626_v49  ;;  %v2485_v31 = vpop.f32.mrf.mxu2  ;;  %4337 = vmatmul.msk.bf16.gmra.mxu3 %vm1217_vm1, %v5674_v25  ;;  %v945_v49 = vrot.slane %v4509_v33, 1 }
 0x2eb   : > { %v2694_v15 = vadd.f32 %v2485_v31, %v2138_v7  ;;  %v297_v31 = vld [vmem:[%s4695_s6 + $0x1f4] sm:$0xf] }
 0x2ec   : > { %v3703_v43 = vsel %vm3447_vm12, %v3319_v26, %v3575_v29  ;;  %v947_v52 = vsel %vm728_vm2, %v945_v49, %v946_v50  ;;  %v5730_v26 = vld [vmem:[%s6172_s2] ss:$0 sm:$0xff] }
 0x2ed   : > { %v3831_v37 = vpack.c.bf16 %v3703_v43, %v3703_v43  ;;  %v2979_v30 = vpop.f32.mrf.mxu3  ;;  %v5701_v34 = vpack.c.bf16 %v949_v53, %v947_v52 }
 0x2ee   : > { %v3188_v20 = vadd.f32 %v2979_v30, %v2694_v15  ;;  %v5735_v15 = vld [vmem:[%s4695_s6 + $0x1f8] sm:$0xff]   ;;  %v462_v30 = vunpack.c.l.bf16 %v297_v31 }
 0x2ef   : > { %3960 = vst.msk [vmem:[%s4807_s14 + $0x124] sm:$0xf] %vm3886_vm4, %v3831_v37  ;;  %v1610_v39 = vpop.f32.mrf.mxu0  ;;  %v2142_v1 = vpop.f32.mrf.mxu1  ;;  %v4517_v43 = vunpack.c.l.bf16 %v5735_v15  ;;  %v4518_v37 = vunpack.c.h.bf16 %v5735_v15 }
 0x2f0   : > { %v3320_v46 = vadd.f32 %v5420_v62, %v3188_v20  ;;  %v2140_v47 = vadd.f32 %v2139_v32, %v1610_v39  ;;  %v5721_v32 = vpack.c.bf16 %v953_v21, %v951_v2 }
 0x2f2   : > { %vm3448_vm13 = vcmp.gt.f32.partialorder %v3320_v46, 0.0  ;;  %v3576_v4 = vmul.f32 0.2, %v3320_v46  ;;  %v2487_v55 = vpop.f32.mrf.mxu2  ;;  %4198 = vmatmul.msk.bf16.gmra.mxu1 %vm1217_vm1, %v5648_v59 }
 0x2f3   : > { %v2695_v11 = vadd.f32 %v2487_v55, %v2140_v47  ;;  %v957_v47 = vrot.slane %v4518_v37, 1 }
 0x2f4   : > { %v3704_v40 = vsel %vm3448_vm13, %v3320_v46, %v3576_v4  ;;  %v954_v46 = vrot.slane %v462_v30, 1 }
 0x2f5   : > { %v3832_v10 = vpack.c.bf16 %v3704_v40, %v3704_v40  ;;  %v2981_v61 = vpop.f32.mrf.mxu3  ;;  %v5748_v40 = vpack.c.bf16 %v4517_v43, %v462_v30 }
 0x2f6   : > { %v3189_v56 = vadd.f32 %v2981_v61, %v2695_v11 }
 0x2f7   : > { %3961 = vst.msk [vmem:[%s4807_s14 + $0x128] sm:$0xf] %vm3886_vm4, %v3832_v10  ;;  %v1613_v38 = vpop.f32.mrf.mxu0  ;;  %4268 = vmatmul.msk.bf16.gmra.mxu2 %vm1217_vm1, %v5682_v35  ;;  %v2144_v58 = vpop.f32.mrf.mxu1 }
 0x2f8   : > { %v3321_v59 = vadd.f32 %v5420_v62, %v3189_v56  ;;  %v2143_v60 = vadd.f32 %v2142_v1, %v1613_v38 }
 0x2fa   : > { %vm3449_vm14 = vcmp.gt.f32.partialorder %v3321_v59, 0.0  ;;  %v3577_v63 = vmul.f32 0.2, %v3321_v59  ;;  %4130 = vmatmul.msk.bf16.gmra.mxu0 %vm1217_vm1, %v5652_v54  ;;  %v2490_v41 = vpop.f32.mrf.mxu2  ;;  %4338 = vmatmul.msk.bf16.gmra.mxu3 %vm1217_vm1, %v5701_v34 }
 0x2fb   : > { %v2696_v45 = vadd.f32 %v2490_v41, %v2143_v60 }
 0x2fc   : > { %v3705_v22 = vsel %vm3449_vm14, %v3321_v59, %v3577_v63 }
 0x2fd   : > { %v3833_v6 = vpack.c.bf16 %v3705_v22, %v3705_v22  ;;  %v2984_v48 = vpop.f32.mrf.mxu3 }
 0x2fe   : > { %v3190_v51 = vadd.f32 %v2984_v48, %v2696_v45  ;;  %v300_v45 = vld [vmem:[%s4695_s6 + $0x200] sm:$0xf] }
 0x2ff   : > { %3962 = vst.msk [vmem:[%s4807_s14 + $0x12c] sm:$0xf] %vm3886_vm4, %v3833_v6  ;;  %v1615_v9 = vpop.f32.mrf.mxu0  ;;  %v2147_v12 = vpop.f32.mrf.mxu1  ;;  %v465_v48 = vunpack.c.l.bf16 %v300_v45 }
 0x300   : > { %v3322_v54 = vadd.f32 %v5420_v62, %v3190_v51  ;;  %v2145_v57 = vadd.f32 %v2144_v58, %v1615_v9  ;;  %v466_v51 = vunpack.c.l.bf16 %v301_v3 }
 0x302   : > { %vm3450_vm15 = vcmp.gt.f32.partialorder %v3322_v54, 0.0  ;;  %v3578_v16 = vmul.f32 0.2, %v3322_v54  ;;  %v2492_v18 = vpop.f32.mrf.mxu2  ;;  %4199 = vmatmul.msk.bf16.gmra.mxu1 %vm1217_vm1, %v5670_v28 }
 0x303   : > { %v2697_v19 = vadd.f32 %v2492_v18, %v2145_v57  ;;  %v961_v18 = vrot.slane %v466_v51, 1 }
 0x304   : > { %v3706_v0 = vsel %vm3450_vm15, %v3322_v54, %v3578_v16  ;;  %v959_v16 = vrot.slane %v465_v48, 1 }
 0x305   : > { %v3834_v23 = vpack.c.bf16 %v3706_v0, %v3706_v0  ;;  %v2986_v24 = vpop.f32.mrf.mxu3 }
 0x306   : > { %v3191_v8 = vadd.f32 %v2986_v24, %v2697_v19  ;;  %v960_v24 = vsel %vm728_vm2, %v957_v47, %v959_v16 }
 0x307   : > { %3963 = vst.msk [vmem:[%s4807_s14 + $0x130] sm:$0xf] %vm3886_vm4, %v3834_v23  ;;  %v1618_v62 = vpop.f32.mrf.mxu0  ;;  %4269 = vmatmul.msk.bf16.gmra.mxu2 %vm1217_vm1, %v5685_v36  ;;  %v2149_v28 = vpop.f32.mrf.mxu1  ;;  %v5770_v23 = vpack.c.bf16 %v465_v48, %v4518_v37 }
 0x308   : > { %v3323_v7 = vadd.f32 %v5730_v26, %v3191_v8  ;;  %v2148_v29 = vadd.f32 %v2147_v12, %v1618_v62  ;;  %v962_v8 = vsel %vm728_vm2, %v959_v16, %v961_v18 }
 0x309   : > { %v5774_v31 = vpack.c.bf16 %v962_v8, %v960_v24 }
 0x30a   : > { %vm3451_vm0 = vcmp.gt.f32.partialorder %v3323_v7, 0.0  ;;  %v3579_v33 = vmul.f32 0.2, %v3323_v7  ;;  %4131 = vmatmul.msk.bf16.gmra.mxu0 %vm1217_vm1, %v5674_v25  ;;  %v2495_v14 = vpop.f32.mrf.mxu2  ;;  %4339 = vmatmul.msk.bf16.gmra.mxu3 %vm1217_vm1, %v5721_v32  ;;  %v955_v25 = vrot.slane %v4517_v43, 1  ;;  %v5785_v43 = vld [vmem:[%s4695_s6 + $0x210] sm:$0xff]  }
 0x30b   : > { %v2698_v42 = vadd.f32 %v2495_v14, %v2148_v29 }
 0x30c   : > { %v3707_v20 = vsel %vm3451_vm0, %v3323_v7, %v3579_v33  ;;  %v956_v10 = vsel %vm728_vm2, %v954_v46, %v955_v25  ;;  %v958_v61 = vsel %vm728_vm2, %v955_v25, %v957_v47 }
 0x30d   : > { %v3835_v39 = vpack.c.bf16 %v3707_v20, %v3707_v20  ;;  %v2989_v1 = vpop.f32.mrf.mxu3  ;;  %v5752_v60 = vpack.c.bf16 %v958_v61, %v956_v10 }
 0x30e   : > { %v3192_v49 = vadd.f32 %v2989_v1, %v2698_v42  ;;  %v5782_v42 = vld [vmem:[%s4695_s6 + $0x208] sm:$0xff]  }
 0x30f   : > { %3964 = vst.msk [vmem:[%s4807_s14 + $0x134] sm:$0xf] %vm3886_vm4, %v3835_v39  ;;  %v1620_v50 = vpop.f32.mrf.mxu0  ;;  %v2152_v44 = vpop.f32.mrf.mxu1  ;;  %v4521_v39 = vunpack.c.l.bf16 %v5782_v42  ;;  %v4522_v1 = vunpack.c.h.bf16 %v5782_v42 }
 0x310   : > { %v3324_v4 = vadd.f32 %v5730_v26, %v3192_v49  ;;  %v2150_v55 = vadd.f32 %v2149_v28, %v1620_v50  ;;  %v4525_v49 = vunpack.c.l.bf16 %v5785_v43 }
 0x312   : > { %vm3452_vm3 = vcmp.gt.f32.partialorder %v3324_v4, 0.0  ;;  %v3580_v11 = vmul.f32 0.2, %v3324_v4  ;;  %v2497_v52 = vpop.f32.mrf.mxu2  ;;  %4200 = vmatmul.msk.bf16.gmra.mxu1 %vm1217_vm1, %v5682_v35 }
 0x313   : > { %v2699_v53 = vadd.f32 %v2497_v52, %v2150_v55  ;;  %v964_v55 = vrot.slane %v4522_v1, 1 }
 0x314   : > { %v3708_v56 = vsel %vm3452_vm3, %v3324_v4, %v3580_v11  ;;  %v966_v11 = vrot.slane %v4525_v49, 1 }
 0x315   : > { %v3836_v38 = vpack.c.bf16 %v3708_v56, %v3708_v56  ;;  %v2991_v58 = vpop.f32.mrf.mxu3 }
 0x316   : > { %v3193_v59 = vadd.f32 %v2991_v58, %v2699_v53  ;;  %v967_v58 = vsel %vm728_vm2, %v964_v55, %v966_v11 }
 0x317   : > { %3965 = vst.msk [vmem:[%s4807_s14 + $0x138] sm:$0xf] %vm3886_vm4, %v3836_v38  ;;  %v1623_v17 = vpop.f32.mrf.mxu0  ;;  %4270 = vmatmul.msk.bf16.gmra.mxu2 %vm1217_vm1, %v5748_v40  ;;  %v2154_v35 = vpop.f32.mrf.mxu1 }
 0x318   : > { %v3325_v63 = vadd.f32 %v5730_v26, %v3193_v59  ;;  %v2153_v41 = vadd.f32 %v2152_v44, %v1623_v17 }
 0x31a   : > { %vm3453_vm5 = vcmp.gt.f32.partialorder %v3325_v63, 0.0  ;;  %v3581_v5 = vmul.f32 0.2, %v3325_v63  ;;  %4132 = vmatmul.msk.bf16.gmra.mxu0 %vm1217_vm1, %v5701_v34  ;;  %v2500_v22 = vpop.f32.mrf.mxu2  ;;  %4340 = vmatmul.msk.bf16.gmra.mxu3 %vm1217_vm1, %v5752_v60 }
 0x31b   : > { %v2700_v6 = vadd.f32 %v2500_v22, %v2153_v41  ;;  %v306_v22 = vld [vmem:[%s4695_s6 + $0x218] sm:$0x1] }
 0x31c   : > { %v3709_v9 = vsel %vm3453_vm5, %v3325_v63, %v3581_v5 }
 0x31d   : > { %v3837_v12 = vpack.c.bf16 %v3709_v9, %v3709_v9  ;;  %v2994_v27 = vpop.f32.mrf.mxu3  ;;  %v4526_v9 = vunpack.c.h.bf16 %v5785_v43 }
 0x31e   : > { %v3194_v13 = vadd.f32 %v2994_v27, %v2700_v6 }
 0x31f   : > { %3966 = vst.msk [vmem:[%s4807_s14 + $0x13c] sm:$0xf] %vm3886_vm4, %v3837_v12  ;;  %v1625_v54 = vpop.f32.mrf.mxu0  ;;  %v2157_v57 = vpop.f32.mrf.mxu1  ;;  %v471_v12 = vunpack.c.l.bf16 %v306_v22 }
 0x320   : > { %v3326_v34 = vadd.f32 %v5730_v26, %v3194_v13  ;;  %v2155_v19 = vadd.f32 %v2154_v35, %v1625_v54 }
 0x322   : > { %vm3454_vm6 = vcmp.gt.f32.partialorder %v3326_v34, 0.0  ;;  %v3582_v2 = vmul.f32 0.2, %v3326_v34  ;;  %v2502_v21 = vpop.f32.mrf.mxu2  ;;  %4201 = vmatmul.msk.bf16.gmra.mxu1 %vm1217_vm1, %v5685_v36 }
 0x323   : > { %v2701_v0 = vadd.f32 %v2502_v21, %v2155_v19  ;;  %v970_v19 = vrot.slane %v471_v12, 1 }
 0x324   : > { %v3710_v62 = vsel %vm3454_vm6, %v3326_v34, %v3582_v2  ;;  %v968_v34 = vrot.slane %v4526_v9, 1  ;;  %v311_v9 = vld [vmem:[%s4695_s6 + $0x22c] sm:$0x1] }
 0x325   : > { %v3838_v28 = vpack.c.bf16 %v3710_v62, %v3710_v62  ;;  %v2996_v7 = vpop.f32.mrf.mxu3 }
 0x326   : > { %v3195_v29 = vadd.f32 %v2996_v7, %v2701_v0  ;;  %v969_v8 = vsel %vm728_vm2, %v966_v11, %v968_v34  ;;  %v971_v62 = vsel %vm728_vm2, %v968_v34, %v970_v19 }
 0x327   : > { %3967 = vst.msk [vmem:[%s4807_s14 + $0x140] sm:$0xf] %vm3886_vm4, %v3838_v28  ;;  %v1628_v15 = vpop.f32.mrf.mxu0  ;;  %4271 = vmatmul.msk.bf16.gmra.mxu2 %vm1217_vm1, %v5770_v23  ;;  %v2159_v36 = vpop.f32.mrf.mxu1 }
 0x328   : > { %v3327_v33 = vadd.f32 %v5730_v26, %v3195_v29  ;;  %v2158_v14 = vadd.f32 %v2157_v57, %v1628_v15 }
 0x32a   : > { %vm3455_vm7 = vcmp.gt.f32.partialorder %v3327_v33, 0.0  ;;  %v3583_v37 = vmul.f32 0.2, %v3327_v33  ;;  %4133 = vmatmul.msk.bf16.gmra.mxu0 %vm1217_vm1, %v5721_v32  ;;  %v2505_v30 = vpop.f32.mrf.mxu2  ;;  %4341 = vmatmul.msk.bf16.gmra.mxu3 %vm1217_vm1, %v5774_v31  ;;  %v963_v32 = vrot.slane %v4521_v39, 1 }
 0x32b   : > { %v2702_v20 = vadd.f32 %v2505_v30, %v2158_v14  ;;  %v307_v30 = vld [vmem:[%s4695_s6 + $0x21c] sm:$0xf] }
 0x32c   : > { %v3711_v50 = vsel %vm3455_vm7, %v3327_v33, %v3583_v37  ;;  %v965_v38 = vsel %vm728_vm2, %v963_v32, %v964_v55 }
 0x32d   : > { %v3839_v44 = vpack.c.bf16 %v3711_v50, %v3711_v50  ;;  %v2999_v46 = vpop.f32.mrf.mxu3  ;;  %v5801_v41 = vpack.c.bf16 %v967_v58, %v965_v38 }
 0x32e   : > { %v3196_v25 = vadd.f32 %v2999_v46, %v2702_v20  ;;  %v5830_v20 = vld [vmem:[%s4695_s6 + $0x220] sm:$0xff]   ;;  %v472_v46 = vunpack.c.l.bf16 %v307_v30 }
 0x32f   : > { %3968 = vst.msk [vmem:[%s4807_s14 + $0x144] sm:$0xf] %vm3886_vm4, %v3839_v44  ;;  %v1630_v47 = vpop.f32.mrf.mxu0  ;;  %v2162_v4 = vpop.f32.mrf.mxu1  ;;  %v4529_v50 = vunpack.c.l.bf16 %v5830_v20  ;;  %v4530_v44 = vunpack.c.h.bf16 %v5830_v20 }
 0x330   : > { %v3328_v52 = vadd.f32 %v5730_v26, %v3196_v25  ;;  %v2160_v53 = vadd.f32 %v2159_v36, %v1630_v47  ;;  %v5821_v36 = vpack.c.bf16 %v971_v62, %v969_v8 }
 0x332   : > { %vm3456_vm8 = vcmp.gt.f32.partialorder %v3328_v52, 0.0  ;;  %v3584_v10 = vmul.f32 0.2, %v3328_v52  ;;  %v2507_v61 = vpop.f32.mrf.mxu2  ;;  %4202 = vmatmul.msk.bf16.gmra.mxu1 %vm1217_vm1, %v5748_v40 }
 0x333   : > { %v2703_v56 = vadd.f32 %v2507_v61, %v2160_v53  ;;  %v975_v53 = vrot.slane %v4530_v44, 1 }
 0x334   : > { %v3712_v59 = vsel %vm3456_vm8, %v3328_v52, %v3584_v10  ;;  %v972_v52 = vrot.slane %v472_v46, 1 }
 0x335   : > { %v3840_v17 = vpack.c.bf16 %v3712_v59, %v3712_v59  ;;  %v3001_v35 = vpop.f32.mrf.mxu3  ;;  %v5843_v59 = vpack.c.bf16 %v4529_v50, %v472_v46 }
 0x336   : > { %v3197_v63 = vadd.f32 %v3001_v35, %v2703_v56 }
 0x337   : > { %3969 = vst.msk [vmem:[%s4807_s14 + $0x148] sm:$0xf] %vm3886_vm4, %v3840_v17  ;;  %v1633_v45 = vpop.f32.mrf.mxu0  ;;  %4272 = vmatmul.msk.bf16.gmra.mxu2 %vm1217_vm1, %v5782_v42  ;;  %v2164_v3 = vpop.f32.mrf.mxu1 }
 0x338   : > { %v3329_v40 = vadd.f32 %v5730_v26, %v3197_v63  ;;  %v2163_v5 = vadd.f32 %v2162_v4, %v1633_v45 }
 0x33a   : > { %vm3457_vm9 = vcmp.gt.f32.partialorder %v3329_v40, 0.0  ;;  %v3585_v6 = vmul.f32 0.2, %v3329_v40  ;;  %4134 = vmatmul.msk.bf16.gmra.mxu0 %vm1217_vm1, %v5752_v60  ;;  %v2510_v48 = vpop.f32.mrf.mxu2  ;;  %4342 = vmatmul.msk.bf16.gmra.mxu3 %vm1217_vm1, %v5801_v41 }
 0x33b   : > { %v2704_v51 = vadd.f32 %v2510_v48, %v2163_v5 }
 0x33c   : > { %v3713_v27 = vsel %vm3457_vm9, %v3329_v40, %v3585_v6 }
 0x33d   : > { %v3841_v13 = vpack.c.bf16 %v3713_v27, %v3713_v27  ;;  %v3004_v54 = vpop.f32.mrf.mxu3 }
 0x33e   : > { %v3198_v57 = vadd.f32 %v3004_v54, %v2704_v51  ;;  %v310_v51 = vld [vmem:[%s4695_s6 + $0x228] sm:$0xf] }
 0x33f   : > { %3970 = vst.msk [vmem:[%s4807_s14 + $0x14c] sm:$0xf] %vm3886_vm4, %v3841_v13  ;;  %v1635_v16 = vpop.f32.mrf.mxu0  ;;  %v2167_v18 = vpop.f32.mrf.mxu1  ;;  %v475_v54 = vunpack.c.l.bf16 %v310_v51 }
 0x340   : > { %v3330_v60 = vadd.f32 %v5730_v26, %v3198_v57  ;;  %v2165_v2 = vadd.f32 %v2164_v3, %v1635_v16  ;;  %v476_v57 = vunpack.c.l.bf16 %v311_v9 }
 0x342   : > { %vm3458_vm10 = vcmp.gt.f32.partialorder %v3330_v60, 0.0  ;;  %v3586_v21 = vmul.f32 0.2, %v3330_v60  ;;  %v2512_v0 = vpop.f32.mrf.mxu2  ;;  %4203 = vmatmul.msk.bf16.gmra.mxu1 %vm1217_vm1, %v5770_v23 }
 0x343   : > { %v2705_v24 = vadd.f32 %v2512_v0, %v2165_v2  ;;  %v979_v0 = vrot.slane %v476_v57, 1 }
 0x344   : > { %v3714_v28 = vsel %vm3458_vm10, %v3330_v60, %v3586_v21  ;;  %v977_v21 = vrot.slane %v475_v54, 1 }
 0x345   : > { %v3842_v7 = vpack.c.bf16 %v3714_v28, %v3714_v28  ;;  %v3006_v29 = vpop.f32.mrf.mxu3 }
 0x346   : > { %v3199_v15 = vadd.f32 %v3006_v29, %v2705_v24  ;;  %v978_v29 = vsel %vm728_vm2, %v975_v53, %v977_v21 }
 0x347   : > { %3971 = vst.msk [vmem:[%s4807_s14 + $0x150] sm:$0xf] %vm3886_vm4, %v3842_v7  ;;  %v1638_v33 = vpop.f32.mrf.mxu0  ;;  %4273 = vmatmul.msk.bf16.gmra.mxu2 %vm1217_vm1, %v5785_v43  ;;  %v2169_v14 = vpop.f32.mrf.mxu1  ;;  %v5865_v7 = vpack.c.bf16 %v475_v54, %v4530_v44 }
 0x348   : > { %v3331_v23 = vadd.f32 %v5730_v26, %v3199_v15  ;;  %v2168_v37 = vadd.f32 %v2167_v18, %v1638_v33  ;;  %v980_v15 = vsel %vm728_vm2, %v977_v21, %v979_v0 }
 0x349   : > { %v5869_v30 = vpack.c.bf16 %v980_v15, %v978_v29 }
 0x34a   : > { %vm3459_vm11 = vcmp.gt.f32.partialorder %v3331_v23, 0.0  ;;  %v3587_v39 = vmul.f32 0.2, %v3331_v23  ;;  %4135 = vmatmul.msk.bf16.gmra.mxu0 %vm1217_vm1, %v5774_v31  ;;  %v2515_v1 = vpop.f32.mrf.mxu2  ;;  %4343 = vmatmul.msk.bf16.gmra.mxu3 %vm1217_vm1, %v5821_v36  ;;  %v973_v31 = vrot.slane %v4529_v50, 1  ;;  %v5880_v50 = vld [vmem:[%s4695_s6 + $0x238] sm:$0xff]  }
 0x34b   : > { %v2706_v49 = vadd.f32 %v2515_v1, %v2168_v37 }
 0x34c   : > { %v3715_v25 = vsel %vm3459_vm11, %v3331_v23, %v3587_v39  ;;  %v974_v17 = vsel %vm728_vm2, %v972_v52, %v973_v31  ;;  %v976_v35 = vsel %vm728_vm2, %v973_v31, %v975_v53 }
 0x34d   : > { %v3843_v47 = vpack.c.bf16 %v3715_v25, %v3715_v25  ;;  %v3009_v4 = vpop.f32.mrf.mxu3  ;;  %v5847_v5 = vpack.c.bf16 %v976_v35, %v974_v17 }
 0x34e   : > { %v3200_v32 = vadd.f32 %v3009_v4, %v2706_v49  ;;  %v5877_v49 = vld [vmem:[%s4695_s6 + $0x230] sm:$0xff]  }
 0x34f   : > { %3972 = vst.msk [vmem:[%s4807_s14 + $0x154] sm:$0xf] %vm3886_vm4, %v3843_v47  ;;  %v1640_v55 = vpop.f32.mrf.mxu0  ;;  %v2172_v11 = vpop.f32.mrf.mxu1  ;;  %v4533_v47 = vunpack.c.l.bf16 %v5877_v49  ;;  %v4534_v4 = vunpack.c.h.bf16 %v5877_v49 }
 0x350   : > { %v3332_v10 = vadd.f32 %v5730_v26, %v3200_v32  ;;  %v2170_v61 = vadd.f32 %v2169_v14, %v1640_v55  ;;  %v4537_v32 = vunpack.c.l.bf16 %v5880_v50 }
 0x352   : > { %vm3460_vm12 = vcmp.gt.f32.partialorder %v3332_v10, 0.0  ;;  %v3588_v56 = vmul.f32 0.2, %v3332_v10  ;;  %v2517_v38 = vpop.f32.mrf.mxu2  ;;  %4204 = vmatmul.msk.bf16.gmra.mxu1 %vm1217_vm1, %v5782_v42 }
 0x353   : > { %v2707_v58 = vadd.f32 %v2517_v38, %v2170_v61  ;;  %v982_v61 = vrot.slane %v4534_v4, 1 }
 0x354   : > { %v3716_v63 = vsel %vm3460_vm12, %v3332_v10, %v3588_v56  ;;  %v984_v56 = vrot.slane %v4537_v32, 1 }
 0x355   : > { %v3844_v45 = vpack.c.bf16 %v3716_v63, %v3716_v63  ;;  %v3011_v3 = vpop.f32.mrf.mxu3 }
 0x356   : > { %v3201_v40 = vadd.f32 %v3011_v3, %v2707_v58  ;;  %v985_v3 = vsel %vm728_vm2, %v982_v61, %v984_v56 }
 0x357   : > { %3973 = vst.msk [vmem:[%s4807_s14 + $0x158] sm:$0xf] %vm3886_vm4, %v3844_v45  ;;  %v1643_v22 = vpop.f32.mrf.mxu0  ;;  %4274 = vmatmul.msk.bf16.gmra.mxu2 %vm1217_vm1, %v5843_v59  ;;  %v2174_v42 = vpop.f32.mrf.mxu1 }
 0x358   : > { %v3333_v6 = vadd.f32 %v5730_v26, %v3201_v40  ;;  %v2173_v48 = vadd.f32 %v2172_v11, %v1643_v22 }
 0x35a   : > { %vm3461_vm13 = vcmp.gt.f32.partialorder %v3333_v6, 0.0  ;;  %v3589_v12 = vmul.f32 0.2, %v3333_v6  ;;  %4136 = vmatmul.msk.bf16.gmra.mxu0 %vm1217_vm1, %v5801_v41  ;;  %v2520_v27 = vpop.f32.mrf.mxu2  ;;  %4344 = vmatmul.msk.bf16.gmra.mxu3 %vm1217_vm1, %v5847_v5 }
 0x35b   : > { %v2708_v13 = vadd.f32 %v2520_v27, %v2173_v48  ;;  %v316_v27 = vld [vmem:[%s4695_s6 + $0x240] sm:$0x1] }
 0x35c   : > { %v3717_v16 = vsel %vm3461_vm13, %v3333_v6, %v3589_v12 }
 0x35d   : > { %v3845_v18 = vpack.c.bf16 %v3717_v16, %v3717_v16  ;;  %v3014_v34 = vpop.f32.mrf.mxu3  ;;  %v4538_v16 = vunpack.c.h.bf16 %v5880_v50 }
 0x35e   : > { %v3202_v19 = vadd.f32 %v3014_v34, %v2708_v13 }
 0x35f   : > { %3974 = vst.msk [vmem:[%s4807_s14 + $0x15c] sm:$0xf] %vm3886_vm4, %v3845_v18  ;;  %v1645_v60 = vpop.f32.mrf.mxu0  ;;  %v2177_v2 = vpop.f32.mrf.mxu1  ;;  %v481_v18 = vunpack.c.l.bf16 %v316_v27 }
 0x360   : > { %v3334_v41 = vadd.f32 %v5730_v26, %v3202_v19  ;;  %v2175_v24 = vadd.f32 %v2174_v42, %v1645_v60 }
 0x362   : > { %vm3462_vm14 = vcmp.gt.f32.partialorder %v3334_v41, 0.0  ;;  %v3590_v8 = vmul.f32 0.2, %v3334_v41  ;;  %v2522_v62 = vpop.f32.mrf.mxu2  ;;  %4205 = vmatmul.msk.bf16.gmra.mxu1 %vm1217_vm1, %v5785_v43 }
 0x363   : > { %v2709_v28 = vadd.f32 %v2522_v62, %v2175_v24  ;;  %v988_v24 = vrot.slane %v481_v18, 1 }
 0x364   : > { %v3718_v33 = vsel %vm3462_vm14, %v3334_v41, %v3590_v8  ;;  %v986_v41 = vrot.slane %v4538_v16, 1  ;;  %v321_v16 = vld [vmem:[%s4695_s6 + $0x254] sm:$0x1] }
 0x365   : > { %v3846_v14 = vpack.c.bf16 %v3718_v33, %v3718_v33  ;;  %v3016_v23 = vpop.f32.mrf.mxu3 }
 0x366   : > { %v3203_v37 = vadd.f32 %v3016_v23, %v2709_v28  ;;  %v987_v15 = vsel %vm728_vm2, %v984_v56, %v986_v41  ;;  %v989_v33 = vsel %vm728_vm2, %v986_v41, %v988_v24 }
 0x367   : > { %3975 = vst.msk [vmem:[%s4807_s14 + $0x160] sm:$0xf] %vm3886_vm4, %v3846_v14  ;;  %v1648_v20 = vpop.f32.mrf.mxu0  ;;  %4275 = vmatmul.msk.bf16.gmra.mxu2 %vm1217_vm1, %v5865_v7  ;;  %v2179_v43 = vpop.f32.mrf.mxu1 }
 0x368   : > { %v3335_v39 = vadd.f32 %v5730_v26, %v3203_v37  ;;  %v2178_v1 = vadd.f32 %v2177_v2, %v1648_v20 }
 0x36a   : > { %vm3463_vm15 = vcmp.gt.f32.partialorder %v3335_v39, 0.0  ;;  %v3591_v44 = vmul.f32 0.2, %v3335_v39  ;;  %4137 = vmatmul.msk.bf16.gmra.mxu0 %vm1217_vm1, %v5821_v36  ;;  %v2525_v46 = vpop.f32.mrf.mxu2  ;;  %4345 = vmatmul.msk.bf16.gmra.mxu3 %vm1217_vm1, %v5869_v30  ;;  %v981_v36 = vrot.slane %v4533_v47, 1 }
 0x36b   : > { %v2710_v25 = vadd.f32 %v2525_v46, %v2178_v1  ;;  %v317_v46 = vld [vmem:[%s4695_s6 + $0x244] sm:$0xf] }
 0x36c   : > { %v3719_v55 = vsel %vm3463_vm15, %v3335_v39, %v3591_v44  ;;  %v983_v45 = vsel %vm728_vm2, %v981_v36, %v982_v61 }
 0x36d   : > { %v3847_v11 = vpack.c.bf16 %v3719_v55, %v3719_v55  ;;  %v3019_v52 = vpop.f32.mrf.mxu3  ;;  %v5896_v48 = vpack.c.bf16 %v985_v3, %v983_v45 }
 0x36e   : > { %v3204_v31 = vadd.f32 %v3019_v52, %v2710_v25  ;;  %v5925_v25 = vld [vmem:[%s4695_s6 + $0x248] sm:$0xff]   ;;  %v482_v52 = vunpack.c.l.bf16 %v317_v46 }
 0x36f   : > { %3976 = vst.msk [vmem:[%s4807_s14 + $0x164] sm:$0xf] %vm3886_vm4, %v3847_v11  ;;  %v1650_v53 = vpop.f32.mrf.mxu0  ;;  %v2182_v10 = vpop.f32.mrf.mxu1  ;;  %v4541_v55 = vunpack.c.l.bf16 %v5925_v25  ;;  %v4542_v11 = vunpack.c.h.bf16 %v5925_v25 }
 0x370   : > { %v3336_v38 = vadd.f32 %v5730_v26, %v3204_v31  ;;  %v2180_v58 = vadd.f32 %v2179_v43, %v1650_v53  ;;  %v5916_v43 = vpack.c.bf16 %v989_v33, %v987_v15 }
 0x372   : > { %vm3464_vm0 = vcmp.gt.f32.partialorder %v3336_v38, 0.0  ;;  %v3592_v17 = vmul.f32 0.2, %v3336_v38  ;;  %v2527_v35 = vpop.f32.mrf.mxu2  ;;  %4206 = vmatmul.msk.bf16.gmra.mxu1 %vm1217_vm1, %v5843_v59 }
 0x373   : > { %v2711_v63 = vadd.f32 %v2527_v35, %v2180_v58  ;;  %v993_v58 = vrot.slane %v4542_v11, 1 }
 0x374   : > { %v3720_v40 = vsel %vm3464_vm0, %v3336_v38, %v3592_v17  ;;  %v990_v38 = vrot.slane %v482_v52, 1 }
 0x375   : > { %v3848_v22 = vpack.c.bf16 %v3720_v40, %v3720_v40  ;;  %v3021_v42 = vpop.f32.mrf.mxu3  ;;  %v5938_v40 = vpack.c.bf16 %v4541_v55, %v482_v52 }
 0x376   : > { %v3205_v6 = vadd.f32 %v3021_v42, %v2711_v63 }
 0x377   : > { %3977 = vst.msk [vmem:[%s4807_s14 + $0x168] sm:$0xf] %vm3886_vm4, %v3848_v22  ;;  %v1653_v51 = vpop.f32.mrf.mxu0  ;;  %4276 = vmatmul.msk.bf16.gmra.mxu2 %vm1217_vm1, %v5877_v49  ;;  %v2184_v9 = vpop.f32.mrf.mxu1 }
 0x378   : > { %v3337_v59 = vadd.f32 %v5730_v26, %v3205_v6  ;;  %v2183_v12 = vadd.f32 %v2182_v10, %v1653_v51 }
 0x37a   : > { %vm3465_vm3 = vcmp.gt.f32.partialorder %v3337_v59, 0.0  ;;  %v3593_v13 = vmul.f32 0.2, %v3337_v59  ;;  %4138 = vmatmul.msk.bf16.gmra.mxu0 %vm1217_vm1, %v5847_v5  ;;  %v2530_v54 = vpop.f32.mrf.mxu2  ;;  %4346 = vmatmul.msk.bf16.gmra.mxu3 %vm1217_vm1, %v5896_v48 }
 0x37b   : > { %v2712_v57 = vadd.f32 %v2530_v54, %v2183_v12 }
 0x37c   : > { %v3721_v34 = vsel %vm3465_vm3, %v3337_v59, %v3593_v13 }
 0x37d   : > { %v3849_v19 = vpack.c.bf16 %v3721_v34, %v3721_v34  ;;  %v3024_v60 = vpop.f32.mrf.mxu3 }
 0x37e   : > { %v3206_v2 = vadd.f32 %v3024_v60, %v2712_v57  ;;  %v320_v57 = vld [vmem:[%s4695_s6 + $0x250] sm:$0xf] }
 0x37f   : > { %3978 = vst.msk [vmem:[%s4807_s14 + $0x16c] sm:$0xf] %vm3886_vm4, %v3849_v19  ;;  %v1655_v21 = vpop.f32.mrf.mxu0  ;;  %v2187_v0 = vpop.f32.mrf.mxu1  ;;  %v485_v60 = vunpack.c.l.bf16 %v320_v57 }
 0x380   : > { %v3338_v5 = vadd.f32 %v5730_v26, %v3206_v2  ;;  %v2185_v8 = vadd.f32 %v2184_v9, %v1655_v21  ;;  %v486_v2 = vunpack.c.l.bf16 %v321_v16 }
 0x382   : > { %vm3466_vm5 = vcmp.gt.f32.partialorder %v3338_v5, 0.0  ;;  %v3594_v62 = vmul.f32 0.2, %v3338_v5  ;;  %v2532_v28 = vpop.f32.mrf.mxu2  ;;  %4207 = vmatmul.msk.bf16.gmra.mxu1 %vm1217_vm1, %v5865_v7 }
 0x383   : > { %v2713_v29 = vadd.f32 %v2532_v28, %v2185_v8  ;;  %v997_v28 = vrot.slane %v486_v2, 1 }
 0x384   : > { %v3722_v14 = vsel %vm3466_vm5, %v3338_v5, %v3594_v62  ;;  %v995_v62 = vrot.slane %v485_v60, 1 }
 0x385   : > { %v3850_v23 = vpack.c.bf16 %v3722_v14, %v3722_v14  ;;  %v3026_v37 = vpop.f32.mrf.mxu3 }
 0x386   : > { %v3207_v20 = vadd.f32 %v3026_v37, %v2713_v29  ;;  %v996_v37 = vsel %vm728_vm2, %v993_v58, %v995_v62 }
 0x387   : > { %3979 = vst.msk [vmem:[%s4807_s14 + $0x170] sm:$0xf] %vm3886_vm4, %v3850_v23  ;;  %v1658_v39 = vpop.f32.mrf.mxu0  ;;  %4277 = vmatmul.msk.bf16.gmra.mxu2 %vm1217_vm1, %v5880_v50  ;;  %v2189_v1 = vpop.f32.mrf.mxu1  ;;  %v5960_v23 = vpack.c.bf16 %v485_v60, %v4542_v11 }
 0x388   : > { %v3339_v7 = vadd.f32 %v5730_v26, %v3207_v20  ;;  %v2188_v44 = vadd.f32 %v2187_v0, %v1658_v39  ;;  %v998_v20 = vsel %vm728_vm2, %v995_v62, %v997_v28 }
 0x389   : > { %v5964_v46 = vpack.c.bf16 %v998_v20, %v996_v37 }
 0x38a   : > { %vm3467_vm6 = vcmp.gt.f32.partialorder %v3339_v7, 0.0  ;;  %v3595_v47 = vmul.f32 0.2, %v3339_v7  ;;  %4139 = vmatmul.msk.bf16.gmra.mxu0 %vm1217_vm1, %v5869_v30  ;;  %v2535_v4 = vpop.f32.mrf.mxu2  ;;  %4347 = vmatmul.msk.bf16.gmra.mxu3 %vm1217_vm1, %v5916_v43  ;;  %v991_v30 = vrot.slane %v4541_v55, 1  ;;  %v5975_v55 = vld [vmem:[%s4695_s6 + $0x260] sm:$0xff]  }
 0x38b   : > { %v2714_v32 = vadd.f32 %v2535_v4, %v2188_v44 }
 0x38c   : > { %v3723_v31 = vsel %vm3467_vm6, %v3339_v7, %v3595_v47  ;;  %v992_v22 = vsel %vm728_vm2, %v990_v38, %v991_v30  ;;  %v994_v42 = vsel %vm728_vm2, %v991_v30, %v993_v58 }
 0x38d   : > { %v3851_v53 = vpack.c.bf16 %v3723_v31, %v3723_v31  ;;  %v3029_v10 = vpop.f32.mrf.mxu3  ;;  %v5942_v12 = vpack.c.bf16 %v994_v42, %v992_v22 }
 0x38e   : > { %v3208_v36 = vadd.f32 %v3029_v10, %v2714_v32  ;;  %v5972_v32 = vld [vmem:[%s4695_s6 + $0x258] sm:$0xff]  }
 0x38f   : > { %3980 = vst.msk [vmem:[%s4807_s14 + $0x174] sm:$0xf] %vm3886_vm4, %v3851_v53  ;;  %v1660_v61 = vpop.f32.mrf.mxu0  ;;  %v2192_v56 = vpop.f32.mrf.mxu1  ;;  %v4545_v53 = vunpack.c.l.bf16 %v5972_v32  ;;  %v4546_v10 = vunpack.c.h.bf16 %v5972_v32 }
 0x390   : > { %v3340_v17 = vadd.f32 %v5730_v26, %v3208_v36  ;;  %v2190_v35 = vadd.f32 %v2189_v1, %v1660_v61  ;;  %v4549_v36 = vunpack.c.l.bf16 %v5975_v55 }
 0x392   : > { %vm3468_vm7 = vcmp.gt.f32.partialorder %v3340_v17, 0.0  ;;  %v3596_v63 = vmul.f32 0.2, %v3340_v17  ;;  %v2537_v45 = vpop.f32.mrf.mxu2  ;;  %4208 = vmatmul.msk.bf16.gmra.mxu1 %vm1217_vm1, %v5877_v49 }
 0x393   : > { %v2715_v3 = vadd.f32 %v2537_v45, %v2190_v35  ;;  %v1000_v35 = vrot.slane %v4546_v10, 1 }
 0x394   : > { %v3724_v6 = vsel %vm3468_vm7, %v3340_v17, %v3596_v63  ;;  %v1002_v63 = vrot.slane %v4549_v36, 1 }
 0x395   : > { %v3852_v51 = vpack.c.bf16 %v3724_v6, %v3724_v6  ;;  %v3031_v9 = vpop.f32.mrf.mxu3 }
 0x396   : > { %v3209_v59 = vadd.f32 %v3031_v9, %v2715_v3  ;;  %v1003_v9 = vsel %vm728_vm2, %v1000_v35, %v1002_v63 }
 0x397   : > { %3981 = vst.msk [vmem:[%s4807_s14 + $0x178] sm:$0xf] %vm3886_vm4, %v3852_v51  ;;  %v1663_v27 = vpop.f32.mrf.mxu0  ;;  %4278 = vmatmul.msk.bf16.gmra.mxu2 %vm1217_vm1, %v5938_v40  ;;  %v2194_v49 = vpop.f32.mrf.mxu1 }
 0x398   : > { %v3341_v13 = vadd.f32 %v5730_v26, %v3209_v59  ;;  %v2193_v54 = vadd.f32 %v2192_v56, %v1663_v27 }
 0x39a   : > { %vm3469_vm8 = vcmp.gt.f32.partialorder %v3341_v13, 0.0  ;;  %v3597_v18 = vmul.f32 0.2, %v3341_v13  ;;  %4140 = vmatmul.msk.bf16.gmra.mxu0 %vm1217_vm1, %v5896_v48  ;;  %v2540_v34 = vpop.f32.mrf.mxu2  ;;  %4348 = vmatmul.msk.bf16.gmra.mxu3 %vm1217_vm1, %v5942_v12 }
 0x39b   : > { %v2716_v19 = vadd.f32 %v2540_v34, %v2193_v54  ;;  %v326_v34 = vld [vmem:[%s4695_s6 + $0x268] sm:$0x1] }
 0x39c   : > { %v3725_v21 = vsel %vm3469_vm8, %v3341_v13, %v3597_v18 }
 0x39d   : > { %v3853_v0 = vpack.c.bf16 %v3725_v21, %v3725_v21  ;;  %v3034_v41 = vpop.f32.mrf.mxu3  ;;  %v4550_v21 = vunpack.c.h.bf16 %v5975_v55 }
 0x39e   : > { %v3210_v24 = vadd.f32 %v3034_v41, %v2716_v19 }
 0x39f   : > { %3982 = vst.msk [vmem:[%s4807_s14 + $0x17c] sm:$0xf] %vm3886_vm4, %v3853_v0  ;;  %v1665_v5 = vpop.f32.mrf.mxu0  ;;  %v2197_v8 = vpop.f32.mrf.mxu1  ;;  %v491_v0 = vunpack.c.l.bf16 %v326_v34  ;;  %v6046_v34 = vld [vmem:[%s6172_s2] ss:$0 sm:$0xff] }
 0x3a0   : > { %v3342_v48 = vadd.f32 %v5730_v26, %v3210_v24  ;;  %v2195_v29 = vadd.f32 %v2194_v49, %v1665_v5 }
 0x3a2   : > { %vm3470_vm9 = vcmp.gt.f32.partialorder %v3342_v48, 0.0  ;;  %v3598_v15 = vmul.f32 0.2, %v3342_v48  ;;  %v2542_v33 = vpop.f32.mrf.mxu2  ;;  %4209 = vmatmul.msk.bf16.gmra.mxu1 %vm1217_vm1, %v5880_v50 }
 0x3a3   : > { %v2717_v14 = vadd.f32 %v2542_v33, %v2195_v29  ;;  %v1006_v29 = vrot.slane %v491_v0, 1 }
 0x3a4   : > { %v3726_v39 = vsel %vm3470_vm9, %v3342_v48, %v3598_v15  ;;  %v1004_v48 = vrot.slane %v4550_v21, 1  ;;  %v331_v21 = vld [vmem:[%s4695_s6 + $0x27c] sm:$0x1] }
 0x3a5   : > { %v3854_v1 = vpack.c.bf16 %v3726_v39, %v3726_v39  ;;  %v3036_v7 = vpop.f32.mrf.mxu3 }
 0x3a6   : > { %v3211_v44 = vadd.f32 %v3036_v7, %v2717_v14  ;;  %v1005_v20 = vsel %vm728_vm2, %v1002_v63, %v1004_v48  ;;  %v1007_v39 = vsel %vm728_vm2, %v1004_v48, %v1006_v29 }
 0x3a7   : > { %3983 = vst.msk [vmem:[%s4807_s14 + $0x180] sm:$0xf] %vm3886_vm4, %v3854_v1  ;;  %v1668_v25 = vpop.f32.mrf.mxu0  ;;  %4279 = vmatmul.msk.bf16.gmra.mxu2 %vm1217_vm1, %v5960_v23  ;;  %v2199_v50 = vpop.f32.mrf.mxu1 }
 0x3a8   : > { %v3343_v47 = vadd.f32 %v5730_v26, %v3211_v44  ;;  %v2198_v4 = vadd.f32 %v2197_v8, %v1668_v25 }
 0x3aa   : > { %vm3471_vm10 = vcmp.gt.f32.partialorder %v3343_v47, 0.0  ;;  %v3599_v11 = vmul.f32 0.2, %v3343_v47  ;;  %4141 = vmatmul.msk.bf16.gmra.mxu0 %vm1217_vm1, %v5916_v43  ;;  %v2545_v52 = vpop.f32.mrf.mxu2  ;;  %4349 = vmatmul.msk.bf16.gmra.mxu3 %vm1217_vm1, %v5964_v46  ;;  %v999_v43 = vrot.slane %v4545_v53, 1 }
 0x3ab   : > { %v2718_v31 = vadd.f32 %v2545_v52, %v2198_v4  ;;  %v327_v52 = vld [vmem:[%s4695_s6 + $0x26c] sm:$0xf] }
 0x3ac   : > { %v3727_v61 = vsel %vm3471_vm10, %v3343_v47, %v3599_v11  ;;  %v1001_v51 = vsel %vm728_vm2, %v999_v43, %v1000_v35 }
 0x3ad   : > { %v3855_v56 = vpack.c.bf16 %v3727_v61, %v3727_v61  ;;  %v3039_v38 = vpop.f32.mrf.mxu3  ;;  %v5991_v54 = vpack.c.bf16 %v1003_v9, %v1001_v51 }
 0x3ae   : > { %v3212_v30 = vadd.f32 %v3039_v38, %v2718_v31  ;;  %v6020_v31 = vld [vmem:[%s4695_s6 + $0x270] sm:$0xff]   ;;  %v492_v38 = vunpack.c.l.bf16 %v327_v52 }
 0x3af   : > { %3984 = vst.msk [vmem:[%s4807_s14 + $0x184] sm:$0xf] %vm3886_vm4, %v3855_v56  ;;  %v1670_v58 = vpop.f32.mrf.mxu0  ;;  %v2202_v17 = vpop.f32.mrf.mxu1  ;;  %v4553_v61 = vunpack.c.l.bf16 %v6020_v31  ;;  %v4554_v56 = vunpack.c.h.bf16 %v6020_v31 }
 0x3b0   : > { %v3344_v45 = vadd.f32 %v5730_v26, %v3212_v30  ;;  %v2200_v3 = vadd.f32 %v2199_v50, %v1670_v58  ;;  %v6011_v50 = vpack.c.bf16 %v1007_v39, %v1005_v20 }
 0x3b2   : > { %vm3472_vm11 = vcmp.gt.f32.partialorder %v3344_v45, 0.0  ;;  %v3600_v22 = vmul.f32 0.2, %v3344_v45  ;;  %v2547_v42 = vpop.f32.mrf.mxu2  ;;  %4210 = vmatmul.msk.bf16.gmra.mxu1 %vm1217_vm1, %v5938_v40 }
 0x3b3   : > { %v2719_v6 = vadd.f32 %v2547_v42, %v2200_v3  ;;  %v1011_v3 = vrot.slane %v4554_v56, 1 }
 0x3b4   : > { %v3728_v59 = vsel %vm3472_vm11, %v3344_v45, %v3600_v22  ;;  %v1008_v45 = vrot.slane %v492_v38, 1 }
 0x3b5   : > { %v3856_v27 = vpack.c.bf16 %v3728_v59, %v3728_v59  ;;  %v3041_v49 = vpop.f32.mrf.mxu3  ;;  %v6033_v59 = vpack.c.bf16 %v4553_v61, %v492_v38 }
 0x3b6   : > { %v3213_v13 = vadd.f32 %v3041_v49, %v2719_v6 }
 0x3b7   : > { %3985 = vst.msk [vmem:[%s4807_s14 + $0x188] sm:$0xf] %vm3886_vm4, %v3856_v27  ;;  %v1673_v57 = vpop.f32.mrf.mxu0  ;;  %4280 = vmatmul.msk.bf16.gmra.mxu2 %vm1217_vm1, %v5972_v32  ;;  %v2204_v16 = vpop.f32.mrf.mxu1 }
 0x3b8   : > { %v3345_v40 = vadd.f32 %v5730_v26, %v3213_v13  ;;  %v2203_v18 = vadd.f32 %v2202_v17, %v1673_v57 }
 0x3ba   : > { %vm3473_vm12 = vcmp.gt.f32.partialorder %v3345_v40, 0.0  ;;  %v3601_v19 = vmul.f32 0.2, %v3345_v40  ;;  %4142 = vmatmul.msk.bf16.gmra.mxu0 %vm1217_vm1, %v5942_v12  ;;  %v2550_v60 = vpop.f32.mrf.mxu2  ;;  %4350 = vmatmul.msk.bf16.gmra.mxu3 %vm1217_vm1, %v5991_v54 }
 0x3bb   : > { %v2720_v2 = vadd.f32 %v2550_v60, %v2203_v18 }
 0x3bc   : > { %v3729_v41 = vsel %vm3473_vm12, %v3345_v40, %v3601_v19 }
 0x3bd   : > { %v3857_v24 = vpack.c.bf16 %v3729_v41, %v3729_v41  ;;  %v3044_v5 = vpop.f32.mrf.mxu3 }
 0x3be   : > { %v3214_v8 = vadd.f32 %v3044_v5, %v2720_v2  ;;  %v330_v2 = vld [vmem:[%s4695_s6 + $0x278] sm:$0xf] }
 0x3bf   : > { %3986 = vst.msk [vmem:[%s4807_s14 + $0x18c] sm:$0xf] %vm3886_vm4, %v3857_v24  ;;  %v1675_v62 = vpop.f32.mrf.mxu0  ;;  %v2207_v28 = vpop.f32.mrf.mxu1  ;;  %v495_v5 = vunpack.c.l.bf16 %v330_v2 }
 0x3c0   : > { %v3346_v12 = vadd.f32 %v5730_v26, %v3214_v8  ;;  %v2205_v15 = vadd.f32 %v2204_v16, %v1675_v62  ;;  %v496_v8 = vunpack.c.l.bf16 %v331_v21 }
 0x3c2   : > { %vm3474_vm13 = vcmp.gt.f32.partialorder %v3346_v12, 0.0  ;;  %v3602_v33 = vmul.f32 0.2, %v3346_v12  ;;  %v2552_v14 = vpop.f32.mrf.mxu2  ;;  %4211 = vmatmul.msk.bf16.gmra.mxu1 %vm1217_vm1, %v5960_v23 }
 0x3c3   : > { %v2721_v37 = vadd.f32 %v2552_v14, %v2205_v15  ;;  %v1015_v14 = vrot.slane %v496_v8, 1 }
 0x3c4   : > { %v3730_v1 = vsel %vm3474_vm13, %v3346_v12, %v3602_v33  ;;  %v1013_v33 = vrot.slane %v495_v5, 1 }
 0x3c5   : > { %v3858_v7 = vpack.c.bf16 %v3730_v1, %v3730_v1  ;;  %v3046_v44 = vpop.f32.mrf.mxu3 }
 0x3c6   : > { %v3215_v25 = vadd.f32 %v3046_v44, %v2721_v37  ;;  %v1014_v44 = vsel %vm728_vm2, %v1011_v3, %v1013_v33 }
 0x3c7   : > { %3987 = vst.msk [vmem:[%s4807_s14 + $0x190] sm:$0xf] %vm3886_vm4, %v3858_v7  ;;  %v1678_v47 = vpop.f32.mrf.mxu0  ;;  %4281 = vmatmul.msk.bf16.gmra.mxu2 %vm1217_vm1, %v5975_v55  ;;  %v2209_v4 = vpop.f32.mrf.mxu1  ;;  %v6060_v7 = vpack.c.bf16 %v495_v5, %v4554_v56 }
 0x3c8   : > { %v3347_v23 = vadd.f32 %v5730_v26, %v3215_v25  ;;  %v2208_v11 = vadd.f32 %v2207_v28, %v1678_v47  ;;  %v1016_v25 = vsel %vm728_vm2, %v1013_v33, %v1015_v14 }
 0x3c9   : > { %v6064_v52 = vpack.c.bf16 %v1016_v25, %v1014_v44 }
 0x3ca   : > { %vm3475_vm14 = vcmp.gt.f32.partialorder %v3347_v23, 0.0  ;;  %v3603_v53 = vmul.f32 0.2, %v3347_v23  ;;  %4143 = vmatmul.msk.bf16.gmra.mxu0 %vm1217_vm1, %v5964_v46  ;;  %v2555_v10 = vpop.f32.mrf.mxu2  ;;  %4351 = vmatmul.msk.bf16.gmra.mxu3 %vm1217_vm1, %v6011_v50  ;;  %v1009_v46 = vrot.slane %v4553_v61, 1  ;;  %v6073_v61 = vld [vmem:[%s4695_s6 + $0x288] sm:$0xff]  }
 0x3cb   : > { %v2722_v36 = vadd.f32 %v2555_v10, %v2208_v11 }
 0x3cc   : > { %v3731_v30 = vsel %vm3475_vm14, %v3347_v23, %v3603_v53  ;;  %v1010_v27 = vsel %vm728_vm2, %v1008_v45, %v1009_v46  ;;  %v1012_v49 = vsel %vm728_vm2, %v1009_v46, %v1011_v3 }
 0x3cd   : > { %v3859_v58 = vpack.c.bf16 %v3731_v30, %v3731_v30  ;;  %v3049_v17 = vpop.f32.mrf.mxu3  ;;  %v6037_v40 = vpack.c.bf16 %v1012_v49, %v1010_v27 }
 0x3ce   : > { %v3216_v43 = vadd.f32 %v3049_v17, %v2722_v36  ;;  %v4610_v36 = vld [vmem:[%s4695_s6 + $0x280] sm:$0xff]  }
 0x3cf   : > { %3988 = vst.msk [vmem:[%s4807_s14 + $0x194] sm:$0xf] %vm3886_vm4, %v3859_v58  ;;  %v1680_v35 = vpop.f32.mrf.mxu0  ;;  %v2212_v63 = vpop.f32.mrf.mxu1  ;;  %v4557_v58 = vunpack.c.l.bf16 %v4610_v36  ;;  %v4558_v17 = vunpack.c.h.bf16 %v4610_v36 }
 0x3d0   : > { %v3348_v22 = vadd.f32 %v5730_v26, %v3216_v43  ;;  %v2210_v42 = vadd.f32 %v2209_v4, %v1680_v35  ;;  %v4561_v43 = vunpack.c.l.bf16 %v6073_v61 }
 0x3d2   : > { %vm3476_vm15 = vcmp.gt.f32.partialorder %v3348_v22, 0.0  ;;  %v3604_v6 = vmul.f32 0.2, %v3348_v22  ;;  %v2557_v51 = vpop.f32.mrf.mxu2  ;;  %4212 = vmatmul.msk.bf16.gmra.mxu1 %vm1217_vm1, %v5972_v32 }
 0x3d3   : > { %v2723_v9 = vadd.f32 %v2557_v51, %v2210_v42  ;;  %v2753_v42 = vrot.slane %v4557_v58, 1 }
 0x3d4   : > { %v3732_v13 = vsel %vm3476_vm15, %v3348_v22, %v3604_v6  ;;  %v2754_v6 = vrot.slane %v4558_v17, 1 }
 0x3d5   : > { %v3860_v57 = vpack.c.bf16 %v3732_v13, %v3732_v13  ;;  %v3051_v16 = vpop.f32.mrf.mxu3 }
 0x3d6   : > { %v3217_v26 = vadd.f32 %v3051_v16, %v2723_v9 }
 0x3d7   : > { %3989 = vst.msk [vmem:[%s4807_s14 + $0x198] sm:$0xf] %vm3886_vm4, %v3860_v57  ;;  %v1683_v18 = vpop.f32.mrf.mxu0  ;;  %4282 = vmatmul.msk.bf16.gmra.mxu2 %vm1217_vm1, %v6033_v59  ;;  %v2214_v32 = vpop.f32.mrf.mxu1  ;;  %v2755_v57 = vsel %vm728_vm2, %v2753_v42, %v2754_v6 }
 0x3d8   : > { %v3349_v19 = vadd.f32 %v6046_v34, %v3217_v26  ;;  %v2213_v60 = vadd.f32 %v2212_v63, %v1683_v18 }
 0x3da   : > { %vm3477_vm0 = vcmp.gt.f32.partialorder %v3349_v19, 0.0  ;;  %v3605_v0 = vmul.f32 0.2, %v3349_v19  ;;  %4144 = vmatmul.msk.bf16.gmra.mxu0 %vm1217_vm1, %v5991_v54  ;;  %v2560_v41 = vpop.f32.mrf.mxu2  ;;  %4352 = vmatmul.msk.bf16.gmra.mxu3 %vm1217_vm1, %v6037_v40 }
 0x3db   : > { %v2724_v24 = vadd.f32 %v2560_v41, %v2213_v60  ;;  %v336_v41 = vld [vmem:[%s4695_s6 + $0x290] sm:$0x1] }
 0x3dc   : > { %v3733_v62 = vsel %vm3477_vm0, %v3349_v19, %v3605_v0 }
 0x3dd   : > { %v3861_v28 = vpack.c.bf16 %v3733_v62, %v3733_v62  ;;  %v3054_v48 = vpop.f32.mrf.mxu3  ;;  %v4562_v62 = vunpack.c.h.bf16 %v6073_v61 }
 0x3de   : > { %v3218_v29 = vadd.f32 %v3054_v48, %v2724_v24 }
 0x3df   : > { %3990 = vst.msk [vmem:[%s4807_s14 + $0x19c] sm:$0xf] %vm3886_vm4, %v3861_v28  ;;  %v1685_v12 = vpop.f32.mrf.mxu0  ;;  %v2217_v15 = vpop.f32.mrf.mxu1  ;;  %v501_v28 = vunpack.c.l.bf16 %v336_v41 }
 0x3e0   : > { %v3350_v54 = vadd.f32 %v6046_v34, %v3218_v29  ;;  %v2215_v37 = vadd.f32 %v2214_v32, %v1685_v12 }
 0x3e2   : > { %vm3478_vm3 = vcmp.gt.f32.partialorder %v3350_v54, 0.0  ;;  %v3606_v20 = vmul.f32 0.2, %v3350_v54  ;;  %v2562_v39 = vpop.f32.mrf.mxu2  ;;  %4213 = vmatmul.msk.bf16.gmra.mxu1 %vm1217_vm1, %v5975_v55 }
 0x3e3   : > { %v2725_v1 = vadd.f32 %v2562_v39, %v2215_v37  ;;  %v2760_v37 = vrot.slane %v501_v28, 1 }
 0x3e4   : > { %v3734_v47 = vsel %vm3478_vm3, %v3350_v54, %v3606_v20  ;;  %v2758_v54 = vrot.slane %v4562_v62, 1 }
 0x3e5   : > { %v3862_v4 = vpack.c.bf16 %v3734_v47, %v3734_v47  ;;  %v3056_v23 = vpop.f32.mrf.mxu3 }
 0x3e6   : > { %v3219_v11 = vadd.f32 %v3056_v23, %v2725_v1  ;;  %v2761_v47 = vsel %vm728_vm2, %v2758_v54, %v2760_v37 }
 0x3e7   : > { %3991 = vst.msk [vmem:[%s4807_s14 + $0x1a0] sm:$0xf] %vm3886_vm4, %v3862_v4  ;;  %v1688_v31 = vpop.f32.mrf.mxu0  ;;  %4283 = vmatmul.msk.bf16.gmra.mxu2 %vm1217_vm1, %v6060_v7  ;;  %v2219_v55 = vpop.f32.mrf.mxu1 }
 0x3e8   : > { %v3351_v53 = vadd.f32 %v6046_v34, %v3219_v11  ;;  %v2218_v10 = vadd.f32 %v2217_v15, %v1688_v31 }
 0x3ea   : > { %vm3479_vm5 = vcmp.gt.f32.partialorder %v3351_v53, 0.0  ;;  %v3607_v56 = vmul.f32 0.2, %v3351_v53  ;;  %4145 = vmatmul.msk.bf16.gmra.mxu0 %vm1217_vm1, %v6011_v50  ;;  %v2565_v38 = vpop.f32.mrf.mxu2  ;;  %4353 = vmatmul.msk.bf16.gmra.mxu3 %vm1217_vm1, %v6064_v52  ;;  %v2756_v50 = vrot.slane %v4561_v43, 1 }
 0x3eb   : > { %v2726_v30 = vadd.f32 %v2565_v38, %v2218_v10 }
 0x3ec   : > { %v3735_v35 = vsel %vm3479_vm5, %v3351_v53, %v3607_v56  ;;  %v2757_v16 = vsel %vm728_vm2, %v2754_v6, %v2756_v50  ;;  %v2759_v25 = vsel %vm728_vm2, %v2756_v50, %v2758_v54 }
 0x3ed   : > { %v3863_v63 = vpack.c.bf16 %v3735_v35, %v3735_v35  ;;  %v3059_v45 = vpop.f32.mrf.mxu3  ;;  %v2766_v60 = vpack.c.bf16 %v2757_v16, %v2755_v57 }
 0x3ee   : > { %v3220_v46 = vadd.f32 %v3059_v45, %v2726_v30 }
 0x3ef   : > { %3992 = vst.msk [vmem:[%s4807_s14 + $0x1a4] sm:$0xf] %vm3886_vm4, %v3863_v63  ;;  %v1690_v3 = vpop.f32.mrf.mxu0  ;;  %v2222_v22 = vpop.f32.mrf.mxu1 }
 0x3f0   : > { %v3352_v51 = vadd.f32 %v6046_v34, %v3220_v46  ;;  %v2220_v9 = vadd.f32 %v2219_v55, %v1690_v3  ;;  %v2767_v55 = vpack.c.bf16 %v2761_v47, %v2759_v25 }
 0x3f2   : > { %vm3480_vm6 = vcmp.gt.f32.partialorder %v3352_v51, 0.0  ;;  %v3608_v27 = vmul.f32 0.2, %v3352_v51  ;;  %v2567_v49 = vpop.f32.mrf.mxu2  ;;  %4214 = vmatmul.msk.bf16.gmra.mxu1 %vm1217_vm1, %v6033_v59 }
 0x3f3   : > { %v2727_v13 = vadd.f32 %v2567_v49, %v2220_v9 }
 0x3f4   : > { %v3736_v26 = vsel %vm3480_vm6, %v3352_v51, %v3608_v27 }
 0x3f5   : > { %v3864_v18 = vpack.c.bf16 %v3736_v26, %v3736_v26  ;;  %v3061_v32 = vpop.f32.mrf.mxu3 }
 0x3f6   : > { %v3221_v19 = vadd.f32 %v3061_v32, %v2727_v13 }
 0x3f7   : > { %3993 = vst.msk [vmem:[%s4807_s14 + $0x1a8] sm:$0xf] %vm3886_vm4, %v3864_v18  ;;  %v1693_v2 = vpop.f32.mrf.mxu0  ;;  %4284 = vmatmul.msk.bf16.gmra.mxu2 %vm1217_vm1, %v4610_v36  ;;  %v2224_v21 = vpop.f32.mrf.mxu1 }
 0x3f8   : > { %v3353_v0 = vadd.f32 %v6046_v34, %v3221_v19  ;;  %v2223_v59 = vadd.f32 %v2222_v22, %v1693_v2 }
 0x3fa   : > { %vm3481_vm7 = vcmp.gt.f32.partialorder %v3353_v0, 0.0  ;;  %v3609_v24 = vmul.f32 0.2, %v3353_v0  ;;  %4146 = vmatmul.msk.bf16.gmra.mxu0 %vm1217_vm1, %v6037_v40  ;;  %v2570_v5 = vpop.f32.mrf.mxu2  ;;  %4354 = vmatmul.msk.bf16.gmra.mxu3 %vm1217_vm1, %v2766_v60 }
 0x3fb   : > { %v2728_v8 = vadd.f32 %v2570_v5, %v2223_v59 }
 0x3fc   : > { %v3737_v48 = vsel %vm3481_vm7, %v3353_v0, %v3609_v24 }
 0x3fd   : > { %v3865_v29 = vpack.c.bf16 %v3737_v48, %v3737_v48  ;;  %v3064_v12 = vpop.f32.mrf.mxu3 }
 0x3fe   : > { %v3222_v15 = vadd.f32 %v3064_v12, %v2728_v8 }
 0x3ff   : > { %3994 = vst.msk [vmem:[%s4807_s14 + $0x1ac] sm:$0xf] %vm3886_vm4, %v3865_v29  ;;  %v1695_v33 = vpop.f32.mrf.mxu0  ;;  %v2227_v14 = vpop.f32.mrf.mxu1 }
 0x400   : > { %v3354_v40 = vadd.f32 %v6046_v34, %v3222_v15  ;;  %v2225_v20 = vadd.f32 %v2224_v21, %v1695_v33 }
 0x402   : > { %vm3482_vm8 = vcmp.gt.f32.partialorder %v3354_v40, 0.0  ;;  %v3610_v39 = vmul.f32 0.2, %v3354_v40  ;;  %v2572_v1 = vpop.f32.mrf.mxu2  ;;  %4215 = vmatmul.msk.bf16.gmra.mxu1 %vm1217_vm1, %v6060_v7 }
 0x403   : > { %v2729_v44 = vadd.f32 %v2572_v1, %v2225_v20 }
 0x404   : > { %v3738_v4 = vsel %vm3482_vm8, %v3354_v40, %v3610_v39 }
 0x405   : > { %v3866_v23 = vpack.c.bf16 %v3738_v4, %v3738_v4  ;;  %v3066_v11 = vpop.f32.mrf.mxu3 }
 0x406   : > { %v3223_v31 = vadd.f32 %v3066_v11, %v2729_v44 }
 0x407   : > { %3995 = vst.msk [vmem:[%s4807_s14 + $0x1b0] sm:$0xf] %vm3886_vm4, %v3866_v23  ;;  %v1698_v53 = vpop.f32.mrf.mxu0  ;;  %4285 = vmatmul.msk.bf16.gmra.mxu2 %vm1217_vm1, %v6073_v61  ;;  %v2229_v10 = vpop.f32.mrf.mxu1 }
 0x408   : > { %v3355_v7 = vadd.f32 %v6046_v34, %v3223_v31  ;;  %v2228_v36 = vadd.f32 %v2227_v14, %v1698_v53 }
 0x40a   : > { %vm3483_vm9 = vcmp.gt.f32.partialorder %v3355_v7, 0.0  ;;  %v3611_v56 = vmul.f32 0.2, %v3355_v7  ;;  %4147 = vmatmul.msk.bf16.gmra.mxu0 %vm1217_vm1, %v6064_v52  ;;  %v2575_v38 = vpop.f32.mrf.mxu2  ;;  %4355 = vmatmul.msk.bf16.gmra.mxu3 %vm1217_vm1, %v2767_v55 }
 0x40b   : > { %v2730_v30 = vadd.f32 %v2575_v38, %v2228_v36 }
 0x40c   : > { %v3739_v58 = vsel %vm3483_vm9, %v3355_v7, %v3611_v56 }
 0x40d   : > { %v3867_v17 = vpack.c.bf16 %v3739_v58, %v3739_v58  ;;  %v3069_v43 = vpop.f32.mrf.mxu3 }
 0x40e   : > { %v3224_v35 = vadd.f32 %v3069_v43, %v2730_v30 }
 0x40f   : > { %3996 = vst.msk [vmem:[%s4807_s14 + $0x1b4] sm:$0xf] %vm3886_vm4, %v3867_v17  ;;  %v1700_v61 = vpop.f32.mrf.mxu0  ;;  %v2232_v63 = vpop.f32.mrf.mxu1 }
 0x410   : > { %v3356_v45 = vadd.f32 %v6046_v34, %v3224_v35  ;;  %v2230_v46 = vadd.f32 %v2229_v10, %v1700_v61 }
 0x412   : > { %vm3484_vm2 = vcmp.gt.f32.partialorder %v3356_v45, 0.0  ;;  %v3612_v3 = vmul.f32 0.2, %v3356_v45  ;;  %v2577_v22 = vpop.f32.mrf.mxu2 }
 0x413   : > { %v2731_v52 = vadd.f32 %v2577_v22, %v2230_v46 }
 0x414   : > { %v3740_v42 = vsel %vm3484_vm2, %v3356_v45, %v3612_v3 }
 0x415   : > { %v3868_v6 = vpack.c.bf16 %v3740_v42, %v3740_v42  ;;  %v3071_v50 = vpop.f32.mrf.mxu3 }
 0x416   : > { %v3225_v51 = vadd.f32 %v3071_v50, %v2731_v52 }
 0x417   : > { %3997 = vst.msk [vmem:[%s4807_s14 + $0x1b8] sm:$0xf] %vm3886_vm4, %v3868_v6  ;;  %v1703_v9 = vpop.f32.mrf.mxu0  ;;  %v2234_v27 = vpop.f32.mrf.mxu1 }
 0x418   : > { %v3357_v49 = vadd.f32 %v6046_v34, %v3225_v51  ;;  %v2233_v13 = vadd.f32 %v2232_v63, %v1703_v9 }
 0x41a   : > { %vm3485_vm1 = vcmp.gt.f32.partialorder %v3357_v49, 0.0  ;;  %v3613_v57 = vmul.f32 0.2, %v3357_v49  ;;  %v2580_v16 = vpop.f32.mrf.mxu2 }
 0x41b   : > { %v2732_v26 = vadd.f32 %v2580_v16, %v2233_v13 }
 0x41c   : > { %v3741_v18 = vsel %vm3485_vm1, %v3357_v49, %v3613_v57 }
 0x41d   : > { %v3869_v32 = vpack.c.bf16 %v3741_v18, %v3741_v18  ;;  %v3074_v19 = vpop.f32.mrf.mxu3 }
 0x41e   : > { %v3226_v60 = vadd.f32 %v3074_v19, %v2732_v26 }
 0x41f   : > { %3998 = vst.msk [vmem:[%s4807_s14 + $0x1bc] sm:$0xf] %vm3886_vm4, %v3869_v32  ;;  %v1705_v2 = vpop.f32.mrf.mxu0  ;;  %v2237_v21 = vpop.f32.mrf.mxu1 }
 0x420   : > { %v3358_v0 = vadd.f32 %v6046_v34, %v3226_v60  ;;  %v2235_v59 = vadd.f32 %v2234_v27, %v1705_v2 }
 0x422   : > { %vm3486_vm10 = vcmp.gt.f32.partialorder %v3358_v0, 0.0  ;;  %v3614_v41 = vmul.f32 0.2, %v3358_v0  ;;  %v2582_v24 = vpop.f32.mrf.mxu2 }
 0x423   : > { %v2733_v5 = vadd.f32 %v2582_v24, %v2235_v59 }
 0x424   : > { %v3742_v8 = vsel %vm3486_vm10, %v3358_v0, %v3614_v41 }
 0x425   : > { %v3870_v62 = vpack.c.bf16 %v3742_v8, %v3742_v8  ;;  %v3076_v28 = vpop.f32.mrf.mxu3 }
 0x426   : > { %v3227_v48 = vadd.f32 %v3076_v28, %v2733_v5 }
 0x427   : > { %3999 = vst.msk [vmem:[%s4807_s14 + $0x1c0] sm:$0xf] %vm3886_vm4, %v3870_v62  ;;  %v1708_v29 = vpop.f32.mrf.mxu0  ;;  %v2239_v12 = vpop.f32.mrf.mxu1 }
 0x428   : > { %v3359_v15 = vadd.f32 %v6046_v34, %v3227_v48  ;;  %v2238_v33 = vadd.f32 %v2237_v21, %v1708_v29 }
 0x42a   : > { %vm3487_vm11 = vcmp.gt.f32.partialorder %v3359_v15, 0.0  ;;  %v3615_v14 = vmul.f32 0.2, %v3359_v15  ;;  %v2585_v54 = vpop.f32.mrf.mxu2 }
 0x42b   : > { %v2734_v37 = vadd.f32 %v2585_v54, %v2238_v33 }
 0x42c   : > { %v3743_v40 = vsel %vm3487_vm11, %v3359_v15, %v3615_v14 }
 0x42d   : > { %v3871_v20 = vpack.c.bf16 %v3743_v40, %v3743_v40  ;;  %v3079_v39 = vpop.f32.mrf.mxu3 }
 0x42e   : > { %v3228_v1 = vadd.f32 %v3079_v39, %v2734_v37 }
 0x42f   : > { %4000 = vst.msk [vmem:[%s4807_s14 + $0x1c4] sm:$0xf] %vm3886_vm4, %v3871_v20  ;;  %v1710_v44 = vpop.f32.mrf.mxu0  ;;  %v2242_v25 = vpop.f32.mrf.mxu1 }
 0x430   : > { %v3360_v47 = vadd.f32 %v6046_v34, %v3228_v1  ;;  %v2240_v4 = vadd.f32 %v2239_v12, %v1710_v44 }
 0x432   : > { %vm3488_vm12 = vcmp.gt.f32.partialorder %v3360_v47, 0.0  ;;  %v3616_v23 = vmul.f32 0.2, %v3360_v47  ;;  %v2587_v11 = vpop.f32.mrf.mxu2 }
 0x433   : > { %v2735_v31 = vadd.f32 %v2587_v11, %v2240_v4 }
 0x434   : > { %v3744_v55 = vsel %vm3488_vm12, %v3360_v47, %v3616_v23 }
 0x435   : > { %v3872_v53 = vpack.c.bf16 %v3744_v55, %v3744_v55  ;;  %v3081_v10 = vpop.f32.mrf.mxu3 }
 0x436   : > { %v3229_v7 = vadd.f32 %v3081_v10, %v2735_v31 }
 0x437   : > { %4001 = vst.msk [vmem:[%s4807_s14 + $0x1c8] sm:$0xf] %vm3886_vm4, %v3872_v53  ;;  %v1713_v36 = vpop.f32.mrf.mxu0  ;;  %v2244_v56 = vpop.f32.mrf.mxu1 }
 0x438   : > { %v3361_v38 = vadd.f32 %v6046_v34, %v3229_v7  ;;  %v2243_v30 = vadd.f32 %v2242_v25, %v1713_v36 }
 0x43a   : > { %vm3489_vm13 = vcmp.gt.f32.partialorder %v3361_v38, 0.0  ;;  %v3617_v58 = vmul.f32 0.2, %v3361_v38  ;;  %v2590_v17 = vpop.f32.mrf.mxu2 }
 0x43b   : > { %v2736_v43 = vadd.f32 %v2590_v17, %v2243_v30 }
 0x43c   : > { %v3745_v35 = vsel %vm3489_vm13, %v3361_v38, %v3617_v58 }
 0x43d   : > { %v3873_v61 = vpack.c.bf16 %v3745_v35, %v3745_v35  ;;  %v3084_v63 = vpop.f32.mrf.mxu3 }
 0x43e   : > { %v3230_v45 = vadd.f32 %v3084_v63, %v2736_v43 }
 0x43f   : > { %4002 = vst.msk [vmem:[%s4807_s14 + $0x1cc] sm:$0xf] %vm3886_vm4, %v3873_v61  ;;  %v1715_v46 = vpop.f32.mrf.mxu0  ;;  %v2247_v3 = vpop.f32.mrf.mxu1 }
 0x440   : > { %v3362_v22 = vadd.f32 %v6046_v34, %v3230_v45  ;;  %v2245_v52 = vadd.f32 %v2244_v56, %v1715_v46 }
 0x442   : > { %vm3490_vm14 = vcmp.gt.f32.partialorder %v3362_v22, 0.0  ;;  %v3618_v42 = vmul.f32 0.2, %v3362_v22  ;;  %v2592_v6 = vpop.f32.mrf.mxu2 }
 0x443   : > { %v2737_v50 = vadd.f32 %v2592_v6, %v2245_v52 }
 0x444   : > { %v3746_v51 = vsel %vm3490_vm14, %v3362_v22, %v3618_v42 }
 0x445   : > { %v3874_v9 = vpack.c.bf16 %v3746_v51, %v3746_v51  ;;  %v3086_v27 = vpop.f32.mrf.mxu3 }
 0x446   : > { %v3231_v49 = vadd.f32 %v3086_v27, %v2737_v50 }
 0x447   : > { %4003 = vst.msk [vmem:[%s4807_s14 + $0x1d0] sm:$0xf] %vm3886_vm4, %v3874_v9  ;;  %v1718_v13 = vpop.f32.mrf.mxu0  ;;  %v2249_v57 = vpop.f32.mrf.mxu1 }
 0x448   : > { %v3363_v16 = vadd.f32 %v6046_v34, %v3231_v49  ;;  %v2248_v26 = vadd.f32 %v2247_v3, %v1718_v13 }
 0x44a   : > { %vm3491_vm15 = vcmp.gt.f32.partialorder %v3363_v16, 0.0  ;;  %v3619_v18 = vmul.f32 0.2, %v3363_v16  ;;  %v2595_v32 = vpop.f32.mrf.mxu2 }
 0x44b   : > { %v2738_v19 = vadd.f32 %v2595_v32, %v2248_v26 }
 0x44c   : > { %v3747_v60 = vsel %vm3491_vm15, %v3363_v16, %v3619_v18 }
 0x44d   : > { %v3875_v2 = vpack.c.bf16 %v3747_v60, %v3747_v60  ;;  %v3089_v21 = vpop.f32.mrf.mxu3 }
 0x44e   : > { %v3232_v0 = vadd.f32 %v3089_v21, %v2738_v19 }
 0x44f   : > { %4004 = vst.msk [vmem:[%s4807_s14 + $0x1d4] sm:$0xf] %vm3886_vm4, %v3875_v2  ;;  %v1720_v59 = vpop.f32.mrf.mxu0  ;;  %v2252_v41 = vpop.f32.mrf.mxu1 }
 0x450   : > { %v3364_v24 = vadd.f32 %v6046_v34, %v3232_v0  ;;  %v2250_v5 = vadd.f32 %v2249_v57, %v1720_v59 }
 0x452   : > { %vm3492_vm0 = vcmp.gt.f32.partialorder %v3364_v24, 0.0  ;;  %v3620_v8 = vmul.f32 0.2, %v3364_v24  ;;  %v2597_v62 = vpop.f32.mrf.mxu2 }
 0x453   : > { %v2739_v28 = vadd.f32 %v2597_v62, %v2250_v5 }
 0x454   : > { %v3748_v48 = vsel %vm3492_vm0, %v3364_v24, %v3620_v8 }
 0x455   : > { %v3876_v29 = vpack.c.bf16 %v3748_v48, %v3748_v48  ;;  %v3091_v12 = vpop.f32.mrf.mxu3 }
 0x456   : > { %v3233_v15 = vadd.f32 %v3091_v12, %v2739_v28 }
 0x457   : > { %4005 = vst.msk [vmem:[%s4807_s14 + $0x1d8] sm:$0xf] %vm3886_vm4, %v3876_v29  ;;  %v1723_v33 = vpop.f32.mrf.mxu0  ;;  %v2254_v14 = vpop.f32.mrf.mxu1 }
 0x458   : > { %v3365_v54 = vadd.f32 %v6046_v34, %v3233_v15  ;;  %v2253_v37 = vadd.f32 %v2252_v41, %v1723_v33 }
 0x45a   : > { %vm3493_vm3 = vcmp.gt.f32.partialorder %v3365_v54, 0.0  ;;  %v3621_v40 = vmul.f32 0.2, %v3365_v54  ;;  %v2600_v20 = vpop.f32.mrf.mxu2 }
 0x45b   : > { %v2740_v39 = vadd.f32 %v2600_v20, %v2253_v37 }
 0x45c   : > { %v3749_v1 = vsel %vm3493_vm3, %v3365_v54, %v3621_v40 }
 0x45d   : > { %v3877_v44 = vpack.c.bf16 %v3749_v1, %v3749_v1  ;;  %v3094_v25 = vpop.f32.mrf.mxu3 }
 0x45e   : > { %v3234_v47 = vadd.f32 %v3094_v25, %v2740_v39 }
 0x45f   : > { %4006 = vst.msk [vmem:[%s4807_s14 + $0x1dc] sm:$0xf] %vm3886_vm4, %v3877_v44  ;;  %v1725_v4 = vpop.f32.mrf.mxu0  ;;  %v2257_v23 = vpop.f32.mrf.mxu1 }
 0x460   : > { %v3366_v11 = vadd.f32 %v6046_v34, %v3234_v47  ;;  %v2255_v31 = vadd.f32 %v2254_v14, %v1725_v4 }
 0x462   : > { %vm3494_vm5 = vcmp.gt.f32.partialorder %v3366_v11, 0.0  ;;  %v3622_v55 = vmul.f32 0.2, %v3366_v11  ;;  %v2602_v53 = vpop.f32.mrf.mxu2 }
 0x463   : > { %v2741_v10 = vadd.f32 %v2602_v53, %v2255_v31 }
 0x464   : > { %v3750_v7 = vsel %vm3494_vm5, %v3366_v11, %v3622_v55 }
 0x465   : > { %v3878_v36 = vpack.c.bf16 %v3750_v7, %v3750_v7  ;;  %v3096_v56 = vpop.f32.mrf.mxu3 }
 0x466   : > { %v3235_v38 = vadd.f32 %v3096_v56, %v2741_v10 }
 0x467   : > { %4007 = vst.msk [vmem:[%s4807_s14 + $0x1e0] sm:$0xf] %vm3886_vm4, %v3878_v36  ;;  %v1728_v30 = vpop.f32.mrf.mxu0  ;;  %v2259_v58 = vpop.f32.mrf.mxu1 }
 0x468   : > { %v3367_v17 = vadd.f32 %v6046_v34, %v3235_v38  ;;  %v2258_v43 = vadd.f32 %v2257_v23, %v1728_v30 }
 0x46a   : > { %vm3495_vm6 = vcmp.gt.f32.partialorder %v3367_v17, 0.0  ;;  %v3623_v35 = vmul.f32 0.2, %v3367_v17  ;;  %v2605_v61 = vpop.f32.mrf.mxu2 }
 0x46b   : > { %v2742_v63 = vadd.f32 %v2605_v61, %v2258_v43 }
 0x46c   : > { %v3751_v45 = vsel %vm3495_vm6, %v3367_v17, %v3623_v35 }
 0x46d   : > { %v3879_v46 = vpack.c.bf16 %v3751_v45, %v3751_v45  ;;  %v3099_v3 = vpop.f32.mrf.mxu3 }
 0x46e   : > { %v3236_v22 = vadd.f32 %v3099_v3, %v2742_v63 }
 0x46f   : > { %4008 = vst.msk [vmem:[%s4807_s14 + $0x1e4] sm:$0xf] %vm3886_vm4, %v3879_v46  ;;  %v1730_v52 = vpop.f32.mrf.mxu0  ;;  %v2262_v50 = vpop.f32.mrf.mxu1 }
 0x470   : > { %v3368_v42 = vadd.f32 %v6046_v34, %v3236_v22  ;;  %v2260_v6 = vadd.f32 %v2259_v58, %v1730_v52 }
 0x472   : > { %vm3496_vm7 = vcmp.gt.f32.partialorder %v3368_v42, 0.0  ;;  %v3624_v51 = vmul.f32 0.2, %v3368_v42  ;;  %v2607_v9 = vpop.f32.mrf.mxu2 }
 0x473   : > { %v2743_v27 = vadd.f32 %v2607_v9, %v2260_v6 }
 0x474   : > { %v3752_v49 = vsel %vm3496_vm7, %v3368_v42, %v3624_v51 }
 0x475   : > { %v3880_v13 = vpack.c.bf16 %v3752_v49, %v3752_v49  ;;  %v3101_v57 = vpop.f32.mrf.mxu3 }
 0x476   : > { %v3237_v16 = vadd.f32 %v3101_v57, %v2743_v27 }
 0x477   : > { %4009 = vst.msk [vmem:[%s4807_s14 + $0x1e8] sm:$0xf] %vm3886_vm4, %v3880_v13  ;;  %v1733_v26 = vpop.f32.mrf.mxu0  ;;  %v2264_v2 = vpop.f32.mrf.mxu1 }
 0x478   : > { %v3369_v18 = vadd.f32 %v6046_v34, %v3237_v16  ;;  %v2263_v32 = vadd.f32 %v2262_v50, %v1733_v26 }
 0x47a   : > { %vm3497_vm8 = vcmp.gt.f32.partialorder %v3369_v18, 0.0  ;;  %v3625_v19 = vmul.f32 0.2, %v3369_v18  ;;  %v2610_v60 = vpop.f32.mrf.mxu2 }
 0x47b   : > { %v2744_v21 = vadd.f32 %v2610_v60, %v2263_v32 }
 0x47c   : > { %v3753_v0 = vsel %vm3497_vm8, %v3369_v18, %v3625_v19 }
 0x47d   : > { %v3881_v59 = vpack.c.bf16 %v3753_v0, %v3753_v0  ;;  %v3104_v41 = vpop.f32.mrf.mxu3 }
 0x47e   : > { %v3238_v24 = vadd.f32 %v3104_v41, %v2744_v21 }
 0x47f   : > { %4010 = vst.msk [vmem:[%s4807_s14 + $0x1ec] sm:$0xf] %vm3886_vm4, %v3881_v59  ;;  %v1735_v5 = vpop.f32.mrf.mxu0  ;;  %v2267_v33 = vpop.f32.mrf.mxu1 }
 0x480   : > { %v3370_v8 = vadd.f32 %v6046_v34, %v3238_v24  ;;  %v2265_v62 = vadd.f32 %v2264_v2, %v1735_v5 }
 0x482   : > { %vm3498_vm9 = vcmp.gt.f32.partialorder %v3370_v8, 0.0  ;;  %v3626_v28 = vmul.f32 0.2, %v3370_v8  ;;  %v2612_v48 = vpop.f32.mrf.mxu2 }
 0x483   : > { %v2745_v29 = vadd.f32 %v2612_v48, %v2265_v62 }
 0x484   : > { %v3754_v12 = vsel %vm3498_vm9, %v3370_v8, %v3626_v28 }
 0x485   : > { %v3882_v15 = vpack.c.bf16 %v3754_v12, %v3754_v12  ;;  %v3106_v14 = vpop.f32.mrf.mxu3 }
 0x486   : > { %v3239_v54 = vadd.f32 %v3106_v14, %v2745_v29 }
 0x487   : > { %4011 = vst.msk [vmem:[%s4807_s14 + $0x1f0] sm:$0xf] %vm3886_vm4, %v3882_v15  ;;  %v1738_v37 = vpop.f32.mrf.mxu0  ;;  %v2269_v11 = vpop.f32.mrf.mxu1 }
 0x488   : > { %v3371_v40 = vadd.f32 %v6046_v34, %v3239_v54  ;;  %v2268_v20 = vadd.f32 %v2267_v33, %v1738_v37 }
 0x48a   : > { %vm3499_vm2 = vcmp.gt.f32.partialorder %v3371_v40, 0.0  ;;  %v3627_v39 = vmul.f32 0.2, %v3371_v40  ;;  %v2615_v1 = vpop.f32.mrf.mxu2 }
 0x48b   : > { %v2746_v44 = vadd.f32 %v2615_v1, %v2268_v20 }
 0x48c   : > { %v3755_v25 = vsel %vm3499_vm2, %v3371_v40, %v3627_v39 }
 0x48d   : > { %v3883_v47 = vpack.c.bf16 %v3755_v25, %v3755_v25  ;;  %v3109_v4 = vpop.f32.mrf.mxu3 }
 0x48e   : > { %v3240_v23 = vadd.f32 %v3109_v4, %v2746_v44 }
 0x48f   : > { %4012 = vst.msk [vmem:[%s4807_s14 + $0x1f4] sm:$0xf] %vm3886_vm4, %v3883_v47  ;;  %v1740_v31 = vpop.f32.mrf.mxu0 }
 0x490   : > { %v3372_v55 = vadd.f32 %v6046_v34, %v3240_v23  ;;  %v2270_v53 = vadd.f32 %v2269_v11, %v1740_v31 }
 0x492   : > { %vm3500_vm1 = vcmp.gt.f32.partialorder %v3372_v55, 0.0  ;;  %v3628_v10 = vmul.f32 0.2, %v3372_v55  ;;  %v2617_v7 = vpop.f32.mrf.mxu2 }
 0x493   : > { %v2747_v36 = vadd.f32 %v2617_v7, %v2270_v53 }
 0x494   : > { %v3756_v56 = vsel %vm3500_vm1, %v3372_v55, %v3628_v10 }
 0x495   : > { %v3884_v38 = vpack.c.bf16 %v3756_v56, %v3756_v56  ;;  %v3111_v30 = vpop.f32.mrf.mxu3 }
 0x496   : > { %v3241_v58 = vadd.f32 %v3111_v30, %v2747_v36 }
 0x497   : > { %4013 = vst.msk [vmem:[%s4807_s14 + $0x1f8] sm:$0xf] %vm3886_vm4, %v3884_v38 }
 0x498   : > { %v3373_v17 = vadd.f32 %v6046_v34, %v3241_v58 }
 0x49a   : > { %vm3501_vm10 = vcmp.gt.f32.partialorder %v3373_v17, 0.0  ;;  %v3629_v43 = vmul.f32 0.2, %v3373_v17 }
 0x49c   : > { %v3757_v35 = vsel %vm3501_vm10, %v3373_v17, %v3629_v43 }
 0x49d   : > { %v3885_v61 = vpack.c.bf16 %v3757_v35, %v3757_v35 }
 0x49f   : > { %4014 = vst.msk [vmem:[%s4807_s14 + $0x1fc] sm:$0xf] %vm3886_vm4, %v3885_v61 }
 0x4a0 PF: > { %s13_s12 = sadd.s32 1, %s4632_s12  }
 0x4a1   : > { %p10_p4 = scmp.ge.s32.totalorder %s13_s12, 4  }
 0x4a3   :  { %12 = sbr.rel (!%p10_p4) target bundleno = 1 (0x1), region = 65 }

// kernel: critic_forward.5
= control target key start
LH: loop header
LB: loop body
LE: loop exit
PB: predicated region body
PF: predicated region fallthrough
CT: control target
= control target key end

     0   :  { %s1829_s15 = smov 0   ;;  %s2549_s0 = inlined_call_operand.vmem [shape: bf16[2,17,17,32], index: 0, kind: input, shape index: {}]   ;;  %s2550_s1 = inlined_call_operand.vmem [shape: bf16[4,32,16], index: 1, kind: input, shape index: {}]   ;;  %s2551_s2 = inlined_call_operand.vmem [shape: f32[1,16], index: 2, kind: input, shape index: {}]   ;;  %s2552_s3 = inlined_call_operand.vmem [shape: f32[1,16], index: 3, kind: input, shape index: {}]   ;;  %s2553_s4 = inlined_call_operand.vmem [shape: bf16[2,256,16], index: 4, kind: output, shape index: {}]  }
   0x1 LB: > { %s1610_s16 = sadd.s32 4294967295, %s1801_s15   ;;  %p1614_p0 = scmp.ge.s32.totalorder %s1801_s15, 1  ;;  %s1801_s15 = sphi %s1829_s15, %s14_s15  }
   0x2   : > { %p162_p1 = scmp.lt.s32.totalorder %s1801_s15, 3 }
   0x4   : > { %p163_p2 = pnand %p1614_p0, %p162_p1 }
   0x6   : > { %166 = sbr.rel (%p163_p2) target bundleno = 585 (0x249), region = 36 }
   0xb   : > { %v1730_v0 = vld [vmem:[%s2550_s1 + $0x8] sm:$0xff]  ;;  %p188_p3 = scmp.lt.s32.totalorder %s1610_s16, 1  ;;  %v1732_v2 = vld [vmem:[%s2550_s1 + $0x18] sm:$0xff]  ;;  %v1729_v4 = vld [vmem:[%s2550_s1] sm:$0xff]  ;;  %vm515_vm0 = vcmask 261120   ;;  %vm369_vm1 = vcmask 1046528  }
   0xc   : > { %v1734_v1 = vld [vmem:[%s2550_s1 + $0x28] sm:$0xff]  ;;  %v1736_v3 = vld [vmem:[%s2550_s1 + $0x38] sm:$0xff]  ;;  %719 = vmatpush.bf16.msra.mxu1 %v1730_v0  ;;  %v1733_v5 = vld [vmem:[%s2550_s1 + $0x20] sm:$0xff]  ;;  %570 = vmatpush.bf16.msra.mxu0 %v1732_v2  ;;  %vm1096_vm2 = vcmask 130048  }
   0xd   : > { %829 = vmatpush.bf16.msra.mxu2 %v1734_v1  ;;  %s2563_s16 = smov (!%p188_p3, %s1610_s16), 1  ;;  %981 = vmatpush.bf16.msra.mxu3 %v1736_v3  ;;  %v1731_v6 = vld [vmem:[%s2550_s1 + $0x10] sm:$0xff] }
   0xe   : > { %v1735_v7 = vld [vmem:[%s2550_s1 + $0x30] sm:$0xff]  ;;  %s1781_s7 = smul.u32 204, %s2563_s16  ;;  %s1728_s17 = sshll.u32 %s2563_s16, 7 }
   0xf   : > { %s2362_s20 = scalar_lea.vmem %s2553_s4, %s1728_s17 }
  0x10   : > { %720 = vmatpush.bf16.msra.mxu1 %v1729_v4  ;;  %s1867_s10 = scalar_lea.vmem %s2549_s0, %s1781_s7  ;;  %571 = vmatpush.bf16.msra.mxu0 %v1731_v6 }
  0x11   : > { %830 = vmatpush.bf16.msra.mxu2 %v1733_v5  ;;  %v1738_v8 = vld [vmem:[%s1867_s10] sm:$0xff]   ;;  %v202_v9 = vld [vmem:[%s1867_s10 + $0xc] sm:$0xff]   ;;  %982 = vmatpush.bf16.msra.mxu3 %v1735_v7  ;;  %v201_v10 = vld [vmem:[%s1867_s10 + $0x8] sm:$0x1] }
  0x12   : > { %v1739_v11 = vunpack.c.l.bf16 %v1738_v8  ;;  %v1740_v12 = vunpack.c.h.bf16 %v1738_v8  ;;  %v253_v13 = vunpack.c.l.bf16 %v202_v9  ;;  %v254_v14 = vunpack.c.h.bf16 %v202_v9  ;;  %v204_v15 = vld [vmem:[%s1867_s10 + $0x14] sm:$0x1]  ;;  %v1773_v30 = vld [vmem:[%s1867_s10 + $0x18] sm:$0xff]   ;;  %v207_v31 = vld [vmem:[%s1867_s10 + $0x20] sm:$0x1] }
  0x13   : > { %1654 = vmatmul.msk.bf16.vlgmr.msra.gmra.mxu1 %vm515_vm0, %v1738_v8  ;;  %v252_v16 = vunpack.c.l.bf16 %v201_v10  ;;  %v255_v17 = vunpack.c.l.bf16 %v204_v15  ;;  %v1743_v32 = vunpack.c.l.bf16 %v1773_v30  ;;  %v1744_v33 = vunpack.c.h.bf16 %v1773_v30  ;;  %v208_v41 = vld [vmem:[%s1867_s10 + $0x24] sm:$0xff]   ;;  %v210_v42 = vld [vmem:[%s1867_s10 + $0x2c] sm:$0x1]  ;;  %v1774_v52 = vld [vmem:[%s1867_s10 + $0x30] sm:$0xff]  }
  0x14   : > { %v370_v18 = vrot.slane %v1739_v11, 1  ;;  %v371_v19 = vrot.slane %v1740_v12, 1  ;;  %v375_v20 = vrot.slane %v253_v13, 1  ;;  %v376_v21 = vrot.slane %v254_v14, 1  ;;  %1682 = vmatmul.msk.bf16.vlgmr.msra.gmra.mxu2 %vm515_vm0, %v202_v9  ;;  %v213_v53 = vld [vmem:[%s1867_s10 + $0x38] sm:$0x1] }
  0x15   : > { %v373_v22 = vrot.slane %v252_v16, 1  ;;  %v378_v23 = vrot.slane %v255_v17, 1  ;;  %v258_v34 = vunpack.c.l.bf16 %v207_v31  ;;  %v380_v35 = vrot.slane %v1743_v32, 1  ;;  %v214_v63 = vld [vmem:[%s1867_s10 + $0x3c] sm:$0xff]   ;;  %v216_v0 = vld [vmem:[%s1867_s10 + $0x44] sm:$0x1] }
  0x16   : > { %v372_v24 = vsel %vm369_vm1, %v370_v18, %v371_v19  ;;  %v377_v26 = vsel %vm369_vm1, %v375_v20, %v376_v21  ;;  %v381_v36 = vrot.slane %v1744_v33, 1  ;;  %v259_v43 = vunpack.c.l.bf16 %v208_v41  ;;  %v1775_v10 = vld [vmem:[%s1867_s10 + $0x48] sm:$0xff]   ;;  %v219_v11 = vld [vmem:[%s1867_s10 + $0x50] sm:$0x1]  ;;  %v1776_v32 = vld [vmem:[%s1867_s10 + $0x60] sm:$0xff]  }
  0x17   : > { %v374_v25 = vsel %vm369_vm1, %v371_v19, %v373_v22  ;;  %v379_v27 = vsel %vm369_vm1, %v376_v21, %v378_v23  ;;  %v383_v37 = vrot.slane %v258_v34, 1  ;;  %v260_v44 = vunpack.c.h.bf16 %v208_v41  ;;  %v220_v21 = vld [vmem:[%s1867_s10 + $0x54] sm:$0xff]   ;;  %v222_v22 = vld [vmem:[%s1867_s10 + $0x5c] sm:$0x1]  ;;  %v225_v33 = vld [vmem:[%s1867_s10 + $0x68] sm:$0x1] }
  0x18   : > { %v482_v28 = vpack.c.bf16 %v374_v25, %v372_v24  ;;  %v483_v29 = vpack.c.bf16 %v379_v27, %v377_v26  ;;  %v382_v38 = vsel %vm369_vm1, %v380_v35, %v381_v36  ;;  %v261_v45 = vunpack.c.l.bf16 %v210_v42 }
  0x19   : > { %v384_v39 = vsel %vm369_vm1, %v381_v36, %v383_v37  ;;  %v385_v46 = vrot.slane %v259_v43, 1  ;;  %v386_v47 = vrot.slane %v260_v44, 1  ;;  %v1747_v54 = vunpack.c.l.bf16 %v1774_v52  ;;  %v226_v43 = vld [vmem:[%s1867_s10 + $0x6c] sm:$0xff]   ;;  %v228_v44 = vld [vmem:[%s1867_s10 + $0x74] sm:$0x1] }
  0x1a   : > { %1630 = vmatmul.msk.bf16.vlgmr.msra.gmra.mxu0 %vm515_vm0, %v482_v28  ;;  %1710 = vmatmul.msk.bf16.vlgmr.msra.gmra.mxu3 %vm515_vm0, %v483_v29  ;;  %v484_v40 = vpack.c.bf16 %v384_v39, %v382_v38  ;;  %v388_v48 = vrot.slane %v261_v45, 1  ;;  %v1748_v55 = vunpack.c.h.bf16 %v1774_v52  ;;  %v264_v56 = vunpack.c.l.bf16 %v213_v53 }
  0x1b   : > { %v387_v49 = vsel %vm369_vm1, %v385_v46, %v386_v47  ;;  %v390_v57 = vrot.slane %v1747_v54, 1  ;;  %v265_v1 = vunpack.c.l.bf16 %v214_v63  ;;  %v266_v2 = vunpack.c.h.bf16 %v214_v63 }
  0x1c   : > { %v389_v50 = vsel %vm369_vm1, %v386_v47, %v388_v48  ;;  %v391_v58 = vrot.slane %v1748_v55, 1  ;;  %v393_v59 = vrot.slane %v264_v56, 1  ;;  %v267_v3 = vunpack.c.l.bf16 %v216_v0 }
  0x1d   : > { %v485_v51 = vpack.c.bf16 %v389_v50, %v387_v49  ;;  %v395_v4 = vrot.slane %v265_v1, 1  ;;  %v396_v5 = vrot.slane %v266_v2, 1  ;;  %v1751_v12 = vunpack.c.l.bf16 %v1775_v10 }
  0x1e   : > { %v392_v60 = vsel %vm369_vm1, %v390_v57, %v391_v58  ;;  %v394_v61 = vsel %vm369_vm1, %v391_v58, %v393_v59  ;;  %v398_v6 = vrot.slane %v267_v3, 1  ;;  %v1752_v13 = vunpack.c.h.bf16 %v1775_v10  ;;  %v1777_v58 = vld [vmem:[%s1867_s10 + $0x78] sm:$0xff]   ;;  %v231_v59 = vld [vmem:[%s1867_s10 + $0x80] sm:$0x1] }
  0x1f   : > { %v486_v62 = vpack.c.bf16 %v394_v61, %v392_v60  ;;  %v397_v7 = vsel %vm369_vm1, %v395_v4, %v396_v5  ;;  %v270_v14 = vunpack.c.l.bf16 %v219_v11  ;;  %v400_v15 = vrot.slane %v1751_v12, 1 }
  0x20   : > { %v399_v8 = vsel %vm369_vm1, %v396_v5, %v398_v6  ;;  %v401_v16 = vrot.slane %v1752_v13, 1  ;;  %v271_v23 = vunpack.c.l.bf16 %v220_v21  ;;  %v272_v24 = vunpack.c.h.bf16 %v220_v21 }
  0x21   : > { %v403_v17 = vrot.slane %v270_v14, 1  ;;  %v273_v25 = vunpack.c.l.bf16 %v222_v22  ;;  %v1755_v34 = vunpack.c.l.bf16 %v1776_v32  ;;  %v1756_v35 = vunpack.c.h.bf16 %v1776_v32 }
  0x22   : > { %v402_v18 = vsel %vm369_vm1, %v400_v15, %v401_v16  ;;  %v405_v26 = vrot.slane %v271_v23, 1  ;;  %v406_v27 = vrot.slane %v272_v24, 1  ;;  %v276_v36 = vunpack.c.l.bf16 %v225_v33 }
  0x23   : > { %1655 = vmatmul.msk.bf16.gmra.mxu1 %vm515_vm0, %v202_v9  ;;  %v487_v9 = vpack.c.bf16 %v399_v8, %v397_v7  ;;  %v404_v19 = vsel %vm369_vm1, %v401_v16, %v403_v17  ;;  %v408_v28 = vrot.slane %v273_v25, 1  ;;  %v410_v37 = vrot.slane %v1755_v34, 1 }
  0x24   : > { %1683 = vmatmul.msk.bf16.gmra.mxu2 %vm515_vm0, %v1773_v30  ;;  %v488_v20 = vpack.c.bf16 %v404_v19, %v402_v18  ;;  %v411_v38 = vrot.slane %v1756_v35, 1  ;;  %v413_v39 = vrot.slane %v276_v36, 1  ;;  %v277_v45 = vunpack.c.l.bf16 %v226_v43  ;;  %v232_v19 = vld [vmem:[%s1867_s10 + $0x84] sm:$0xff]  }
  0x25   : > { %v278_v46 = vunpack.c.h.bf16 %v226_v43  ;;  %v279_v47 = vunpack.c.l.bf16 %v228_v44  ;;  %v282_v0 = vunpack.c.l.bf16 %v231_v59  ;;  %v283_v23 = vunpack.c.l.bf16 %v232_v19  ;;  %v1778_v44 = vld [vmem:[%s1867_s10 + $0x90] sm:$0xff]  }
  0x26   : > { %v415_v48 = vrot.slane %v277_v45, 1  ;;  %v284_v24 = vunpack.c.h.bf16 %v232_v19  ;;  %v237_v45 = vld [vmem:[%s1867_s10 + $0x98] sm:$0x1] }
  0x27   : > { %v416_v49 = vrot.slane %v278_v46, 1  ;;  %v418_v50 = vrot.slane %v279_v47, 1  ;;  %v423_v6 = vrot.slane %v282_v0, 1 }
  0x29   : > { %v419_v53 = vsel %vm369_vm1, %v416_v49, %v418_v50  ;;  %v288_v50 = vunpack.c.l.bf16 %v237_v45 }
  0x2a   : > { %1631 = vmatmul.msk.bf16.gmra.mxu0 %vm515_vm0, %v483_v29  ;;  %1711 = vmatmul.msk.bf16.gmra.mxu3 %vm515_vm0, %v484_v40  ;;  %v407_v29 = vsel %vm369_vm1, %v405_v26, %v406_v27 }
  0x33   : > { %1656 = vmatmul.msk.bf16.gmra.mxu1 %vm515_vm0, %v1773_v30  ;;  %v409_v30 = vsel %vm369_vm1, %v406_v27, %v408_v28 }
  0x34   : > { %1684 = vmatmul.msk.bf16.gmra.mxu2 %vm515_vm0, %v208_v41  ;;  %v489_v31 = vpack.c.bf16 %v409_v30, %v407_v29  ;;  %v425_v29 = vrot.slane %v283_v23, 1  ;;  %v426_v30 = vrot.slane %v284_v24, 1 }
  0x36   : > { %v427_v36 = vsel %vm369_vm1, %v425_v29, %v426_v30 }
  0x3a   : > { %1632 = vmatmul.msk.bf16.gmra.mxu0 %vm515_vm0, %v484_v40  ;;  %1712 = vmatmul.msk.bf16.gmra.mxu3 %vm515_vm0, %v485_v51  ;;  %v412_v40 = vsel %vm369_vm1, %v410_v37, %v411_v38 }
  0x43   : > { %1657 = vmatmul.msk.bf16.gmra.mxu1 %vm515_vm0, %v208_v41  ;;  %v414_v41 = vsel %vm369_vm1, %v411_v38, %v413_v39 }
  0x44   : > { %1685 = vmatmul.msk.bf16.gmra.mxu2 %vm515_vm0, %v1774_v52  ;;  %v490_v42 = vpack.c.bf16 %v414_v41, %v412_v40 }
  0x4a   : > { %1633 = vmatmul.msk.bf16.gmra.mxu0 %vm515_vm0, %v485_v51  ;;  %1713 = vmatmul.msk.bf16.gmra.mxu3 %vm515_vm0, %v486_v62 }
  0x53   : > { %1658 = vmatmul.msk.bf16.gmra.mxu1 %vm515_vm0, %v1774_v52  ;;  %v417_v52 = vsel %vm369_vm1, %v415_v48, %v416_v49  ;;  %v1763_v48 = vunpack.c.l.bf16 %v1778_v44  ;;  %v1764_v49 = vunpack.c.h.bf16 %v1778_v44 }
  0x54   : > { %1686 = vmatmul.msk.bf16.gmra.mxu2 %vm515_vm0, %v214_v63  ;;  %v491_v54 = vpack.c.bf16 %v419_v53, %v417_v52 }
  0x5a   : > { %1634 = vmatmul.msk.bf16.gmra.mxu0 %vm515_vm0, %v486_v62  ;;  %1714 = vmatmul.msk.bf16.gmra.mxu3 %vm515_vm0, %v487_v9  ;;  %v1759_v62 = vunpack.c.l.bf16 %v1777_v58 }
  0x5c   : > { %v420_v4 = vrot.slane %v1759_v62, 1 }
  0x63   : > { %1659 = vmatmul.msk.bf16.gmra.mxu1 %vm515_vm0, %v214_v63  ;;  %v1760_v63 = vunpack.c.h.bf16 %v1777_v58 }
  0x64   : > { %1687 = vmatmul.msk.bf16.gmra.mxu2 %vm515_vm0, %v1775_v10 }
  0x65   : > { %v421_v5 = vrot.slane %v1760_v63, 1 }
  0x67   : > { %v422_v11 = vsel %vm369_vm1, %v420_v4, %v421_v5  ;;  %v424_v12 = vsel %vm369_vm1, %v421_v5, %v423_v6  ;;  %v238_v6 = vld [vmem:[%s1867_s10 + $0x9c] sm:$0xff]  }
  0x68   : > { %v492_v15 = vpack.c.bf16 %v424_v12, %v422_v11  ;;  %v290_v11 = vunpack.c.h.bf16 %v238_v6 }
  0x6a   : > { %1635 = vmatmul.msk.bf16.gmra.mxu0 %vm515_vm0, %v487_v9  ;;  %1715 = vmatmul.msk.bf16.gmra.mxu3 %vm515_vm0, %v488_v20 }
  0x73   : > { %1660 = vmatmul.msk.bf16.gmra.mxu1 %vm515_vm0, %v1775_v10 }
  0x74   : > { %1688 = vmatmul.msk.bf16.gmra.mxu2 %vm515_vm0, %v220_v21 }
  0x7a   : > { %1636 = vmatmul.msk.bf16.gmra.mxu0 %vm515_vm0, %v488_v20  ;;  %1716 = vmatmul.msk.bf16.gmra.mxu3 %vm515_vm0, %v489_v31  ;;  %v234_v20 = vld [vmem:[%s1867_s10 + $0x8c] sm:$0x1] }
  0x7b   : > { %v285_v25 = vunpack.c.l.bf16 %v234_v20 }
  0x83   : > { %1661 = vmatmul.msk.bf16.gmra.mxu1 %vm515_vm0, %v220_v21 }
  0x84   : > { %1689 = vmatmul.msk.bf16.gmra.mxu2 %vm515_vm0, %v1776_v32 }
  0x8a   : > { %1637 = vmatmul.msk.bf16.gmra.mxu0 %vm515_vm0, %v489_v31  ;;  %1717 = vmatmul.msk.bf16.gmra.mxu3 %vm515_vm0, %v490_v42  ;;  %v428_v31 = vrot.slane %v285_v25, 1 }
  0x8c   : > { %v429_v37 = vsel %vm369_vm1, %v426_v30, %v428_v31 }
  0x8d   : > { %v493_v40 = vpack.c.bf16 %v429_v37, %v427_v36 }
  0x90   : > { %v722_v51 = vpop.f32.mrf.mxu1 }
  0x93   : > { %1662 = vmatmul.msk.bf16.gmra.mxu1 %vm515_vm0, %v1776_v32 }
  0x94   : > { %1690 = vmatmul.msk.bf16.gmra.mxu2 %vm515_vm0, %v226_v43 }
  0x97   : > { %v573_v55 = vpop.f32.mrf.mxu0  ;;  %v832_v60 = vpop.f32.mrf.mxu2 }
  0x98   : > { %v723_v56 = vadd.f32 %v722_v51, %v573_v55  ;;  %v724_v57 = vpop.f32.mrf.mxu1  ;;  %v431_v55 = vrot.slane %v1764_v49, 1 }
  0x9a   : > { %1638 = vmatmul.msk.bf16.gmra.mxu0 %vm515_vm0, %v490_v42  ;;  %v912_v61 = vadd.f32 %v832_v60, %v723_v56  ;;  %1718 = vmatmul.msk.bf16.gmra.mxu3 %vm515_vm0, %v491_v54  ;;  %v433_v56 = vrot.slane %v288_v50, 1 }
  0x9c   : > { %v434_v62 = vsel %vm369_vm1, %v431_v55, %v433_v56 }
  0x9d   : > { %v984_v1 = vpop.f32.mrf.mxu3 }
  0x9e   : > { %v1947_v2 = vadd.f32 %v984_v1, %v912_v61 }
  0x9f   : > { %v575_v3 = vpop.f32.mrf.mxu0  ;;  %v834_v9 = vpop.f32.mrf.mxu2 }
  0xa0   : > { %v725_v7 = vadd.f32 %v724_v57, %v575_v3  ;;  %v727_v8 = vpop.f32.mrf.mxu1 }
  0xa2   : > { %v913_v10 = vadd.f32 %v834_v9, %v725_v7  ;;  %v240_v7 = vld [vmem:[%s1867_s10 + $0xa4] sm:$0x1] }
  0xa3   : > { %1663 = vmatmul.msk.bf16.gmra.mxu1 %vm515_vm0, %v226_v43  ;;  %v291_v12 = vunpack.c.l.bf16 %v240_v7 }
  0xa4   : > { %1691 = vmatmul.msk.bf16.gmra.mxu2 %vm515_vm0, %v1777_v58 }
  0xa5   : > { %v986_v13 = vpop.f32.mrf.mxu3 }
  0xa6   : > { %v1952_v14 = vadd.f32 %v986_v13, %v913_v10  ;;  %v289_v10 = vunpack.c.l.bf16 %v238_v6 }
  0xa7   : > { %v578_v16 = vpop.f32.mrf.mxu0  ;;  %v837_v21 = vpop.f32.mrf.mxu2 }
  0xa8   : > { %v728_v17 = vadd.f32 %v727_v8, %v578_v16  ;;  %v729_v18 = vpop.f32.mrf.mxu1 }
  0xaa   : > { %1639 = vmatmul.msk.bf16.gmra.mxu0 %vm515_vm0, %v491_v54  ;;  %v914_v22 = vadd.f32 %v837_v21, %v728_v17  ;;  %1719 = vmatmul.msk.bf16.gmra.mxu3 %vm515_vm0, %v492_v15  ;;  %v430_v54 = vrot.slane %v1763_v48, 1  ;;  %v435_v17 = vrot.slane %v289_v10, 1 }
  0xac   : > { %v432_v61 = vsel %vm369_vm1, %v430_v54, %v431_v55 }
  0xad   : > { %v989_v26 = vpop.f32.mrf.mxu3  ;;  %v494_v1 = vpack.c.bf16 %v434_v62, %v432_v61  ;;  %v246_v61 = vld [vmem:[%s1867_s10 + $0xbc] sm:$0x1] }
  0xae   : > { %v1959_v27 = vadd.f32 %v989_v26, %v914_v22 }
  0xaf   : > { %v580_v28 = vpop.f32.mrf.mxu0  ;;  %v839_v34 = vpop.f32.mrf.mxu2 }
  0xb0   : > { %v730_v32 = vadd.f32 %v729_v18, %v580_v28  ;;  %v732_v33 = vpop.f32.mrf.mxu1  ;;  %v436_v18 = vrot.slane %v290_v11, 1 }
  0xb2   : > { %v915_v35 = vadd.f32 %v839_v34, %v730_v32  ;;  %v437_v24 = vsel %vm369_vm1, %v435_v17, %v436_v18  ;;  %v243_v34 = vld [vmem:[%s1867_s10 + $0xb0] sm:$0x1] }
  0xb3   : > { %1664 = vmatmul.msk.bf16.gmra.mxu1 %vm515_vm0, %v1777_v58 }
  0xb4   : > { %1692 = vmatmul.msk.bf16.gmra.mxu2 %vm515_vm0, %v232_v19 }
  0xb5   : > { %v991_v38 = vpop.f32.mrf.mxu3 }
  0xb6   : > { %v1964_v39 = vadd.f32 %v991_v38, %v915_v35 }
  0xb7   : > { %v583_v41 = vpop.f32.mrf.mxu0  ;;  %v842_v46 = vpop.f32.mrf.mxu2 }
  0xb8   : > { %v733_v42 = vadd.f32 %v732_v33, %v583_v41  ;;  %v734_v43 = vpop.f32.mrf.mxu1  ;;  %v1779_v33 = vld [vmem:[%s1867_s10 + $0xa8] sm:$0xff]  }
  0xb9   : > { %v1767_v37 = vunpack.c.l.bf16 %v1779_v33  ;;  %v1768_v38 = vunpack.c.h.bf16 %v1779_v33 }
  0xba   : > { %1640 = vmatmul.msk.bf16.gmra.mxu0 %vm515_vm0, %v492_v15  ;;  %v916_v47 = vadd.f32 %v842_v46, %v733_v42  ;;  %1720 = vmatmul.msk.bf16.gmra.mxu3 %vm515_vm0, %v493_v40 }
  0xbb   : > { %v441_v45 = vrot.slane %v1768_v38, 1 }
  0xbd   : > { %v994_v51 = vpop.f32.mrf.mxu3 }
  0xbe   : > { %v1971_v52 = vadd.f32 %v994_v51, %v916_v47 }
  0xbf   : > { %v585_v53 = vpop.f32.mrf.mxu0  ;;  %v844_v59 = vpop.f32.mrf.mxu2 }
  0xc0   : > { %v735_v57 = vadd.f32 %v734_v43, %v585_v53  ;;  %v737_v58 = vpop.f32.mrf.mxu1 }
  0xc2   : > { %v917_v60 = vadd.f32 %v844_v59, %v735_v57 }
  0xc3   : > { %1665 = vmatmul.msk.bf16.gmra.mxu1 %vm515_vm0, %v232_v19  ;;  %v438_v19 = vrot.slane %v291_v12, 1 }
  0xc4   : > { %1693 = vmatmul.msk.bf16.gmra.mxu2 %vm515_vm0, %v1778_v44 }
  0xc5   : > { %v996_v63 = vpop.f32.mrf.mxu3  ;;  %v439_v25 = vsel %vm369_vm1, %v436_v18, %v438_v19 }
  0xc6   : > { %v1976_v0 = vadd.f32 %v996_v63, %v917_v60  ;;  %v495_v29 = vpack.c.bf16 %v439_v25, %v437_v24  ;;  %v244_v60 = vld [vmem:[%s1867_s10 + $0xb4] sm:$0xff]   ;;  %v1780_v25 = vld [vmem:[%s1867_s10 + $0xc0] sm:$0xff]  }
  0xc7   : > { %v588_v3 = vpop.f32.mrf.mxu0  ;;  %v847_v8 = vpop.f32.mrf.mxu2 }
  0xc8   : > { %v738_v4 = vadd.f32 %v737_v58, %v588_v3  ;;  %v739_v5 = vpop.f32.mrf.mxu1  ;;  %v296_v3 = vunpack.c.h.bf16 %v244_v60 }
  0xca   : > { %1641 = vmatmul.msk.bf16.gmra.mxu0 %vm515_vm0, %v493_v40  ;;  %v918_v9 = vadd.f32 %v847_v8, %v738_v4  ;;  %1721 = vmatmul.msk.bf16.gmra.mxu3 %vm515_vm0, %v494_v1  ;;  %v294_v40 = vunpack.c.l.bf16 %v243_v34  ;;  %v297_v4 = vunpack.c.l.bf16 %v246_v61 }
  0xcc   : > { %v443_v46 = vrot.slane %v294_v40, 1  ;;  %v448_v10 = vrot.slane %v297_v4, 1 }
  0xcd   : > { %v999_v13 = vpop.f32.mrf.mxu3 }
  0xce   : > { %v1983_v15 = vadd.f32 %v999_v13, %v918_v9  ;;  %v444_v53 = vsel %vm369_vm1, %v441_v45, %v443_v46  ;;  %v446_v9 = vrot.slane %v296_v3, 1 }
  0xcf   : > { %v590_v16 = vpop.f32.mrf.mxu0  ;;  %v849_v22 = vpop.f32.mrf.mxu2 }
  0xd0   : > { %v740_v20 = vadd.f32 %v739_v5, %v590_v16  ;;  %v742_v21 = vpop.f32.mrf.mxu1  ;;  %v449_v18 = vsel %vm369_vm1, %v446_v9, %v448_v10 }
  0xd2   : > { %v919_v23 = vadd.f32 %v849_v22, %v740_v20 }
  0xd3   : > { %1666 = vmatmul.msk.bf16.gmra.mxu1 %vm515_vm0, %v1778_v44  ;;  %v440_v44 = vrot.slane %v1767_v37, 1 }
  0xd4   : > { %1694 = vmatmul.msk.bf16.gmra.mxu2 %vm515_vm0, %v238_v6 }
  0xd5   : > { %v1001_v26 = vpop.f32.mrf.mxu3  ;;  %v442_v51 = vsel %vm369_vm1, %v440_v44, %v441_v45 }
  0xd6   : > { %v1988_v28 = vadd.f32 %v1001_v26, %v919_v23  ;;  %v496_v56 = vpack.c.bf16 %v444_v53, %v442_v51  ;;  %v249_v26 = vld [vmem:[%s1867_s10 + $0xc8] sm:$0x1] }
  0xd7   : > { %v593_v30 = vpop.f32.mrf.mxu0  ;;  %v852_v35 = vpop.f32.mrf.mxu2 }
  0xd8   : > { %v743_v31 = vadd.f32 %v742_v21, %v593_v30  ;;  %v744_v32 = vpop.f32.mrf.mxu1 }
  0xda   : > { %1642 = vmatmul.msk.bf16.gmra.mxu0 %vm515_vm0, %v494_v1  ;;  %v920_v36 = vadd.f32 %v852_v35, %v743_v31  ;;  %1722 = vmatmul.msk.bf16.gmra.mxu3 %vm515_vm0, %v495_v29  ;;  %v295_v1 = vunpack.c.l.bf16 %v244_v60  ;;  %v1771_v31 = vunpack.c.l.bf16 %v1780_v25 }
  0xdc   : > { %v445_v8 = vrot.slane %v295_v1, 1  ;;  %v947_v37 = vrot.slane %v1771_v31, 1 }
  0xdd   : > { %v1004_v41 = vpop.f32.mrf.mxu3 }
  0xde   : > { %v1995_v42 = vadd.f32 %v1004_v41, %v920_v36  ;;  %v447_v17 = vsel %vm369_vm1, %v445_v8, %v446_v9 }
  0xdf   : > { %v595_v43 = vpop.f32.mrf.mxu0  ;;  %v854_v49 = vpop.f32.mrf.mxu2  ;;  %v497_v21 = vpack.c.bf16 %v449_v18, %v447_v17 }
  0xe0   : > { %v745_v47 = vadd.f32 %v744_v32, %v595_v43  ;;  %v747_v48 = vpop.f32.mrf.mxu1  ;;  %v1772_v32 = vunpack.c.h.bf16 %v1780_v25 }
  0xe2   : > { %v921_v50 = vadd.f32 %v854_v49, %v745_v47  ;;  %v948_v38 = vrot.slane %v1772_v32, 1 }
  0xe3   : > { %1667 = vmatmul.msk.bf16.gmra.mxu1 %vm515_vm0, %v238_v6 }
  0xe4   : > { %1695 = vmatmul.msk.bf16.gmra.mxu2 %vm515_vm0, %v1779_v33  ;;  %v949_v46 = vsel %vm369_vm1, %v947_v37, %v948_v38 }
  0xe5   : > { %v1006_v54 = vpop.f32.mrf.mxu3 }
  0xe6   : > { %v2000_v55 = vadd.f32 %v1006_v54, %v921_v50 }
  0xe7   : > { %v598_v57 = vpop.f32.mrf.mxu0  ;;  %v857_v62 = vpop.f32.mrf.mxu2 }
  0xe8   : > { %v748_v58 = vadd.f32 %v747_v48, %v598_v57  ;;  %v749_v59 = vpop.f32.mrf.mxu1 }
  0xea   : > { %1643 = vmatmul.msk.bf16.gmra.mxu0 %vm515_vm0, %v495_v29  ;;  %v922_v63 = vadd.f32 %v857_v62, %v748_v58  ;;  %1723 = vmatmul.msk.bf16.gmra.mxu3 %vm515_vm0, %v496_v56 }
  0xed   : > { %v1009_v5 = vpop.f32.mrf.mxu3 }
  0xee   : > { %v2007_v6 = vadd.f32 %v1009_v5, %v922_v63 }
  0xef   : > { %v600_v7 = vpop.f32.mrf.mxu0  ;;  %v859_v13 = vpop.f32.mrf.mxu2 }
  0xf0   : > { %v750_v11 = vadd.f32 %v749_v59, %v600_v7  ;;  %v752_v12 = vpop.f32.mrf.mxu1 }
  0xf2   : > { %v923_v16 = vadd.f32 %v859_v13, %v750_v11 }
  0xf3   : > { %1668 = vmatmul.msk.bf16.gmra.mxu1 %vm515_vm0, %v1779_v33  ;;  %v300_v33 = vunpack.c.l.bf16 %v249_v26 }
  0xf4   : > { %1696 = vmatmul.msk.bf16.gmra.mxu2 %vm515_vm0, %v244_v60 }
  0xf5   : > { %v1011_v19 = vpop.f32.mrf.mxu3  ;;  %v950_v40 = vrot.slane %v300_v33, 1 }
  0xf6   : > { %v2012_v20 = vadd.f32 %v1011_v19, %v923_v16 }
  0xf7   : > { %v603_v22 = vpop.f32.mrf.mxu0  ;;  %v862_v29 = vpop.f32.mrf.mxu2  ;;  %v951_v47 = vsel %vm369_vm1, %v948_v38, %v950_v40  ;;  %vm1522_vm1 = vcmask 125952  }
  0xf8   : > { %v753_v23 = vadd.f32 %v752_v12, %v603_v22  ;;  %v754_v24 = vpop.f32.mrf.mxu1  ;;  %v954_v50 = vpack.c.bf16 %v951_v47, %v949_v46 }
  0xfa   : > { %1644 = vmatmul.msk.bf16.gmra.mxu0 %vm515_vm0, %v496_v56  ;;  %v924_v30 = vadd.f32 %v862_v29, %v753_v23  ;;  %1724 = vmatmul.msk.bf16.gmra.mxu3 %vm515_vm0, %v497_v21 }
  0xfd   : > { %v1014_v34 = vpop.f32.mrf.mxu3 }
  0xfe   : > { %v2019_v35 = vadd.f32 %v1014_v34, %v924_v30 }
  0xff   : > { %v605_v36 = vpop.f32.mrf.mxu0  ;;  %v864_v44 = vpop.f32.mrf.mxu2 }
 0x100   : > { %v755_v41 = vadd.f32 %v754_v24, %v605_v36  ;;  %v757_v43 = vpop.f32.mrf.mxu1 }
 0x102   : > { %v925_v45 = vadd.f32 %v864_v44, %v755_v41 }
 0x103   : > { %1669 = vmatmul.msk.bf16.gmra.mxu1 %vm515_vm0, %v244_v60 }
 0x104   : > { %1697 = vmatmul.msk.bf16.gmra.mxu2 %vm515_vm0, %v1780_v25 }
 0x105   : > { %v1016_v48 = vpop.f32.mrf.mxu3 }
 0x106   : > { %v2024_v49 = vadd.f32 %v1016_v48, %v925_v45 }
 0x107   : > { %v608_v51 = vpop.f32.mrf.mxu0  ;;  %v867_v56 = vpop.f32.mrf.mxu2 }
 0x108   : > { %v758_v53 = vadd.f32 %v757_v43, %v608_v51  ;;  %v759_v54 = vpop.f32.mrf.mxu1 }
 0x10a   : > { %1645 = vmatmul.msk.bf16.gmra.mxu0 %vm515_vm0, %v497_v21  ;;  %v926_v57 = vadd.f32 %v867_v56, %v758_v53  ;;  %1725 = vmatmul.msk.bf16.gmra.mxu3 %vm515_vm0, %v954_v50 }
 0x10d   : > { %v1019_v58 = vpop.f32.mrf.mxu3 }
 0x10e   : > { %v2029_v59 = vadd.f32 %v1019_v58, %v926_v57 }
 0x10f   : > { %v610_v60 = vpop.f32.mrf.mxu0  ;;  %v869_v63 = vpop.f32.mrf.mxu2 }
 0x110   : > { %2558 = vst [vmem:[#allocation2_spill] sm:$0xff] %v2029_v59  ;;  %v760_v61 = vadd.f32 %v759_v54, %v610_v60  ;;  %v762_v62 = vpop.f32.mrf.mxu1 }
 0x112   : > { %v927_v1 = vadd.f32 %v869_v63, %v760_v61 }
 0x115   : > { %v1021_v3 = vpop.f32.mrf.mxu3 }
 0x116   : > { %v2031_v4 = vadd.f32 %v1021_v3, %v927_v1 }
 0x117   : > { %v613_v5 = vpop.f32.mrf.mxu0  ;;  %v872_v9 = vpop.f32.mrf.mxu2 }
 0x118   : > { %2559 = vst [vmem:[#allocation3_spill] sm:$0xff] %v2031_v4  ;;  %v763_v7 = vadd.f32 %v762_v62, %v613_v5  ;;  %v764_v8 = vpop.f32.mrf.mxu1 }
 0x11a   : > { %v928_v10 = vadd.f32 %v872_v9, %v763_v7  ;;  %v1097_v9 = vsel %vm1096_vm2, %v1947_v2, 0.0 }
 0x11d   : > { %v1024_v11 = vpop.f32.mrf.mxu3 }
 0x11e   : > { %v2033_v12 = vadd.f32 %v1024_v11, %v928_v10  ;;  %v1100_v10 = vsel %vm1096_vm2, %v1959_v27, 0.0 }
 0x11f   : > { %v615_v13 = vpop.f32.mrf.mxu0  ;;  %v874_v18 = vpop.f32.mrf.mxu2 }
 0x120   : > { %v765_v16 = vadd.f32 %v764_v8, %v615_v13  ;;  %v767_v17 = vpop.f32.mrf.mxu1  ;;  %v1098_v8 = vsel %vm1096_vm2, %v1952_v14, 0.0 }
 0x121   : > { %v1099_v11 = vadd.f32 %v1098_v8, %v1097_v9 }
 0x122   : > { %v929_v19 = vadd.f32 %v874_v18, %v765_v16  ;;  %v1102_v16 = vsel %vm1096_vm2, %v1964_v39, 0.0 }
 0x125   : > { %v1026_v21 = vpop.f32.mrf.mxu3 }
 0x126   : > { %v2035_v22 = vadd.f32 %v1026_v21, %v929_v19  ;;  %v1104_v19 = vsel %vm1096_vm2, %v1971_v52, 0.0 }
 0x127   : > { %v618_v23 = vpop.f32.mrf.mxu0  ;;  %v877_v26 = vpop.f32.mrf.mxu2 }
 0x128   : > { %v768_v24 = vadd.f32 %v767_v17, %v618_v23  ;;  %v769_v25 = vpop.f32.mrf.mxu1  ;;  %v1101_v17 = vadd.f32 %v1100_v10, %v1099_v11  ;;  %v1118_v10 = vsel %vm1096_vm2, %v2012_v20, 0.0 }
 0x12a   : > { %v930_v29 = vadd.f32 %v877_v26, %v768_v24  ;;  %v1103_v23 = vadd.f32 %v1102_v16, %v1101_v17  ;;  %v1120_v17 = vsel %vm1096_vm2, %v2019_v35, 0.0 }
 0x12c   : > { %v1105_v26 = vadd.f32 %v1104_v19, %v1103_v23 }
 0x12d   : > { %v1029_v30 = vpop.f32.mrf.mxu3 }
 0x12e   : > { %v2037_v31 = vadd.f32 %v1029_v30, %v930_v29  ;;  %v1108_v29 = vsel %vm1096_vm2, %v1983_v15, 0.0 }
 0x12f   : > { %v620_v32 = vpop.f32.mrf.mxu0  ;;  %v879_v36 = vpop.f32.mrf.mxu2 }
 0x130   : > { %v770_v33 = vadd.f32 %v769_v25, %v620_v32  ;;  %v772_v34 = vpop.f32.mrf.mxu1  ;;  %v1106_v25 = vsel %vm1096_vm2, %v1976_v0, 0.0 }
 0x131   : > { %v1107_v30 = vadd.f32 %v1106_v25, %v1105_v26  ;;  %v1122_v26 = vsel %vm1096_vm2, %v2024_v49, 0.0 }
 0x132   : > { %v931_v37 = vadd.f32 %v879_v36, %v770_v33  ;;  %v1110_v33 = vsel %vm1096_vm2, %v1988_v28, 0.0 }
 0x135   : > { %v1031_v38 = vpop.f32.mrf.mxu3 }
 0x136   : > { %v2039_v40 = vadd.f32 %v1031_v38, %v931_v37  ;;  %v1112_v37 = vsel %vm1096_vm2, %v1995_v42, 0.0 }
 0x137   : > { %v623_v41 = vpop.f32.mrf.mxu0  ;;  %v882_v45 = vpop.f32.mrf.mxu2 }
 0x138   : > { %v773_v43 = vadd.f32 %v772_v34, %v623_v41  ;;  %v2041_v44 = vpop.f32.mrf.mxu1  ;;  %v1109_v34 = vadd.f32 %v1108_v29, %v1107_v30  ;;  %v1124_v30 = vsel %vm1096_vm2, %v2029_v59, 0.0 }
 0x13a   : > { %v932_v46 = vadd.f32 %v882_v45, %v773_v43  ;;  %v1111_v41 = vadd.f32 %v1110_v33, %v1109_v34  ;;  %v1114_v45 = vsel %vm1096_vm2, %v2000_v55, 0.0 }
 0x13d   : > { %v1034_v47 = vpop.f32.mrf.mxu3 }
 0x13e   : > { %v2043_v48 = vadd.f32 %v1034_v47, %v932_v46  ;;  %v1113_v46 = vadd.f32 %v1112_v37, %v1111_v41  ;;  %v1116_v47 = vsel %vm1096_vm2, %v2007_v6, 0.0  ;;  %v1126_v37 = vsel %vm1096_vm2, %v2031_v4, 0.0 }
 0x13f   : > { %v625_v50 = vpop.f32.mrf.mxu0  ;;  %v2045_v53 = vpop.f32.mrf.mxu2  ;;  %v1132_v4 = vsel %vm1096_vm2, %v2037_v31, 0.0 }
 0x140   : > { %v777_v51 = vpop.f32.mrf.mxu1  ;;  %v1115_v8 = vadd.f32 %v1114_v45, %v1113_v46  ;;  %v775_v41 = vadd.f32 %v2041_v44, %v625_v50 }
 0x142   : > { %v1117_v11 = vadd.f32 %v1116_v47, %v1115_v8  ;;  %v1128_v47 = vsel %vm1096_vm2, %v2033_v12, 0.0 }
 0x144   : > { %v1119_v19 = vadd.f32 %v1118_v10, %v1117_v11 }
 0x145   : > { %v2047_v54 = vpop.f32.mrf.mxu3 }
 0x146   : > { %v1121_v29 = vadd.f32 %v1120_v17, %v1119_v19  ;;  %v1130_v17 = vsel %vm1096_vm2, %v2035_v22, 0.0  ;;  %v933_v19 = vadd.f32 %v2045_v53, %v775_v41  ;;  %v1136_v41 = vsel %vm1096_vm2, %v2043_v48, 0.0 }
 0x147   : > { %v628_v56 = vpop.f32.mrf.mxu0  ;;  %v2049_v58 = vpop.f32.mrf.mxu2 }
 0x148   : > { %v779_v57 = vpop.f32.mrf.mxu1  ;;  %v1123_v33 = vadd.f32 %v1122_v26, %v1121_v29  ;;  %v778_v8 = vadd.f32 %v777_v51, %v628_v56  ;;  %v1134_v51 = vsel %vm1096_vm2, %v2039_v40, 0.0  ;;  %v2112_v56 = vadd.f32 %v2047_v54, %v933_v19 }
 0x14a   : > { %v1125_v45 = vadd.f32 %v1124_v30, %v1123_v33  ;;  %v934_v44 = vadd.f32 %v2049_v58, %v778_v8  ;;  %v1138_v54 = vsel %vm1096_vm2, %v2112_v56, 0.0 }
 0x14c   : > { %v1127_v10 = vadd.f32 %v1126_v37, %v1125_v45 }
 0x14d   : > { %v2051_v60 = vpop.f32.mrf.mxu3 }
 0x14e   : > { %v1129_v29 = vadd.f32 %v1128_v47, %v1127_v10  ;;  %v2119_v58 = vadd.f32 %v2051_v60, %v934_v44 }
 0x14f   : > { %v630_v61 = vpop.f32.mrf.mxu0  ;;  %v2055_v63 = vpop.f32.mrf.mxu2 }
 0x150   : > { %v2053_v62 = vpop.f32.mrf.mxu1  ;;  %v780_v26 = vadd.f32 %v779_v57, %v630_v61  ;;  %v1131_v30 = vadd.f32 %v1130_v17, %v1129_v29  ;;  %v1140_v8 = vsel %vm1096_vm2, %v2119_v58, 0.0 }
 0x152   : > { %v935_v53 = vadd.f32 %v2055_v63, %v780_v26  ;;  %v1133_v61 = vadd.f32 %v1132_v4, %v1131_v30 }
 0x154   : > { %v1135_v45 = vadd.f32 %v1134_v51, %v1133_v61 }
 0x155   : > { %v2057_v1 = vpop.f32.mrf.mxu3 }
 0x156   : > { %v2125_v63 = vadd.f32 %v2057_v1, %v935_v53 }
 0x157   : > { %v633_v3 = vpop.f32.mrf.mxu0  ;;  %v2061_v7 = vpop.f32.mrf.mxu2 }
 0x158   : > { %v2059_v5 = vpop.f32.mrf.mxu1  ;;  %v783_v50 = vadd.f32 %v2053_v62, %v633_v3  ;;  %v1142_v19 = vsel %vm1096_vm2, %v2125_v63, 0.0 }
 0x15a   : > { %v936_v62 = vadd.f32 %v2061_v7, %v783_v50 }
 0x15d   : > { %v2069_v13 = vpop.f32.mrf.mxu3 }
 0x15e   : > { %v2130_v60 = vadd.f32 %v2069_v13, %v936_v62 }
 0x15f   : > { %v635_v18 = vpop.f32.mrf.mxu0  ;;  %v894_v24 = vpop.f32.mrf.mxu2 }
 0x160   : > { %v787_v21 = vpop.f32.mrf.mxu1  ;;  %v785_v57 = vadd.f32 %v2059_v5, %v635_v18  ;;  %v1137_v18 = vadd.f32 %v1136_v41, %v1135_v45  ;;  %v1144_v29 = vsel %vm1096_vm2, %v2130_v60, 0.0 }
 0x162   : > { %v937_v5 = vadd.f32 %v894_v24, %v785_v57 }
 0x165   : > { %v2079_v32 = vpop.f32.mrf.mxu3 }
 0x166   : > { %v2135_v1 = vadd.f32 %v2079_v32, %v937_v5 }
 0x167   : > { %v638_v36 = vpop.f32.mrf.mxu0  ;;  %v897_v43 = vpop.f32.mrf.mxu2 }
 0x168   : > { %v789_v38 = vpop.f32.mrf.mxu1  ;;  %v788_v3 = vadd.f32 %v787_v21, %v638_v36  ;;  %v1139_v21 = vadd.f32 %v1138_v54, %v1137_v18  ;;  %v1146_v50 = vsel %vm1096_vm2, %v2135_v1, 0.0  ;;  %v1803_v54 = vmov 256.0  }
 0x169   : > { %1791 = vrcp.f32 %v1803_v54 }
 0x16a   : > { %v938_v10 = vadd.f32 %v897_v43, %v788_v3 }
 0x16d   : > { %v1049_v9 = vpop.f32.mrf.mxu3 }
 0x16e   : > { %v2139_v13 = vadd.f32 %v1049_v9, %v938_v10 }
 0x16f   : > { %v640_v16 = vpop.f32.mrf.mxu0  ;;  %v899_v25 = vpop.f32.mrf.mxu2 }
 0x170   : > { %v792_v23 = vpop.f32.mrf.mxu1  ;;  %v790_v4 = vadd.f32 %v789_v38, %v640_v16  ;;  %v1141_v16 = vadd.f32 %v1140_v8, %v1139_v21 }
 0x172   : > { %v939_v24 = vadd.f32 %v899_v25, %v790_v4 }
 0x175   : > { %v1051_v34 = vpop.f32.mrf.mxu3 }
 0x176   : > { %v2143_v30 = vadd.f32 %v1051_v34, %v939_v24 }
 0x177   : > { %v643_v46 = vpop.f32.mrf.mxu0  ;;  %v902_v11 = vpop.f32.mrf.mxu2 }
 0x178   : > { %v794_v59 = vpop.f32.mrf.mxu1  ;;  %v793_v7 = vadd.f32 %v792_v23, %v643_v46  ;;  %v1143_v46 = vadd.f32 %v1142_v19, %v1141_v16 }
 0x17a   : > { %v940_v43 = vadd.f32 %v902_v11, %v793_v7  ;;  %v1145_v51 = vadd.f32 %v1144_v29, %v1143_v46  ;;  %v1150_v11 = vsel %vm1096_vm2, %v2143_v30, 0.0 }
 0x17c   : > { %v1147_v57 = vadd.f32 %v1146_v50, %v1145_v51 }
 0x17d   : > { %v1054_v33 = vpop.f32.mrf.mxu3 }
 0x17e   : > { %v2147_v25 = vadd.f32 %v1054_v33, %v940_v43 }
 0x17f   : > { %v645_v37 = vpop.f32.mrf.mxu0  ;;  %v904_v47 = vpop.f32.mrf.mxu2 }
 0x180   : > { %v797_v36 = vpop.f32.mrf.mxu1  ;;  %v795_v38 = vadd.f32 %v794_v59, %v645_v37  ;;  %v1148_v59 = vsel %vm1096_vm2, %v2139_v13, 0.0  ;;  %v1152_v34 = vsel %vm1096_vm2, %v2147_v25, 0.0 }
 0x181   : > { %v1149_v37 = vadd.f32 %v1148_v59, %v1147_v57 }
 0x182   : > { %v941_v32 = vadd.f32 %v904_v47, %v795_v38 }
 0x183   : > { %v1151_v47 = vadd.f32 %v1150_v11, %v1149_v37 }
 0x185   : > { %v1056_v17 = vpop.f32.mrf.mxu3  ;;  %v1153_v18 = vadd.f32 %v1152_v34, %v1151_v47 }
 0x186   : > { %v2151_v61 = vadd.f32 %v1056_v17, %v941_v32 }
 0x187   : > { %v648_v26 = vpop.f32.mrf.mxu0  ;;  %v907_v44 = vpop.f32.mrf.mxu2 }
 0x188   : > { %v798_v23 = vadd.f32 %v797_v36, %v648_v26  ;;  %v799_v41 = vpop.f32.mrf.mxu1  ;;  %v1154_v5 = vsel %vm1096_vm2, %v2151_v61, 0.0  ;;  %v1792_v36 = vpop.eup %1791 }
 0x189   : > { %v1155_v10 = vadd.f32 %v1154_v5, %v1153_v18  ;;  %v1167_v38 = vmul.f32 256.0, %v1792_v36  ;;  %vm1171_vm3 = vweird.f32 %v1792_v36 }
 0x18a   : > { %v942_v53 = vadd.f32 %v907_v44, %v798_v23 }
 0x18b   : > { %v1168_v29 = vsub.f32 1.0, %v1167_v38 }
 0x18d   : > { %v1059_v9 = vpop.f32.mrf.mxu3  ;;  %v1169_v46 = vmul.f32 %v1792_v36, %v1168_v29 }
 0x18e   : > { %v2155_v3 = vadd.f32 %v1059_v9, %v942_v53 }
 0x18f   : > { %v650_v62 = vpop.f32.mrf.mxu0  ;;  %v909_v33 = vpop.f32.mrf.mxu2  ;;  %v1170_v50 = vadd.f32 %v1792_v36, %v1169_v46 }
 0x190   : > { %v800_v45 = vadd.f32 %v799_v41, %v650_v62  ;;  %v1156_v8 = vsel %vm1096_vm2, %v2155_v3, 0.0 }
 0x191   : > { %v1157_v17 = vadd.f32 %v1156_v8, %v1155_v10  ;;  %v2165_v51 = vsel %vm1171_vm3, %v1792_v36, %v1170_v50 }
 0x192   : > { %v943_v4 = vadd.f32 %v909_v33, %v800_v45 }
 0x195   : > { %v1061_v7 = vpop.f32.mrf.mxu3 }
 0x196   : > { %v2161_v21 = vadd.f32 %v1061_v7, %v943_v4 }
 0x198   : > { %v1158_v19 = vsel %vm1096_vm2, %v2161_v21, 0.0 }
 0x199   : > { %v1159_v24 = vadd.f32 %v1158_v19, %v1157_v17 }
 0x19b   : > { %v1160_v16 = vrot.slane %v1159_v24, 4 }
 0x19d   : > { %v1161_v26 = vadd.f32 %v1160_v16, %v1159_v24 }
 0x19f   : > { %v1162_v43 = vrot.slane %v1161_v26, 2 }
 0x1a1   : > { %v1163_v23 = vadd.f32 %v1162_v43, %v1161_v26 }
 0x1a3   : > { %v1164_v44 = vrot.slane %v1163_v23, 1 }
 0x1a5   : > { %v1165_v32 = vadd.f32 %v1164_v44, %v1163_v23 }
 0x1a7   : > { %v2168_v59 = vmul.f32 %v2165_v51, %v1165_v32 }
 0x1a9   : > { %v1174_v53 = vsub.f32 %v1947_v2, %v2168_v59  ;;  %v1175_v57 = vsub.f32 %v1952_v14, %v2168_v59  ;;  %v1176_v9 = vsub.f32 %v1959_v27, %v2168_v59  ;;  %v1177_v11 = vsub.f32 %v1964_v39, %v2168_v59 }
 0x1aa   : > { %v1178_v62 = vsub.f32 %v1971_v52, %v2168_v59  ;;  %v1179_v45 = vsub.f32 %v1976_v0, %v2168_v59  ;;  %v1180_v4 = vsub.f32 %v1983_v15, %v2168_v59  ;;  %v1181_v7 = vsub.f32 %v1988_v28, %v2168_v59 }
 0x1ab   : > { %v1206_v37 = vmul.f32 %v1174_v53, %v1174_v53  ;;  %v1207_v41 = vmul.f32 %v1175_v57, %v1175_v57  ;;  %v1208_v34 = vmul.f32 %v1176_v9, %v1176_v9  ;;  %v1209_v47 = vmul.f32 %v1177_v11, %v1177_v11 }
 0x1ac   : > { %v1210_v18 = vmul.f32 %v1178_v62, %v1178_v62  ;;  %v1211_v36 = vmul.f32 %v1179_v45, %v1179_v45  ;;  %v1182_v24 = vsub.f32 %v1995_v42, %v2168_v59  ;;  %v1212_v38 = vmul.f32 %v1180_v4, %v1180_v4  ;;  %v2560_v4 = vld [vmem:[#allocation2_spill] sm:$0xff] }
 0x1ad   : > { %v1238_v33 = vsel %vm1096_vm2, %v1206_v37, 0.0  ;;  %v1239_v54 = vsel %vm1096_vm2, %v1207_v41, 0.0  ;;  %v1241_v8 = vsel %vm1096_vm2, %v1208_v34, 0.0  ;;  %v1243_v17 = vsel %vm1096_vm2, %v1209_v47, 0.0 }
 0x1ae   : > { %v1240_v5 = vadd.f32 %v1239_v54, %v1238_v33  ;;  %v1245_v16 = vsel %vm1096_vm2, %v1210_v18, 0.0  ;;  %v1183_v29 = vsub.f32 %v2000_v55, %v2168_v59  ;;  %v1213_v43 = vmul.f32 %v1181_v7, %v1181_v7 }
 0x1af   : > { %v1247_v23 = vsel %vm1096_vm2, %v1211_v36, 0.0  ;;  %v1184_v44 = vsub.f32 %v2007_v6, %v2168_v59  ;;  %v1214_v50 = vmul.f32 %v1182_v24, %v1182_v24  ;;  %v1249_v32 = vsel %vm1096_vm2, %v1212_v38, 0.0  ;;  %v2561_v36 = vld [vmem:[#allocation3_spill] sm:$0xff] }
 0x1b0   : > { %v1242_v10 = vadd.f32 %v1241_v8, %v1240_v5  ;;  %v1185_v57 = vsub.f32 %v2012_v20, %v2168_v59  ;;  %v1215_v9 = vmul.f32 %v1183_v29, %v1183_v29  ;;  %v1251_v11 = vsel %vm1096_vm2, %v1213_v43, 0.0 }
 0x1b1   : > { %v1186_v41 = vsub.f32 %v2019_v35, %v2168_v59  ;;  %v1216_v62 = vmul.f32 %v1184_v44, %v1184_v44  ;;  %v1253_v34 = vsel %vm1096_vm2, %v1214_v50, 0.0  ;;  %v1187_v47 = vsub.f32 %v2024_v49, %v2168_v59 }
 0x1b2   : > { %v1244_v19 = vadd.f32 %v1243_v17, %v1242_v10  ;;  %v1217_v33 = vmul.f32 %v1185_v57, %v1185_v57  ;;  %v1255_v54 = vsel %vm1096_vm2, %v1215_v9, 0.0  ;;  %v1188_v18 = vsub.f32 %v2560_v4, %v2168_v59 }
 0x1b3   : > { %v1218_v8 = vmul.f32 %v1186_v41, %v1186_v41  ;;  %v1257_v10 = vsel %vm1096_vm2, %v1216_v62, 0.0  ;;  %v1189_v17 = vsub.f32 %v2561_v36, %v2168_v59 }
 0x1b4   : > { %v1246_v26 = vadd.f32 %v1245_v16, %v1244_v19  ;;  %v1219_v19 = vmul.f32 %v1187_v47, %v1187_v47  ;;  %v1259_v24 = vsel %vm1096_vm2, %v1217_v33, 0.0  ;;  %v1190_v16 = vsub.f32 %v2033_v12, %v2168_v59 }
 0x1b5   : > { %v1261_v29 = vsel %vm1096_vm2, %v1218_v8, 0.0 }
 0x1b6   : > { %v1248_v46 = vadd.f32 %v1247_v23, %v1246_v26  ;;  %v1220_v26 = vmul.f32 %v1188_v18, %v1188_v18  ;;  %v1191_v23 = vsub.f32 %v2035_v22, %v2168_v59  ;;  %v1263_v44 = vsel %vm1096_vm2, %v1219_v19, 0.0 }
 0x1b8   : > { %v1250_v53 = vadd.f32 %v1249_v32, %v1248_v46  ;;  %v1221_v46 = vmul.f32 %v1189_v17, %v1189_v17  ;;  %v1192_v32 = vsub.f32 %v2037_v31, %v2168_v59  ;;  %v1265_v57 = vsel %vm1096_vm2, %v1220_v26, 0.0 }
 0x1ba   : > { %v1252_v37 = vadd.f32 %v1251_v11, %v1250_v53  ;;  %v1222_v53 = vmul.f32 %v1190_v16, %v1190_v16  ;;  %v1193_v11 = vsub.f32 %v2039_v40, %v2168_v59  ;;  %v1267_v41 = vsel %vm1096_vm2, %v1221_v46, 0.0 }
 0x1bc   : > { %v1254_v45 = vadd.f32 %v1253_v34, %v1252_v37  ;;  %v1223_v37 = vmul.f32 %v1191_v23, %v1191_v23  ;;  %v1194_v34 = vsub.f32 %v2043_v48, %v2168_v59  ;;  %v1269_v47 = vsel %vm1096_vm2, %v1222_v53, 0.0 }
 0x1be   : > { %v1256_v5 = vadd.f32 %v1255_v54, %v1254_v45  ;;  %v1224_v45 = vmul.f32 %v1192_v32, %v1192_v32  ;;  %v1195_v54 = vsub.f32 %v2112_v56, %v2168_v59  ;;  %v1271_v18 = vsel %vm1096_vm2, %v1223_v37, 0.0 }
 0x1c0   : > { %v1258_v7 = vadd.f32 %v1257_v10, %v1256_v5  ;;  %v1225_v5 = vmul.f32 %v1193_v11, %v1193_v11  ;;  %v1196_v10 = vsub.f32 %v2119_v58, %v2168_v59  ;;  %v1273_v17 = vsel %vm1096_vm2, %v1224_v45, 0.0 }
 0x1c2   : > { %v1260_v38 = vadd.f32 %v1259_v24, %v1258_v7  ;;  %v1226_v7 = vmul.f32 %v1194_v34, %v1194_v34  ;;  %v1197_v24 = vsub.f32 %v2125_v63, %v2168_v59  ;;  %v1275_v16 = vsel %vm1096_vm2, %v1225_v5, 0.0 }
 0x1c4   : > { %v1262_v43 = vadd.f32 %v1261_v29, %v1260_v38  ;;  %v1227_v38 = vmul.f32 %v1195_v54, %v1195_v54  ;;  %v1198_v29 = vsub.f32 %v2130_v60, %v2168_v59  ;;  %v1277_v23 = vsel %vm1096_vm2, %v1226_v7, 0.0 }
 0x1c6   : > { %v1264_v50 = vadd.f32 %v1263_v44, %v1262_v43  ;;  %v1228_v43 = vmul.f32 %v1196_v10, %v1196_v10  ;;  %v1199_v44 = vsub.f32 %v2135_v1, %v2168_v59  ;;  %v1279_v32 = vsel %vm1096_vm2, %v1227_v38, 0.0 }
 0x1c8   : > { %v1266_v9 = vadd.f32 %v1265_v57, %v1264_v50  ;;  %v1229_v50 = vmul.f32 %v1197_v24, %v1197_v24  ;;  %v1200_v57 = vsub.f32 %v2139_v13, %v2168_v59  ;;  %v1281_v11 = vsel %vm1096_vm2, %v1228_v43, 0.0 }
 0x1ca   : > { %v1268_v62 = vadd.f32 %v1267_v41, %v1266_v9  ;;  %v1230_v9 = vmul.f32 %v1198_v29, %v1198_v29  ;;  %v1201_v41 = vsub.f32 %v2143_v30, %v2168_v59  ;;  %v1283_v34 = vsel %vm1096_vm2, %v1229_v50, 0.0 }
 0x1cc   : > { %v1270_v33 = vadd.f32 %v1269_v47, %v1268_v62  ;;  %v1231_v62 = vmul.f32 %v1199_v44, %v1199_v44  ;;  %v1202_v47 = vsub.f32 %v2147_v25, %v2168_v59  ;;  %v1285_v54 = vsel %vm1096_vm2, %v1230_v9, 0.0 }
 0x1ce   : > { %v1272_v8 = vadd.f32 %v1271_v18, %v1270_v33  ;;  %v1232_v33 = vmul.f32 %v1200_v57, %v1200_v57  ;;  %v1203_v18 = vsub.f32 %v2151_v61, %v2168_v59  ;;  %v1287_v10 = vsel %vm1096_vm2, %v1231_v62, 0.0 }
 0x1d0   : > { %v1274_v19 = vadd.f32 %v1273_v17, %v1272_v8  ;;  %v1233_v8 = vmul.f32 %v1201_v41, %v1201_v41  ;;  %v1204_v17 = vsub.f32 %v2155_v3, %v2168_v59  ;;  %v1289_v24 = vsel %vm1096_vm2, %v1232_v33, 0.0 }
 0x1d2   : > { %v1276_v26 = vadd.f32 %v1275_v16, %v1274_v19  ;;  %v1234_v19 = vmul.f32 %v1202_v47, %v1202_v47  ;;  %v1205_v16 = vsub.f32 %v2161_v21, %v2168_v59  ;;  %v1291_v29 = vsel %vm1096_vm2, %v1233_v8, 0.0 }
 0x1d4   : > { %v1278_v46 = vadd.f32 %v1277_v23, %v1276_v26  ;;  %v1235_v26 = vmul.f32 %v1203_v18, %v1203_v18  ;;  %v1236_v23 = vmul.f32 %v1204_v17, %v1204_v17  ;;  %v1237_v50 = vmul.f32 %v1205_v16, %v1205_v16 }
 0x1d6   : > { %v1280_v53 = vadd.f32 %v1279_v32, %v1278_v46  ;;  %v1293_v46 = vsel %vm1096_vm2, %v1234_v19, 0.0  ;;  %v1295_v32 = vsel %vm1096_vm2, %v1235_v26, 0.0  ;;  %v1297_v57 = vsel %vm1096_vm2, %v1236_v23, 0.0 }
 0x1d8   : > { %v1282_v37 = vadd.f32 %v1281_v11, %v1280_v53  ;;  %v1299_v11 = vsel %vm1096_vm2, %v1237_v50, 0.0 }
 0x1da   : > { %v1284_v45 = vadd.f32 %v1283_v34, %v1282_v37 }
 0x1dc   : > { %v1286_v5 = vadd.f32 %v1285_v54, %v1284_v45 }
 0x1de   : > { %v1288_v7 = vadd.f32 %v1287_v10, %v1286_v5 }
 0x1e0   : > { %v1290_v38 = vadd.f32 %v1289_v24, %v1288_v7  ;;  %v1308_v24 = vld [vmem:[%s2551_s2] sm:$0x1] }
 0x1e2   : > { %v1292_v43 = vadd.f32 %v1291_v29, %v1290_v38  ;;  %v1321_v29 = vld [vmem:[%s2552_s3] sm:$0x1] }
 0x1e4   : > { %v1294_v44 = vadd.f32 %v1293_v46, %v1292_v43 }
 0x1e6   : > { %v1296_v53 = vadd.f32 %v1295_v32, %v1294_v44 }
 0x1e8   : > { %v1298_v9 = vadd.f32 %v1297_v57, %v1296_v53 }
 0x1ea   : > { %v1300_v37 = vadd.f32 %v1299_v11, %v1298_v9 }
 0x1ec   : > { %v1301_v41 = vrot.slane %v1300_v37, 4 }
 0x1ee   : > { %v1302_v62 = vadd.f32 %v1301_v41, %v1300_v37 }
 0x1f0   : > { %v1303_v34 = vrot.slane %v1302_v62, 2 }
 0x1f2   : > { %v1304_v45 = vadd.f32 %v1303_v34, %v1302_v62 }
 0x1f4   : > { %v1305_v47 = vrot.slane %v1304_v45, 1 }
 0x1f6   : > { %v1306_v33 = vadd.f32 %v1305_v47, %v1304_v45 }
 0x1f8   : > { %v1307_v54 = vmul.f32 %v1306_v33, %v2165_v51 }
 0x1fa   : > { %v1309_v5 = vadd.f32 1e-05, %v1307_v54 }
 0x1fc   : > { %1793 = vrsqrt.f32 %v1309_v5  ;;  %vm1316_vm5 = vweird.f32 %v1309_v5 }
 0x202   : > { %v1794_v18 = vpop.eup %1793 }
 0x203   : > { %v1311_v8 = vmul.f32 %v1794_v18, %v1309_v5  ;;  %vm1317_vm4 = vweird.f32 %v1794_v18 }
 0x204   : > { %vm1318_vm6 = vmor %vm1316_vm5, %vm1317_vm4 }
 0x205   : > { %v1312_v10 = vmul.f32 %v1794_v18, %v1311_v8 }
 0x207   : > { %v1313_v7 = vmul.f32 0.5, %v1312_v10 }
 0x209   : > { %v1314_v17 = vsub.f32 1.5, %v1313_v7 }
 0x20b   : > { %v1315_v19 = vmul.f32 %v1794_v18, %v1314_v17 }
 0x20d   : > { %v1319_v38 = vsel %vm1318_vm6, %v1794_v18, %v1315_v19 }
 0x20e   : > { %v1320_v16 = vmul.f32 %v1319_v38, %v1308_v24 }
 0x210   : > { %v1322_v26 = vmul.f32 %v1320_v16, %v2168_v59  ;;  %v1325_v51 = vperm.slane %v1320_v16, 0 }
 0x212   : > { %v1323_v43 = vsub.f32 %v1321_v29, %v1322_v26  ;;  %v1327_v23 = vmul.f32 %v1325_v51, %v1947_v2  ;;  %v1328_v46 = vmul.f32 %v1325_v51, %v1952_v14  ;;  %v1329_v44 = vmul.f32 %v1325_v51, %v1959_v27 }
 0x213   : > { %v1330_v50 = vmul.f32 %v1325_v51, %v1964_v39  ;;  %v1331_v32 = vmul.f32 %v1325_v51, %v1971_v52  ;;  %v1332_v53 = vmul.f32 %v1325_v51, %v1976_v0  ;;  %v1333_v59 = vmul.f32 %v1325_v51, %v1983_v15 }
 0x214   : > { %v1334_v57 = vmul.f32 %v1325_v51, %v1988_v28  ;;  %v1335_v9 = vmul.f32 %v1325_v51, %v1995_v42  ;;  %v1336_v11 = vmul.f32 %v1325_v51, %v2000_v55  ;;  %v1337_v2 = vmul.f32 %v1325_v51, %v2007_v6 }
 0x215   : > { %v1338_v14 = vmul.f32 %v1325_v51, %v2012_v20  ;;  %v1339_v27 = vmul.f32 %v1325_v51, %v2019_v35  ;;  %v1340_v39 = vmul.f32 %v1325_v51, %v2024_v49  ;;  %v1341_v52 = vmul.f32 %v1325_v51, %v2560_v4 }
 0x216   : > { %v1342_v0 = vmul.f32 %v1325_v51, %v2561_v36  ;;  %v1343_v15 = vmul.f32 %v1325_v51, %v2033_v12  ;;  %v1360_v37 = vperm.slane %v1323_v43, 0  ;;  %v1344_v28 = vmul.f32 %v1325_v51, %v2035_v22 }
 0x217   : > { %v1345_v42 = vmul.f32 %v1325_v51, %v2037_v31  ;;  %v1346_v55 = vmul.f32 %v1325_v51, %v2039_v40  ;;  %v1347_v6 = vmul.f32 %v1325_v51, %v2043_v48  ;;  %v1348_v20 = vmul.f32 %v1325_v51, %v2112_v56 }
 0x218   : > { %v1349_v35 = vmul.f32 %v1325_v51, %v2119_v58  ;;  %v1350_v49 = vmul.f32 %v1325_v51, %v2125_v63  ;;  %v1351_v4 = vmul.f32 %v1325_v51, %v2130_v60  ;;  %v1352_v36 = vmul.f32 %v1325_v51, %v2135_v1 }
 0x219   : > { %v1353_v12 = vmul.f32 %v1325_v51, %v2139_v13  ;;  %v1354_v22 = vmul.f32 %v1325_v51, %v2143_v30  ;;  %v1355_v31 = vmul.f32 %v1325_v51, %v2147_v25  ;;  %v1356_v40 = vmul.f32 %v1325_v51, %v2151_v61 }
 0x21a   : > { %v1357_v48 = vmul.f32 %v1325_v51, %v2155_v3  ;;  %v1358_v56 = vmul.f32 %v1325_v51, %v2161_v21  ;;  %v1362_v41 = vadd.f32 %v1360_v37, %v1327_v23  ;;  %v1363_v58 = vadd.f32 %v1360_v37, %v1328_v46 }
 0x21b   : > { %v1364_v62 = vadd.f32 %v1360_v37, %v1329_v44  ;;  %v1365_v63 = vadd.f32 %v1360_v37, %v1330_v50  ;;  %v1366_v34 = vadd.f32 %v1360_v37, %v1331_v32  ;;  %v1367_v60 = vadd.f32 %v1360_v37, %v1332_v53 }
 0x21c   : > { %v1368_v45 = vadd.f32 %v1360_v37, %v1333_v59  ;;  %v2306_v1 = vadd.f32 %v1360_v37, %v1334_v57  ;;  %v2308_v13 = vadd.f32 %v1360_v37, %v1335_v9  ;;  %v2310_v30 = vadd.f32 %v1360_v37, %v1336_v11 }
 0x21d   : > { %v2312_v25 = vadd.f32 %v1360_v37, %v1337_v2  ;;  %v2314_v61 = vadd.f32 %v1360_v37, %v1338_v14  ;;  %v2316_v3 = vadd.f32 %v1360_v37, %v1339_v27  ;;  %v2318_v21 = vadd.f32 %v1360_v37, %v1340_v39 }
 0x21e   : > { %v2320_v47 = vadd.f32 %v1360_v37, %v1341_v52  ;;  %v2322_v33 = vadd.f32 %v1360_v37, %v1342_v0  ;;  %v2324_v54 = vadd.f32 %v1360_v37, %v1343_v15  ;;  %v2326_v5 = vadd.f32 %v1360_v37, %v1344_v28 }
 0x21f   : > { %v2328_v18 = vadd.f32 %v1360_v37, %v1345_v42  ;;  %v2330_v8 = vadd.f32 %v1360_v37, %v1346_v55  ;;  %v2332_v10 = vadd.f32 %v1360_v37, %v1347_v6  ;;  %v2334_v7 = vadd.f32 %v1360_v37, %v1348_v20 }
 0x220   : > { %v2336_v17 = vadd.f32 %v1360_v37, %v1349_v35  ;;  %v2338_v19 = vadd.f32 %v1360_v37, %v1350_v49  ;;  %v1426_v24 = vmul.f32 0.2, %v1362_v41  ;;  %v2340_v38 = vadd.f32 %v1360_v37, %v1351_v4 }
 0x221   : > { %v2342_v16 = vadd.f32 %v1360_v37, %v1352_v36  ;;  %vm1394_vm7 = vcmp.gt.f32.partialorder %v1362_v41, 0.0  ;;  %v1427_v26 = vmul.f32 0.2, %v1363_v58  ;;  %v2344_v51 = vadd.f32 %v1360_v37, %v1353_v12 }
 0x222   : > { %v2346_v29 = vadd.f32 %v1360_v37, %v1354_v22  ;;  %vm1395_vm8 = vcmp.gt.f32.partialorder %v1363_v58, 0.0  ;;  %v1428_v43 = vmul.f32 0.2, %v1364_v62  ;;  %v2348_v23 = vadd.f32 %v1360_v37, %v1355_v31 }
 0x223   : > { %v2350_v46 = vadd.f32 %v1360_v37, %v1356_v40  ;;  %vm1396_vm9 = vcmp.gt.f32.partialorder %v1364_v62, 0.0  ;;  %v1429_v44 = vmul.f32 0.2, %v1365_v63  ;;  %v2352_v50 = vadd.f32 %v1360_v37, %v1357_v48 }
 0x224   : > { %vm1397_vm10 = vcmp.gt.f32.partialorder %v1365_v63, 0.0  ;;  %v1430_v32 = vmul.f32 0.2, %v1366_v34  ;;  %v1458_v53 = vsel %vm1394_vm7, %v1362_v41, %v1426_v24  ;;  %v2355_v59 = vadd.f32 %v1360_v37, %v1358_v56 }
 0x225   : > { %vm1398_vm11 = vcmp.gt.f32.partialorder %v1366_v34, 0.0  ;;  %v1431_v57 = vmul.f32 0.2, %v1367_v60  ;;  %v1459_v9 = vsel %vm1395_vm8, %v1363_v58, %v1427_v26  ;;  %vm1399_vm12 = vcmp.gt.f32.partialorder %v1367_v60, 0.0 }
 0x226   : > { %vm1400_vm13 = vcmp.gt.f32.partialorder %v1368_v45, 0.0  ;;  %v1432_v11 = vmul.f32 0.2, %v1368_v45  ;;  %v1460_v2 = vsel %vm1396_vm9, %v1364_v62, %v1428_v43  ;;  %vm1401_vm14 = vcmp.gt.f32.partialorder %v2306_v1, 0.0 }
 0x227   : > { %v1433_v14 = vmul.f32 0.2, %v2306_v1  ;;  %v1461_v27 = vsel %vm1397_vm10, %v1365_v63, %v1429_v44  ;;  %v1490_v39 = vpack.c.bf16 %v1458_v53, %v1458_v53  ;;  %vm1402_vm15 = vcmp.gt.f32.partialorder %v2308_v13, 0.0 }
 0x228   : > { %v1434_v52 = vmul.f32 0.2, %v2308_v13  ;;  %v1462_v0 = vsel %vm1398_vm11, %v1366_v34, %v1430_v32  ;;  %v1491_v15 = vpack.c.bf16 %v1459_v9, %v1459_v9  ;;  %vm1403_vm0 = vcmp.gt.f32.partialorder %v2310_v30, 0.0 }
 0x229   : > { %v1435_v37 = vmul.f32 0.2, %v2310_v30  ;;  %v1463_v28 = vsel %vm1399_vm12, %v1367_v60, %v1431_v57  ;;  %v1492_v42 = vpack.c.bf16 %v1460_v2, %v1460_v2  ;;  %v1436_v55 = vmul.f32 0.2, %v2312_v25  ;;  %1523 = vst.msk [vmem:[%s2362_s20] sm:$0xf] %vm1522_vm1, %v1490_v39 }
 0x22a   : > { %v1464_v6 = vsel %vm1400_vm13, %v1368_v45, %v1432_v11  ;;  %v1493_v20 = vpack.c.bf16 %v1461_v27, %v1461_v27  ;;  %vm1404_vm2 = vcmp.gt.f32.partialorder %v2312_v25, 0.0  ;;  %v1437_v35 = vmul.f32 0.2, %v2314_v61  ;;  %1524 = vst.msk [vmem:[%s2362_s20 + $0x4] sm:$0xf] %vm1522_vm1, %v1491_v15 }
 0x22b   : > { %v1465_v49 = vsel %vm1401_vm14, %v2306_v1, %v1433_v14  ;;  %v1494_v4 = vpack.c.bf16 %v1462_v0, %v1462_v0  ;;  %vm1405_vm3 = vcmp.gt.f32.partialorder %v2314_v61, 0.0  ;;  %v1438_v36 = vmul.f32 0.2, %v2316_v3  ;;  %1525 = vst.msk [vmem:[%s2362_s20 + $0x8] sm:$0xf] %vm1522_vm1, %v1492_v42 }
 0x22c   : > { %v1466_v12 = vsel %vm1402_vm15, %v2308_v13, %v1434_v52  ;;  %v1495_v22 = vpack.c.bf16 %v1463_v28, %v1463_v28  ;;  %vm1406_vm4 = vcmp.gt.f32.partialorder %v2316_v3, 0.0  ;;  %v1439_v31 = vmul.f32 0.2, %v2318_v21  ;;  %1526 = vst.msk [vmem:[%s2362_s20 + $0xc] sm:$0xf] %vm1522_vm1, %v1493_v20 }
 0x22d   : > { %v1467_v40 = vsel %vm1403_vm0, %v2310_v30, %v1435_v37  ;;  %v1496_v48 = vpack.c.bf16 %v1464_v6, %v1464_v6  ;;  %vm1407_vm5 = vcmp.gt.f32.partialorder %v2318_v21, 0.0  ;;  %v1440_v56 = vmul.f32 0.2, %v2320_v47  ;;  %1527 = vst.msk [vmem:[%s2362_s20 + $0x10] sm:$0xf] %vm1522_vm1, %v1494_v4 }
 0x22e   : > { %v1468_v41 = vsel %vm1404_vm2, %v2312_v25, %v1436_v55  ;;  %v1497_v58 = vpack.c.bf16 %v1465_v49, %v1465_v49  ;;  %vm1408_vm6 = vcmp.gt.f32.partialorder %v2320_v47, 0.0  ;;  %v1441_v62 = vmul.f32 0.2, %v2322_v33  ;;  %1528 = vst.msk [vmem:[%s2362_s20 + $0x14] sm:$0xf] %vm1522_vm1, %v1495_v22 }
 0x22f   : > { %v1469_v63 = vsel %vm1405_vm3, %v2314_v61, %v1437_v35  ;;  %v1498_v34 = vpack.c.bf16 %v1466_v12, %v1466_v12  ;;  %vm1409_vm7 = vcmp.gt.f32.partialorder %v2322_v33, 0.0  ;;  %v1442_v60 = vmul.f32 0.2, %v2324_v54  ;;  %1529 = vst.msk [vmem:[%s2362_s20 + $0x18] sm:$0xf] %vm1522_vm1, %v1496_v48 }
 0x230   : > { %v1470_v45 = vsel %vm1406_vm4, %v2316_v3, %v1438_v36  ;;  %v1499_v1 = vpack.c.bf16 %v1467_v40, %v1467_v40  ;;  %vm1410_vm8 = vcmp.gt.f32.partialorder %v2324_v54, 0.0  ;;  %v1443_v13 = vmul.f32 0.2, %v2326_v5  ;;  %1530 = vst.msk [vmem:[%s2362_s20 + $0x1c] sm:$0xf] %vm1522_vm1, %v1497_v58 }
 0x231   : > { %v1471_v30 = vsel %vm1407_vm5, %v2318_v21, %v1439_v31  ;;  %v1500_v25 = vpack.c.bf16 %v1468_v41, %v1468_v41  ;;  %vm1411_vm9 = vcmp.gt.f32.partialorder %v2326_v5, 0.0  ;;  %v1444_v61 = vmul.f32 0.2, %v2328_v18  ;;  %1531 = vst.msk [vmem:[%s2362_s20 + $0x20] sm:$0xf] %vm1522_vm1, %v1498_v34 }
 0x232   : > { %v1472_v3 = vsel %vm1408_vm6, %v2320_v47, %v1440_v56  ;;  %v1501_v24 = vpack.c.bf16 %v1469_v63, %v1469_v63  ;;  %vm1412_vm10 = vcmp.gt.f32.partialorder %v2328_v18, 0.0  ;;  %v1445_v21 = vmul.f32 0.2, %v2330_v8  ;;  %1532 = vst.msk [vmem:[%s2362_s20 + $0x24] sm:$0xf] %vm1522_vm1, %v1499_v1 }
 0x233   : > { %v1473_v26 = vsel %vm1409_vm7, %v2322_v33, %v1441_v62  ;;  %v1502_v43 = vpack.c.bf16 %v1470_v45, %v1470_v45  ;;  %vm1413_vm11 = vcmp.gt.f32.partialorder %v2330_v8, 0.0  ;;  %v1446_v47 = vmul.f32 0.2, %v2332_v10  ;;  %1533 = vst.msk [vmem:[%s2362_s20 + $0x28] sm:$0xf] %vm1522_vm1, %v1500_v25 }
 0x234   : > { %v1474_v44 = vsel %vm1410_vm8, %v2324_v54, %v1442_v60  ;;  %v1503_v32 = vpack.c.bf16 %v1471_v30, %v1471_v30  ;;  %vm1414_vm12 = vcmp.gt.f32.partialorder %v2332_v10, 0.0  ;;  %v1447_v33 = vmul.f32 0.2, %v2334_v7  ;;  %1534 = vst.msk [vmem:[%s2362_s20 + $0x2c] sm:$0xf] %vm1522_vm1, %v1501_v24 }
 0x235   : > { %v1475_v53 = vsel %vm1411_vm9, %v2326_v5, %v1443_v13  ;;  %v1504_v57 = vpack.c.bf16 %v1472_v3, %v1472_v3  ;;  %vm1415_vm13 = vcmp.gt.f32.partialorder %v2334_v7, 0.0  ;;  %v1448_v54 = vmul.f32 0.2, %v2336_v17  ;;  %1535 = vst.msk [vmem:[%s2362_s20 + $0x30] sm:$0xf] %vm1522_vm1, %v1502_v43 }
 0x236   : > { %v1476_v9 = vsel %vm1412_vm10, %v2328_v18, %v1444_v61  ;;  %v1505_v11 = vpack.c.bf16 %v1473_v26, %v1473_v26  ;;  %vm1416_vm14 = vcmp.gt.f32.partialorder %v2336_v17, 0.0  ;;  %v1449_v5 = vmul.f32 0.2, %v2338_v19  ;;  %1536 = vst.msk [vmem:[%s2362_s20 + $0x34] sm:$0xf] %vm1522_vm1, %v1503_v32 }
 0x237   : > { %v1477_v2 = vsel %vm1413_vm11, %v2330_v8, %v1445_v21  ;;  %v1506_v14 = vpack.c.bf16 %v1474_v44, %v1474_v44  ;;  %vm1417_vm15 = vcmp.gt.f32.partialorder %v2338_v19, 0.0  ;;  %v1450_v18 = vmul.f32 0.2, %v2340_v38  ;;  %1537 = vst.msk [vmem:[%s2362_s20 + $0x38] sm:$0xf] %vm1522_vm1, %v1504_v57 }
 0x238   : > { %v1478_v27 = vsel %vm1414_vm12, %v2332_v10, %v1446_v47  ;;  %v1507_v39 = vpack.c.bf16 %v1475_v53, %v1475_v53  ;;  %vm1418_vm0 = vcmp.gt.f32.partialorder %v2340_v38, 0.0  ;;  %v1451_v8 = vmul.f32 0.2, %v2342_v16  ;;  %1538 = vst.msk [vmem:[%s2362_s20 + $0x3c] sm:$0xf] %vm1522_vm1, %v1505_v11 }
 0x239   : > { %v1479_v52 = vsel %vm1415_vm13, %v2334_v7, %v1447_v33  ;;  %v1508_v0 = vpack.c.bf16 %v1476_v9, %v1476_v9  ;;  %vm1419_vm2 = vcmp.gt.f32.partialorder %v2342_v16, 0.0  ;;  %v1452_v10 = vmul.f32 0.2, %v2344_v51  ;;  %1539 = vst.msk [vmem:[%s2362_s20 + $0x40] sm:$0xf] %vm1522_vm1, %v1506_v14 }
 0x23a   : > { %v1480_v15 = vsel %vm1416_vm14, %v2336_v17, %v1448_v54  ;;  %v1509_v37 = vpack.c.bf16 %v1477_v2, %v1477_v2  ;;  %vm1420_vm3 = vcmp.gt.f32.partialorder %v2344_v51, 0.0  ;;  %v1453_v7 = vmul.f32 0.2, %v2346_v29  ;;  %1540 = vst.msk [vmem:[%s2362_s20 + $0x44] sm:$0xf] %vm1522_vm1, %v1507_v39 }
 0x23b   : > { %v1481_v28 = vsel %vm1417_vm15, %v2338_v19, %v1449_v5  ;;  %v1510_v42 = vpack.c.bf16 %v1478_v27, %v1478_v27  ;;  %vm1421_vm4 = vcmp.gt.f32.partialorder %v2346_v29, 0.0  ;;  %v1454_v17 = vmul.f32 0.2, %v2348_v23  ;;  %1541 = vst.msk [vmem:[%s2362_s20 + $0x48] sm:$0xf] %vm1522_vm1, %v1508_v0 }
 0x23c   : > { %v1482_v55 = vsel %vm1418_vm0, %v2340_v38, %v1450_v18  ;;  %v1511_v6 = vpack.c.bf16 %v1479_v52, %v1479_v52  ;;  %vm1422_vm5 = vcmp.gt.f32.partialorder %v2348_v23, 0.0  ;;  %v1455_v19 = vmul.f32 0.2, %v2350_v46  ;;  %1542 = vst.msk [vmem:[%s2362_s20 + $0x4c] sm:$0xf] %vm1522_vm1, %v1509_v37 }
 0x23d   : > { %v1483_v20 = vsel %vm1419_vm2, %v2342_v16, %v1451_v8  ;;  %v1512_v35 = vpack.c.bf16 %v1480_v15, %v1480_v15  ;;  %vm1423_vm6 = vcmp.gt.f32.partialorder %v2350_v46, 0.0  ;;  %v1456_v38 = vmul.f32 0.2, %v2352_v50  ;;  %1543 = vst.msk [vmem:[%s2362_s20 + $0x50] sm:$0xf] %vm1522_vm1, %v1510_v42 }
 0x23e   : > { %v1484_v49 = vsel %vm1420_vm3, %v2344_v51, %v1452_v10  ;;  %v1513_v4 = vpack.c.bf16 %v1481_v28, %v1481_v28  ;;  %vm1424_vm7 = vcmp.gt.f32.partialorder %v2352_v50, 0.0  ;;  %v1457_v16 = vmul.f32 0.2, %v2355_v59  ;;  %1544 = vst.msk [vmem:[%s2362_s20 + $0x54] sm:$0xf] %vm1522_vm1, %v1511_v6 }
 0x23f   : > { %v1485_v36 = vsel %vm1421_vm4, %v2346_v29, %v1453_v7  ;;  %v1514_v12 = vpack.c.bf16 %v1482_v55, %v1482_v55  ;;  %vm1425_vm8 = vcmp.gt.f32.partialorder %v2355_v59, 0.0  ;;  %v1486_v51 = vsel %vm1422_vm5, %v2348_v23, %v1454_v17  ;;  %1545 = vst.msk [vmem:[%s2362_s20 + $0x58] sm:$0xf] %vm1522_vm1, %v1512_v35 }
 0x240   : > { %v1515_v22 = vpack.c.bf16 %v1483_v20, %v1483_v20  ;;  %v1487_v31 = vsel %vm1423_vm6, %v2350_v46, %v1455_v19  ;;  %v1516_v29 = vpack.c.bf16 %v1484_v49, %v1484_v49  ;;  %v1488_v40 = vsel %vm1424_vm7, %v2352_v50, %v1456_v38  ;;  %1546 = vst.msk [vmem:[%s2362_s20 + $0x5c] sm:$0xf] %vm1522_vm1, %v1513_v4 }
 0x241   : > { %v1517_v48 = vpack.c.bf16 %v1485_v36, %v1485_v36  ;;  %v1489_v23 = vsel %vm1425_vm8, %v2355_v59, %v1457_v16  ;;  %v1518_v56 = vpack.c.bf16 %v1486_v51, %v1486_v51  ;;  %1547 = vst.msk [vmem:[%s2362_s20 + $0x60] sm:$0xf] %vm1522_vm1, %v1514_v12  ;;  %v1519_v41 = vpack.c.bf16 %v1487_v31, %v1487_v31 }
 0x242   : > { %1548 = vst.msk [vmem:[%s2362_s20 + $0x64] sm:$0xf] %vm1522_vm1, %v1515_v22  ;;  %v1520_v46 = vpack.c.bf16 %v1488_v40, %v1488_v40  ;;  %v1521_v58 = vpack.c.bf16 %v1489_v23, %v1489_v23 }
 0x243   : > { %1549 = vst.msk [vmem:[%s2362_s20 + $0x68] sm:$0xf] %vm1522_vm1, %v1516_v29 }
 0x244   : > { %1550 = vst.msk [vmem:[%s2362_s20 + $0x6c] sm:$0xf] %vm1522_vm1, %v1517_v48 }
 0x245   : > { %1551 = vst.msk [vmem:[%s2362_s20 + $0x70] sm:$0xf] %vm1522_vm1, %v1518_v56 }
 0x246   : > { %1552 = vst.msk [vmem:[%s2362_s20 + $0x74] sm:$0xf] %vm1522_vm1, %v1519_v41 }
 0x247   : > { %1553 = vst.msk [vmem:[%s2362_s20 + $0x78] sm:$0xf] %vm1522_vm1, %v1520_v46 }
 0x248   : > { %1554 = vst.msk [vmem:[%s2362_s20 + $0x7c] sm:$0xf] %vm1522_vm1, %v1521_v58 }
 0x249 PF: > { %s14_s15 = sadd.s32 1, %s1801_s15  }
 0x24a   : > { %p11_p4 = scmp.ge.s32.totalorder %s14_s15, 4  }
 0x24c   :  { %13 = sbr.rel (!%p11_p4) target bundleno = 1 (0x1), region = 69 }

// kernel: critic_forward.6
= control target key start
LH: loop header
LB: loop body
LE: loop exit
PB: predicated region body
PF: predicated region fallthrough
CT: control target
= control target key end

     0   :  { %s999_s15 = smov 0   ;;  %s1190_s0 = inlined_call_operand.vmem [shape: bf16[2,9,9,64], index: 0, kind: input, shape index: {}]   ;;  %s1191_s1 = inlined_call_operand.vmem [shape: bf16[4,64,32], index: 1, kind: input, shape index: {}]   ;;  %s1192_s2 = inlined_call_operand.vmem [shape: f32[1,32], index: 2, kind: input, shape index: {}]   ;;  %s1193_s3 = inlined_call_operand.vmem [shape: f32[1,32], index: 3, kind: input, shape index: {}]   ;;  %s1194_s4 = inlined_call_operand.vmem [shape: bf16[2,64,32], index: 4, kind: output, shape index: {}]  }
   0x1 LB: > { %s820_s16 = sadd.s32 4294967295, %s971_s15   ;;  %p824_p0 = scmp.ge.s32.totalorder %s971_s15, 1  ;;  %s971_s15 = sphi %s999_s15, %s14_s15  }
   0x2   : > { %p162_p1 = scmp.lt.s32.totalorder %s971_s15, 3 }
   0x4   : > { %p163_p2 = pnand %p824_p0, %p162_p1 }
   0x5   : > { %p188_p3 = scmp.lt.s32.totalorder (!%p163_p2), %s820_s16, 1 }
   0x6   : > { %166 = sbr.rel (%p163_p2) target bundleno = 316 (0x13c), region = 36 }
   0xb   : > { %v942_v0 = vld [vmem:[%s1191_s1 + $0x38] sm:$0xff]  ;;  %v941_v4 = vld [vmem:[%s1191_s1 + $0x30] sm:$0xff]  ;;  %s1196_s16 = smov (!%p188_p3, %s820_s16), 1  ;;  %v940_v8 = vld [vmem:[%s1191_s1 + $0x28] sm:$0xff]  ;;  %vm263_vm0 = vcmask 1046528   ;;  %vm333_vm1 = vcmask 523264  }
   0xc   : > { %v938_v1 = vld [vmem:[%s1191_s1 + $0x18] sm:$0xff]  ;;  %350 = vmatpush.bf16.msra.mxu0 %v942_v0  ;;  %v937_v5 = vld [vmem:[%s1191_s1 + $0x10] sm:$0xff]  ;;  %s951_s7 = smul.u32 72, %s1196_s16  ;;  %v936_v9 = vld [vmem:[%s1191_s1 + $0x8] sm:$0xff]  ;;  %vm618_vm2 = vcmask 261120   ;;  %vm756_vm7 = vcmask 257024  }
   0xd   : > { %v946_v2 = vld [vmem:[%s1191_s1 + $0x58] sm:$0xff]  ;;  %415 = vmatpush.bf16.msra.mxu1 %v938_v1  ;;  %v945_v6 = vld [vmem:[%s1191_s1 + $0x50] sm:$0xff]  ;;  %v944_v10 = vld [vmem:[%s1191_s1 + $0x48] sm:$0xff] }
   0xe   : > { %v950_v3 = vld [vmem:[%s1191_s1 + $0x78] sm:$0xff]  ;;  %493 = vmatpush.bf16.msra.mxu2 %v946_v2  ;;  %v949_v7 = vld [vmem:[%s1191_s1 + $0x70] sm:$0xff]  ;;  %v948_v11 = vld [vmem:[%s1191_s1 + $0x68] sm:$0xff]  ;;  %s1049_s20 = scalar_lea.vmem %s1190_s0, %s951_s7  ;;  %s934_s7 = sshll.u32 %s1196_s16, 5 }
   0xf   : > { %585 = vmatpush.bf16.msra.mxu3 %v950_v3  ;;  %v199_v12 = vld [vmem:[%s1049_s20] sm:$0xf]  ;;  %v200_v13 = vld [vmem:[%s1049_s20 + $0x4] sm:$0x1]  ;;  %v201_v14 = vld [vmem:[%s1049_s20 + $0x8] sm:$0xf]  ;;  %s197_s16 = scalar_lea.vmem %s1194_s4, %s934_s7 }
  0x10   : > { %351 = vmatpush.bf16.msra.mxu0 %v941_v4  ;;  %v202_v15 = vld [vmem:[%s1049_s20 + $0xc] sm:$0x1]  ;;  %v217_v16 = vunpack.c.l.bf16 %v199_v12  ;;  %v218_v17 = vunpack.c.l.bf16 %v200_v13  ;;  %v219_v18 = vunpack.c.l.bf16 %v201_v14  ;;  %v203_v19 = vld [vmem:[%s1049_s20 + $0x10] sm:$0xf]  ;;  %v204_v20 = vld [vmem:[%s1049_s20 + $0x14] sm:$0x1] }
  0x11   : > { %416 = vmatpush.bf16.msra.mxu1 %v937_v5  ;;  %v220_v21 = vunpack.c.l.bf16 %v202_v15  ;;  %v221_v22 = vunpack.c.l.bf16 %v203_v19  ;;  %v222_v23 = vunpack.c.l.bf16 %v204_v20  ;;  %v939_v24 = vld [vmem:[%s1191_s1 + $0x20] sm:$0xff]  ;;  %v205_v41 = vld [vmem:[%s1049_s20 + $0x18] sm:$0xf]  ;;  %v206_v42 = vld [vmem:[%s1049_s20 + $0x1c] sm:$0x1] }
  0x12   : > { %494 = vmatpush.bf16.msra.mxu2 %v945_v6  ;;  %v935_v25 = vld [vmem:[%s1191_s1] sm:$0xff]  ;;  %v264_v26 = vrot.slane %v217_v16, 1  ;;  %v265_v27 = vrot.slane %v218_v17, 1  ;;  %v267_v28 = vrot.slane %v219_v18, 1  ;;  %v235_v36 = vpack.c.bf16 %v219_v18, %v217_v16  ;;  %v209_v59 = vld [vmem:[%s1049_s20 + $0x28] sm:$0xf] }
  0x13   : > { %586 = vmatpush.bf16.msra.mxu3 %v949_v7  ;;  %v943_v29 = vld [vmem:[%s1191_s1 + $0x40] sm:$0xff]  ;;  %v268_v31 = vrot.slane %v220_v21, 1  ;;  %v270_v32 = vrot.slane %v221_v22, 1  ;;  %v271_v33 = vrot.slane %v222_v23, 1  ;;  %v440_v39 = vpack.c.bf16 %v221_v22, %v219_v18  ;;  %v210_v60 = vld [vmem:[%s1049_s20 + $0x2c] sm:$0x1] }
  0x14   : > { %352 = vmatpush.bf16.msra.mxu0 %v940_v8  ;;  %v947_v30 = vld [vmem:[%s1191_s1 + $0x60] sm:$0xff]  ;;  %v266_v34 = vsel %vm263_vm0, %v264_v26, %v265_v27  ;;  %v223_v45 = vunpack.c.l.bf16 %v205_v41  ;;  %v224_v46 = vunpack.c.l.bf16 %v206_v42  ;;  %v211_v61 = vld [vmem:[%s1049_s20 + $0x30] sm:$0xf]  ;;  %v212_v62 = vld [vmem:[%s1049_s20 + $0x34] sm:$0x1]  ;;  %v227_v63 = vunpack.c.l.bf16 %v209_v59 }
  0x15   : > { %417 = vmatpush.bf16.msra.mxu1 %v936_v9  ;;  %v269_v35 = vsel %vm263_vm0, %v267_v28, %v268_v31  ;;  %v272_v37 = vsel %vm263_vm0, %v270_v32, %v271_v33  ;;  %v207_v43 = vld [vmem:[%s1049_s20 + $0x20] sm:$0xf]  ;;  %v208_v44 = vld [vmem:[%s1049_s20 + $0x24] sm:$0x1]  ;;  %v228_v0 = vunpack.c.l.bf16 %v210_v60  ;;  %v229_v1 = vunpack.c.l.bf16 %v211_v61  ;;  %v213_v13 = vld [vmem:[%s1049_s20 + $0x38] sm:$0xf] }
  0x16   : > { %495 = vmatpush.bf16.msra.mxu2 %v944_v10  ;;  %v296_v38 = vpack.c.bf16 %v269_v35, %v266_v34  ;;  %v532_v40 = vpack.c.bf16 %v272_v37, %v269_v35  ;;  %v225_v47 = vunpack.c.l.bf16 %v207_v43  ;;  %v226_v48 = vunpack.c.l.bf16 %v208_v44  ;;  %v214_v14 = vld [vmem:[%s1049_s20 + $0x3c] sm:$0x1]  ;;  %v215_v15 = vld [vmem:[%s1049_s20 + $0x40] sm:$0xf]  ;;  %v216_v16 = vld [vmem:[%s1049_s20 + $0x44] sm:$0x1] }
  0x17   : > { %587 = vmatpush.bf16.msra.mxu3 %v948_v11  ;;  %v273_v49 = vrot.slane %v223_v45, 1  ;;  %v274_v50 = vrot.slane %v224_v46, 1  ;;  %v236_v56 = vpack.c.bf16 %v223_v45, %v221_v22  ;;  %v230_v2 = vunpack.c.l.bf16 %v212_v62 }
  0x18   : > { %353 = vmatpush.bf16.msra.mxu0 %v939_v24  ;;  %v276_v51 = vrot.slane %v225_v47, 1  ;;  %v277_v52 = vrot.slane %v226_v48, 1  ;;  %v441_v57 = vpack.c.bf16 %v225_v47, %v223_v45  ;;  %v279_v3 = vrot.slane %v227_v63, 1 }
  0x19   : > { %418 = vmatpush.bf16.msra.mxu1 %v935_v25  ;;  %v275_v53 = vsel %vm263_vm0, %v273_v49, %v274_v50  ;;  %v280_v4 = vrot.slane %v228_v0, 1  ;;  %v282_v5 = vrot.slane %v229_v1, 1  ;;  %v283_v6 = vrot.slane %v230_v2, 1 }
  0x1a   : > { %496 = vmatpush.bf16.msra.mxu2 %v943_v29  ;;  %v278_v54 = vsel %vm263_vm0, %v276_v51, %v277_v52  ;;  %v297_v55 = vpack.c.bf16 %v275_v53, %v272_v37  ;;  %v237_v10 = vpack.c.bf16 %v227_v63, %v225_v47  ;;  %v442_v11 = vpack.c.bf16 %v229_v1, %v227_v63 }
  0x1b   : > { %588 = vmatpush.bf16.msra.mxu3 %v947_v30  ;;  %852 = vmatmul.msk.bf16.vlgmr.msra.gmra.mxu0 %vm333_vm1, %v296_v38  ;;  %v533_v58 = vpack.c.bf16 %v278_v54, %v275_v53  ;;  %v281_v7 = vsel %vm263_vm0, %v279_v3, %v280_v4  ;;  %v284_v8 = vsel %vm263_vm0, %v282_v5, %v283_v6  ;;  %v231_v17 = vunpack.c.l.bf16 %v213_v13 }
  0x1c   : > { %872 = vmatmul.msk.bf16.vlgmr.msra.gmra.mxu1 %vm333_vm1, %v235_v36  ;;  %v298_v9 = vpack.c.bf16 %v281_v7, %v278_v54  ;;  %v534_v12 = vpack.c.bf16 %v284_v8, %v281_v7  ;;  %v232_v18 = vunpack.c.l.bf16 %v214_v14  ;;  %v233_v19 = vunpack.c.l.bf16 %v215_v15 }
  0x1d   : > { %900 = vmatmul.msk.bf16.vlgmr.msra.gmra.mxu2 %vm333_vm1, %v440_v39  ;;  %v234_v20 = vunpack.c.l.bf16 %v216_v16  ;;  %v285_v21 = vrot.slane %v231_v17, 1  ;;  %v238_v28 = vpack.c.bf16 %v231_v17, %v229_v1  ;;  %v973_v13 = vmov 64.0  }
  0x1e   : > { %928 = vmatmul.msk.bf16.vlgmr.msra.gmra.mxu3 %vm333_vm1, %v532_v40  ;;  %v286_v22 = vrot.slane %v232_v18, 1  ;;  %v528_v23 = vrot.slane %v233_v19, 1  ;;  %v443_v29 = vpack.c.bf16 %v233_v19, %v231_v17  ;;  %961 = vrcp.f32 %v973_v13 }
  0x1f   : > { %v529_v24 = vrot.slane %v234_v20, 1 }
  0x20   : > { %v287_v25 = vsel %vm263_vm0, %v285_v21, %v286_v22 }
  0x21   : > { %v530_v26 = vsel %vm263_vm0, %v528_v23, %v529_v24  ;;  %v299_v27 = vpack.c.bf16 %v287_v25, %v284_v8 }
  0x22   : > { %v535_v30 = vpack.c.bf16 %v530_v26, %v287_v25 }
  0x24   : > { %v962_v26 = vpop.eup %961 }
  0x25   : > { %vm645_vm3 = vweird.f32 %v962_v26 }
  0x2b   : > { %853 = vmatmul.msk.bf16.gmra.mxu0 %vm333_vm1, %v297_v55 }
  0x2c   : > { %873 = vmatmul.msk.bf16.gmra.mxu1 %vm333_vm1, %v236_v56 }
  0x2d   : > { %901 = vmatmul.msk.bf16.gmra.mxu2 %vm333_vm1, %v441_v57 }
  0x2e   : > { %929 = vmatmul.msk.bf16.gmra.mxu3 %vm333_vm1, %v533_v58 }
  0x3b   : > { %854 = vmatmul.msk.bf16.gmra.mxu0 %vm333_vm1, %v298_v9 }
  0x3c   : > { %874 = vmatmul.msk.bf16.gmra.mxu1 %vm333_vm1, %v237_v10 }
  0x3d   : > { %902 = vmatmul.msk.bf16.gmra.mxu2 %vm333_vm1, %v442_v11 }
  0x3e   : > { %930 = vmatmul.msk.bf16.gmra.mxu3 %vm333_vm1, %v534_v12 }
  0x4b   : > { %855 = vmatmul.msk.bf16.gmra.mxu0 %vm333_vm1, %v299_v27 }
  0x4c   : > { %875 = vmatmul.msk.bf16.gmra.mxu1 %vm333_vm1, %v238_v28 }
  0x4d   : > { %903 = vmatmul.msk.bf16.gmra.mxu2 %vm333_vm1, %v443_v29 }
  0x4e   : > { %931 = vmatmul.msk.bf16.gmra.mxu3 %vm333_vm1, %v535_v30 }
  0x98   : > { %v355_v31 = vpop.f32.mrf.mxu0 }
  0x99   : > { %v420_v32 = vpop.f32.mrf.mxu1 }
  0x9a   : > { %v421_v53 = vadd.f32 %v420_v32, %v355_v31 }
  0xa0   : > { %v498_v33 = vpop.f32.mrf.mxu2  ;;  %v357_v35 = vpop.f32.mrf.mxu0 }
  0xa1   : > { %v590_v34 = vpop.f32.mrf.mxu3  ;;  %v422_v36 = vpop.f32.mrf.mxu1  ;;  %v518_v57 = vadd.f32 %v498_v33, %v421_v53 }
  0xa2   : > { %v423_v55 = vadd.f32 %v422_v36, %v357_v35 }
  0xa3   : > { %v1108_v3 = vadd.f32 %v590_v34, %v518_v57  ;;  %v641_v34 = vmul.f32 64.0, %v962_v26 }
  0xa5   : > { %v619_v14 = vsel %vm618_vm2, %v1108_v3, 0.0 }
  0xa8   : > { %v500_v37 = vpop.f32.mrf.mxu2  ;;  %v360_v39 = vpop.f32.mrf.mxu0 }
  0xa9   : > { %v592_v38 = vpop.f32.mrf.mxu3  ;;  %v425_v40 = vpop.f32.mrf.mxu1  ;;  %v519_v56 = vadd.f32 %v500_v37, %v423_v55 }
  0xaa   : > { %v426_v54 = vadd.f32 %v425_v40, %v360_v39  ;;  %v642_v40 = vsub.f32 1.0, %v641_v34 }
  0xab   : > { %v1106_v1 = vadd.f32 %v592_v38, %v519_v56 }
  0xad   : > { %v620_v8 = vsel %vm618_vm2, %v1106_v1, 0.0 }
  0xae   : > { %v621_v18 = vadd.f32 %v620_v8, %v619_v14 }
  0xb0   : > { %v503_v41 = vpop.f32.mrf.mxu2  ;;  %v362_v43 = vpop.f32.mrf.mxu0 }
  0xb1   : > { %v595_v42 = vpop.f32.mrf.mxu3  ;;  %v427_v44 = vpop.f32.mrf.mxu1  ;;  %v520_v58 = vadd.f32 %v503_v41, %v426_v54 }
  0xb2   : > { %v428_v61 = vadd.f32 %v427_v44, %v362_v43  ;;  %v643_v43 = vmul.f32 %v962_v26, %v642_v40  ;;  %v686_v40 = vld [vmem:[%s1192_s2] sm:$0x1] }
  0xb3   : > { %v1110_v4 = vadd.f32 %v595_v42, %v520_v58 }
  0xb5   : > { %v622_v15 = vsel %vm618_vm2, %v1110_v4, 0.0 }
  0xb6   : > { %v623_v21 = vadd.f32 %v622_v15, %v621_v18 }
  0xb8   : > { %v505_v45 = vpop.f32.mrf.mxu2  ;;  %v365_v47 = vpop.f32.mrf.mxu0 }
  0xb9   : > { %v597_v46 = vpop.f32.mrf.mxu3  ;;  %v430_v48 = vpop.f32.mrf.mxu1  ;;  %v521_v2 = vadd.f32 %v505_v45, %v428_v61 }
  0xba   : > { %v431_v62 = vadd.f32 %v430_v48, %v365_v47 }
  0xbb   : > { %v1114_v9 = vadd.f32 %v597_v46, %v521_v2  ;;  %v644_v46 = vadd.f32 %v962_v26, %v643_v43 }
  0xbd   : > { %v624_v19 = vsel %vm618_vm2, %v1114_v9, 0.0 }
  0xbe   : > { %v625_v27 = vadd.f32 %v624_v19, %v623_v21 }
  0xc0   : > { %v508_v49 = vpop.f32.mrf.mxu2  ;;  %v367_v51 = vpop.f32.mrf.mxu0 }
  0xc1   : > { %v600_v50 = vpop.f32.mrf.mxu3  ;;  %v432_v52 = vpop.f32.mrf.mxu1  ;;  %v522_v5 = vadd.f32 %v508_v49, %v431_v62  ;;  %v646_v49 = vsel %vm645_vm3, %v962_v26, %v644_v46 }
  0xc2   : > { %v433_v6 = vadd.f32 %v432_v52, %v367_v51 }
  0xc3   : > { %v1120_v16 = vadd.f32 %v600_v50, %v522_v5 }
  0xc5   : > { %v626_v24 = vsel %vm618_vm2, %v1120_v16, 0.0 }
  0xc6   : > { %v627_v30 = vadd.f32 %v626_v24, %v625_v27 }
  0xc8   : > { %v510_v59 = vpop.f32.mrf.mxu2  ;;  %v370_v63 = vpop.f32.mrf.mxu0 }
  0xc9   : > { %v602_v60 = vpop.f32.mrf.mxu3  ;;  %v435_v0 = vpop.f32.mrf.mxu1  ;;  %v523_v10 = vadd.f32 %v510_v59, %v433_v6 }
  0xca   : > { %v436_v7 = vadd.f32 %v435_v0, %v370_v63 }
  0xcb   : > { %v1124_v20 = vadd.f32 %v602_v60, %v523_v10 }
  0xcd   : > { %v628_v28 = vsel %vm618_vm2, %v1124_v20, 0.0 }
  0xce   : > { %v629_v35 = vadd.f32 %v628_v28, %v627_v30 }
  0xd0   : > { %v513_v11 = vpop.f32.mrf.mxu2  ;;  %v372_v22 = vpop.f32.mrf.mxu0 }
  0xd1   : > { %v605_v12 = vpop.f32.mrf.mxu3  ;;  %v524_v17 = vadd.f32 %v513_v11, %v436_v7  ;;  %v437_v23 = vpop.f32.mrf.mxu1 }
  0xd2   : > { %v438_v29 = vadd.f32 %v437_v23, %v372_v22 }
  0xd3   : > { %v1128_v25 = vadd.f32 %v605_v12, %v524_v17 }
  0xd5   : > { %v630_v32 = vsel %vm618_vm2, %v1128_v25, 0.0 }
  0xd6   : > { %v631_v38 = vadd.f32 %v630_v32, %v629_v35 }
  0xd8   : > { %v515_v31 = vpop.f32.mrf.mxu2 }
  0xd9   : > { %v525_v33 = vadd.f32 %v515_v31, %v438_v29  ;;  %v607_v36 = vpop.f32.mrf.mxu3 }
  0xdb   : > { %v1134_v37 = vadd.f32 %v607_v36, %v525_v33 }
  0xdd   : > { %v632_v39 = vsel %vm618_vm2, %v1134_v37, 0.0 }
  0xde   : > { %v633_v41 = vadd.f32 %v632_v39, %v631_v38 }
  0xe0   : > { %v634_v42 = vrot.slane %v633_v41, 4 }
  0xe2   : > { %v635_v44 = vadd.f32 %v634_v42, %v633_v41 }
  0xe4   : > { %v636_v45 = vrot.slane %v635_v44, 2 }
  0xe6   : > { %v637_v47 = vadd.f32 %v636_v45, %v635_v44  ;;  %v699_v44 = vld [vmem:[%s1193_s3] sm:$0x1] }
  0xe8   : > { %v638_v48 = vrot.slane %v637_v47, 1 }
  0xea   : > { %v639_v50 = vadd.f32 %v638_v48, %v637_v47 }
  0xec   : > { %v647_v51 = vmul.f32 %v646_v49, %v639_v50 }
  0xee   : > { %v648_v52 = vsub.f32 %v1108_v3, %v647_v51  ;;  %v649_v53 = vsub.f32 %v1106_v1, %v647_v51  ;;  %v650_v54 = vsub.f32 %v1110_v4, %v647_v51  ;;  %v651_v55 = vsub.f32 %v1114_v9, %v647_v51 }
  0xef   : > { %v652_v56 = vsub.f32 %v1120_v16, %v647_v51  ;;  %v653_v60 = vsub.f32 %v1124_v20, %v647_v51  ;;  %v654_v2 = vsub.f32 %v1128_v25, %v647_v51  ;;  %v655_v8 = vsub.f32 %v1134_v37, %v647_v51 }
  0xf0   : > { %v656_v57 = vmul.f32 %v648_v52, %v648_v52  ;;  %v657_v58 = vmul.f32 %v649_v53, %v649_v53  ;;  %v658_v59 = vmul.f32 %v650_v54, %v650_v54  ;;  %v659_v61 = vmul.f32 %v651_v55, %v651_v55 }
  0xf1   : > { %v660_v5 = vmul.f32 %v652_v56, %v652_v56  ;;  %v661_v10 = vmul.f32 %v653_v60, %v653_v60  ;;  %v662_v13 = vmul.f32 %v654_v2, %v654_v2  ;;  %v663_v17 = vmul.f32 %v655_v8, %v655_v8 }
  0xf2   : > { %v664_v62 = vsel %vm618_vm2, %v656_v57, 0.0  ;;  %v665_v63 = vsel %vm618_vm2, %v657_v58, 0.0  ;;  %v667_v6 = vsel %vm618_vm2, %v658_v59, 0.0  ;;  %v669_v11 = vsel %vm618_vm2, %v659_v61, 0.0 }
  0xf3   : > { %v666_v0 = vadd.f32 %v665_v63, %v664_v62  ;;  %v671_v14 = vsel %vm618_vm2, %v660_v5, 0.0  ;;  %v673_v18 = vsel %vm618_vm2, %v661_v10, 0.0  ;;  %v675_v21 = vsel %vm618_vm2, %v662_v13, 0.0 }
  0xf4   : > { %v677_v23 = vsel %vm618_vm2, %v663_v17, 0.0 }
  0xf5   : > { %v668_v7 = vadd.f32 %v667_v6, %v666_v0 }
  0xf7   : > { %v670_v12 = vadd.f32 %v669_v11, %v668_v7 }
  0xf9   : > { %v672_v15 = vadd.f32 %v671_v14, %v670_v12 }
  0xfb   : > { %v674_v19 = vadd.f32 %v673_v18, %v672_v15 }
  0xfd   : > { %v676_v22 = vadd.f32 %v675_v21, %v674_v19 }
  0xff   : > { %v678_v24 = vadd.f32 %v677_v23, %v676_v22 }
 0x101   : > { %v679_v26 = vrot.slane %v678_v24, 4 }
 0x103   : > { %v680_v27 = vadd.f32 %v679_v26, %v678_v24 }
 0x105   : > { %v681_v28 = vrot.slane %v680_v27, 2 }
 0x107   : > { %v682_v29 = vadd.f32 %v681_v28, %v680_v27 }
 0x109   : > { %v683_v30 = vrot.slane %v682_v29, 1 }
 0x10b   : > { %v684_v31 = vadd.f32 %v683_v30, %v682_v29 }
 0x10d   : > { %v685_v32 = vmul.f32 %v684_v31, %v646_v49 }
 0x10f   : > { %v687_v33 = vadd.f32 1e-05, %v685_v32 }
 0x111   : > { %963 = vrsqrt.f32 %v687_v33  ;;  %vm694_vm5 = vweird.f32 %v687_v33 }
 0x117   : > { %v964_v34 = vpop.eup %963 }
 0x118   : > { %v689_v35 = vmul.f32 %v964_v34, %v687_v33  ;;  %vm695_vm4 = vweird.f32 %v964_v34 }
 0x119   : > { %vm696_vm6 = vmor %vm694_vm5, %vm695_vm4 }
 0x11a   : > { %v690_v36 = vmul.f32 %v964_v34, %v689_v35 }
 0x11c   : > { %v691_v38 = vmul.f32 0.5, %v690_v36 }
 0x11e   : > { %v692_v39 = vsub.f32 1.5, %v691_v38 }
 0x120   : > { %v693_v41 = vmul.f32 %v964_v34, %v692_v39 }
 0x122   : > { %v697_v42 = vsel %vm696_vm6, %v964_v34, %v693_v41 }
 0x123   : > { %v698_v43 = vmul.f32 %v697_v42, %v686_v40 }
 0x125   : > { %v700_v45 = vmul.f32 %v698_v43, %v647_v51  ;;  %v703_v46 = vperm.slane %v698_v43, 0 }
 0x127   : > { %v701_v47 = vsub.f32 %v699_v44, %v700_v45  ;;  %v705_v48 = vmul.f32 %v703_v46, %v1108_v3  ;;  %v706_v49 = vmul.f32 %v703_v46, %v1106_v1  ;;  %v707_v50 = vmul.f32 %v703_v46, %v1110_v4 }
 0x128   : > { %v708_v52 = vmul.f32 %v703_v46, %v1114_v9  ;;  %v709_v54 = vmul.f32 %v703_v46, %v1120_v16  ;;  %v710_v55 = vmul.f32 %v703_v46, %v1124_v20  ;;  %v711_v56 = vmul.f32 %v703_v46, %v1128_v25 }
 0x129   : > { %v714_v53 = vperm.slane %v701_v47, 0  ;;  %v712_v51 = vmul.f32 %v703_v46, %v1134_v37 }
 0x12b   : > { %v716_v57 = vadd.f32 %v714_v53, %v705_v48  ;;  %v717_v58 = vadd.f32 %v714_v53, %v706_v49  ;;  %v718_v59 = vadd.f32 %v714_v53, %v707_v50  ;;  %v719_v3 = vadd.f32 %v714_v53, %v708_v52 }
 0x12c   : > { %v720_v60 = vadd.f32 %v714_v53, %v709_v54  ;;  %v721_v1 = vadd.f32 %v714_v53, %v710_v55  ;;  %v722_v61 = vadd.f32 %v714_v53, %v711_v56  ;;  %v723_v4 = vadd.f32 %v714_v53, %v712_v51 }
 0x12d   : > { %vm724_vm8 = vcmp.gt.f32.partialorder %v716_v57, 0.0  ;;  %vm725_vm9 = vcmp.gt.f32.partialorder %v717_v58, 0.0  ;;  %vm726_vm10 = vcmp.gt.f32.partialorder %v718_v59, 0.0  ;;  %vm727_vm11 = vcmp.gt.f32.partialorder %v719_v3, 0.0 }
 0x12e   : > { %vm728_vm12 = vcmp.gt.f32.partialorder %v720_v60, 0.0  ;;  %vm729_vm13 = vcmp.gt.f32.partialorder %v721_v1, 0.0  ;;  %vm730_vm14 = vcmp.gt.f32.partialorder %v722_v61, 0.0  ;;  %v732_v9 = vmul.f32 0.2, %v716_v57 }
 0x12f   : > { %v733_v16 = vmul.f32 0.2, %v717_v58  ;;  %v734_v20 = vmul.f32 0.2, %v718_v59  ;;  %v735_v25 = vmul.f32 0.2, %v719_v3 }
 0x130   : > { %v736_v37 = vmul.f32 0.2, %v720_v60  ;;  %v737_v62 = vmul.f32 0.2, %v721_v1  ;;  %v738_v63 = vmul.f32 0.2, %v722_v61  ;;  %v740_v2 = vsel %vm724_vm8, %v716_v57, %v732_v9 }
 0x131   : > { %v739_v0 = vmul.f32 0.2, %v723_v4  ;;  %v741_v5 = vsel %vm725_vm9, %v717_v58, %v733_v16  ;;  %vm731_vm15 = vcmp.gt.f32.partialorder %v723_v4, 0.0  ;;  %v742_v6 = vsel %vm726_vm10, %v718_v59, %v734_v20 }
 0x132   : > { %v743_v7 = vsel %vm727_vm11, %v719_v3, %v735_v25  ;;  %v744_v8 = vsel %vm728_vm12, %v720_v60, %v736_v37  ;;  %v745_v10 = vsel %vm729_vm13, %v721_v1, %v737_v62  ;;  %v748_v11 = vpack.c.bf16 %v740_v2, %v740_v2 }
 0x133   : > { %v749_v12 = vpack.c.bf16 %v741_v5, %v741_v5  ;;  %v746_v13 = vsel %vm730_vm14, %v722_v61, %v738_v63  ;;  %v750_v14 = vpack.c.bf16 %v742_v6, %v742_v6  ;;  %v751_v15 = vpack.c.bf16 %v743_v7, %v743_v7 }
 0x134   : > { %v747_v17 = vsel %vm731_vm15, %v723_v4, %v739_v0  ;;  %v752_v18 = vpack.c.bf16 %v744_v8, %v744_v8  ;;  %757 = vst.msk [vmem:[%s197_s16] sm:$0xf] %vm756_vm7, %v748_v11  ;;  %v753_v19 = vpack.c.bf16 %v745_v10, %v745_v10  ;;  %v754_v21 = vpack.c.bf16 %v746_v13, %v746_v13 }
 0x135   : > { %758 = vst.msk [vmem:[%s197_s16 + $0x4] sm:$0xf] %vm756_vm7, %v749_v12  ;;  %v755_v22 = vpack.c.bf16 %v747_v17, %v747_v17 }
 0x136   : > { %759 = vst.msk [vmem:[%s197_s16 + $0x8] sm:$0xf] %vm756_vm7, %v750_v14 }
 0x137   : > { %760 = vst.msk [vmem:[%s197_s16 + $0xc] sm:$0xf] %vm756_vm7, %v751_v15 }
 0x138   : > { %761 = vst.msk [vmem:[%s197_s16 + $0x10] sm:$0xf] %vm756_vm7, %v752_v18 }
 0x139   : > { %762 = vst.msk [vmem:[%s197_s16 + $0x14] sm:$0xf] %vm756_vm7, %v753_v19 }
 0x13a   : > { %763 = vst.msk [vmem:[%s197_s16 + $0x18] sm:$0xf] %vm756_vm7, %v754_v21 }
 0x13b   : > { %764 = vst.msk [vmem:[%s197_s16 + $0x1c] sm:$0xf] %vm756_vm7, %v755_v22 }
 0x13c PF: > { %s14_s15 = sadd.s32 1, %s971_s15  }
 0x13d   : > { %p11_p4 = scmp.ge.s32.totalorder %s14_s15, 4  }
 0x13f   :  { %13 = sbr.rel (!%p11_p4) target bundleno = 1 (0x1), region = 69 }

// kernel: critic_forward.7
= control target key start
LH: loop header
LB: loop body
LE: loop exit
PB: predicated region body
PF: predicated region fallthrough
CT: control target
= control target key end

     0   :  { %s967_s23 = smov 0   ;;  %s1107_s0 = inlined_call_operand.vmem [shape: bf16[2,16,512], index: 0, kind: input, shape index: {}]   ;;  %s1108_s1 = inlined_call_operand.vmem [shape: bf16[512,64], index: 1, kind: input, shape index: {}]   ;;  %s1109_s2 = inlined_call_operand.vmem [shape: f32[1,64], index: 2, kind: input, shape index: {}]   ;;  %s1110_s3 = inlined_call_operand.vmem [shape: f32[1,64], index: 3, kind: input, shape index: {}]   ;;  %s1111_s4 = inlined_call_operand.vmem [shape: f32[16,64], index: 4, kind: input, shape index: {}]   ;;  %s1112_s5 = inlined_call_operand.<no memory space> [shape: f32[1,1], index: 5, kind: input, shape index: {}]   ;;  %s1113_s6 = inlined_call_operand.vmem [shape: f32[2,1,1], index: 6, kind: output, shape index: {}]  }
   0x1   :  { %v11_v0 = vstv %s1112_s5 }
   0x2   :  { %12 = vst [vmem:[#allocation2] sm:$0x1] %v11_v0 }
   0x3 LB: > { %s717_s24 = sadd.s32 4294967295, %s926_s23   ;;  %p721_p0 = scmp.ge.s32.totalorder %s926_s23, 1  ;;  %s926_s23 = sphi %s967_s23, %s18_s23  }
   0x4   : > { %p214_p1 = scmp.lt.s32.totalorder %s926_s23, 3 }
   0x6   : > { %p215_p2 = pnand %p721_p0, %p214_p1 }
   0x7   : > { %p242_p3 = scmp.lt.s32.totalorder (!%p215_p2), %s717_s24, 1 }
   0x8   : > { %218 = sbr.rel (%p215_p2) target bundleno = 399 (0x18f), region = 44 }
   0xd   : > { %v882_v1 = vld [vmem:[%s1108_s1 + $0x38] sm:$0xff]  ;;  %v881_v5 = vld [vmem:[%s1108_s1 + $0x30] sm:$0xff]  ;;  %v880_v9 = vld [vmem:[%s1108_s1 + $0x28] sm:$0xff]  ;;  %s1115_s24 = smov (!%p242_p3, %s717_s24), 1  ;;  %v928_v49 = vmov 16.0   ;;  %vm586_vm0 = vcmask 523264  }
   0xe   : > { %v890_v2 = vld [vmem:[%s1108_s1 + $0x78] sm:$0xff]  ;;  %530 = vmatpush.bf16.msra.mxu0 %v882_v1  ;;  %v889_v6 = vld [vmem:[%s1108_s1 + $0x70] sm:$0xff]  ;;  %v888_v10 = vld [vmem:[%s1108_s1 + $0x68] sm:$0xff]  ;;  %s870_s5 = sshll.u32 %s1115_s24, 5  ;;  %916 = vrcp.f32 %v928_v49  ;;  %vm668_vm7 = vcmask 0  }
   0xf   : > { %v898_v3 = vld [vmem:[%s1108_s1 + $0xb8] sm:$0xff]  ;;  %544 = vmatpush.bf16.msra.mxu1 %v890_v2  ;;  %v897_v7 = vld [vmem:[%s1108_s1 + $0xb0] sm:$0xff]  ;;  %v896_v11 = vld [vmem:[%s1108_s1 + $0xa8] sm:$0xff]  ;;  %s246_s9 = scalar_lea.vmem %s1107_s0, %s870_s5 }
  0x10   : > { %v906_v4 = vld [vmem:[%s1108_s1 + $0xf8] sm:$0xff]  ;;  %558 = vmatpush.bf16.msra.mxu2 %v898_v3  ;;  %v905_v8 = vld [vmem:[%s1108_s1 + $0xf0] sm:$0xff]  ;;  %v904_v12 = vld [vmem:[%s1108_s1 + $0xe8] sm:$0xff] }
  0x11   : > { %572 = vmatpush.bf16.msra.mxu3 %v906_v4  ;;  %v879_v13 = vld [vmem:[%s1108_s1 + $0x20] sm:$0xff]  ;;  %v878_v17 = vld [vmem:[%s1108_s1 + $0x18] sm:$0xff]  ;;  %v877_v21 = vld [vmem:[%s1108_s1 + $0x10] sm:$0xff] }
  0x12   : > { %531 = vmatpush.bf16.msra.mxu0 %v881_v5  ;;  %v887_v14 = vld [vmem:[%s1108_s1 + $0x60] sm:$0xff]  ;;  %v886_v18 = vld [vmem:[%s1108_s1 + $0x58] sm:$0xff]  ;;  %v885_v22 = vld [vmem:[%s1108_s1 + $0x50] sm:$0xff] }
  0x13   : > { %545 = vmatpush.bf16.msra.mxu1 %v889_v6  ;;  %v895_v15 = vld [vmem:[%s1108_s1 + $0xa0] sm:$0xff]  ;;  %v894_v19 = vld [vmem:[%s1108_s1 + $0x98] sm:$0xff]  ;;  %v893_v23 = vld [vmem:[%s1108_s1 + $0x90] sm:$0xff] }
  0x14   : > { %559 = vmatpush.bf16.msra.mxu2 %v897_v7  ;;  %v903_v16 = vld [vmem:[%s1108_s1 + $0xe0] sm:$0xff]  ;;  %v902_v20 = vld [vmem:[%s1108_s1 + $0xd8] sm:$0xff]  ;;  %v901_v24 = vld [vmem:[%s1108_s1 + $0xd0] sm:$0xff]  ;;  %v917_v54 = vpop.eup %916 }
  0x15   : > { %573 = vmatpush.bf16.msra.mxu3 %v905_v8  ;;  %v876_v25 = vld [vmem:[%s1108_s1 + $0x8] sm:$0xff]  ;;  %v875_v29 = vld [vmem:[%s1108_s1] sm:$0xff]  ;;  %v873_v34 = vld [vmem:[%s246_s9 + $0xc] sm:$0xf0]  ;;  %v597_v59 = vmul.f32 16.0, %v917_v54  ;;  %vm601_vm1 = vweird.f32 %v917_v54 }
  0x16   : > { %532 = vmatpush.bf16.msra.mxu0 %v880_v9  ;;  %v884_v26 = vld [vmem:[%s1108_s1 + $0x48] sm:$0xff]  ;;  %v883_v30 = vld [vmem:[%s1108_s1 + $0x40] sm:$0xff]  ;;  %v728_v36 = vld [vmem:[%s246_s9 + $0x10] sm:$0xf0] }
  0x17   : > { %546 = vmatpush.bf16.msra.mxu1 %v888_v10  ;;  %v892_v27 = vld [vmem:[%s1108_s1 + $0x88] sm:$0xff]  ;;  %v891_v31 = vld [vmem:[%s1108_s1 + $0x80] sm:$0xff]  ;;  %v874_v38 = vld [vmem:[%s246_s9 + $0x14] sm:$0xf0]  ;;  %v598_v0 = vsub.f32 1.0, %v597_v59 }
  0x18   : > { %560 = vmatpush.bf16.msra.mxu2 %v896_v11  ;;  %v900_v28 = vld [vmem:[%s1108_s1 + $0xc8] sm:$0xff]  ;;  %v899_v32 = vld [vmem:[%s1108_s1 + $0xc0] sm:$0xff]  ;;  %v736_v40 = vld [vmem:[%s246_s9 + $0x18] sm:$0xf0] }
  0x19   : > { %574 = vmatpush.bf16.msra.mxu3 %v904_v12  ;;  %v726_v33 = vld [vmem:[%s246_s9] sm:$0xf]  ;;  %v871_v35 = vld [vmem:[%s246_s9 + $0x4] sm:$0xf]  ;;  %v734_v37 = vld [vmem:[%s246_s9 + $0x8] sm:$0xf]  ;;  %v599_v3 = vmul.f32 %v917_v54, %v598_v0 }
  0x1a   : > { %533 = vmatpush.bf16.msra.mxu0 %v879_v13  ;;  %v872_v39 = vld [vmem:[%s246_s9 + $0xc] sm:$0xf]  ;;  %v727_v41 = vor.u32 %v873_v34, %v726_v33  ;;  %v731_v42 = vor.u32 %v871_v35, %v728_v36  ;;  %v735_v43 = vor.u32 %v874_v38, %v734_v37  ;;  %v631_v36 = vld [vmem:[%s1110_s3] sm:$0x1]  ;;  %s249_s9 = scalar_lea.vmem %s1113_s6, %s1115_s24 }
  0x1b   : > { %547 = vmatpush.bf16.msra.mxu1 %v887_v14  ;;  %v739_v44 = vor.u32 %v872_v39, %v736_v40  ;;  %v600_v6 = vadd.f32 %v917_v54, %v599_v3 }
  0x1c   : > { %561 = vmatpush.bf16.msra.mxu2 %v895_v15 }
  0x1d   : > { %575 = vmatpush.bf16.msra.mxu3 %v903_v16  ;;  %v602_v9 = vsel %vm601_vm1, %v917_v54, %v600_v6 }
  0x1e   : > { %534 = vmatpush.bf16.msra.mxu0 %v878_v17 }
  0x1f   : > { %548 = vmatpush.bf16.msra.mxu1 %v886_v18 }
  0x20   : > { %562 = vmatpush.bf16.msra.mxu2 %v894_v19 }
  0x21   : > { %576 = vmatpush.bf16.msra.mxu3 %v902_v20 }
  0x22   : > { %535 = vmatpush.bf16.msra.mxu0 %v877_v21 }
  0x23   : > { %549 = vmatpush.bf16.msra.mxu1 %v885_v22 }
  0x24   : > { %563 = vmatpush.bf16.msra.mxu2 %v893_v23 }
  0x25   : > { %577 = vmatpush.bf16.msra.mxu3 %v901_v24 }
  0x26   : > { %536 = vmatpush.bf16.msra.mxu0 %v876_v25 }
  0x27   : > { %550 = vmatpush.bf16.msra.mxu1 %v884_v26 }
  0x28   : > { %564 = vmatpush.bf16.msra.mxu2 %v892_v27 }
  0x29   : > { %578 = vmatpush.bf16.msra.mxu3 %v900_v28 }
  0x2a   : > { %537 = vmatpush.bf16.msra.mxu0 %v875_v29 }
  0x2b   : > { %551 = vmatpush.bf16.msra.mxu1 %v883_v30 }
  0x2c   : > { %565 = vmatpush.bf16.msra.mxu2 %v891_v31 }
  0x2d   : > { %579 = vmatpush.bf16.msra.mxu3 %v899_v32  ;;  %538 = vmatmul.bf16.vlgmr.msra.gmra.mxu0 %v727_v41  ;;  %v618_v32 = vld [vmem:[%s1109_s2] sm:$0x1] }
  0x2e   : > { %552 = vmatmul.bf16.vlgmr.msra.gmra.mxu1 %v731_v42 }
  0x2f   : > { %566 = vmatmul.bf16.vlgmr.msra.gmra.mxu2 %v735_v43 }
  0x30   : > { %580 = vmatmul.bf16.vlgmr.msra.gmra.mxu3 %v739_v44 }
  0xaa   : > { %v539_v45 = vpop.f32.mrf.mxu0 }
  0xab   : > { %v553_v46 = vpop.f32.mrf.mxu1 }
  0xac   : > { %v554_v50 = vadd.f32 %v553_v46, %v539_v45  ;;  %v650_v45 = vld [vmem:[%s1111_s4] sm:$0xff]  ;;  %v651_v46 = vld [vmem:[%s1111_s4 + $0x8] sm:$0xff] }
  0xb2   : > { %v567_v47 = vpop.f32.mrf.mxu2  ;;  %v541_v51 = vpop.f32.mrf.mxu0 }
  0xb3   : > { %v581_v48 = vpop.f32.mrf.mxu3  ;;  %v555_v52 = vpop.f32.mrf.mxu1  ;;  %v568_v53 = vadd.f32 %v567_v47, %v554_v50 }
  0xb4   : > { %v556_v55 = vadd.f32 %v555_v52, %v541_v51 }
  0xb5   : > { %v582_v57 = vadd.f32 %v581_v48, %v568_v53 }
  0xb7   : > { %v587_v62 = vsel %vm586_vm0, %v582_v57, 0.0 }
  0xba   : > { %v569_v56 = vpop.f32.mrf.mxu2 }
  0xbb   : > { %v570_v58 = vadd.f32 %v569_v56, %v556_v55  ;;  %v583_v60 = vpop.f32.mrf.mxu3 }
  0xbd   : > { %v584_v61 = vadd.f32 %v583_v60, %v570_v58 }
  0xbf   : > { %v588_v63 = vsel %vm586_vm0, %v584_v61, 0.0 }
  0xc0   : > { %v589_v1 = vadd.f32 %v588_v63, %v587_v62  ;;  %v666_v63 = vld [vmem:[#allocation2] sm:$0x1] }
  0xc2   : > { %v590_v2 = vrot.slane %v589_v1, 4 }
  0xc4   : > { %v591_v4 = vadd.f32 %v590_v2, %v589_v1 }
  0xc6   : > { %v592_v5 = vrot.slane %v591_v4, 2 }
  0xc8   : > { %v593_v7 = vadd.f32 %v592_v5, %v591_v4 }
  0xca   : > { %v594_v8 = vrot.slane %v593_v7, 1 }
  0xcc   : > { %v595_v10 = vadd.f32 %v594_v8, %v593_v7 }
  0xce   : > { %v603_v11 = vmul.f32 %v602_v9, %v595_v10 }
  0xd0   : > { %v604_v12 = vsub.f32 %v582_v57, %v603_v11  ;;  %v605_v13 = vsub.f32 %v584_v61, %v603_v11 }
  0xd2   : > { %v606_v14 = vmul.f32 %v604_v12, %v604_v12  ;;  %v607_v15 = vmul.f32 %v605_v13, %v605_v13 }
  0xd4   : > { %v608_v16 = vsel %vm586_vm0, %v606_v14, 0.0  ;;  %v609_v17 = vsel %vm586_vm0, %v607_v15, 0.0 }
  0xd5   : > { %v610_v18 = vadd.f32 %v609_v17, %v608_v16 }
  0xd7   : > { %v611_v19 = vrot.slane %v610_v18, 4 }
  0xd9   : > { %v612_v20 = vadd.f32 %v611_v19, %v610_v18 }
  0xdb   : > { %v613_v21 = vrot.slane %v612_v20, 2 }
  0xdd   : > { %v614_v22 = vadd.f32 %v613_v21, %v612_v20 }
  0xdf   : > { %v615_v23 = vrot.slane %v614_v22, 1 }
  0xe1   : > { %v616_v24 = vadd.f32 %v615_v23, %v614_v22 }
  0xe3   : > { %v617_v25 = vmul.f32 %v616_v24, %v602_v9 }
  0xe5   : > { %v619_v26 = vadd.f32 1e-05, %v617_v25 }
  0xe7   : > { %918 = vrsqrt.f32 %v619_v26  ;;  %vm626_vm3 = vweird.f32 %v619_v26 }
  0xed   : > { %v919_v27 = vpop.eup %918 }
  0xee   : > { %v621_v28 = vmul.f32 %v919_v27, %v619_v26  ;;  %vm627_vm2 = vweird.f32 %v919_v27 }
  0xef   : > { %vm628_vm4 = vmor %vm626_vm3, %vm627_vm2 }
  0xf0   : > { %v622_v29 = vmul.f32 %v919_v27, %v621_v28 }
  0xf2   : > { %v623_v30 = vmul.f32 0.5, %v622_v29 }
  0xf4   : > { %v624_v31 = vsub.f32 1.5, %v623_v30 }
  0xf6   : > { %v625_v33 = vmul.f32 %v919_v27, %v624_v31 }
  0xf8   : > { %v629_v34 = vsel %vm628_vm4, %v919_v27, %v625_v33 }
  0xf9   : > { %v630_v35 = vmul.f32 %v629_v34, %v618_v32 }
  0xfb   : > { %v632_v37 = vmul.f32 %v630_v35, %v603_v11  ;;  %v635_v38 = vperm.slane %v630_v35, 0 }
  0xfd   : > { %v633_v39 = vsub.f32 %v631_v36, %v632_v37  ;;  %v637_v40 = vmul.f32 %v635_v38, %v582_v57  ;;  %v638_v41 = vmul.f32 %v635_v38, %v584_v61 }
  0xff   : > { %v640_v42 = vperm.slane %v633_v39, 0 }
 0x101   : > { %v642_v43 = vadd.f32 %v640_v42, %v637_v40  ;;  %v643_v44 = vadd.f32 %v640_v42, %v638_v41 }
 0x103   : > { %vm645_vm5 = vcmp.gt.f32.partialorder %v643_v44, 0.0  ;;  %v646_v47 = vmul.f32 0.2, %v642_v43  ;;  %v647_v48 = vmul.f32 0.2, %v643_v44  ;;  %vm644_vm6 = vcmp.gt.f32.partialorder %v642_v43, 0.0 }
 0x105   : > { %v649_v49 = vsel %vm645_vm5, %v643_v44, %v647_v48  ;;  %v648_v50 = vsel %vm644_vm6, %v642_v43, %v646_v47 }
 0x106   : > { %v652_v51 = vmul.f32 %v650_v45, %v648_v50  ;;  %v653_v52 = vmul.f32 %v651_v46, %v649_v49 }
 0x108   : > { %v654_v53 = vsel %vm586_vm0, %v652_v51, 0.0  ;;  %v655_v54 = vsel %vm586_vm0, %v653_v52, 0.0 }
 0x109   : > { %v656_v55 = vadd.f32 %v655_v54, %v654_v53 }
 0x10b   : > { %v657_v56 = vrot.slane %v656_v55, 4 }
 0x10d   : > { %v658_v57 = vadd.f32 %v657_v56, %v656_v55 }
 0x10f   : > { %v659_v58 = vrot.slane %v658_v57, 2 }
 0x111   : > { %v660_v59 = vadd.f32 %v659_v58, %v658_v57 }
 0x113   : > { %v661_v60 = vrot.slane %v660_v59, 1 }
 0x115   : > { %v662_v61 = vadd.f32 %v661_v60, %v660_v59 }
 0x117   : > { %v663_v62 = vsel %vm586_vm0, %v662_v61, 0.0 }
 0x118   : > { %664 = vadd.xlane.f32.xlu0 %v663_v62 }
 0x18b   : > { %v665_v0 = vpop.xlane.xlu0 %664 }
 0x18c   : > { %v667_v1 = vadd.f32 %v666_v63, %v665_v0 }
 0x18e   : > { %669 = vst.msk [vmem:[%s249_s9] sm:$0x1] %vm668_vm7, %v667_v1 }
 0x18f PF: > { %s18_s23 = sadd.s32 1, %s926_s23  }
 0x190   : > { %p15_p4 = scmp.ge.s32.totalorder %s18_s23, 4  }
 0x192   :  { %17 = sbr.rel (!%p15_p4) target bundleno = 3 (0x3), region = 74 }

</bundles_post_ra>
